<compile_context>
chip_gen: v5e
topology: v5e:2x2
jax: 0.10.0
libtpu: 0.0.40
codegen_flags: <defaults>
</compile_context>

<pallas_src>
import math
import functools

import jax
import jax.numpy as jnp
from jax import lax
from jax.experimental import pallas as pl
from jax.experimental.pallas import tpu as pltpu


def _erf(x):
    # Abramowitz & Stegun 7.1.26 rational approximation (max abs err ~1.5e-7) so the
    # erf-based (PyTorch-default) GELU lowers on Mosaic.  The 1/(1+p*|x|) term uses the
    # EUP approximate reciprocal (own VLIW slot; ~1e-3-level relative error).
    a1, a2, a3, a4, a5 = 0.254829592, -0.284496736, 1.421413741, -1.453152027, 1.061405429
    p = 0.3275911
    s = jnp.sign(x)
    ax = jnp.abs(x)
    t = pl.reciprocal(1.0 + p * ax, approx=True)
    poly = ((((a5 * t + a4) * t + a3) * t + a2) * t + a1) * t
    return s * (1.0 - poly * jnp.exp(-ax * ax))


def _gelu_exact(x):
    # matches torch nn.GELU() default (erf-based).  Kept exact: the VALU work sits
    # under the two FFN MXU matmuls (per review: only swap for tanh-approx if a bundle
    # audit shows VALU saturating before MXU).
    return 0.5 * x * (1.0 + _erf(x * 0.7071067811865476))


# ----------------------------------------------------------------------------------
# Kernel 1: LayerNorm1 + fused Q|K|V projection
# ----------------------------------------------------------------------------------
def qkv_projection_kernel(x_ref, g1_ref, be1_ref, wqkv_ref, qkv_ref, *, eps):
    """x_ref: (1, Ts, D) f32; wqkv_ref: (D, 3D) bf16 (Q columns pre-scaled by 1/sqrt(d_k));
    qkv_ref: (1, Ts, 3D) bf16 with lane layout [Q heads | K heads | V heads]."""
    x = x_ref[0]
    mu = jnp.mean(x, axis=-1, keepdims=True)
    var = jnp.mean(jnp.square(x - mu), axis=-1, keepdims=True)
    ln1 = ((x - mu) * lax.rsqrt(var + eps) * g1_ref[...] + be1_ref[...]).astype(jnp.bfloat16)
    qkv_ref[0] = jnp.dot(ln1, wqkv_ref[...],
                         preferred_element_type=jnp.float32).astype(jnp.bfloat16)


# ----------------------------------------------------------------------------------
# Kernel 2: flash attention + output projection + residual + LN2 + FFN + residual
# ----------------------------------------------------------------------------------
def attention_ffn_kernel(len_ref,
                         q_ref, k_ref, v_ref, x_ref, wo_ref,
                         g2_ref, be2_ref, w1_ref, b1_ref, w2_ref, b2_ref,
                         o_ref,
                         m_sc, l_sc, ctx_sc, cat_sc,
                         *, n_heads, d_k, block_q, block_k, eps):
    b = pl.program_id(0)
    qi = pl.program_id(1)
    ki = pl.program_id(2)
    last_k = pl.num_programs(2) - 1
    seq_len = len_ref[b]
    q_start = qi * block_q
    k_start = ki * block_k
    q_block_valid = q_start < seq_len

    @pl.when(jnp.logical_and(q_block_valid, ki == 0))
    def _():
        m_sc[...] = jnp.full_like(m_sc, -1e30)
        l_sc[...] = jnp.zeros_like(l_sc)
        ctx_sc[...] = jnp.zeros_like(ctx_sc)

    # ---- online softmax over this KV tile (skipped for fully padded tiles/blocks) ----
    @pl.when(jnp.logical_and(q_block_valid, k_start < seq_len))
    def _():
        q_all = q_ref[0]                       # (Tq, H*d_k) bf16, pre-scaled by 1/sqrt(d_k)
        k_all = k_ref[0]                       # (Tk, H*d_k) bf16
        v_all = v_ref[0]                       # (Tk, H*d_k) bf16
        col_ids = k_start + lax.broadcasted_iota(jnp.int32, (1, block_k), 1)
        col_bias = jnp.where(col_ids < seq_len, 0.0, -1e9)

        for h in range(n_heads):               # static loop; 128-aligned lane slices only
            sl = slice(h * d_k, (h + 1) * d_k)
            s = lax.dot_general(q_all[:, sl], k_all[:, sl], (((1,), (1,)), ((), ())),
                                preferred_element_type=jnp.float32)     # (Tq, Tk)
            s = s + col_bias
            m_prev = m_sc[h]
            m_new = jnp.maximum(m_prev, jnp.max(s, axis=-1, keepdims=True))
            alpha = jnp.exp(m_prev - m_new)
            p = jnp.exp(s - m_new)              # masked columns underflow to exactly 0
            l_sc[h] = alpha * l_sc[h] + jnp.sum(p, axis=-1, keepdims=True)
            ctx_sc[h] = alpha * ctx_sc[h] + jnp.dot(p.astype(jnp.bfloat16), v_all[:, sl],
                                                    preferred_element_type=jnp.float32)
            m_sc[h] = m_new

    # ---- finalize: concat heads -> single Wo matmul -> residual + LN2 + FFN + residual ----
    @pl.when(jnp.logical_and(q_block_valid, ki == last_k))
    def _():
        for h in range(n_heads):               # static 128-aligned lane-offset stores
            ctx = ctx_sc[h] * pl.reciprocal(l_sc[h], approx=True)       # (Tq, d_k)
            cat_sc[:, h * d_k:(h + 1) * d_k] = ctx.astype(jnp.bfloat16)

        attn = jnp.dot(cat_sc[...], wo_ref[...],
                       preferred_element_type=jnp.float32)              # (Tq, D)

        row_ids = q_start + lax.broadcasted_iota(jnp.int32, (block_q, 1), 0)
        row_valid = (row_ids < seq_len).astype(jnp.float32)             # (Tq, 1)

        x = x_ref[0]                                                    # (Tq, D) f32
        x1 = x + attn * row_valid               # padded query rows: attention output == 0

        mu = jnp.mean(x1, axis=-1, keepdims=True)
        var = jnp.mean(jnp.square(x1 - mu), axis=-1, keepdims=True)
        ln2 = (x1 - mu) * lax.rsqrt(var + eps) * g2_ref[...] + be2_ref[...]

        hdd = jnp.dot(ln2.astype(jnp.bfloat16), w1_ref[...],
                      preferred_element_type=jnp.float32) + b1_ref[...]
        hdd = _gelu_exact(hdd)
        ff = jnp.dot(hdd.astype(jnp.bfloat16), w2_ref[...],
                     preferred_element_type=jnp.float32) + b2_ref[...]
        # PositionwiseFeedForward mask: rows with mask.sum(-1) == 0 are zeroed.
        # TODO(synk): dropout layers (attention / sublayers / final) are identity (inference).
        o_ref[0] = x1 + ff * row_valid

    # fully padded query block: output degrades to the residual input (matches reference).
    @pl.when(jnp.logical_and(jnp.logical_not(q_block_valid), ki == last_k))
    def _():
        o_ref[0] = x_ref[0]


# ----------------------------------------------------------------------------------
# Wrapper
# ----------------------------------------------------------------------------------
def prepare_params(params, n_heads):
    """One-time weight prep (hoisted off the per-invocation path for serving):
    concat wq|wk|wv with the 1/sqrt(d_k) scale folded into wq, bf16 casts."""
    D = params["wq"].shape[0]
    d_k = D // n_heads
    scale = 1.0 / math.sqrt(d_k)
    bf16 = jnp.bfloat16
    return {
        "wqkv": jnp.concatenate([params["wq"] * scale, params["wk"], params["wv"]],
                                axis=1).astype(bf16),
        "wo": params["wo"].astype(bf16),
        "w1": params["w1"].astype(bf16),
        "w2": params["w2"].astype(bf16),
        "g1": params["g1"], "be1": params["be1"],
        "g2": params["g2"], "be2": params["be2"],
        "b1": params["b1"], "b2": params["b2"],
    }


def _vmem_limit_bytes():
    """Generation-aware scoped-VMEM limit: ~85% of physical capacity
    (~54 MiB on v7x's 64 MiB/TC, ~108 MiB on v5e/v6e's 128 MiB)."""
    cap = 64 * 1024 * 1024
    try:
        cap = int(pltpu.get_tpu_info().vmem_capacity_bytes)
    except Exception:
        pass
    return min(int(cap * 0.85), 112 * 1024 * 1024)


def _auto_block(S, target):
    b = min(target, S)
    while b > 128 and S % b != 0:
        b -= 128
    if S % b != 0:
        b = S
    return b


def transformer_block(x, lengths, p, n_heads, *, block_q=None, block_k=None,
                      block_s=None, single_buffer_weights=True, eps=1e-5):
    """Fused TransformerBlock forward (eval mode).

    x: (B, S, D) f32.  lengths: (B,) int32 valid sequence lengths (padding mask
    mask[b,i,j] = (i < len_b) & (j < len_b)), or None for "no mask".
    p: output of prepare_params().  Linear weights are (in_dim, out_dim): y = x @ W.
    """
    B, S, D = x.shape
    assert D % n_heads == 0
    d_k = D // n_heads
    d_ff = p["w1"].shape[1]
    # Lane-dense layouts. TODO(synk): pad D / d_k / d_ff / S in the wrapper for unaligned shapes.
    assert D % 128 == 0 and d_k % 128 == 0 and d_ff % 128 == 0

    vmem_cap = _vmem_limit_bytes()
    # Bigger tiles on v5e/v6e (more VMEM, lower HBM BW -> fewer K/V re-reads); 256 on v7x.
    default_blk = 512 if vmem_cap >= 96 * 1024 * 1024 else 256
    block_q = _auto_block(S, block_q or default_blk)
    block_k = _auto_block(S, block_k or default_blk)
    block_s = _auto_block(S, block_s or default_blk)

    if lengths is None:
        lengths = jnp.full((B,), S, dtype=jnp.int32)
    lengths = lengths.astype(jnp.int32)

    def _spec(shape, index_map):
        # Grid-invariant operands: optionally single-buffered (saves VMEM, esp. on v7x).
        if single_buffer_weights:
            return pl.BlockSpec(shape, index_map, pipeline_mode=pl.Buffered(1))
        return pl.BlockSpec(shape, index_map)

    # ---- kernel 1: LayerNorm1 + fused QKV projection -> (B, S, 3D) bf16 ----
    qkv = pl.pallas_call(
        functools.partial(qkv_projection_kernel, eps=eps),
        out_shape=jax.ShapeDtypeStruct((B, S, 3 * D), jnp.bfloat16),
        grid=(B, S // block_s),
        in_specs=[
            pl.BlockSpec((1, block_s, D), lambda b, si: (b, si, 0)),        # x
            _spec((1, D), lambda b, si: (0, 0)),                            # g1
            _spec((1, D), lambda b, si: (0, 0)),                            # be1
            _spec((D, 3 * D), lambda b, si: (0, 0)),                        # wqkv
        ],
        out_specs=pl.BlockSpec((1, block_s, 3 * D), lambda b, si: (b, si, 0)),
        compiler_params=pltpu.CompilerParams(
            dimension_semantics=("parallel", "parallel"),
            vmem_limit_bytes=vmem_cap),
    )(x, p["g1"], p["be1"], p["wqkv"])

    # ---- kernel 2: flash attention + Wo + residual + LN2 + FFN + residual ----
    n_q, n_kv = S // block_q, S // block_k

    def _kv_index(lane_block):
        # Clamp the KV block index to the valid range: fully padded KV tiles reuse the
        # last valid tile's block index -> Pallas dedups the DMA (no HBM re-read).
        def idx(b, qi, ki, lens):
            last_kv = jnp.maximum(lens[b] - 1, 0) // block_k
            return (b, jnp.minimum(ki, last_kv), lane_block)
        return idx

    def _cspec(shape):
        n = len(shape)
        return _spec(shape, lambda b, qi, ki, lens, _n=n: (0,) * _n)

    # TODO(synk): for very large D*d_ff on v7x, tile the FFN over d_ff with an extra
    # reduction grid axis instead of keeping w1/w2 fully VMEM-resident.
    out = pl.pallas_call(
        functools.partial(attention_ffn_kernel, n_heads=n_heads, d_k=d_k,
                          block_q=block_q, block_k=block_k, eps=eps),
        out_shape=jax.ShapeDtypeStruct((B, S, D), x.dtype),
        grid_spec=pltpu.PrefetchScalarGridSpec(
            num_scalar_prefetch=1,
            grid=(B, n_q, n_kv),
            in_specs=[
                pl.BlockSpec((1, block_q, D), lambda b, qi, ki, lens: (b, qi, 0)),  # Q lanes
                pl.BlockSpec((1, block_k, D), _kv_index(1)),                        # K lanes
                pl.BlockSpec((1, block_k, D), _kv_index(2)),                        # V lanes
                pl.BlockSpec((1, block_q, D), lambda b, qi, ki, lens: (b, qi, 0)),  # x
                _cspec((D, D)),                                                     # wo
                _cspec((1, D)), _cspec((1, D)),                                     # g2, be2
                _cspec((D, d_ff)), _cspec((1, d_ff)),                               # w1, b1
                _cspec((d_ff, D)), _cspec((1, D)),                                  # w2, b2
            ],
            out_specs=pl.BlockSpec((1, block_q, D), lambda b, qi, ki, lens: (b, qi, 0)),
            scratch_shapes=[
                pltpu.VMEM((n_heads, block_q, 1), jnp.float32),     # running max (per head)
                pltpu.VMEM((n_heads, block_q, 1), jnp.float32),     # running denom (per head)
                pltpu.VMEM((n_heads, block_q, d_k), jnp.float32),   # per-head context acc
                pltpu.VMEM((block_q, D), jnp.bfloat16),             # head-concat context
            ]),
        compiler_params=pltpu.CompilerParams(
            dimension_semantics=("parallel", "parallel", "arbitrary"),
            vmem_limit_bytes=vmem_cap),
    )(lengths, qkv, qkv, qkv, x, p["wo"],
      p["g2"], p["be2"], p["w1"], p["b1"], p["w2"], p["b2"])
    return out


# ----------------------------------------------------------------------------------
# Plain-JAX reference (PyTorch forward in eval mode); matmul inputs are cast to bf16
# (with f32 accumulation) to mirror the kernel's MXU numerics for a tight check.
# ----------------------------------------------------------------------------------
def reference(x, lengths, params, n_heads):
    B, S, D = x.shape
    dk = D // n_heads
    bf16 = jnp.bfloat16

    valid = jnp.arange(S)[None, :] < lengths[:, None]                      # (B, S)
    mask = (valid[:, :, None] & valid[:, None, :]).astype(jnp.float32)     # (B, S, S)

    def ln(z, g, b):
        mu = z.mean(-1, keepdims=True)
        var = ((z - mu) ** 2).mean(-1, keepdims=True)
        return (z - mu) / jnp.sqrt(var + 1e-5) * g + b

    ln1 = ln(x, params["g1"], params["be1"]).astype(bf16)
    q = (jnp.einsum("bsd,de->bse", ln1, params["wq"].astype(bf16),
                    preferred_element_type=jnp.float32) / math.sqrt(dk)).astype(bf16)
    k = jnp.einsum("bsd,de->bse", ln1, params["wk"].astype(bf16),
                   preferred_element_type=jnp.float32).astype(bf16)
    v = jnp.einsum("bsd,de->bse", ln1, params["wv"].astype(bf16),
                   preferred_element_type=jnp.float32).astype(bf16)
    qh = q.reshape(B, S, n_heads, dk).transpose(0, 2, 1, 3)
    kh = k.reshape(B, S, n_heads, dk).transpose(0, 2, 1, 3)
    vh = v.reshape(B, S, n_heads, dk).transpose(0, 2, 1, 3)
    s = jnp.einsum("bhqd,bhkd->bhqk", qh, kh, preferred_element_type=jnp.float32)
    m4 = mask[:, None]
    s = jnp.where(m4 == 0, -1e9, s)
    p = jax.nn.softmax(s, axis=-1)
    p = jnp.where(m4 == 0, 0.0, p)
    ctx = jnp.einsum("bhqk,bhkd->bhqd", p.astype(bf16), vh,
                     preferred_element_type=jnp.float32)
    ctx = ctx.transpose(0, 2, 1, 3).reshape(B, S, D)
    attn = jnp.einsum("bsd,de->bse", ctx.astype(bf16), params["wo"].astype(bf16),
                      preferred_element_type=jnp.float32)
    x1 = x + attn

    ln2 = ln(x1, params["g2"], params["be2"])
    hdd = jnp.einsum("bsd,df->bsf", ln2.astype(bf16), params["w1"].astype(bf16),
                     preferred_element_type=jnp.float32) + params["b1"]
    hdd = jax.nn.gelu(hdd, approximate=False)
    ff = jnp.einsum("bsf,fd->bsd", hdd.astype(bf16), params["w2"].astype(bf16),
                    preferred_element_type=jnp.float32) + params["b2"]
    keep = mask.sum(-1, keepdims=True) > 0
    ff = jnp.where(keep, ff, 0.0)
    return x1 + ff


if __name__ == "__main__":
    B, S, D, H = 2, 256, 256, 2          # d_k = 128 -> lane-dense head tiles
    D_FF = 4 * D

    key = jax.random.PRNGKey(0)
    ks = jax.random.split(key, 13)
    init = lambda k, shape, scale: (scale * jax.random.normal(k, shape)).astype(jnp.float32)

    params = {
        "wq": init(ks[0], (D, D), D ** -0.5),
        "wk": init(ks[1], (D, D), D ** -0.5),
        "wv": init(ks[2], (D, D), D ** -0.5),
        "wo": init(ks[3], (D, D), D ** -0.5),
        "g1": 1.0 + init(ks[4], (1, D), 0.05),
        "be1": init(ks[5], (1, D), 0.05),
        "g2": 1.0 + init(ks[6], (1, D), 0.05),
        "be2": init(ks[7], (1, D), 0.05),
        "w1": init(ks[8], (D, D_FF), D ** -0.5),
        "b1": init(ks[9], (1, D_FF), 0.05),
        "w2": init(ks[10], (D_FF, D), D_FF ** -0.5),
        "b2": init(ks[11], (1, D), 0.05),
    }
    x = jax.random.normal(ks[12], (B, S, D), dtype=jnp.float32)

    # padding mask via per-sequence lengths; second sequence is padded mid KV-tile.
    lengths = jnp.array([S, 131], dtype=jnp.int32)

    prepped = prepare_params(params, n_heads=H)   # one-time weight prep (off hot path)

    try:
        out = transformer_block(x, lengths, prepped, n_heads=H,
                                single_buffer_weights=True)
        out = jax.block_until_ready(out)
    except Exception:
        # Fallback for jax versions without BlockSpec(pipeline_mode=pl.Buffered(1)):
        # identical kernel, default double-buffered weights.
        out = transformer_block(x, lengths, prepped, n_heads=H,
                                single_buffer_weights=False)
        out = jax.block_until_ready(out)

    ref = reference(x, lengths, params, n_heads=H)
    assert out.shape == (B, S, D)
    abs_err = jnp.abs(out - ref)
    max_err = float(jnp.max(abs_err))
    mean_err = float(jnp.mean(abs_err))
    # bf16 MXU operands + approximate reciprocals => loosened tolerance vs pure-f32 math.
    assert jnp.allclose(out, ref, atol=5e-2, rtol=5e-2), (max_err, mean_err)
    assert mean_err < 1.5e-2, (max_err, mean_err)

    print("KERNEL_OK")
</pallas_src>

<mosaic_0001>
module attributes {stable_mosaic.version = 11 : i64} {
  func.func @qkv_projection_kernel(%arg0: i32, %arg1: i32, %arg2: memref<1x256x256xf32, #tpu.memory_space<vmem>>, %arg3: memref<1x256xf32, #tpu.memory_space<vmem>>, %arg4: memref<1x256xf32, #tpu.memory_space<vmem>>, %arg5: memref<256x768xbf16, #tpu.memory_space<vmem>>, %arg6: memref<1x256x768xbf16, #tpu.memory_space<vmem>>) attributes {dimension_semantics = [#tpu.dimension_semantics<parallel>, #tpu.dimension_semantics<parallel>], iteration_bounds = array<i64: 2, 1>, scalar_prefetch = 0 : i64, scratch_operands = 0 : i64, tpu.core_type = #tpu.core_type<tc>, window_params = [{transform_indices = @transform_0, window_bounds = array<i64: 1, 256, 256>}, {pipeline_mode = #tpu.pipeline_mode<synchronous>, transform_indices = @transform_1, window_bounds = array<i64: 1, 256>}, {pipeline_mode = #tpu.pipeline_mode<synchronous>, transform_indices = @transform_2, window_bounds = array<i64: 1, 256>}, {pipeline_mode = #tpu.pipeline_mode<synchronous>, transform_indices = @transform_3, window_bounds = array<i64: 256, 768>}, {transform_indices = @transform_4, window_bounds = array<i64: 1, 256, 768>}]} {
    %c0 = arith.constant 0 : index
    %c0_0 = arith.constant 0 : index
    %c0_1 = arith.constant 0 : index
    %0 = vector.load %arg2[%c0, %c0_0, %c0_1] : memref<1x256x256xf32, #tpu.memory_space<vmem>>, vector<1x256x256xf32>
    %1 = vector.shape_cast %0 : vector<1x256x256xf32> to vector<256x256xf32>
    %cst = arith.constant dense<0.000000e+00> : vector<256xf32>
    %2 = vector.multi_reduction <add>, %1, %cst [1] : vector<256x256xf32> to vector<256xf32>
    %3 = vector.shape_cast %2 : vector<256xf32> to vector<256x1xf32>
    %cst_2 = arith.constant 2.560000e+02 : f32
    %4 = vector.broadcast %cst_2 : f32 to vector<256x1xf32>
    %5 = arith.divf %3, %4 : vector<256x1xf32>
    %6 = vector.broadcast %5 : vector<256x1xf32> to vector<256x256xf32>
    %7 = arith.subf %1, %6 : vector<256x256xf32>
    %8 = arith.mulf %7, %7 : vector<256x256xf32>
    %cst_3 = arith.constant dense<0.000000e+00> : vector<256xf32>
    %9 = vector.multi_reduction <add>, %8, %cst_3 [1] : vector<256x256xf32> to vector<256xf32>
    %10 = vector.shape_cast %9 : vector<256xf32> to vector<256x1xf32>
    %cst_4 = arith.constant 2.560000e+02 : f32
    %11 = vector.broadcast %cst_4 : f32 to vector<256x1xf32>
    %12 = arith.divf %10, %11 : vector<256x1xf32>
    %13 = vector.broadcast %5 : vector<256x1xf32> to vector<256x256xf32>
    %14 = arith.subf %1, %13 : vector<256x256xf32>
    %cst_5 = arith.constant 9.99999974E-6 : f32
    %15 = vector.broadcast %cst_5 : f32 to vector<256x1xf32>
    %16 = arith.addf %12, %15 : vector<256x1xf32>
    %17 = math.rsqrt %16 : vector<256x1xf32>
    %18 = vector.broadcast %17 : vector<256x1xf32> to vector<256x256xf32>
    %19 = arith.mulf %14, %18 : vector<256x256xf32>
    %c0_6 = arith.constant 0 : index
    %c0_7 = arith.constant 0 : index
    %20 = vector.load %arg3[%c0_6, %c0_7] : memref<1x256xf32, #tpu.memory_space<vmem>>, vector<1x256xf32>
    %21 = vector.broadcast %20 : vector<1x256xf32> to vector<256x256xf32>
    %22 = arith.mulf %19, %21 : vector<256x256xf32>
    %c0_8 = arith.constant 0 : index
    %c0_9 = arith.constant 0 : index
    %23 = vector.load %arg4[%c0_8, %c0_9] : memref<1x256xf32, #tpu.memory_space<vmem>>, vector<1x256xf32>
    %24 = vector.broadcast %23 : vector<1x256xf32> to vector<256x256xf32>
    %25 = arith.addf %22, %24 : vector<256x256xf32>
    %26 = arith.truncf %25 : vector<256x256xf32> to vector<256x256xbf16>
    %c0_10 = arith.constant 0 : index
    %c0_11 = arith.constant 0 : index
    %27 = vector.load %arg5[%c0_10, %c0_11] : memref<256x768xbf16, #tpu.memory_space<vmem>>, vector<256x768xbf16>
    %cst_12 = arith.constant dense<0.000000e+00> : vector<256x768xf32>
    %28 = tpu.matmul %26, %27, %cst_12 {dimension_numbers = #tpu.dot_dimension_numbers<[1], [0], [0], [1], [0, 0, 1, 1], [], []>} : vector<256x256xbf16>, vector<256x768xbf16>, vector<256x768xf32> -> vector<256x768xf32>
    %29 = arith.truncf %28 : vector<256x768xf32> to vector<256x768xbf16>
    %c0_13 = arith.constant 0 : index
    %c0_14 = arith.constant 0 : index
    %c0_15 = arith.constant 0 : index
    %30 = vector.load %arg6[%c0_13, %c0_14, %c0_15] : memref<1x256x768xbf16, #tpu.memory_space<vmem>>, vector<1x256x768xbf16>
    %31 = vector.shape_cast %30 : vector<1x256x768xbf16> to vector<256x768xbf16>
    %32 = vector.shape_cast %29 : vector<256x768xbf16> to vector<1x256x768xbf16>
    tpu.vector_store %arg6[%c0_13, %c0_14, %c0_15], %32 {strides = array<i32>} : memref<1x256x768xbf16, #tpu.memory_space<vmem>>, vector<1x256x768xbf16>,
    return
  }
  func.func @transform_0(%arg0: i32, %arg1: i32) -> (i32, i32, i32) {
    %c0_i32 = arith.constant 0 : i32
    %c0_i32_0 = arith.constant 0 : i32
    return %arg0, %arg1, %c0_i32 : i32, i32, i32
  }
  func.func @transform_1(%arg0: i32, %arg1: i32) -> (i32, i32) {
    %c0_i32 = arith.constant 0 : i32
    %c0_i32_0 = arith.constant 0 : i32
    %c0_i32_1 = arith.constant 0 : i32
    return %c0_i32, %c0_i32_0 : i32, i32
  }
  func.func @transform_2(%arg0: i32, %arg1: i32) -> (i32, i32) {
    %c0_i32 = arith.constant 0 : i32
    %c0_i32_0 = arith.constant 0 : i32
    %c0_i32_1 = arith.constant 0 : i32
    return %c0_i32, %c0_i32_0 : i32, i32
  }
  func.func @transform_3(%arg0: i32, %arg1: i32) -> (i32, i32) {
    %c0_i32 = arith.constant 0 : i32
    %c0_i32_0 = arith.constant 0 : i32
    %c0_i32_1 = arith.constant 0 : i32
    return %c0_i32, %c0_i32_0 : i32, i32
  }
  func.func @transform_4(%arg0: i32, %arg1: i32) -> (i32, i32, i32) {
    %c0_i32 = arith.constant 0 : i32
    %c0_i32_0 = arith.constant 0 : i32
    return %arg0, %arg1, %c0_i32 : i32, i32, i32
  }
}

module attributes {stable_mosaic.version = 11 : i64} {
  func.func @qkv_projection_kernel(%arg0: i32, %arg1: i32, %arg2: memref<1x256x256xf32, #tpu.memory_space<vmem>>, %arg3: memref<1x256xf32, #tpu.memory_space<vmem>>, %arg4: memref<1x256xf32, #tpu.memory_space<vmem>>, %arg5: memref<256x768xbf16, #tpu.memory_space<vmem>>, %arg6: memref<1x256x768xbf16, #tpu.memory_space<vmem>>) attributes {dimension_semantics = [#tpu.dimension_semantics<parallel>, #tpu.dimension_semantics<parallel>], iteration_bounds = array<i64: 2, 1>, scalar_prefetch = 0 : i64, scratch_operands = 0 : i64, tpu.core_type = #tpu.core_type<tc>, window_params = [{transform_indices = @transform_0, window_bounds = array<i64: 1, 256, 256>}, {pipeline_mode = #tpu.pipeline_mode<synchronous>, transform_indices = @transform_1, window_bounds = array<i64: 1, 256>}, {pipeline_mode = #tpu.pipeline_mode<synchronous>, transform_indices = @transform_2, window_bounds = array<i64: 1, 256>}, {pipeline_mode = #tpu.pipeline_mode<synchronous>, transform_indices = @transform_3, window_bounds = array<i64: 256, 768>}, {transform_indices = @transform_4, window_bounds = array<i64: 1, 256, 768>}]} {
    %c0 = arith.constant 0 : index
    %c0_0 = arith.constant 0 : index
    %c0_1 = arith.constant 0 : index
    %0 = vector.load %arg2[%c0, %c0_0, %c0_1] : memref<1x256x256xf32, #tpu.memory_space<vmem>>, vector<1x256x256xf32>
    %1 = vector.shape_cast %0 : vector<1x256x256xf32> to vector<256x256xf32>
    %cst = arith.constant dense<0.000000e+00> : vector<256xf32>
    %2 = vector.multi_reduction <add>, %1, %cst [1] : vector<256x256xf32> to vector<256xf32>
    %3 = vector.shape_cast %2 : vector<256xf32> to vector<256x1xf32>
    %cst_2 = arith.constant 2.560000e+02 : f32
    %4 = vector.broadcast %cst_2 : f32 to vector<256x1xf32>
    %5 = arith.divf %3, %4 : vector<256x1xf32>
    %6 = vector.broadcast %5 : vector<256x1xf32> to vector<256x256xf32>
    %7 = arith.subf %1, %6 : vector<256x256xf32>
    %8 = arith.mulf %7, %7 : vector<256x256xf32>
    %cst_3 = arith.constant dense<0.000000e+00> : vector<256xf32>
    %9 = vector.multi_reduction <add>, %8, %cst_3 [1] : vector<256x256xf32> to vector<256xf32>
    %10 = vector.shape_cast %9 : vector<256xf32> to vector<256x1xf32>
    %cst_4 = arith.constant 2.560000e+02 : f32
    %11 = vector.broadcast %cst_4 : f32 to vector<256x1xf32>
    %12 = arith.divf %10, %11 : vector<256x1xf32>
    %13 = vector.broadcast %5 : vector<256x1xf32> to vector<256x256xf32>
    %14 = arith.subf %1, %13 : vector<256x256xf32>
    %cst_5 = arith.constant 9.99999974E-6 : f32
    %15 = vector.broadcast %cst_5 : f32 to vector<256x1xf32>
    %16 = arith.addf %12, %15 : vector<256x1xf32>
    %17 = math.rsqrt %16 : vector<256x1xf32>
    %18 = vector.broadcast %17 : vector<256x1xf32> to vector<256x256xf32>
    %19 = arith.mulf %14, %18 : vector<256x256xf32>
    %c0_6 = arith.constant 0 : index
    %c0_7 = arith.constant 0 : index
    %20 = vector.load %arg3[%c0_6, %c0_7] : memref<1x256xf32, #tpu.memory_space<vmem>>, vector<1x256xf32>
    %21 = vector.broadcast %20 : vector<1x256xf32> to vector<256x256xf32>
    %22 = arith.mulf %19, %21 : vector<256x256xf32>
    %c0_8 = arith.constant 0 : index
    %c0_9 = arith.constant 0 : index
    %23 = vector.load %arg4[%c0_8, %c0_9] : memref<1x256xf32, #tpu.memory_space<vmem>>, vector<1x256xf32>
    %24 = vector.broadcast %23 : vector<1x256xf32> to vector<256x256xf32>
    %25 = arith.addf %22, %24 : vector<256x256xf32>
    %26 = arith.truncf %25 : vector<256x256xf32> to vector<256x256xbf16>
    %c0_10 = arith.constant 0 : index
    %c0_11 = arith.constant 0 : index
    %27 = vector.load %arg5[%c0_10, %c0_11] : memref<256x768xbf16, #tpu.memory_space<vmem>>, vector<256x768xbf16>
    %cst_12 = arith.constant dense<0.000000e+00> : vector<256x768xf32>
    %28 = tpu.matmul %26, %27, %cst_12 {dimension_numbers = #tpu.dot_dimension_numbers<[1], [0], [0], [1], [0, 0, 1, 1], [], []>} : vector<256x256xbf16>, vector<256x768xbf16>, vector<256x768xf32> -> vector<256x768xf32>
    %29 = arith.truncf %28 : vector<256x768xf32> to vector<256x768xbf16>
    %c0_13 = arith.constant 0 : index
    %c0_14 = arith.constant 0 : index
    %c0_15 = arith.constant 0 : index
    %30 = vector.load %arg6[%c0_13, %c0_14, %c0_15] : memref<1x256x768xbf16, #tpu.memory_space<vmem>>, vector<1x256x768xbf16>
    %31 = vector.shape_cast %30 : vector<1x256x768xbf16> to vector<256x768xbf16>
    %32 = vector.shape_cast %29 : vector<256x768xbf16> to vector<1x256x768xbf16>
    tpu.vector_store %arg6[%c0_13, %c0_14, %c0_15], %32 {strides = array<i32>} : memref<1x256x768xbf16, #tpu.memory_space<vmem>>, vector<1x256x768xbf16>,
    return
  }
  func.func @transform_0(%arg0: i32, %arg1: i32) -> (i32, i32, i32) {
    %c0_i32 = arith.constant 0 : i32
    %c0_i32_0 = arith.constant 0 : i32
    return %arg0, %arg1, %c0_i32 : i32, i32, i32
  }
  func.func @transform_1(%arg0: i32, %arg1: i32) -> (i32, i32) {
    %c0_i32 = arith.constant 0 : i32
    %c0_i32_0 = arith.constant 0 : i32
    %c0_i32_1 = arith.constant 0 : i32
    return %c0_i32, %c0_i32_0 : i32, i32
  }
  func.func @transform_2(%arg0: i32, %arg1: i32) -> (i32, i32) {
    %c0_i32 = arith.constant 0 : i32
    %c0_i32_0 = arith.constant 0 : i32
    %c0_i32_1 = arith.constant 0 : i32
    return %c0_i32, %c0_i32_0 : i32, i32
  }
  func.func @transform_3(%arg0: i32, %arg1: i32) -> (i32, i32) {
    %c0_i32 = arith.constant 0 : i32
    %c0_i32_0 = arith.constant 0 : i32
    %c0_i32_1 = arith.constant 0 : i32
    return %c0_i32, %c0_i32_0 : i32, i32
  }
  func.func @transform_4(%arg0: i32, %arg1: i32) -> (i32, i32, i32) {
    %c0_i32 = arith.constant 0 : i32
    %c0_i32_0 = arith.constant 0 : i32
    return %arg0, %arg1, %c0_i32 : i32, i32, i32
  }
}

</mosaic_0001>

<bundles_post_ra>
// kernel: tpu_custom_call.1
= control target key start
LH: loop header
LB: loop body
LE: loop exit
PB: predicated region body
PF: predicated region fallthrough
CT: control target
= control target key end

     0   :  { %s5939_s0 = inlined_call_operand.hbm [shape: f32[2,256,256], index: 0, kind: input, shape index: {}]   ;;  %s5940_s1 = inlined_call_operand.hbm [shape: f32[1,256], index: 1, kind: input, shape index: {}]   ;;  %s5941_s2 = inlined_call_operand.hbm [shape: f32[1,256], index: 2, kind: input, shape index: {}]   ;;  %s5942_s3 = inlined_call_operand.hbm [shape: bf16[256,768], index: 3, kind: input, shape index: {}]   ;;  %s5943_s4 = inlined_call_operand.hbm [shape: bf16[2,256,768], index: 4, kind: output, shape index: {}]  }
   0x1   :  { %6000 = sst [smem:[#allocation46_spill]] %s5940_s1 }
   0x2   :  { %6001 = sst [smem:[#allocation47_spill]] %s5941_s2 }
   0x3   :  { %9 = vsyncpa [#allocation3], 0 }
   0x4   :  { %11 = vsyncpa [#allocation3 + $0x1], 0 }
   0x5   :  { %12 = vsyncpa [#allocation6], 0 }
   0x6   :  { %13 = vsyncpa [#allocation9], 0 }
   0x7   :  { %14 = vsyncpa [#allocation4], 0 }
   0x8   :  { %16 = vsyncpa [#allocation4 + $0x1], 0  ;;  %s4213_s15 = smov 0   ;;  %s4215_s16 = smov 0  }
   0x9   :  { %s4217_s17 = smov 0   ;;  %s4219_s18 = smov 0  }
   0xa   :  { %s4221_s19 = smov 0   ;;  %s4223_s20 = smov 0  }
   0xb LB: > { %s3299_s21 = sadd.s32 4294967295, %s4176_s20   ;;  %s3300_s22 = sadd.s32 4294967294, %s4176_s20   ;;  %s4176_s20 = sphi %s4223_s20, %s22_s20   ;;  %s4172_s19 = sphi %s4221_s19, %s6108_s19   ;;  %s4168_s18 = sphi %s4219_s18, %s6107_s18   ;;  %s4164_s17 = sphi %s4217_s17, %s6106_s17   ;;  %s4160_s16 = sphi %s4215_s16, %s6105_s16   ;;  %s4156_s15 = sphi %s4213_s15, %s6104_s15  }
   0xc   : > { %p56_p0 = scmp.ne.s32.totalorder %s4160_s16, %s4156_s15  ;;  %p4247_p1 = scmp.eq.s32.totalorder %s3299_s21, 0 }
   0xd   : > { %p4251_p2 = scmp.eq.s32.totalorder %s3299_s21, 1  ;;  %p151_p3 = scmp.eq.s32.totalorder %s3300_s22, 1 }
   0xe   : > { %p4257_p4 = por %p4247_p1, %p56_p0  ;;  %p3301_p5 = scmp.ge.s32.totalorder %s4176_s20, 1 }
   0xf   : > { %p4262_p6 = por %p151_p3, %p56_p0  ;;  %p158_p7 = scmp.lt.s32.totalorder %s4176_s20, 3 }
  0x10   : > { %s6006_s1 = sld [smem:[#allocation46_spill]]  ;;  %p3305_p9 = scmp.ge.s32.totalorder %s4176_s20, 2 }
  0x11   : > { %p4270_p8 = pnand %p3301_p5, %p158_p7  ;;  %s4178_s5 = smov [#allocation5]  }
  0x12   : > { %s172_s6 = sshll.u32 %s4178_s5, 4  ;;  %s6008_s2 = sld [smem:[#allocation47_spill]]  ;;  %s173_s6 = int_to_ptr.vmem [resolvable:$true] %s172_s6 }
  0x13   : > { %p3816_p10 = pneg %p4270_p8  ;;  %s193_s13 = sshll.u32 %s5942_s3, 4  ;;  %s194_s13 = int_to_ptr.hbm [resolvable:$true] %s193_s13 }
  0x14   : > { %s4179_s14 = smov [#allocation7]   ;;  %s4180_s22 = smov [#allocation8]  }
  0x15   : > { %p4282_p11 = pnand %p3816_p10, %p4247_p1  ;;  %s184_s21 = sshll.u32 %s4179_s14, 4  ;;  %s185_s21 = int_to_ptr.vmem [resolvable:$true] %s184_s21 }
  0x16   : > { %s170_s29 = sshll.u32 %s6006_s1, 4  ;;  %s195_s27 = sshll.u32 %s4180_s22, 4  ;;  %s171_s29 = int_to_ptr.hbm [resolvable:$true] %s170_s29  ;;  %s196_s27 = int_to_ptr.vmem [resolvable:$true] %s195_s27 }
  0x17   : > { %3819 = dma.hbm_to_vmem [thread:$0]  (!%p4282_p11), %s171_s29, 32, %s173_s6, [#allocation6]  }
  0x18   : > { %s182_s9 = sshll.u32 %s6008_s2, 4  ;;  %s4181_s28 = smov 384   ;;  %s183_s9 = int_to_ptr.hbm [resolvable:$true] %s182_s9 }
  0x19   : > { %3822 = dma.hbm_to_vmem [thread:$0]  (!%p4282_p11), %s183_s9, 32, %s185_s21, [#allocation6]  }
  0x1a   : > { %s4182_s5 = smov 24   ;;  %s43_s7 = sadd.s32 1, %s4164_s17 }
  0x1b   : > { %3825 = dma.hbm_to_vmem [thread:$0]  (!%p4282_p11), %s194_s13, 12288, %s196_s27, [#allocation9], %s4181_s28, %s4181_s28, %s4182_s5  }
  0x1c   : > { %s34_s8 = sadd.s32 1, %s4172_s19  ;;  %p50_p12 = scmp.ne.s32.totalorder %s4164_s17, %s4160_s16 }
  0x1d   : > { %p36_p13 = scmp.ge.s32.totalorder %s34_s8, 2  ;;  %p51_p0 = scmp.eq.s32.totalorder %s4176_s20, 0 }
  0x1e   : > { %p4302_p3 = por %p4251_p2, %p50_p12  ;;  %p3837_p5 = scmp.lt.s32.totalorder %s4176_s20, 2 }
  0x1f   : > { %s6110_s8 = smov (%p36_p13, %s34_s8), 0  ;;  %p4309_p7 = por %p51_p0, %p50_p12 }
  0x20   : > { %s209_s9 = sand.u32 1, %s4164_s17   ;;  %s38_s10 = ssub.s32 %s4172_s19, %s6110_s8 }
  0x21   : > { %p41_p10 = scmp.eq.s32.totalorder %s38_s10, 0  ;;  %s3306_s11 = sshll.u32 %s209_s9, 9 }
  0x22   : > { %s3701_s12 = sshll.u32 %s4172_s19, 9  ;;  %s213_s22 = scalar_lea.vmem [#allocation2], %s3306_s11 }
  0x23   : > { %s4318_s24 = scalar_select %p41_p10, %s4164_s17, %s43_s7  }
  0x24   : > { %s221_s21 = scalar_lea.hbm %s5939_s0, %s3701_s12  ;;  %s224_s27 = sshll.u32 %s213_s22, 4  ;;  %s225_s27 = int_to_ptr.vmem [resolvable:$true] %s224_s27 }
  0x25   : > { %s222_s28 = sshll.u32 %s221_s21, 4  ;;  %p3827_p2 = pnand %p3837_p5, %p4309_p7  ;;  %s223_s28 = int_to_ptr.hbm [resolvable:$true] %s222_s28 }
  0x26   : > { %s210_s5 = scalar_lea.sflag [#allocation3], %s209_s9  ;;  %s4183_s1 = smov 256  }
  0x27   : > { %s4184_s2 = smov 16   ;;  %236 = sbr.rel (%p4270_p8) target bundleno = 1438 (0x59e), region = 36 }
  0x28   : > { %3829 = dma.hbm_to_vmem [thread:$0]  (!%p3827_p2), %s223_s28, 8192, %s225_s27, %s210_s5, %s4183_s1, %s4183_s1, %s4184_s2  }
  0x2c   : > { %s4330_s7 = sand.u32 1, %s4160_s16  }
  0x2d   : > { %s3310_s10 = sshll.u32 %s4330_s7, 9  ;;  %s239_s11 = scalar_lea.sflag [#allocation3], %s4330_s7 }
  0x2e   : > { %s4334_s12 = scalar_lea.vmem [#allocation2], %s3310_s10 }
  0x2f   : > { %4139 = dma.done.wait (%p4257_p4), %s239_s11, 8192  }
  0x30   : > { %4141 = vsyncadd (%p4257_p4), %s239_s11, 4294959104 }
  0x31   : > { %4143 = dma.done.wait (%p4247_p1), [#allocation6], 64  }
  0x32   : > { %4145 = vsyncadd (%p4247_p1), [#allocation6], 4294967232 }
  0x33   : > { %4147 = dma.done.wait (%p4247_p1), [#allocation9], 12288  }
  0x34   : > { %4149 = vsyncadd (%p4247_p1), [#allocation9], 4294955008  ;;  %v4349_v0 = vld [vmem:[%s4334_s12 + $0x20] sm:$0xff]  ;;  %v4352_v1 = vld [vmem:[%s4334_s12 + $0x28] sm:$0xff]  ;;  %v4185_v27 = vmov 256.0   ;;  %s3798_s1 = smul.u32 768, %s4330_s7 }
  0x35   : > { %v285_v2 = vld [vmem:[%s4334_s12] sm:$0xff]  ;;  %v355_v3 = vadd.f32 %v4352_v1, %v4349_v0  ;;  %v286_v4 = vld [vmem:[%s4334_s12 + $0x8] sm:$0xff]  ;;  %v291_v8 = vld [vmem:[%s4334_s12 + $0x30] sm:$0xff]  ;;  %3900 = vrcp.f32 %v4185_v27  ;;  %s3799_s23 = smul.u32 768, %s4168_s18  ;;  %s3165_s18 = scalar_lea.sflag [#allocation4], %s4330_s7 }
  0x36   : > { %v349_v5 = vadd.f32 %v286_v4, %v285_v2  ;;  %v293_v6 = vld [vmem:[%s4334_s12 + $0x40] sm:$0xff]  ;;  %v294_v7 = vld [vmem:[%s4334_s12 + $0x48] sm:$0xff]  ;;  %v292_v9 = vld [vmem:[%s4334_s12 + $0x38] sm:$0xff]  ;;  %s5063_s2 = scalar_lea.vmem [#allocation10], %s3798_s1  ;;  %s4106_s28 = scalar_lea.hbm %s5943_s4, 1536 }
  0x37   : > { %356 = vadd.xlane.f32.xlu1 %v355_v3  ;;  %v361_v10 = vadd.f32 %v294_v7, %v293_v6  ;;  %v287_v11 = vld [vmem:[%s4334_s12 + $0x10] sm:$0xff]  ;;  %v288_v12 = vld [vmem:[%s4334_s12 + $0x18] sm:$0xff]  ;;  %v358_v13 = vadd.f32 %v292_v9, %v291_v8  ;;  %v4379_v20 = vld [vmem:[%s4334_s12 + $0x60] sm:$0xff]  ;;  %s3179_s6 = scalar_lea.hbm %s5943_s4, %s3799_s23  ;;  %s3180_s9 = sshll.u32 %s5063_s2, 4  ;;  %s3181_s9 = int_to_ptr.vmem [resolvable:$true] %s3180_s9 }
  0x38   : > { %350 = vadd.xlane.f32.xlu0 %v349_v5  ;;  %v4365_v14 = vld [vmem:[%s4334_s12 + $0x50] sm:$0xff]  ;;  %v4368_v15 = vld [vmem:[%s4334_s12 + $0x58] sm:$0xff]  ;;  %v352_v16 = vadd.f32 %v288_v12, %v287_v11  ;;  %v4382_v21 = vld [vmem:[%s4334_s12 + $0x68] sm:$0xff]  ;;  %s3182_s13 = sshll.u32 %s3179_s6, 4  ;;  %s3183_s13 = int_to_ptr.hbm [resolvable:$true] %s3182_s13 }
  0x39   : > { %362 = vadd.xlane.f32.xlu2 %v361_v10  ;;  %v364_v17 = vadd.f32 %v4368_v15, %v4365_v14  ;;  %v4373_v18 = vld [vmem:[%s4334_s12 + $0x70] sm:$0xff]  ;;  %v4376_v19 = vld [vmem:[%s4334_s12 + $0x78] sm:$0xff]  ;;  %v367_v23 = vadd.f32 %v4382_v21, %v4379_v20  ;;  %v4389_v24 = vld [vmem:[%s4334_s12 + $0x80] sm:$0xff]  ;;  %s4100_s14 = sshra.s32 %s3183_s13, 4  ;;  %s4101_s14 = int_to_ptr.hbm [resolvable:$true] %s4100_s14 }
  0x3a   : > { %v370_v22 = vadd.f32 %v4376_v19, %v4373_v18  ;;  %v4392_v25 = vld [vmem:[%s4334_s12 + $0x88] sm:$0xff]  ;;  %v4410_v47 = vld [vmem:[%s4334_s12 + $0x90] sm:$0xff]  ;;  %v4413_v48 = vld [vmem:[%s4334_s12 + $0x98] sm:$0xff]  ;;  %s4102_s21 = scalar_lea.hbm %s4101_s14, 768  ;;  %p4107_p11 = scmp.lt.s32.totalorder %s4101_s14, %s5943_s4 }
  0x3b   : > { %v373_v26 = vadd.f32 %v4392_v25, %v4389_v24  ;;  %v3901_v28 = vpop.eup %3900  ;;  %v376_v55 = vadd.f32 %v4413_v48, %v4410_v47  ;;  %v4480_v27 = vld [vmem:[%s4334_s12 + $0xb0] sm:$0xff]  ;;  %p4103_p1 = scmp.ne.s32.totalorder %s4101_s14, %s4102_s21  ;;  %p4108_p12 = scmp.lt.s32.totalorder %s4106_s28, %s4102_s21 }
  0x3c   : > { %v446_v29 = vmul.f32 256.0, %v3901_v28  ;;  %vm450_vm0 = vweird.f32 %v3901_v28 }
  0x3d   : > { %p4104_p4 = pnand %p4103_p1, %p4302_p3  ;;  %p4109_p13 = por %p4108_p12, %p4107_p11 }
  0x3e   : > { %v447_v30 = vsub.f32 1.0, %v446_v29 }
  0x3f   : > { %359 = vadd.xlane.f32.xlu1 %v358_v13  ;;  %p4105_p8 = pneg %p4104_p4 }
  0x40   : > { %353 = vadd.xlane.f32.xlu0 %v352_v16  ;;  %v448_v31 = vmul.f32 %v3901_v28, %v447_v30 }
  0x41   : > { %365 = vadd.xlane.f32.xlu2 %v364_v17  ;;  %p4110_p0 = pnand %p4109_p13, %p4105_p8 }
  0x42   : > { %v449_v32 = vadd.f32 %v3901_v28, %v448_v31 }
  0x44   : > { %v4396_v33 = vsel %vm450_vm0, %v3901_v28, %v449_v32  ;;  %v4483_v28 = vld [vmem:[%s4334_s12 + $0xb8] sm:$0xff] }
  0x47   : > { %371 = vadd.xlane.f32.xlu1 %v370_v22 }
  0x48   : > { %368 = vadd.xlane.f32.xlu0 %v367_v23  ;;  %v4470_v23 = vld [vmem:[%s4334_s12 + $0xd0] sm:$0xff] }
  0x4f   : > { %374 = vadd.xlane.f32.xlu1 %v373_v26  ;;  %v4473_v26 = vld [vmem:[%s4334_s12 + $0xd8] sm:$0xff] }
  0x50   : > { %v388_v29 = vadd.f32 %v4473_v26, %v4470_v23 }
  0xaa   : > { %v357_v34 = vpop.xlane.xlu1 %356 }
  0xab   : > { %v351_v35 = vpop.xlane.xlu0 %350  ;;  %v454_v49 = vmul.f32 %v4396_v33, %v357_v34 }
  0xac   : > { %v452_v36 = vmul.f32 %v4396_v33, %v351_v35  ;;  %v363_v39 = vpop.xlane.xlu2 %362  ;;  %v382_v35 = vadd.f32 %v4483_v28, %v4480_v27 }
  0xad   : > { %v456_v46 = vmul.f32 %v4396_v33, %v363_v39  ;;  %v4436_v60 = vsub.f32 %v4349_v0, %v454_v49  ;;  %v4439_v61 = vsub.f32 %v4352_v1, %v454_v49  ;;  %v4497_v39 = vld [vmem:[%s4334_s12 + $0xe0] sm:$0xff] }
  0xae   : > { %v4399_v37 = vsub.f32 %v285_v2, %v452_v36  ;;  %v4401_v38 = vsub.f32 %v286_v4, %v452_v36 }
  0xaf   : > { %v4427_v56 = vsub.f32 %v293_v6, %v456_v46  ;;  %v4429_v57 = vsub.f32 %v294_v7, %v456_v46  ;;  %v552_v6 = vmul.f32 %v4436_v60, %v4436_v60  ;;  %v553_v7 = vmul.f32 %v4439_v61, %v4439_v61 }
  0xb0   : > { %v548_v40 = vmul.f32 %v4399_v37, %v4399_v37  ;;  %v549_v41 = vmul.f32 %v4401_v38, %v4401_v38 }
  0xb1   : > { %v556_v5 = vmul.f32 %v4427_v56, %v4427_v56  ;;  %v557_v0 = vmul.f32 %v4429_v57, %v4429_v57  ;;  %v618_v16 = vadd.f32 %v553_v7, %v552_v6  ;;  %v4554_v6 = vld [vmem:[%s4334_s12 + $0x110] sm:$0xff]  ;;  %v4557_v7 = vld [vmem:[%s4334_s12 + $0x118] sm:$0xff] }
  0xb2   : > { %v360_v42 = vpop.xlane.xlu1 %359  ;;  %v612_v43 = vadd.f32 %v549_v41, %v548_v40  ;;  %v4500_v40 = vld [vmem:[%s4334_s12 + $0xe8] sm:$0xff]  ;;  %v4507_v41 = vld [vmem:[%s4334_s12 + $0xc0] sm:$0xff] }
  0xb3   : > { %v455_v44 = vmul.f32 %v4396_v33, %v360_v42  ;;  %v354_v45 = vpop.xlane.xlu0 %353  ;;  %v624_v10 = vadd.f32 %v557_v0, %v556_v5  ;;  %v4510_v42 = vld [vmem:[%s4334_s12 + $0xc8] sm:$0xff]  ;;  %v4546_v0 = vld [vmem:[%s4334_s12 + $0x100] sm:$0xff] }
  0xb4   : > { %v453_v50 = vmul.f32 %v4396_v33, %v354_v45  ;;  %613 = vadd.xlane.f32.xlu2 %v612_v43  ;;  %v366_v3 = vpop.xlane.xlu2 %365  ;;  %v391_v43 = vadd.f32 %v4500_v40, %v4497_v39  ;;  %v385_v46 = vadd.f32 %v4510_v42, %v4507_v41 }
  0xb5   : > { %v4417_v51 = vsub.f32 %v291_v8, %v455_v44  ;;  %v4419_v52 = vsub.f32 %v292_v9, %v455_v44  ;;  %v457_v1 = vmul.f32 %v4396_v33, %v366_v3  ;;  %v4455_v8 = vld [vmem:[%s4334_s12 + $0xa0] sm:$0xff]  ;;  %v4458_v9 = vld [vmem:[%s4334_s12 + $0xa8] sm:$0xff] }
  0xb6   : > { %v4421_v53 = vsub.f32 %v287_v11, %v453_v50  ;;  %v4423_v54 = vsub.f32 %v288_v12, %v453_v50  ;;  %v379_v13 = vadd.f32 %v4458_v9, %v4455_v8 }
  0xb7   : > { %v554_v58 = vmul.f32 %v4417_v51, %v4417_v51  ;;  %v555_v59 = vmul.f32 %v4419_v52, %v4419_v52  ;;  %v4461_v11 = vsub.f32 %v4365_v14, %v457_v1  ;;  %v4464_v12 = vsub.f32 %v4368_v15, %v457_v1 }
  0xb8   : > { %v550_v62 = vmul.f32 %v4421_v53, %v4421_v53  ;;  %v551_v63 = vmul.f32 %v4423_v54, %v4423_v54 }
  0xb9   : > { %v621_v2 = vadd.f32 %v555_v59, %v554_v58  ;;  %v558_v14 = vmul.f32 %v4461_v11, %v4461_v11  ;;  %v559_v15 = vmul.f32 %v4464_v12, %v4464_v12  ;;  %v4531_v59 = vld [vmem:[%s4334_s12 + $0xf8] sm:$0xff] }
  0xba   : > { %v615_v4 = vadd.f32 %v551_v63, %v550_v62  ;;  %v372_v30 = vpop.xlane.xlu1 %371 }
  0xbb   : > { %622 = vadd.xlane.f32.xlu1 %v621_v2  ;;  %v369_v17 = vpop.xlane.xlu0 %368  ;;  %v627_v34 = vadd.f32 %v559_v15, %v558_v14  ;;  %v459_v36 = vmul.f32 %v4396_v33, %v372_v30  ;;  %v3747_v14 = vld [vmem:[#allocation8 + $0x164] sm:$0xf0]  ;;  %v3676_v15 = vld [vmem:[#allocation8 + $0x2d0] sm:$0xf] }
  0xbc   : > { %377 = vadd.xlane.f32.xlu2 %v376_v55  ;;  %616 = vadd.xlane.f32.xlu0 %v615_v4  ;;  %v458_v22 = vmul.f32 %v4396_v33, %v369_v17  ;;  %v3795_v30 = vld [vmem:[#allocation8 + $0x2e4] sm:$0xf0] }
  0xbd   : > { %v4515_v44 = vsub.f32 %v4373_v18, %v459_v36  ;;  %v4518_v45 = vsub.f32 %v4376_v19, %v459_v36  ;;  %v4528_v19 = vld [vmem:[%s4334_s12 + $0xf0] sm:$0xff]  ;;  %v3677_v36 = vor.u32 %v3795_v30, %v3676_v15  ;;  %v3732_v30 = vld [vmem:[#allocation8 + $0xf4] sm:$0xf] }
  0xbe   : > { %v4488_v31 = vsub.f32 %v4379_v20, %v458_v22  ;;  %v4491_v32 = vsub.f32 %v4382_v21, %v458_v22  ;;  %v394_v3 = vadd.f32 %v4531_v59, %v4528_v19  ;;  %v3484_v22 = vld [vmem:[#allocation8 + $0x150] sm:$0xf] }
  0xbf   : > { %v562_v58 = vmul.f32 %v4515_v44, %v4515_v44  ;;  %v563_v18 = vmul.f32 %v4518_v45, %v4518_v45  ;;  %1993 = vmatpush.bf16.msra.mxu1 %v3677_v36 }
  0xc0   : > { %v560_v20 = vmul.f32 %v4488_v31, %v4488_v31  ;;  %v561_v21 = vmul.f32 %v4491_v32, %v4491_v32 }
  0xc1   : > { %v633_v2 = vadd.f32 %v563_v18, %v562_v58  ;;  %v3789_v18 = vld [vmem:[#allocation8 + $0x2b4] sm:$0xf0] }
  0xc2   : > { %v630_v49 = vadd.f32 %v561_v21, %v560_v20  ;;  %v375_v50 = vpop.xlane.xlu1 %374  ;;  %v3792_v21 = vld [vmem:[#allocation8 + $0x2d4] sm:$0xf] }
  0xc3   : > { %625 = vadd.xlane.f32.xlu1 %v624_v10  ;;  %v460_v55 = vmul.f32 %v4396_v33, %v375_v50  ;;  %v400_v10 = vadd.f32 %v4557_v7, %v4554_v6  ;;  %v3741_v50 = vld [vmem:[#allocation8 + $0x134] sm:$0xf0] }
  0xc4   : > { %380 = vadd.xlane.f32.xlu2 %v379_v13  ;;  %619 = vadd.xlane.f32.xlu0 %v618_v16  ;;  %v4562_v13 = vld [vmem:[%s4334_s12 + $0x120] sm:$0xff]  ;;  %v4565_v16 = vld [vmem:[%s4334_s12 + $0x128] sm:$0xff] }
  0xc5   : > { %v4534_v62 = vsub.f32 %v4389_v24, %v460_v55  ;;  %v4537_v63 = vsub.f32 %v4392_v25, %v460_v55  ;;  %v4549_v24 = vld [vmem:[%s4334_s12 + $0x108] sm:$0xff]  ;;  %v403_v17 = vadd.f32 %v4565_v16, %v4562_v13  ;;  %v3652_v55 = vld [vmem:[#allocation8 + $0x2a0] sm:$0xf] }
  0xc6   : > { %v397_v1 = vadd.f32 %v4549_v24, %v4546_v0 }
  0xc7   : > { %6012 = vst [vmem:[#allocation15_spill] sm:$0xff] %v4537_v63  ;;  %v564_v4 = vmul.f32 %v4534_v62, %v4534_v62  ;;  %v565_v5 = vmul.f32 %v4537_v63, %v4537_v63 }
  0xc9   : > { %v636_v25 = vadd.f32 %v565_v5, %v564_v4  ;;  %v3653_v4 = vor.u32 %v3789_v18, %v3652_v55  ;;  %v3726_v18 = vld [vmem:[#allocation8 + $0xc4] sm:$0xf] }
  0xcb   : > { %389 = vadd.xlane.f32.xlu1 %v388_v29  ;;  %v3485_v29 = vor.u32 %v3747_v14, %v3484_v22  ;;  %1994 = vmatpush.bf16.msra.mxu1 %v3653_v4  ;;  %v3735_v22 = vld [vmem:[#allocation8 + $0x104] sm:$0xf0]  ;;  %v3628_v14 = vld [vmem:[#allocation8 + $0x270] sm:$0xf] }
  0xcc   : > { %628 = vadd.xlane.f32.xlu2 %v627_v34  ;;  %383 = vadd.xlane.f32.xlu0 %v382_v35  ;;  %v3744_v34 = vld [vmem:[#allocation8 + $0x154] sm:$0xf]  ;;  %v3486_v35 = vld [vmem:[#allocation8 + $0x168] sm:$0xf0] }
  0xcd   : > { %v3489_v20 = vor.u32 %v3744_v34, %v3486_v35  ;;  %1904 = vmatpush.bf16.msra.mxu0 %v3485_v29  ;;  %v3783_v29 = vld [vmem:[#allocation8 + $0x284] sm:$0xf0]  ;;  %v3438_v34 = vld [vmem:[#allocation8 + $0x108] sm:$0xf0] }
  0xce   : > { %v3629_v35 = vor.u32 %v3783_v29, %v3628_v14  ;;  %v3441_v36 = vor.u32 %v3732_v30, %v3438_v34  ;;  %v3720_v29 = vld [vmem:[#allocation8 + $0x94] sm:$0xf]  ;;  %v3390_v30 = vld [vmem:[#allocation8 + $0xa8] sm:$0xf0] }
  0xcf   : > { %2082 = vmatpush.bf16.msra.mxu2 %v3489_v20  ;;  %v3780_v20 = vld [vmem:[#allocation8 + $0x274] sm:$0xf] }
  0xd0   : > { %1995 = vmatpush.bf16.msra.mxu1 %v3629_v35  ;;  %v3393_v35 = vor.u32 %v3720_v29, %v3390_v30  ;;  %v3759_v29 = vld [vmem:[#allocation8 + $0x1c4] sm:$0xf0]  ;;  %v3708_v30 = vld [vmem:[#allocation8 + $0x34] sm:$0xf] }
  0xd3   : > { %392 = vadd.xlane.f32.xlu1 %v391_v43  ;;  %v3678_v43 = vld [vmem:[#allocation8 + $0x2e8] sm:$0xf0] }
  0xd4   : > { %386 = vadd.xlane.f32.xlu0 %v385_v46  ;;  %631 = vadd.xlane.f32.xlu2 %v630_v49  ;;  %v3681_v46 = vor.u32 %v3792_v21, %v3678_v43  ;;  %v3460_v49 = vld [vmem:[#allocation8 + $0x120] sm:$0xf]  ;;  %v3630_v21 = vld [vmem:[#allocation8 + $0x288] sm:$0xf0] }
  0xd5   : > { %v3461_v58 = vor.u32 %v3741_v50, %v3460_v49  ;;  %v3633_v43 = vor.u32 %v3780_v20, %v3630_v21  ;;  %v3729_v49 = vld [vmem:[#allocation8 + $0xd4] sm:$0xf0]  ;;  %v3604_v50 = vld [vmem:[#allocation8 + $0x240] sm:$0xf]  ;;  %v3582_v20 = vld [vmem:[#allocation8 + $0x228] sm:$0xf0] }
  0xd6   : > { %2171 = vmatpush.bf16.msra.mxu3 %v3681_v46  ;;  %v3412_v46 = vld [vmem:[#allocation8 + $0xc0] sm:$0xf] }
  0xd7   : > { %1905 = vmatpush.bf16.msra.mxu0 %v3461_v58  ;;  %v3413_v55 = vor.u32 %v3729_v49, %v3412_v46  ;;  %v3777_v58 = vld [vmem:[#allocation8 + $0x254] sm:$0xf0]  ;;  %v3556_v49 = vld [vmem:[#allocation8 + $0x1e0] sm:$0xf] }
  0xd8   : > { %v3717_v46 = vld [vmem:[#allocation8 + $0x74] sm:$0xf0] }
  0xdc   : > { %634 = vadd.xlane.f32.xlu0 %v633_v2  ;;  %395 = vadd.xlane.f32.xlu2 %v394_v3  ;;  %v3738_v2 = vld [vmem:[#allocation8 + $0x124] sm:$0xf]  ;;  %v3462_v3 = vld [vmem:[#allocation8 + $0x138] sm:$0xf0] }
  0xdd   : > { %v3465_v5 = vor.u32 %v3738_v2, %v3462_v3  ;;  %v3414_v2 = vld [vmem:[#allocation8 + $0xd8] sm:$0xf0]  ;;  %v3605_v3 = vor.u32 %v3777_v58, %v3604_v50  ;;  %v3714_v58 = vld [vmem:[#allocation8 + $0x64] sm:$0xf] }
  0xde   : > { %v3417_v4 = vor.u32 %v3726_v18, %v3414_v2  ;;  %v3366_v18 = vld [vmem:[#allocation8 + $0x78] sm:$0xf0] }
  0xdf   : > { %2083 = vmatpush.bf16.msra.mxu2 %v3465_v5  ;;  %v3774_v5 = vld [vmem:[#allocation8 + $0x244] sm:$0xf]  ;;  %1996 = vmatpush.bf16.msra.mxu1 %v3605_v3  ;;  %v3369_v3 = vor.u32 %v3714_v58, %v3366_v18 }
  0xe3   : > { %2084 = vmatpush.bf16.msra.mxu2 %v3441_v36  ;;  %v3768_v36 = vld [vmem:[#allocation8 + $0x214] sm:$0xf] }
  0xe4   : > { %637 = vadd.xlane.f32.xlu0 %v636_v25  ;;  %398 = vadd.xlane.f32.xlu2 %v397_v1  ;;  %v3786_v25 = vld [vmem:[#allocation8 + $0x2a4] sm:$0xf]  ;;  %v3654_v1 = vld [vmem:[#allocation8 + $0x2b8] sm:$0xf0]  ;;  %v3585_v21 = vor.u32 %v3768_v36, %v3582_v20  ;;  %v3756_v20 = vld [vmem:[#allocation8 + $0x1b4] sm:$0xf] }
  0xe7   : > { %2085 = vmatpush.bf16.msra.mxu2 %v3417_v4  ;;  %v3762_v4 = vld [vmem:[#allocation8 + $0x1e4] sm:$0xf] }
  0xeb   : > { %2086 = vmatpush.bf16.msra.mxu2 %v3393_v35 }
  0xec   : > { %401 = vadd.xlane.f32.xlu0 %v400_v10  ;;  %v3657_v10 = vor.u32 %v3786_v25, %v3654_v1  ;;  %v3606_v25 = vld [vmem:[#allocation8 + $0x258] sm:$0xf0] }
  0xed   : > { %v3609_v1 = vor.u32 %v3774_v5, %v3606_v25  ;;  %v3558_v5 = vld [vmem:[#allocation8 + $0x1f8] sm:$0xf0] }
  0xee   : > { %2172 = vmatpush.bf16.msra.mxu3 %v3657_v10  ;;  %v3388_v10 = vld [vmem:[#allocation8 + $0x90] sm:$0xf]  ;;  %v3561_v25 = vor.u32 %v3762_v4, %v3558_v5 }
  0xef   : > { %2087 = vmatpush.bf16.msra.mxu2 %v3369_v3 }
  0xf2   : > { %2173 = vmatpush.bf16.msra.mxu3 %v3633_v43  ;;  %v3364_v43 = vld [vmem:[#allocation8 + $0x60] sm:$0xf] }
  0xf3   : > { %v3365_v50 = vor.u32 %v3717_v46, %v3364_v43 }
  0xf4   : > { %404 = vadd.xlane.f32.xlu0 %v403_v17  ;;  %v3436_v17 = vld [vmem:[#allocation8 + $0xf0] sm:$0xf] }
  0xf5   : > { %v3437_v15 = vor.u32 %v3735_v22, %v3436_v17  ;;  %v3723_v17 = vld [vmem:[#allocation8 + $0xa4] sm:$0xf0]  ;;  %v3580_v22 = vld [vmem:[#allocation8 + $0x210] sm:$0xf] }
  0xf6   : > { %2174 = vmatpush.bf16.msra.mxu3 %v3609_v1  ;;  %v3389_v14 = vor.u32 %v3723_v17, %v3388_v10  ;;  %v3340_v10 = vld [vmem:[#allocation8 + $0x30] sm:$0xf]  ;;  %v3711_v17 = vld [vmem:[#allocation8 + $0x44] sm:$0xf0] }
  0xf7   : > { %1906 = vmatpush.bf16.msra.mxu0 %v3437_v15  ;;  %v3771_v15 = vld [vmem:[#allocation8 + $0x224] sm:$0xf0] }
  0xf8   : > { %v3581_v34 = vor.u32 %v3771_v15, %v3580_v22  ;;  %v3532_v22 = vld [vmem:[#allocation8 + $0x1b0] sm:$0xf]  ;;  %v3341_v15 = vor.u32 %v3711_v17, %v3340_v10 }
  0xf9   : > { %v3533_v35 = vor.u32 %v3759_v29, %v3532_v22  ;;  %v3508_v29 = vld [vmem:[#allocation8 + $0x180] sm:$0xf] }
  0xfa   : > { %1997 = vmatpush.bf16.msra.mxu1 %v3581_v34  ;;  %2175 = vmatpush.bf16.msra.mxu3 %v3585_v21  ;;  %v3342_v34 = vld [vmem:[#allocation8 + $0x48] sm:$0xf0] }
  0xfb   : > { %1907 = vmatpush.bf16.msra.mxu0 %v3413_v55  ;;  %v3765_v55 = vld [vmem:[#allocation8 + $0x1f4] sm:$0xf0]  ;;  %v3345_v36 = vor.u32 %v3708_v30, %v3342_v34  ;;  %v3534_v21 = vld [vmem:[#allocation8 + $0x1c8] sm:$0xf0] }
  0xfc   : > { %v3557_v2 = vor.u32 %v3765_v55, %v3556_v49  ;;  %v3537_v46 = vor.u32 %v3756_v20, %v3534_v21  ;;  %v3318_v20 = vld [vmem:[#allocation8 + $0x18] sm:$0xf0] }
  0xfd   : > { %2088 = vmatpush.bf16.msra.mxu2 %v3345_v36  ;;  %v3702_v36 = vld [vmem:[#allocation8 + $0x4] sm:$0xf] }
  0xfe   : > { %1998 = vmatpush.bf16.msra.mxu1 %v3557_v2  ;;  %2176 = vmatpush.bf16.msra.mxu3 %v3561_v25 }
  0xff   : > { %1908 = vmatpush.bf16.msra.mxu0 %v3389_v14 }
 0x102   : > { %1999 = vmatpush.bf16.msra.mxu1 %v3533_v35  ;;  %2177 = vmatpush.bf16.msra.mxu3 %v3537_v46  ;;  %v3753_v35 = vld [vmem:[#allocation8 + $0x194] sm:$0xf0] }
 0x103   : > { %1909 = vmatpush.bf16.msra.mxu0 %v3365_v50 }
 0x107   : > { %1910 = vmatpush.bf16.msra.mxu0 %v3341_v15  ;;  %v3705_v15 = vld [vmem:[#allocation8 + $0x14] sm:$0xf0] }
 0x127   : > { %v614_v1 = vpop.xlane.xlu2 %613 }
 0x128   : > { %v708_v14 = vmul.f32 %v614_v1, %v4396_v33 }
 0x12a   : > { %v4570_v43 = vadd.f32 1e-05, %v708_v14 }
 0x12c   : > { %3902 = vrsqrt.f32 %v4570_v43  ;;  %vm778_vm2 = vweird.f32 %v4570_v43 }
 0x12e   : > { %v623_v49 = vpop.xlane.xlu1 %622 }
 0x12f   : > { %v711_v50 = vmul.f32 %v623_v49, %v4396_v33  ;;  %v378_v55 = vpop.xlane.xlu2 %377  ;;  %v617_v58 = vpop.xlane.xlu0 %616 }
 0x130   : > { %v461_v18 = vmul.f32 %v4396_v33, %v378_v55  ;;  %v709_v2 = vmul.f32 %v617_v58, %v4396_v33  ;;  %v3509_v55 = vor.u32 %v3753_v35, %v3508_v29  ;;  %v3321_v58 = vor.u32 %v3702_v36, %v3318_v20 }
 0x131   : > { %v4576_v3 = vadd.f32 1e-05, %v711_v50 }
 0x132   : > { %v3903_v4 = vpop.eup %3902  ;;  %v4579_v5 = vsub.f32 %v4410_v47, %v461_v18  ;;  %v4582_v25 = vsub.f32 %v4413_v48, %v461_v18  ;;  %v4584_v1 = vadd.f32 1e-05, %v709_v2  ;;  %v3316_v47 = vld [vmem:[#allocation8] sm:$0xf]  ;;  %v3750_v18 = vld [vmem:[#allocation8 + $0x184] sm:$0xf]  ;;  %2000 = vmatpush.bf16.msra.mxu1 %v3509_v55  ;;  %2089 = vmatpush.bf16.msra.mxu2 %v3321_v58 }
 0x133   : > { %v773_v10 = vmul.f32 %v3903_v4, %v4570_v43  ;;  %3904 = vrsqrt.f32 %v4576_v3  ;;  %v3317_v34 = vor.u32 %v3705_v15, %v3316_v47  ;;  %v3510_v2 = vld [vmem:[#allocation8 + $0x198] sm:$0xf0]  ;;  %vm779_vm1 = vweird.f32 %v3903_v4 }
 0x134   : > { %6013 = vst [vmem:[#allocation16_spill] sm:$0xff] %v4579_v5  ;;  %3906 = vrsqrt.f32 %v4584_v1  ;;  %v566_v17 = vmul.f32 %v4579_v5, %v4579_v5  ;;  %v567_v22 = vmul.f32 %v4582_v25, %v4582_v25  ;;  %vm780_vm3 = vmor %vm778_vm2, %vm779_vm1  ;;  %vm788_vm5 = vweird.f32 %v4584_v1 }
 0x135   : > { %6014 = vst [vmem:[#allocation17_spill] sm:$0xff] %v4582_v25  ;;  %v774_v14 = vmul.f32 %v3903_v4, %v773_v10  ;;  %1911 = vmatpush.bf16.msra.mxu0 %v3317_v34  ;;  %vm808_vm6 = vweird.f32 %v4576_v3 }
 0x136   : > { %v626_v48 = vpop.xlane.xlu1 %625  ;;  %v639_v30 = vadd.f32 %v567_v22, %v566_v17  ;;  %v3513_v17 = vor.u32 %v3750_v18, %v3510_v2 }
 0x137   : > { %v775_v21 = vmul.f32 0.5, %v774_v14  ;;  %v712_v46 = vmul.f32 %v626_v48, %v4396_v33  ;;  %v381_v49 = vpop.xlane.xlu2 %380  ;;  %v620_v50 = vpop.xlane.xlu0 %619 }
 0x138   : > { %v462_v10 = vmul.f32 %v4396_v33, %v381_v49  ;;  %v710_v25 = vmul.f32 %v620_v50, %v4396_v33  ;;  %640 = vadd.xlane.f32.xlu1 %v639_v30  ;;  %2178 = vmatpush.bf16.msra.mxu3 %v3513_v17 }
 0x139   : > { %v4596_v22 = vpop.eup %3904  ;;  %v776_v47 = vsub.f32 1.5, %v775_v21  ;;  %v4598_v15 = vadd.f32 1e-05, %v712_v46  ;;  %v1156_v46 = vld [vmem:[#allocation5] sm:$0x3] }
 0x13a   : > { %v3907_v14 = vpop.eup %3906  ;;  %v803_v29 = vmul.f32 %v4596_v22, %v4576_v3  ;;  %v4603_v48 = vsub.f32 %v4455_v8, %v462_v10  ;;  %v4606_v35 = vsub.f32 %v4458_v9, %v462_v10  ;;  %v4611_v20 = vadd.f32 1e-05, %v710_v25  ;;  %v1226_v25 = vld [vmem:[#allocation7] sm:$0x3] }
 0x13b   : > { %v777_v30 = vmul.f32 %v3903_v4, %v776_v47  ;;  %v783_v34 = vmul.f32 %v3907_v14, %v4584_v1  ;;  %3908 = vrsqrt.f32 %v4598_v15  ;;  %v4619_v10 = vperm.slane %v1156_v46, 0 }
 0x13c   : > { %6015 = vst [vmem:[#allocation18_spill] sm:$0xff] %v4603_v48  ;;  %v804_v36 = vmul.f32 %v4596_v22, %v803_v29  ;;  %v568_v21 = vmul.f32 %v4603_v48, %v4603_v48  ;;  %v569_v9 = vmul.f32 %v4606_v35, %v4606_v35  ;;  %3910 = vrsqrt.f32 %v4611_v20 }
 0x13d   : > { %6016 = vst [vmem:[#allocation19_spill] sm:$0xff] %v4606_v35  ;;  %v784_v8 = vmul.f32 %v3907_v14, %v783_v34  ;;  %v781_v49 = vsel %vm780_vm3, %v3903_v4, %v777_v30  ;;  %v4621_v17 = vperm.slane %v1156_v46, 1  ;;  %vm789_vm4 = vweird.f32 %v3907_v14  ;;  %v4627_v34 = vld [vmem:[%s4334_s12 + $0x130] sm:$0xff] }
 0x13e   : > { %v805_v50 = vmul.f32 0.5, %v804_v36  ;;  %v390_v43 = vpop.xlane.xlu1 %389  ;;  %v642_v2 = vadd.f32 %v569_v9, %v568_v21  ;;  %v1092_v4 = vmul.f32 %v781_v49, %v4399_v37  ;;  %v1093_v29 = vmul.f32 %v781_v49, %v4401_v38  ;;  %6017 = vst [vmem:[#allocation20_spill] sm:$0xff] %v4627_v34  ;;  %v4630_v36 = vld [vmem:[%s4334_s12 + $0x138] sm:$0xff]  ;;  %v4642_v38 = vld [vmem:[%s4334_s12 + $0x140] sm:$0xff]  ;;  %v4645_v49 = vld [vmem:[%s4334_s12 + $0x148] sm:$0xff] }
 0x13f   : > { %v785_v55 = vmul.f32 0.5, %v784_v8  ;;  %v629_v58 = vpop.xlane.xlu2 %628  ;;  %v384_v18 = vpop.xlane.xlu0 %383  ;;  %6018 = vst [vmem:[#allocation21_spill] sm:$0xff] %v4630_v36  ;;  %v4632_v21 = vperm.slane %v1226_v25, 0  ;;  %v4636_v9 = vperm.slane %v1226_v25, 1  ;;  %vm809_vm7 = vweird.f32 %v4596_v22  ;;  %vm790_vm8 = vmor %vm788_vm5, %vm789_vm4 }
 0x140   : > { %v713_v47 = vmul.f32 %v629_v58, %v4396_v33  ;;  %643 = vadd.xlane.f32.xlu1 %v642_v2  ;;  %v806_v8 = vsub.f32 1.5, %v805_v50  ;;  %6019 = vst [vmem:[#allocation22_spill] sm:$0xff] %v4642_v38  ;;  %v465_v50 = vmul.f32 %v4396_v33, %v390_v43  ;;  %v406_v25 = vadd.f32 %v4630_v36, %v4627_v34  ;;  %vm4661_vm9 = vmor %vm808_vm6, %vm809_vm7 }
 0x141   : > { %v786_v30 = vsub.f32 1.5, %v785_v55  ;;  %v4634_v46 = vpop.eup %3908  ;;  %6020 = vst [vmem:[#allocation23_spill] sm:$0xff] %v4645_v49  ;;  %v1162_v1 = vmul.f32 %v4619_v10, %v1092_v4  ;;  %v1163_v2 = vmul.f32 %v4621_v17, %v1093_v29  ;;  %v409_v5 = vadd.f32 %v4645_v49, %v4642_v38 }
 0x142   : > { %v4639_v37 = vadd.f32 1e-05, %v713_v47  ;;  %v3911_v55 = vpop.eup %3910  ;;  %v807_v35 = vmul.f32 %v4596_v22, %v806_v8  ;;  %v813_v4 = vmul.f32 %v4634_v46, %v4598_v15  ;;  %vm798_vm10 = vweird.f32 %v4611_v20 }
 0x143   : > { %v787_v58 = vmul.f32 %v3907_v14, %v786_v30  ;;  %v793_v30 = vmul.f32 %v3911_v55, %v4611_v20  ;;  %v1232_v38 = vadd.f32 %v4632_v21, %v1162_v1  ;;  %v4678_v34 = vsub.f32 %v4473_v26, %v465_v50 }
 0x144   : > { %3912 = vrsqrt.f32 %v4639_v37  ;;  %v814_v63 = vmul.f32 %v4634_v46, %v813_v4  ;;  %vm799_vm11 = vweird.f32 %v3911_v55  ;;  %vm818_vm13 = vweird.f32 %v4598_v15 }
 0x145   : > { %v791_v47 = vsel %vm790_vm8, %v3907_v14, %v787_v58  ;;  %v794_v29 = vmul.f32 %v3911_v55, %v793_v30  ;;  %v4672_v58 = vsub.f32 %v4470_v23, %v465_v50  ;;  %v1233_v30 = vadd.f32 %v4636_v9, %v1163_v2  ;;  %vm800_vm12 = vmor %vm798_vm10, %vm799_vm11 }
 0x146   : > { %v1094_v3 = vmul.f32 %v791_v47, %v4421_v53  ;;  %v1095_v48 = vmul.f32 %v791_v47, %v4423_v54  ;;  %v463_v47 = vmul.f32 %v4396_v33, %v384_v18  ;;  %v393_v49 = vpop.xlane.xlu1 %392  ;;  %vm819_vm14 = vweird.f32 %v4634_v46 }
 0x147   : > { %v632_v14 = vpop.xlane.xlu2 %631  ;;  %v387_v8 = vpop.xlane.xlu0 %386  ;;  %v795_v36 = vmul.f32 0.5, %v794_v29  ;;  %v466_v2 = vmul.f32 %v4396_v33, %v393_v49  ;;  %v574_v49 = vmul.f32 %v4672_v58, %v4672_v58  ;;  %vm828_vm15 = vweird.f32 %v4639_v37  ;;  %vm820_vm2 = vmor %vm818_vm13, %vm819_vm14 }
 0x148   : > { %v1164_v53 = vmul.f32 %v4619_v10, %v1094_v3  ;;  %v1165_v54 = vmul.f32 %v4621_v17, %v1095_v48  ;;  %407 = vadd.xlane.f32.xlu1 %v406_v25  ;;  %v811_v3 = vsel %vm4661_vm9, %v4596_v22, %v807_v35  ;;  %v714_v18 = vmul.f32 %v632_v14, %v4396_v33 }
 0x149   : > { %v796_v1 = vsub.f32 1.5, %v795_v36  ;;  %v4693_v50 = vsub.f32 %v4480_v27, %v463_v47  ;;  %v4696_v22 = vsub.f32 %v4483_v28, %v463_v47  ;;  %v464_v36 = vmul.f32 %v4396_v33, %v387_v8 }
 0x14a   : > { %v1234_v48 = vadd.f32 %v4632_v21, %v1164_v53  ;;  %v1235_v23 = vadd.f32 %v4636_v9, %v1165_v54  ;;  %v4698_v35 = vpop.eup %3912  ;;  %v4700_v43 = vadd.f32 1e-05, %v714_v18  ;;  %v1099_v4 = vmul.f32 %v811_v3, %v4419_v52 }
 0x14b   : > { %v797_v25 = vmul.f32 %v3911_v55, %v796_v1  ;;  %v823_v27 = vmul.f32 %v4698_v35, %v4639_v37  ;;  %v815_v28 = vmul.f32 0.5, %v814_v63  ;;  %v4714_v8 = vsub.f32 %v4497_v39, %v466_v2 }
 0x14c   : > { %v4688_v29 = vpack.c.bf16 %v1234_v48, %v1232_v38  ;;  %v4690_v26 = vpack.c.bf16 %v1235_v23, %v1233_v30  ;;  %v1098_v38 = vmul.f32 %v811_v3, %v4417_v51  ;;  %v4717_v53 = vsub.f32 %v4500_v40, %v466_v2 }
 0x14d   : > { %v801_v14 = vsel %vm800_vm12, %v3911_v55, %v797_v25  ;;  %v824_v47 = vmul.f32 %v4698_v35, %v823_v27  ;;  %v575_v63 = vmul.f32 %v4678_v34, %v4678_v34  ;;  %3914 = vrsqrt.f32 %v4700_v43 }
 0x14e   : > { %6023 = vst [vmem:[#allocation24_spill] sm:$0xff] %v4688_v29  ;;  %1912 = vmatmul.bf16.vlgmr.msra.gmra.mxu0 %v4688_v29  ;;  %2001 = vmatmul.bf16.vlgmr.msra.gmra.mxu1 %v4690_v26  ;;  %v1096_v20 = vmul.f32 %v801_v14, %v4436_v60  ;;  %v1097_v54 = vmul.f32 %v801_v14, %v4439_v61  ;;  %vm829_vm0 = vweird.f32 %v4698_v35  ;;  %vm838_vm3 = vweird.f32 %v4700_v43 }
 0x14f   : > { %6024 = vst [vmem:[#allocation25_spill] sm:$0xff] %v4690_v26  ;;  %2090 = vmatmul.bf16.vlgmr.msra.gmra.mxu2 %v4688_v29  ;;  %v396_v51 = vpop.xlane.xlu2 %395  ;;  %v635_v52 = vpop.xlane.xlu0 %634  ;;  %2179 = vmatmul.bf16.vlgmr.msra.gmra.mxu3 %v4690_v26  ;;  %v4729_v39 = vsub.f32 %v4507_v41, %v464_v36  ;;  %v570_v40 = vmul.f32 %v4693_v50, %v4693_v50  ;;  %v825_v30 = vmul.f32 0.5, %v824_v47  ;;  %vm830_vm1 = vmor %vm828_vm15, %vm829_vm0 }
 0x150   : > { %v571_v60 = vmul.f32 %v4696_v22, %v4696_v22  ;;  %410 = vadd.xlane.f32.xlu1 %v409_v5  ;;  %v1166_v61 = vmul.f32 %v4619_v10, %v1096_v20  ;;  %v1167_v55 = vmul.f32 %v4621_v17, %v1097_v54  ;;  %v651_v3 = vadd.f32 %v575_v63, %v574_v49 }
 0x151   : > { %v4738_v48 = vsub.f32 %v4510_v42, %v464_v36  ;;  %v467_v41 = vmul.f32 %v4396_v33, %v396_v51  ;;  %v715_v18 = vmul.f32 %v635_v52, %v4396_v33  ;;  %v826_v1 = vsub.f32 1.5, %v825_v30 }
 0x152   : > { %v645_v23 = vadd.f32 %v571_v60, %v570_v40  ;;  %652 = vadd.xlane.f32.xlu0 %v651_v3  ;;  %v576_v5 = vmul.f32 %v4714_v8, %v4714_v8  ;;  %v577_v2 = vmul.f32 %v4717_v53, %v4717_v53  ;;  %v1168_v25 = vmul.f32 %v4619_v10, %v1098_v38 }
 0x153   : > { %v1169_v42 = vmul.f32 %v4621_v17, %v1099_v4  ;;  %v816_v36 = vsub.f32 1.5, %v815_v28  ;;  %v1236_v49 = vadd.f32 %v4632_v21, %v1166_v61  ;;  %v1237_v27 = vadd.f32 %v4636_v9, %v1167_v55  ;;  %v4755_v51 = vpop.eup %3914 }
 0x154   : > { %646 = vadd.xlane.f32.xlu2 %v645_v23  ;;  %v4753_v14 = vadd.f32 1e-05, %v715_v18  ;;  %v4758_v52 = vsub.f32 %v4528_v19, %v467_v41  ;;  %v4761_v38 = vsub.f32 %v4531_v59, %v467_v41  ;;  %v572_v4 = vmul.f32 %v4729_v39, %v4729_v39 }
 0x155   : > { %v573_v28 = vmul.f32 %v4738_v48, %v4738_v48  ;;  %v827_v47 = vmul.f32 %v4698_v35, %v826_v1  ;;  %v654_v63 = vadd.f32 %v577_v2, %v576_v5  ;;  %v1238_v40 = vadd.f32 %v4632_v21, %v1168_v25  ;;  %v4801_v1 = vld [vmem:[%s4334_s12 + $0x170] sm:$0xff]  ;;  %v4804_v5 = vld [vmem:[%s4334_s12 + $0x178] sm:$0xff] }
 0x156   : > { %3916 = vrsqrt.f32 %v4753_v14  ;;  %v1239_v59 = vadd.f32 %v4636_v9, %v1169_v42  ;;  %v817_v61 = vmul.f32 %v4634_v46, %v816_v36  ;;  %v833_v3 = vmul.f32 %v4755_v51, %v4700_v43  ;;  %v4810_v42 = vld [vmem:[%s4334_s12 + $0x150] sm:$0xff] }
 0x157   : > { %v399_v20 = vpop.xlane.xlu2 %398  ;;  %v4767_v54 = vpop.xlane.xlu0 %637  ;;  %v648_v60 = vadd.f32 %v573_v28, %v572_v4  ;;  %v4783_v55 = vpack.c.bf16 %v1238_v40, %v1236_v49  ;;  %v578_v37 = vmul.f32 %v4758_v52, %v4758_v52  ;;  %v831_v23 = vsel %vm830_vm1, %v4698_v35, %v827_v47 }
 0x158   : > { %v468_v19 = vmul.f32 %v4396_v33, %v399_v20  ;;  %v4785_v30 = vpack.c.bf16 %v1239_v59, %v1237_v27  ;;  %v579_v18 = vmul.f32 %v4761_v38, %v4761_v38  ;;  %v821_v25 = vsel %vm820_vm2, %v4634_v46, %v817_v61 }
 0x159   : > { %6025 = vst [vmem:[#allocation26_spill] sm:$0xff] %v4783_v55  ;;  %v1103_v36 = vmul.f32 %v831_v23, %v4464_v12  ;;  %v834_v49 = vmul.f32 %v4755_v51, %v833_v3  ;;  %v418_v46 = vadd.f32 %v4804_v5, %v4801_v1  ;;  %v1100_v47 = vmul.f32 %v821_v25, %v4427_v56 }
 0x15a   : > { %6026 = vst [vmem:[#allocation27_spill] sm:$0xff] %v4785_v30  ;;  %655 = vadd.xlane.f32.xlu0 %v654_v63  ;;  %v4793_v41 = vsub.f32 %v4546_v0, %v468_v19  ;;  %v4796_v15 = vsub.f32 %v4549_v24, %v468_v19  ;;  %v657_v35 = vadd.f32 %v579_v18, %v578_v37  ;;  %v4813_v0 = vld [vmem:[%s4334_s12 + $0x158] sm:$0xff]  ;;  %v4842_v18 = vld [vmem:[%s4334_s12 + $0x188] sm:$0xff]  ;;  %vm848_vm4 = vweird.f32 %v4753_v14 }
 0x15b   : > { %v1102_v24 = vmul.f32 %v831_v23, %v4461_v11  ;;  %v412_v20 = vadd.f32 %v4813_v0, %v4810_v42  ;;  %v1101_v63 = vmul.f32 %v821_v25, %v4429_v57  ;;  %v835_v19 = vmul.f32 0.5, %v834_v49  ;;  %v4839_v23 = vld [vmem:[%s4334_s12 + $0x180] sm:$0xff] }
 0x15c   : > { %6027 = vst [vmem:[#allocation28_spill] sm:$0xff] %v4793_v41  ;;  %649 = vadd.xlane.f32.xlu2 %v648_v60  ;;  %v4806_v2 = vpop.eup %3916  ;;  %658 = vadd.xlane.f32.xlu1 %v657_v35  ;;  %v580_v11 = vmul.f32 %v4793_v41, %v4793_v41  ;;  %v581_v12 = vmul.f32 %v4796_v15, %v4796_v15  ;;  %v4847_v25 = vld [vmem:[%s4334_s12 + $0x160] sm:$0xff]  ;;  %v4850_v35 = vld [vmem:[%s4334_s12 + $0x168] sm:$0xff]  ;;  %vm839_vm6 = vweird.f32 %v4755_v51 }
 0x15d   : > { %6028 = vst [vmem:[#allocation29_spill] sm:$0xff] %v4796_v15  ;;  %v843_v27 = vmul.f32 %v4806_v2, %v4753_v14  ;;  %v1172_v59 = vmul.f32 %v4619_v10, %v1102_v24  ;;  %v1173_v60 = vmul.f32 %v4621_v17, %v1103_v36  ;;  %v1170_v56 = vmul.f32 %v4619_v10, %v1100_v47  ;;  %vm840_vm8 = vmor %vm838_vm3, %vm839_vm6 }
 0x15e   : > { %1917 = vmatmul.bf16.gmra.mxu0 %v4783_v55  ;;  %2006 = vmatmul.bf16.gmra.mxu1 %v4785_v30  ;;  %v660_v61 = vadd.f32 %v581_v12, %v580_v11  ;;  %v1171_v57 = vmul.f32 %v4621_v17, %v1101_v63  ;;  %v836_v24 = vsub.f32 1.5, %v835_v19  ;;  %vm849_vm5 = vweird.f32 %v4806_v2 }
 0x15f   : > { %2095 = vmatmul.bf16.gmra.mxu2 %v4783_v55  ;;  %2184 = vmatmul.bf16.gmra.mxu3 %v4785_v30  ;;  %v402_v4 = vpop.xlane.xlu0 %401  ;;  %v844_v28 = vmul.f32 %v4806_v2, %v843_v27  ;;  %v1242_v36 = vadd.f32 %v4632_v21, %v1172_v59  ;;  %v1243_v49 = vadd.f32 %v4636_v9, %v1173_v60  ;;  %vm850_vm7 = vmor %vm848_vm4, %vm849_vm5 }
 0x160   : > { %v469_v37 = vmul.f32 %v4396_v33, %v402_v4  ;;  %v421_v27 = vadd.f32 %v4842_v18, %v4839_v23  ;;  %v415_v12 = vadd.f32 %v4850_v35, %v4847_v25  ;;  %v1240_v47 = vadd.f32 %v4632_v21, %v1170_v56 }
 0x161   : > { %v845_v40 = vmul.f32 0.5, %v844_v28  ;;  %v4870_v28 = vld [vmem:[%s4334_s12 + $0x190] sm:$0xff]  ;;  %v1241_v63 = vadd.f32 %v4636_v9, %v1171_v57 }
 0x162   : > { %419 = vadd.xlane.f32.xlu0 %v418_v46  ;;  %v4862_v4 = vsub.f32 %v4554_v6, %v469_v37  ;;  %v4865_v11 = vsub.f32 %v4557_v7, %v469_v37  ;;  %v837_v6 = vmul.f32 %v4755_v51, %v836_v24 }
 0x163   : > { %v846_v3 = vsub.f32 1.5, %v845_v40  ;;  %v4880_v40 = vpack.c.bf16 %v1242_v36, %v1240_v47  ;;  %v4882_v7 = vpack.c.bf16 %v1243_v49, %v1241_v63  ;;  %v4910_v36 = vld [vmem:[%s4334_s12 + $0x1a0] sm:$0xff]  ;;  %v4913_v49 = vld [vmem:[%s4334_s12 + $0x1a8] sm:$0xff] }
 0x164   : > { %413 = vadd.xlane.f32.xlu2 %v412_v20  ;;  %661 = vadd.xlane.f32.xlu1 %v660_v61  ;;  %6029 = vst [vmem:[#allocation30_spill] sm:$0xff] %v4862_v4  ;;  %v4873_v20 = vld [vmem:[%s4334_s12 + $0x198] sm:$0xff]  ;;  %v582_v61 = vmul.f32 %v4862_v4, %v4862_v4  ;;  %v841_v43 = vsel %vm840_vm8, %v4755_v51, %v837_v6 }
 0x165   : > { %v847_v46 = vmul.f32 %v4806_v2, %v846_v3  ;;  %6030 = vst [vmem:[#allocation31_spill] sm:$0xff] %v4865_v11  ;;  %v424_v59 = vadd.f32 %v4873_v20, %v4870_v28  ;;  %v583_v3 = vmul.f32 %v4865_v11, %v4865_v11  ;;  %v1104_v51 = vmul.f32 %v841_v43, %v4488_v31 }
 0x166   : > { %6031 = vst [vmem:[#allocation32_spill] sm:$0xff] %v4880_v40 }
 0x167   : > { %v405_v19 = vpop.xlane.xlu0 %404  ;;  %6032 = vst [vmem:[#allocation33_spill] sm:$0xff] %v4882_v7  ;;  %v851_v60 = vsel %vm850_vm7, %v4806_v2, %v847_v46  ;;  %v663_v24 = vadd.f32 %v583_v3, %v582_v61  ;;  %v1174_v31 = vmul.f32 %v4619_v10, %v1104_v51  ;;  %v4939_v61 = vld [vmem:[%s4334_s12 + $0x1b8] sm:$0xff] }
 0x168   : > { %v470_v14 = vmul.f32 %v4396_v33, %v405_v19  ;;  %v1106_v2 = vmul.f32 %v851_v60, %v4515_v44  ;;  %v1107_v37 = vmul.f32 %v851_v60, %v4518_v45  ;;  %v1105_v44 = vmul.f32 %v841_v43, %v4491_v32  ;;  %v4948_v43 = vld [vmem:[%s4334_s12 + $0x1c0] sm:$0xff] }
 0x169   : > { %v1244_v19 = vadd.f32 %v4632_v21, %v1174_v31 }
 0x16a   : > { %422 = vadd.xlane.f32.xlu0 %v421_v27  ;;  %v4903_v56 = vsub.f32 %v4562_v13, %v470_v14  ;;  %v4906_v57 = vsub.f32 %v4565_v16, %v470_v14  ;;  %v1176_v45 = vmul.f32 %v4619_v10, %v1106_v2  ;;  %v1177_v27 = vmul.f32 %v4621_v17, %v1107_v37  ;;  %v4936_v14 = vld [vmem:[%s4334_s12 + $0x1b0] sm:$0xff]  ;;  %v4951_v2 = vld [vmem:[%s4334_s12 + $0x1c8] sm:$0xff] }
 0x16b   : > { %v427_v13 = vadd.f32 %v4913_v49, %v4910_v36  ;;  %v1175_v32 = vmul.f32 %v4621_v17, %v1105_v44  ;;  %v430_v3 = vadd.f32 %v4939_v61, %v4936_v14  ;;  %6037 = vst [vmem:[#allocation38_spill] sm:$0xff] %v4951_v2  ;;  %v433_v37 = vadd.f32 %v4951_v2, %v4948_v43 }
 0x16c   : > { %416 = vadd.xlane.f32.xlu2 %v415_v12  ;;  %425 = vadd.xlane.f32.xlu1 %v424_v59  ;;  %6033 = vst [vmem:[#allocation34_spill] sm:$0xff] %v4903_v56  ;;  %v584_v16 = vmul.f32 %v4903_v56, %v4903_v56  ;;  %v585_v46 = vmul.f32 %v4906_v57, %v4906_v57 }
 0x16d   : > { %6034 = vst [vmem:[#allocation35_spill] sm:$0xff] %v4906_v57  ;;  %v1246_v12 = vadd.f32 %v4632_v21, %v1176_v45  ;;  %v1247_v47 = vadd.f32 %v4636_v9, %v1177_v27  ;;  %v1245_v6 = vadd.f32 %v4636_v9, %v1175_v32  ;;  %v5051_v57 = vld [vmem:[%s4334_s12 + $0x1e8] sm:$0xff] }
 0x16e   : > { %1922 = vmatmul.bf16.gmra.mxu0 %v4880_v40  ;;  %2011 = vmatmul.bf16.gmra.mxu1 %v4882_v7  ;;  %v666_v63 = vadd.f32 %v585_v46, %v584_v16 }
 0x16f   : > { %2100 = vmatmul.bf16.gmra.mxu2 %v4880_v40  ;;  %2189 = vmatmul.bf16.gmra.mxu3 %v4882_v7  ;;  %v4931_v59 = vpack.c.bf16 %v1246_v12, %v1244_v19  ;;  %v4933_v60 = vpack.c.bf16 %v1247_v47, %v1245_v6 }
 0x171   : > { %6035 = vst [vmem:[#allocation36_spill] sm:$0xff] %v4931_v59 }
 0x172   : > { %6036 = vst [vmem:[#allocation37_spill] sm:$0xff] %v4933_v60 }
 0x174   : > { %664 = vadd.xlane.f32.xlu2 %v663_v24  ;;  %428 = vadd.xlane.f32.xlu1 %v427_v13  ;;  %v716_v24 = vmul.f32 %v4767_v54, %v4396_v33 }
 0x176   : > { %v748_v51 = vadd.f32 1e-05, %v716_v24 }
 0x178   : > { %3918 = vrsqrt.f32 %v748_v51  ;;  %vm858_vm9 = vweird.f32 %v748_v51 }
 0x17c   : > { %667 = vadd.xlane.f32.xlu2 %v666_v63 }
 0x17e   : > { %1927 = vmatmul.bf16.gmra.mxu0 %v4931_v59  ;;  %2016 = vmatmul.bf16.gmra.mxu1 %v4933_v60  ;;  %v3919_v44 = vpop.eup %3918 }
 0x17f   : > { %2105 = vmatmul.bf16.gmra.mxu2 %v4931_v59  ;;  %2194 = vmatmul.bf16.gmra.mxu3 %v4933_v60  ;;  %v853_v45 = vmul.f32 %v3919_v44, %v748_v51  ;;  %vm859_vm10 = vweird.f32 %v3919_v44  ;;  %v6039_v60 = vld [vmem:[#allocation20_spill] sm:$0xff] }
 0x180   : > { %vm860_vm11 = vmor %vm858_vm9, %vm859_vm10 }
 0x181   : > { %v854_v27 = vmul.f32 %v3919_v44, %v853_v45 }
 0x183   : > { %v855_v46 = vmul.f32 0.5, %v854_v27 }
 0x184   : > { %431 = vadd.xlane.f32.xlu2 %v430_v3 }
 0x185   : > { %v856_v32 = vsub.f32 1.5, %v855_v46 }
 0x187   : > { %v857_v19 = vmul.f32 %v3919_v44, %v856_v32 }
 0x18c   : > { %434 = vadd.xlane.f32.xlu2 %v433_v37  ;;  %v861_v37 = vsel %vm860_vm11, %v3919_v44, %v857_v19 }
 0x18d   : > { %v1108_v27 = vmul.f32 %v861_v37, %v4534_v62 }
 0x18f   : > { %v1178_v62 = vmul.f32 %v4619_v10, %v1108_v27 }
 0x191   : > { %v1248_v40 = vadd.f32 %v4632_v21, %v1178_v62 }
 0x1ab   : > { %v641_v13 = vpop.xlane.xlu1 %640 }
 0x1ac   : > { %v717_v16 = vmul.f32 %v641_v13, %v4396_v33 }
 0x1ae   : > { %v749_v31 = vadd.f32 1e-05, %v717_v16  ;;  %v6038_v16 = vld [vmem:[#allocation15_spill] sm:$0xff] }
 0x1af   : > { %v1109_v46 = vmul.f32 %v861_v37, %v6038_v16 }
 0x1b0   : > { %3920 = vrsqrt.f32 %v749_v31  ;;  %vm868_vm13 = vweird.f32 %v749_v31 }
 0x1b3   : > { %v644_v12 = vpop.xlane.xlu1 %643 }
 0x1b4   : > { %v718_v47 = vmul.f32 %v644_v12, %v4396_v33 }
 0x1b6   : > { %v3921_v63 = vpop.eup %3920  ;;  %v4959_v6 = vadd.f32 1e-05, %v718_v47 }
 0x1b7   : > { %v863_v54 = vmul.f32 %v3921_v63, %v749_v31  ;;  %vm869_vm12 = vweird.f32 %v3921_v63  ;;  %v1179_v31 = vmul.f32 %v4621_v17, %v1109_v46 }
 0x1b8   : > { %3922 = vrsqrt.f32 %v4959_v6  ;;  %vm870_vm14 = vmor %vm868_vm13, %vm869_vm12  ;;  %vm878_vm0 = vweird.f32 %v4959_v6 }
 0x1b9   : > { %v864_v3 = vmul.f32 %v3921_v63, %v863_v54  ;;  %v6041_v54 = vld [vmem:[#allocation21_spill] sm:$0xff]  ;;  %v1249_v30 = vadd.f32 %v4636_v9, %v1179_v31 }
 0x1bb   : > { %v865_v24 = vmul.f32 0.5, %v864_v3  ;;  %v408_v45 = vpop.xlane.xlu1 %407 }
 0x1bc   : > { %v471_v51 = vmul.f32 %v4396_v33, %v408_v45  ;;  %v6044_v45 = vld [vmem:[#allocation17_spill] sm:$0xff] }
 0x1bd   : > { %v866_v13 = vsub.f32 1.5, %v865_v24  ;;  %v6043_v24 = vld [vmem:[#allocation16_spill] sm:$0xff] }
 0x1be   : > { %v3923_v12 = vpop.eup %3922  ;;  %v4966_v47 = vsub.f32 %v6039_v60, %v471_v51  ;;  %v4969_v59 = vsub.f32 %v6041_v54, %v471_v51 }
 0x1bf   : > { %v867_v32 = vmul.f32 %v3921_v63, %v866_v13  ;;  %v873_v44 = vmul.f32 %v3923_v12, %v4959_v6  ;;  %vm879_vm15 = vweird.f32 %v3923_v12 }
 0x1c0   : > { %6040 = vst [vmem:[#allocation15_spill] sm:$0xff] %v4966_v47  ;;  %v586_v3 = vmul.f32 %v4966_v47, %v4966_v47  ;;  %v587_v37 = vmul.f32 %v4969_v59, %v4969_v59  ;;  %vm880_vm1 = vmor %vm878_vm0, %vm879_vm15 }
 0x1c1   : > { %6042 = vst [vmem:[#allocation20_spill] sm:$0xff] %v4969_v59  ;;  %v871_v19 = vsel %vm870_vm14, %v3921_v63, %v867_v32  ;;  %v874_v51 = vmul.f32 %v3923_v12, %v873_v44  ;;  %v6045_v44 = vld [vmem:[#allocation22_spill] sm:$0xff] }
 0x1c2   : > { %v1110_v60 = vmul.f32 %v871_v19, %v6043_v24  ;;  %v1111_v13 = vmul.f32 %v871_v19, %v6044_v45  ;;  %v669_v16 = vadd.f32 %v587_v37, %v586_v3  ;;  %v6047_v37 = vld [vmem:[#allocation23_spill] sm:$0xff] }
 0x1c3   : > { %v875_v27 = vmul.f32 0.5, %v874_v51  ;;  %v411_v63 = vpop.xlane.xlu1 %410 }
 0x1c4   : > { %v1180_v54 = vmul.f32 %v4619_v10, %v1110_v60  ;;  %v1181_v7 = vmul.f32 %v4621_v17, %v1111_v13  ;;  %v472_v32 = vmul.f32 %v4396_v33, %v411_v63  ;;  %670 = vadd.xlane.f32.xlu0 %v669_v16 }
 0x1c5   : > { %v653_v19 = vpop.xlane.xlu0 %652  ;;  %v876_v51 = vsub.f32 1.5, %v875_v27 }
 0x1c6   : > { %v1250_v46 = vadd.f32 %v4632_v21, %v1180_v54  ;;  %v1251_v24 = vadd.f32 %v4636_v9, %v1181_v7  ;;  %v4988_v3 = vsub.f32 %v6045_v44, %v472_v32  ;;  %v4991_v60 = vsub.f32 %v6047_v37, %v472_v32 }
 0x1c7   : > { %v647_v16 = vpop.xlane.xlu2 %646  ;;  %v721_v62 = vmul.f32 %v653_v19, %v4396_v33  ;;  %v5018_v19 = vld [vmem:[%s4334_s12 + $0x1d8] sm:$0xff] }
 0x1c8   : > { %6046 = vst [vmem:[#allocation21_spill] sm:$0xff] %v4988_v3  ;;  %v4993_v45 = vpack.c.bf16 %v1250_v46, %v1248_v40  ;;  %v4995_v13 = vpack.c.bf16 %v1251_v24, %v1249_v30  ;;  %v719_v31 = vmul.f32 %v647_v16, %v4396_v33  ;;  %v588_v7 = vmul.f32 %v4988_v3, %v4988_v3  ;;  %v5015_v24 = vld [vmem:[%s4334_s12 + $0x1d0] sm:$0xff] }
 0x1c9   : > { %6048 = vst [vmem:[#allocation16_spill] sm:$0xff] %v4991_v60  ;;  %v589_v54 = vmul.f32 %v4991_v60, %v4991_v60  ;;  %v5003_v63 = vadd.f32 1e-05, %v721_v62  ;;  %v877_v46 = vmul.f32 %v3923_v12, %v876_v51 }
 0x1ca   : > { %6049 = vst [vmem:[#allocation17_spill] sm:$0xff] %v4993_v45  ;;  %1932 = vmatmul.bf16.gmra.mxu0 %v4993_v45  ;;  %2021 = vmatmul.bf16.gmra.mxu1 %v4995_v13  ;;  %v5007_v30 = vadd.f32 1e-05, %v719_v31  ;;  %v436_v31 = vadd.f32 %v5018_v19, %v5015_v24 }
 0x1cb   : > { %6050 = vst [vmem:[#allocation22_spill] sm:$0xff] %v4995_v13  ;;  %2110 = vmatmul.bf16.gmra.mxu2 %v4993_v45  ;;  %2199 = vmatmul.bf16.gmra.mxu3 %v4995_v13  ;;  %v1913_v40 = vpop.f32.mrf.mxu0  ;;  %v2002_v27 = vpop.f32.mrf.mxu1  ;;  %v672_v32 = vadd.f32 %v589_v54, %v588_v7  ;;  %3924 = vrsqrt.f32 %v5003_v63  ;;  %v881_v37 = vsel %vm880_vm1, %v3923_v12, %v877_v46  ;;  %v6053_v13 = vld [vmem:[#allocation18_spill] sm:$0xff]  ;;  %vm908_vm2 = vweird.f32 %v5003_v63 }
 0x1cc   : > { %3926 = vrsqrt.f32 %v5007_v30  ;;  %6051 = vst [vmem:[#allocation23_spill] sm:$0xff] %v5015_v24  ;;  %v1112_v45 = vmul.f32 %v881_v37, %v6053_v13  ;;  %v2003_v59 = vadd.f32 %v2002_v27, %v1913_v40  ;;  %v5048_v24 = vld [vmem:[%s4334_s12 + $0x1e0] sm:$0xff]  ;;  %vm888_vm5 = vweird.f32 %v5007_v30 }
 0x1cd   : > { %673 = vadd.xlane.f32.xlu0 %v672_v32  ;;  %6052 = vst [vmem:[#allocation39_spill] sm:$0xff] %v5018_v19  ;;  %v656_v44 = vpop.xlane.xlu0 %655 }
 0x1ce   : > { %v722_v62 = vmul.f32 %v656_v44, %v4396_v33  ;;  %6055 = vst [vmem:[#allocation18_spill] sm:$0xff] %v5048_v24 }
 0x1cf   : > { %v650_v16 = vpop.xlane.xlu2 %649  ;;  %v659_v46 = vpop.xlane.xlu1 %658 }
 0x1d0   : > { %v720_v51 = vmul.f32 %v650_v16, %v4396_v33  ;;  %v5026_v54 = vadd.f32 1e-05, %v722_v62  ;;  %v6054_v16 = vld [vmem:[#allocation19_spill] sm:$0xff] }
 0x1d1   : > { %v5024_v7 = vpop.eup %3924  ;;  %v1113_v26 = vmul.f32 %v881_v37, %v6054_v16  ;;  %v1182_v37 = vmul.f32 %v4619_v10, %v1112_v45  ;;  %6056 = vst [vmem:[#allocation19_spill] sm:$0xff] %v5051_v57  ;;  %v439_v45 = vadd.f32 %v5051_v57, %v5048_v24 }
 0x1d2   : > { %v2091_v6 = vpop.f32.mrf.mxu2  ;;  %v3927_v32 = vpop.eup %3926  ;;  %v903_v55 = vmul.f32 %v5024_v7, %v5003_v63  ;;  %v5031_v12 = vadd.f32 1e-05, %v720_v51  ;;  %3928 = vrsqrt.f32 %v5026_v54  ;;  %v723_v51 = vmul.f32 %v659_v46, %v4396_v33 }
 0x1d3   : > { %v2180_v44 = vpop.f32.mrf.mxu3  ;;  %v883_v29 = vmul.f32 %v3927_v32, %v5007_v30  ;;  %v5037_v62 = vpop.f32.mrf.mxu0  ;;  %vm909_vm3 = vweird.f32 %v5024_v7  ;;  %vm889_vm4 = vweird.f32 %v3927_v32  ;;  %vm918_vm7 = vweird.f32 %v5026_v54 }
 0x1d4   : > { %v5039_v60 = vpop.f32.mrf.mxu1  ;;  %v904_v13 = vmul.f32 %v5024_v7, %v903_v55  ;;  %3930 = vrsqrt.f32 %v5031_v12  ;;  %v2181_v47 = vadd.f32 %v2180_v44, %v2091_v6  ;;  %v5045_v19 = vadd.f32 1e-05, %v723_v51  ;;  %vm5080_vm6 = vmor %vm908_vm2, %vm909_vm3 }
 0x1d5   : > { %437 = vadd.xlane.f32.xlu0 %v436_v31  ;;  %v884_v3 = vmul.f32 %v3927_v32, %v883_v29  ;;  %v1183_v55 = vmul.f32 %v4621_v17, %v1113_v26  ;;  %v420_v6 = vpop.xlane.xlu0 %419  ;;  %vm890_vm8 = vmor %vm888_vm5, %vm889_vm4  ;;  %vm898_vm9 = vweird.f32 %v5031_v12 }
 0x1d6   : > { %v905_v16 = vmul.f32 0.5, %v904_v13  ;;  %v2972_v31 = vpack.c.bf16 %v2181_v47, %v2003_v59  ;;  %3932 = vrsqrt.f32 %v5045_v19  ;;  %v1252_v47 = vadd.f32 %v4632_v21, %v1182_v37 }
 0x1d7   : > { %v885_v56 = vmul.f32 0.5, %v884_v3  ;;  %v414_v46 = vpop.xlane.xlu2 %413  ;;  %v1253_v51 = vadd.f32 %v4636_v9, %v1183_v55  ;;  %vm928_vm10 = vweird.f32 %v5045_v19  ;;  %v475_v15 = vmul.f32 %v4396_v33, %v420_v6 }
 0x1d8   : > { %v906_v29 = vsub.f32 1.5, %v905_v16  ;;  %v5059_v40 = vpop.eup %3928  ;;  %3068 = vst [vmem:[%s5063_s2] sm:$0xff] %v2972_v31  ;;  %v473_v63 = vmul.f32 %v4396_v33, %v414_v46 }
 0x1d9   : > { %v886_v27 = vsub.f32 1.5, %v885_v56  ;;  %v913_v44 = vmul.f32 %v5059_v40, %v5026_v54  ;;  %v662_v56 = vpop.xlane.xlu1 %661  ;;  %vm919_vm11 = vweird.f32 %v5059_v40 }
 0x1da   : > { %v5066_v26 = vpop.f32.mrf.mxu2  ;;  %v3931_v59 = vpop.eup %3930  ;;  %v907_v3 = vmul.f32 %v5024_v7, %v906_v29  ;;  %vm5124_vm14 = vmor %vm918_vm7, %vm919_vm11  ;;  %v5141_v54 = vsub.f32 %v4813_v0, %v473_v63 }
 0x1db   : > { %v5073_v13 = vpop.f32.mrf.mxu3  ;;  %v887_v16 = vmul.f32 %v3927_v32, %v886_v27  ;;  %v893_v30 = vmul.f32 %v3931_v59, %v5031_v12  ;;  %v5086_v37 = vpop.f32.mrf.mxu0  ;;  %v914_v55 = vmul.f32 %v5059_v40, %v913_v44  ;;  %v724_v27 = vmul.f32 %v662_v56, %v4396_v33 }
 0x1dc   : > { %v5088_v29 = vpop.f32.mrf.mxu1  ;;  %v3933_v41 = vpop.eup %3932  ;;  %v911_v44 = vsel %vm5080_vm6, %v5024_v7, %v907_v3  ;;  %vm899_vm12 = vweird.f32 %v3931_v59 }
 0x1dd   : > { %440 = vadd.xlane.f32.xlu0 %v439_v45  ;;  %v891_v57 = vsel %vm890_vm8, %v3927_v32, %v887_v16  ;;  %v894_v24 = vmul.f32 %v3931_v59, %v893_v30  ;;  %v915_v2 = vmul.f32 0.5, %v914_v55  ;;  %v923_v32 = vmul.f32 %v3933_v41, %v5045_v19  ;;  %vm900_vm15 = vmor %vm898_vm9, %vm899_vm12 }
 0x1de   : > { %v1114_v11 = vmul.f32 %v891_v57, %v4693_v50  ;;  %v1115_v4 = vmul.f32 %v891_v57, %v4696_v22  ;;  %v5104_v45 = vadd.f32 1e-05, %v724_v27  ;;  %v5109_v22 = vsub.f32 %v4810_v42, %v473_v63 }
 0x1df   : > { %v895_v46 = vmul.f32 0.5, %v894_v24  ;;  %v417_v56 = vpop.xlane.xlu2 %416  ;;  %v916_v50 = vsub.f32 1.5, %v915_v2  ;;  %v1118_v57 = vmul.f32 %v911_v44, %v4672_v58  ;;  %v924_v24 = vmul.f32 %v3933_v41, %v923_v32 }
 0x1e0   : > { %v1184_v6 = vmul.f32 %v4619_v10, %v1114_v11  ;;  %v1185_v16 = vmul.f32 %v4621_v17, %v1115_v4  ;;  %v1119_v55 = vmul.f32 %v911_v44, %v4678_v34  ;;  %vm929_vm13 = vweird.f32 %v3933_v41 }
 0x1e1   : > { %v896_v7 = vsub.f32 1.5, %v895_v46  ;;  %v917_v42 = vmul.f32 %v5059_v40, %v916_v50  ;;  %v925_v2 = vmul.f32 0.5, %v924_v24  ;;  %3934 = vrsqrt.f32 %v5104_v45  ;;  %vm5148_vm0 = vmor %vm928_vm10, %vm929_vm13  ;;  %v426_v12 = vpop.xlane.xlu1 %425 }
 0x1e2   : > { %v5112_v3 = vpop.f32.mrf.mxu2  ;;  %v1254_v31 = vadd.f32 %v4632_v21, %v1184_v6  ;;  %v1255_v30 = vadd.f32 %v4636_v9, %v1185_v16  ;;  %v1188_v16 = vmul.f32 %v4619_v10, %v1118_v57  ;;  %v1189_v50 = vmul.f32 %v4621_v17, %v1119_v55 }
 0x1e3   : > { %v5117_v11 = vpop.f32.mrf.mxu3  ;;  %v897_v4 = vmul.f32 %v3931_v59, %v896_v7  ;;  %v5129_v27 = vpop.f32.mrf.mxu0  ;;  %v926_v6 = vsub.f32 1.5, %v925_v2  ;;  %v590_v0 = vmul.f32 %v5109_v22, %v5109_v22  ;;  %v921_v19 = vsel %vm5124_vm14, %v5059_v40, %v917_v42 }
 0x1e4   : > { %v5131_v34 = vpop.f32.mrf.mxu1  ;;  %v5133_v44 = vpack.c.bf16 %v1254_v31, %v1252_v47  ;;  %v5135_v46 = vpack.c.bf16 %v1255_v30, %v1253_v51  ;;  %v5153_v51 = vsub.f32 %v4801_v1, %v475_v15  ;;  %v423_v7 = vpop.xlane.xlu0 %422  ;;  %v474_v24 = vmul.f32 %v4396_v33, %v417_v56 }
 0x1e5   : > { %v901_v32 = vsel %vm900_vm15, %v3931_v59, %v897_v4  ;;  %v927_v57 = vmul.f32 %v3933_v41, %v926_v6  ;;  %v591_v31 = vmul.f32 %v5141_v54, %v5141_v54  ;;  %v2005_v40 = vadd.f32 %v5039_v60, %v5037_v62 }
 0x1e6   : > { %6061 = vst [vmem:[#allocation40_spill] sm:$0xff] %v5133_v44  ;;  %1937 = vmatmul.bf16.gmra.mxu0 %v5133_v44  ;;  %v1116_v59 = vmul.f32 %v901_v32, %v4729_v39  ;;  %v1117_v63 = vmul.f32 %v901_v32, %v4738_v48  ;;  %2026 = vmatmul.bf16.gmra.mxu1 %v5135_v46  ;;  %vm938_vm1 = vweird.f32 %v5104_v45 }
 0x1e7   : > { %6062 = vst [vmem:[#allocation41_spill] sm:$0xff] %v5135_v46  ;;  %v665_v1 = vpop.xlane.xlu2 %664  ;;  %2115 = vmatmul.bf16.gmra.mxu2 %v5133_v44  ;;  %v5168_v30 = vpop.eup %3934  ;;  %v931_v39 = vsel %vm5148_vm0, %v3933_v41, %v927_v57  ;;  %v5173_v48 = vsub.f32 %v4804_v5, %v475_v15  ;;  %2204 = vmatmul.bf16.gmra.mxu3 %v5135_v46 }
 0x1e8   : > { %v1258_v56 = vadd.f32 %v4632_v21, %v1188_v16  ;;  %v1259_v4 = vadd.f32 %v4636_v9, %v1189_v50  ;;  %v1120_v42 = vmul.f32 %v921_v19, %v4714_v8  ;;  %v476_v58 = vmul.f32 %v4396_v33, %v423_v7 }
 0x1e9   : > { %v1186_v41 = vmul.f32 %v4619_v10, %v1116_v59  ;;  %v1187_v15 = vmul.f32 %v4621_v17, %v1117_v63  ;;  %v675_v5 = vadd.f32 %v591_v31, %v590_v0  ;;  %v594_v60 = vmul.f32 %v5153_v51, %v5153_v51 }
 0x1ea   : > { %v5178_v55 = vpop.f32.mrf.mxu2  ;;  %v1121_v6 = vmul.f32 %v921_v19, %v4717_v53  ;;  %v1122_v8 = vmul.f32 %v931_v39, %v4758_v52  ;;  %v933_v16 = vmul.f32 %v5168_v30, %v5104_v45  ;;  %v5199_v50 = vsub.f32 %v4847_v25, %v474_v24 }
 0x1eb   : > { %v5184_v2 = vpop.f32.mrf.mxu3  ;;  %v5190_v62 = vpop.f32.mrf.mxu0  ;;  %v5202_v47 = vsub.f32 %v4850_v35, %v474_v24  ;;  %676 = vadd.xlane.f32.xlu1 %v675_v5  ;;  %v595_v0 = vmul.f32 %v5173_v48, %v5173_v48  ;;  %v2183_v59 = vadd.f32 %v5073_v13, %v5066_v26  ;;  %v477_v53 = vmul.f32 %v4396_v33, %v426_v12 }
 0x1ec   : > { %v5192_v32 = vpop.f32.mrf.mxu1  ;;  %v1190_v52 = vmul.f32 %v4619_v10, %v1120_v42  ;;  %v5211_v63 = vsub.f32 %v4839_v23, %v476_v58  ;;  %v5214_v25 = vsub.f32 %v4842_v18, %v476_v58  ;;  %v725_v35 = vmul.f32 %v665_v1, %v4396_v33  ;;  %v429_v18 = vpop.xlane.xlu1 %428 }
 0x1ed   : > { %v1256_v19 = vadd.f32 %v4632_v21, %v1186_v41  ;;  %v1257_v57 = vadd.f32 %v4636_v9, %v1187_v15  ;;  %v681_v7 = vadd.f32 %v595_v0, %v594_v60  ;;  %v2975_v24 = vpack.c.bf16 %v2183_v59, %v2005_v40 }
 0x1ee   : > { %v1123_v13 = vmul.f32 %v931_v39, %v4761_v38  ;;  %v1192_v12 = vmul.f32 %v4619_v10, %v1122_v8  ;;  %v934_v23 = vmul.f32 %v5168_v30, %v933_v16  ;;  %v5224_v31 = vadd.f32 1e-05, %v725_v35 }
 0x1ef   : > { %v5219_v26 = vpop.xlane.xlu2 %667  ;;  %682 = vadd.xlane.f32.xlu2 %v681_v7  ;;  %3071 = vst [vmem:[%s5063_s2 + $0x18] sm:$0xff] %v2975_v24  ;;  %v5228_v1 = vsub.f32 %v4870_v28, %v477_v53  ;;  %v592_v42 = vmul.f32 %v5199_v50, %v5199_v50  ;;  %v593_v40 = vmul.f32 %v5202_v47, %v5202_v47  ;;  %vm939_vm4 = vweird.f32 %v5168_v30 }
 0x1f0   : > { %v5235_v38 = vsub.f32 %v4873_v20, %v477_v53  ;;  %3936 = vrsqrt.f32 %v5224_v31  ;;  %v596_v39 = vmul.f32 %v5211_v63, %v5211_v63  ;;  %v597_v41 = vmul.f32 %v5214_v25, %v5214_v25  ;;  %vm940_vm6 = vmor %vm938_vm1, %vm939_vm4 }
 0x1f1   : > { %v2008_v28 = vadd.f32 %v5088_v29, %v5086_v37  ;;  %v678_v15 = vadd.f32 %v593_v40, %v592_v42  ;;  %v2186_v5 = vadd.f32 %v5117_v11, %v5112_v3  ;;  %v478_v60 = vmul.f32 %v4396_v33, %v429_v18  ;;  %v3494_v40 = vld [vmem:[#allocation8 + $0x170] sm:$0xf0] }
 0x1f2   : > { %v2101_v58 = vpop.f32.mrf.mxu2  ;;  %v5247_v8 = vpack.c.bf16 %v1258_v56, %v1256_v19  ;;  %v1193_v16 = vmul.f32 %v4621_v17, %v1123_v13  ;;  %v5250_v59 = vpack.c.bf16 %v1259_v4, %v1257_v57  ;;  %v5253_v53 = vmul.f32 %v4621_v17, %v1121_v6  ;;  %v5266_v19 = vld [vmem:[%s4334_s12 + $0x1f0] sm:$0xff]  ;;  %v5269_v6 = vld [vmem:[%s4334_s12 + $0x1f8] sm:$0xff] }
 0x1f3   : > { %v2190_v20 = vpop.f32.mrf.mxu3  ;;  %v1925_v0 = vpop.f32.mrf.mxu0  ;;  %679 = vadd.xlane.f32.xlu1 %v678_v15  ;;  %v684_v37 = vadd.f32 %v597_v41, %v596_v39  ;;  %v2978_v29 = vpack.c.bf16 %v2186_v5, %v2008_v28  ;;  %v5256_v11 = vadd.f32 %v4632_v21, %v1190_v52  ;;  %v5259_v35 = vsub.f32 %v4910_v36, %v478_v60  ;;  %v3793_v39 = vld [vmem:[#allocation8 + $0x2dc] sm:$0xf] }
 0x1f4   : > { %6065 = vst [vmem:[#allocation42_spill] sm:$0xff] %v5247_v8  ;;  %v2014_v3 = vpop.f32.mrf.mxu1  ;;  %v598_v56 = vmul.f32 %v5228_v1, %v5228_v1  ;;  %v599_v4 = vmul.f32 %v5235_v38, %v5235_v38  ;;  %v5273_v57 = vadd.f32 %v4632_v21, %v1192_v12  ;;  %v5275_v52 = vmul.f32 0.5, %v934_v23 }
 0x1f5   : > { %6066 = vst [vmem:[#allocation43_spill] sm:$0xff] %v5250_v59  ;;  %v5279_v36 = vsub.f32 %v4913_v49, %v478_v60  ;;  %v2188_v7 = vadd.f32 %v5184_v2, %v5178_v55  ;;  %v5287_v18 = vadd.f32 %v4636_v9, %v1193_v16  ;;  %v2010_v12 = vadd.f32 %v5131_v34, %v5129_v27  ;;  %v3745_v34 = vld [vmem:[#allocation8 + $0x15c] sm:$0xf]  ;;  %v3686_v60 = vld [vmem:[#allocation8 + $0x2f0] sm:$0xf0] }
 0x1f6   : > { %6067 = vst [vmem:[#allocation44_spill] sm:$0xff] %v5259_v35  ;;  %1942 = vmatmul.bf16.gmra.mxu0 %v5247_v8  ;;  %2031 = vmatmul.bf16.gmra.mxu1 %v5250_v59  ;;  %v5284_v13 = vpop.eup %3936  ;;  %v687_v23 = vadd.f32 %v599_v4, %v598_v56  ;;  %v442_v2 = vadd.f32 %v5269_v6, %v5266_v19  ;;  %v3492_v16 = vld [vmem:[#allocation8 + $0x158] sm:$0xf]  ;;  %vm948_vm2 = vweird.f32 %v5224_v31 }
 0x1f7   : > { %3074 = vst [vmem:[%s5063_s2 + $0x30] sm:$0xff] %v2978_v29  ;;  %v432_v24 = vpop.xlane.xlu2 %431  ;;  %2120 = vmatmul.bf16.gmra.mxu2 %v5247_v8  ;;  %v943_v55 = vmul.f32 %v5284_v13, %v5224_v31  ;;  %685 = vadd.xlane.f32.xlu2 %v684_v37  ;;  %v2013_v42 = vadd.f32 %v5192_v32, %v5190_v62  ;;  %v3748_v37 = vld [vmem:[#allocation8 + $0x16c] sm:$0xf0]  ;;  %v936_v8 = vsub.f32 1.5, %v5275_v52  ;;  %vm949_vm3 = vweird.f32 %v5284_v13 }
 0x1f8   : > { %6068 = vst [vmem:[#allocation45_spill] sm:$0xff] %v5279_v36  ;;  %v479_v49 = vmul.f32 %v4396_v33, %v432_v24  ;;  %2209 = vmatmul.bf16.gmra.mxu3 %v5250_v59  ;;  %688 = vadd.xlane.f32.xlu0 %v687_v23  ;;  %v2981_v41 = vpack.c.bf16 %v2188_v7, %v2010_v12  ;;  %v3684_v7 = vld [vmem:[#allocation8 + $0x2d8] sm:$0xf]  ;;  %v3739_v24 = vld [vmem:[#allocation8 + $0x12c] sm:$0xf]  ;;  %vm950_vm5 = vmor %vm948_vm2, %vm949_vm3 }
 0x1f9   : > { %v600_v5 = vmul.f32 %v5259_v35, %v5259_v35  ;;  %v944_v62 = vmul.f32 %v5284_v13, %v943_v55  ;;  %v601_v32 = vmul.f32 %v5279_v36, %v5279_v36  ;;  %v2191_v29 = vadd.f32 %v2190_v20, %v2101_v58  ;;  %v3470_v59 = vld [vmem:[#allocation8 + $0x140] sm:$0xf0]  ;;  %v3787_v55 = vld [vmem:[#allocation8 + $0x2ac] sm:$0xf] }
 0x1fa   : > { %v2103_v27 = vpop.f32.mrf.mxu2  ;;  %v5302_v28 = vsub.f32 %v4936_v14, %v479_v49  ;;  %v5305_v15 = vsub.f32 %v4939_v61, %v479_v49  ;;  %v2015_v56 = vadd.f32 %v2014_v3, %v1925_v0  ;;  %v3796_v14 = vld [vmem:[#allocation8 + $0x2ec] sm:$0xf0]  ;;  %3077 = vst [vmem:[%s5063_s2 + $0x48] sm:$0xff] %v2981_v41  ;;  %v3497_v49 = vor.u32 %v3745_v34, %v3494_v40  ;;  %v3662_v20 = vld [vmem:[#allocation8 + $0x2c0] sm:$0xf0] }
 0x1fb   : > { %v2192_v4 = vpop.f32.mrf.mxu3  ;;  %v945_v46 = vmul.f32 0.5, %v944_v62  ;;  %443 = vadd.xlane.f32.xlu1 %v442_v2  ;;  %v2984_v58 = vpack.c.bf16 %v2191_v29, %v2013_v42  ;;  %v3468_v0 = vld [vmem:[#allocation8 + $0x128] sm:$0xf]  ;;  %v1928_v44 = vpop.f32.mrf.mxu0  ;;  %v3689_v36 = vor.u32 %v3793_v39, %v3686_v60  ;;  %v3742_v34 = vld [vmem:[#allocation8 + $0x13c] sm:$0xf0]  ;;  %v3685_v2 = vor.u32 %v3796_v14, %v3684_v7  ;;  %v6070_v14 = vld [vmem:[#allocation30_spill] sm:$0xff] }
 0x1fc   : > { %v602_v61 = vmul.f32 %v5302_v28, %v5302_v28  ;;  %v603_v12 = vmul.f32 %v5305_v15, %v5305_v15  ;;  %v2193_v23 = vadd.f32 %v2192_v4, %v2103_v27  ;;  %2438 = vmatpush.bf16.msrb.mxu2 %v3497_v49  ;;  %v3493_v27 = vor.u32 %v3748_v37, %v3492_v16  ;;  %v3660_v40 = vld [vmem:[#allocation8 + $0x2a8] sm:$0xf]  ;;  %v3790_v4 = vld [vmem:[#allocation8 + $0x2bc] sm:$0xf0]  ;;  %v2017_v62 = vpop.f32.mrf.mxu1 }
 0x1fd   : > { %v946_v35 = vsub.f32 1.5, %v945_v46  ;;  %3080 = vst [vmem:[%s5063_s2 + $0x60] sm:$0xff] %v2984_v58  ;;  %v3473_v42 = vor.u32 %v3739_v24, %v3470_v59  ;;  %v690_v29 = vadd.f32 %v601_v32, %v600_v5  ;;  %2527 = vmatpush.bf16.msrb.mxu3 %v3689_v36  ;;  %2349 = vmatpush.bf16.msrb.mxu1 %v3685_v2  ;;  %v6069_v36 = vld [vmem:[#allocation38_spill] sm:$0xff]  ;;  %v6072_v58 = vld [vmem:[#allocation28_spill] sm:$0xff] }
 0x1fe   : > { %v693_v3 = vadd.f32 %v603_v12, %v602_v61  ;;  %v2987_v41 = vpack.c.bf16 %v2193_v23, %v2015_v56  ;;  %2260 = vmatpush.bf16.msrb.mxu0 %v3493_v27  ;;  %v3665_v56 = vor.u32 %v3787_v55, %v3662_v20  ;;  %v3469_v60 = vor.u32 %v3742_v34, %v3468_v0  ;;  %v6071_v12 = vld [vmem:[#allocation31_spill] sm:$0xff]  ;;  %v6073_v20 = vld [vmem:[#allocation29_spill] sm:$0xff] }
 0x1ff   : > { %v435_v52 = vpop.xlane.xlu2 %434  ;;  %v947_v39 = vmul.f32 %v5284_v13, %v946_v35  ;;  %v3661_v16 = vor.u32 %v3790_v4, %v3660_v40  ;;  %v1261_v37 = vadd.f32 %v4636_v9, %v5253_v53  ;;  %v5339_v35 = vpack.c.bf16 %v5273_v57, %v5256_v11 }
 0x200   : > { %v480_v61 = vmul.f32 %v4396_v33, %v435_v52  ;;  %3083 = vst [vmem:[%s5063_s2 + $0x78] sm:$0xff] %v2987_v41  ;;  %694 = vadd.xlane.f32.xlu2 %v693_v3  ;;  %2439 = vmatpush.bf16.msrb.mxu2 %v3473_v42  ;;  %v937_v32 = vmul.f32 %v5168_v30, %v936_v8 }
 0x201   : > { %v5343_v53 = vpack.c.bf16 %v5287_v18, %v1261_v37  ;;  %2528 = vmatpush.bf16.msrb.mxu3 %v3665_v56  ;;  %v951_v11 = vsel %vm950_vm5, %v5284_v13, %v947_v39  ;;  %2350 = vmatpush.bf16.msrb.mxu1 %v3661_v16 }
 0x202   : > { %v2106_v46 = vpop.f32.mrf.mxu2  ;;  %v5332_v59 = vsub.f32 %v4948_v43, %v480_v61  ;;  %v5335_v5 = vsub.f32 %v6069_v36, %v480_v61  ;;  %v2018_v43 = vadd.f32 %v2017_v62, %v1928_v44  ;;  %2261 = vmatpush.bf16.msrb.mxu0 %v3469_v60  ;;  %v941_v45 = vsel %vm940_vm6, %v5168_v30, %v937_v32 }
 0x203   : > { %v2195_v7 = vpop.f32.mrf.mxu3  ;;  %691 = vadd.xlane.f32.xlu1 %v690_v29  ;;  %v1126_v24 = vmul.f32 %v951_v11, %v6070_v14  ;;  %v1930_v13 = vpop.f32.mrf.mxu0  ;;  %v1127_v23 = vmul.f32 %v951_v11, %v6071_v12  ;;  %v1124_v30 = vmul.f32 %v941_v45, %v6072_v58  ;;  %v1125_v0 = vmul.f32 %v941_v45, %v6073_v20  ;;  %v3733_v11 = vld [vmem:[#allocation8 + $0xfc] sm:$0xf] }
 0x204   : > { %v604_v31 = vmul.f32 %v5332_v59, %v5332_v59  ;;  %v605_v8 = vmul.f32 %v5335_v5, %v5335_v5  ;;  %v2196_v57 = vadd.f32 %v2195_v7, %v2106_v46  ;;  %v2019_v49 = vpop.f32.mrf.mxu1  ;;  %v726_v46 = vmul.f32 %v5219_v26, %v4396_v33  ;;  %v3781_v45 = vld [vmem:[#allocation8 + $0x27c] sm:$0xf] }
 0x205   : > { %v1196_v41 = vmul.f32 %v4619_v10, %v1126_v24  ;;  %v2020_v27 = vadd.f32 %v2019_v49, %v1930_v13  ;;  %v1197_v40 = vmul.f32 %v4621_v17, %v1127_v23  ;;  %v1194_v4 = vmul.f32 %v4619_v10, %v1124_v30 }
 0x206   : > { %1947 = vmatmul.bf16.gmra.mxu0 %v5339_v35  ;;  %2036 = vmatmul.bf16.gmra.mxu1 %v5343_v53  ;;  %v696_v44 = vadd.f32 %v605_v8, %v604_v31  ;;  %v2990_v18 = vpack.c.bf16 %v2196_v57, %v2018_v43  ;;  %v1195_v62 = vmul.f32 %v4621_v17, %v1125_v0  ;;  %v758_v60 = vadd.f32 1e-05, %v726_v46  ;;  %v3446_v8 = vld [vmem:[#allocation8 + $0x110] sm:$0xf0]  ;;  %v6074_v0 = vld [vmem:[#allocation34_spill] sm:$0xff] }
 0x207   : > { %2125 = vmatmul.bf16.gmra.mxu2 %v5339_v35  ;;  %v1266_v2 = vadd.f32 %v4632_v21, %v1196_v41  ;;  %v1267_v42 = vadd.f32 %v4636_v9, %v1197_v40  ;;  %v1264_v29 = vadd.f32 %v4632_v21, %v1194_v4  ;;  %v3449_v57 = vor.u32 %v3733_v11, %v3446_v8  ;;  %v6075_v41 = vld [vmem:[#allocation35_spill] sm:$0xff]  ;;  %v6079_v8 = vld [vmem:[#allocation20_spill] sm:$0xff] }
 0x208   : > { %2214 = vmatmul.bf16.gmra.mxu3 %v5343_v53  ;;  %697 = vadd.xlane.f32.xlu0 %v696_v44  ;;  %3086 = vst [vmem:[%s5063_s2 + $0x90] sm:$0xff] %v2990_v18  ;;  %v1265_v61 = vadd.f32 %v4636_v9, %v1195_v62  ;;  %3938 = vrsqrt.f32 %v758_v60  ;;  %v3638_v44 = vld [vmem:[#allocation8 + $0x290] sm:$0xf0]  ;;  %vm958_vm7 = vweird.f32 %v758_v60  ;;  %v6078_v11 = vld [vmem:[#allocation15_spill] sm:$0xff] }
 0x209   : > { %v5373_v56 = vpack.c.bf16 %v1266_v2, %v1264_v29  ;;  %v3641_v18 = vor.u32 %v3781_v45, %v3638_v44  ;;  %2440 = vmatpush.bf16.msrb.mxu2 %v3449_v57  ;;  %v6077_v2 = vld [vmem:[#allocation39_spill] sm:$0xff] }
 0x20a   : > { %v2108_v55 = vpop.f32.mrf.mxu2  ;;  %v5375_v39 = vpack.c.bf16 %v1267_v42, %v1265_v61 }
 0x20b   : > { %v2197_v3 = vpop.f32.mrf.mxu3  ;;  %2529 = vmatpush.bf16.msrb.mxu3 %v3641_v18 }
 0x20c   : > { %v2198_v34 = vadd.f32 %v2197_v3, %v2108_v55 }
 0x20e   : > { %v2993_v52 = vpack.c.bf16 %v2198_v34, %v2020_v27  ;;  %v3939_v16 = vpop.eup %3938 }
 0x20f   : > { %v953_v37 = vmul.f32 %v3939_v16, %v758_v60  ;;  %vm959_vm8 = vweird.f32 %v3939_v16 }
 0x210   : > { %3089 = vst [vmem:[%s5063_s2 + $0xa8] sm:$0xff] %v2993_v52  ;;  %vm960_vm9 = vmor %vm958_vm7, %vm959_vm8  ;;  %v6076_v52 = vld [vmem:[#allocation23_spill] sm:$0xff] }
 0x211   : > { %v954_v36 = vmul.f32 %v3939_v16, %v953_v37 }
 0x213   : > { %v955_v43 = vmul.f32 0.5, %v954_v36 }
 0x215   : > { %v956_v14 = vsub.f32 1.5, %v955_v43 }
 0x216   : > { %1952 = vmatmul.bf16.gmra.mxu0 %v5373_v56  ;;  %2041 = vmatmul.bf16.gmra.mxu1 %v5375_v39 }
 0x217   : > { %2130 = vmatmul.bf16.gmra.mxu2 %v5373_v56  ;;  %v957_v13 = vmul.f32 %v3939_v16, %v956_v14 }
 0x218   : > { %2219 = vmatmul.bf16.gmra.mxu3 %v5375_v39 }
 0x219   : > { %v961_v49 = vsel %vm960_vm9, %v3939_v16, %v957_v13 }
 0x21a   : > { %v1128_v3 = vmul.f32 %v961_v49, %v6074_v0  ;;  %v1129_v27 = vmul.f32 %v961_v49, %v6075_v41 }
 0x21c   : > { %v1198_v16 = vmul.f32 %v4619_v10, %v1128_v3  ;;  %v1199_v37 = vmul.f32 %v4621_v17, %v1129_v27 }
 0x237   : > { %v671_v32 = vpop.xlane.xlu0 %670 }
 0x238   : > { %v727_v7 = vmul.f32 %v671_v32, %v4396_v33 }
 0x23a   : > { %v759_v31 = vadd.f32 1e-05, %v727_v7 }
 0x23c   : > { %3940 = vrsqrt.f32 %v759_v31  ;;  %vm968_vm11 = vweird.f32 %v759_v31 }
 0x240   : > { %v674_v26 = vpop.xlane.xlu0 %673 }
 0x241   : > { %v728_v58 = vmul.f32 %v674_v26, %v4396_v33 }
 0x242   : > { %v3941_v24 = vpop.eup %3940 }
 0x243   : > { %v963_v12 = vmul.f32 %v3941_v24, %v759_v31  ;;  %vm969_vm10 = vweird.f32 %v3941_v24  ;;  %v5394_v61 = vadd.f32 1e-05, %v728_v58  ;;  %v6080_v58 = vld [vmem:[#allocation18_spill] sm:$0xff] }
 0x244   : > { %vm970_vm12 = vmor %vm968_vm11, %vm969_vm10 }
 0x245   : > { %v964_v23 = vmul.f32 %v3941_v24, %v963_v12  ;;  %3942 = vrsqrt.f32 %v5394_v61  ;;  %v1268_v12 = vadd.f32 %v4632_v21, %v1198_v16  ;;  %vm978_vm14 = vweird.f32 %v5394_v61 }
 0x247   : > { %v965_v55 = vmul.f32 0.5, %v964_v23  ;;  %v1933_v40 = vpop.f32.mrf.mxu0  ;;  %v2022_v4 = vpop.f32.mrf.mxu1  ;;  %v1269_v23 = vadd.f32 %v4636_v9, %v1199_v37 }
 0x248   : > { %v438_v30 = vpop.xlane.xlu0 %437  ;;  %v2023_v32 = vadd.f32 %v2022_v4, %v1933_v40 }
 0x249   : > { %v481_v20 = vmul.f32 %v4396_v33, %v438_v30  ;;  %v966_v34 = vsub.f32 1.5, %v965_v55 }
 0x24b   : > { %v5389_v62 = vsub.f32 %v6076_v52, %v481_v20  ;;  %v5392_v42 = vsub.f32 %v6077_v2, %v481_v20  ;;  %v967_v29 = vmul.f32 %v3941_v24, %v966_v34  ;;  %v6081_v20 = vld [vmem:[#allocation19_spill] sm:$0xff]  ;;  %v3943_v52 = vpop.eup %3942 }
 0x24c   : > { %v973_v37 = vmul.f32 %v3943_v52, %v5394_v61  ;;  %vm979_vm13 = vweird.f32 %v3943_v52 }
 0x24d   : > { %v606_v46 = vmul.f32 %v5389_v62, %v5389_v62  ;;  %v607_v60 = vmul.f32 %v5392_v42, %v5392_v42  ;;  %v971_v36 = vsel %vm970_vm12, %v3941_v24, %v967_v29  ;;  %vm980_vm15 = vmor %vm978_vm14, %vm979_vm13 }
 0x24e   : > { %v2111_v7 = vpop.f32.mrf.mxu2  ;;  %v2200_v43 = vpop.f32.mrf.mxu3  ;;  %v1130_v31 = vmul.f32 %v971_v36, %v6078_v11  ;;  %v1131_v57 = vmul.f32 %v971_v36, %v6079_v8  ;;  %v3636_v11 = vld [vmem:[#allocation8 + $0x278] sm:$0xf] }
 0x24f   : > { %v2201_v45 = vadd.f32 %v2200_v43, %v2111_v7  ;;  %v699_v44 = vadd.f32 %v607_v60, %v606_v46  ;;  %v1935_v3 = vpop.f32.mrf.mxu0  ;;  %v2024_v41 = vpop.f32.mrf.mxu1  ;;  %v3444_v7 = vld [vmem:[#allocation8 + $0xf8] sm:$0xf]  ;;  %v3736_v43 = vld [vmem:[#allocation8 + $0x10c] sm:$0xf0] }
 0x250   : > { %v441_v18 = vpop.xlane.xlu0 %440  ;;  %v1200_v14 = vmul.f32 %v4619_v10, %v1130_v31  ;;  %v1201_v26 = vmul.f32 %v4621_v17, %v1131_v57  ;;  %v2025_v46 = vadd.f32 %v2024_v41, %v1935_v3  ;;  %v3445_v57 = vor.u32 %v3736_v43, %v3444_v7 }
 0x251   : > { %v2996_v13 = vpack.c.bf16 %v2201_v45, %v2023_v32  ;;  %v482_v24 = vmul.f32 %v4396_v33, %v441_v18  ;;  %700 = vadd.xlane.f32.xlu1 %v699_v44  ;;  %v974_v32 = vmul.f32 %v3943_v52, %v973_v37  ;;  %v3784_v45 = vld [vmem:[#allocation8 + $0x28c] sm:$0xf0] }
 0x252   : > { %v1270_v49 = vadd.f32 %v4632_v21, %v1200_v14  ;;  %v1271_v55 = vadd.f32 %v4636_v9, %v1201_v26  ;;  %v3637_v18 = vor.u32 %v3784_v45, %v3636_v11  ;;  %2262 = vmatpush.bf16.msrb.mxu0 %v3445_v57 }
 0x253   : > { %3092 = vst [vmem:[%s5063_s2 + $0xc0] sm:$0xff] %v2996_v13  ;;  %v5414_v30 = vsub.f32 %v6080_v58, %v482_v24  ;;  %v5417_v0 = vsub.f32 %v6081_v20, %v482_v24  ;;  %v975_v31 = vmul.f32 0.5, %v974_v32 }
 0x254   : > { %v5419_v27 = vpack.c.bf16 %v1270_v49, %v1268_v12  ;;  %v5421_v34 = vpack.c.bf16 %v1271_v55, %v1269_v23  ;;  %2351 = vmatpush.bf16.msrb.mxu1 %v3637_v18 }
 0x255   : > { %v608_v40 = vmul.f32 %v5414_v30, %v5414_v30  ;;  %v609_v4 = vmul.f32 %v5417_v0, %v5417_v0  ;;  %v976_v13 = vsub.f32 1.5, %v975_v31  ;;  %v6083_v31 = vld [vmem:[#allocation21_spill] sm:$0xff] }
 0x256   : > { %6082 = vst [vmem:[#allocation38_spill] sm:$0xff] %v5421_v34  ;;  %v2113_v2 = vpop.f32.mrf.mxu2  ;;  %v2202_v29 = vpop.f32.mrf.mxu3  ;;  %1957 = vmatmul.bf16.gmra.mxu0 %v5419_v27  ;;  %2046 = vmatmul.bf16.gmra.mxu1 %v5421_v34 }
 0x257   : > { %v2203_v60 = vadd.f32 %v2202_v29, %v2113_v2  ;;  %2135 = vmatmul.bf16.gmra.mxu2 %v5419_v27  ;;  %2224 = vmatmul.bf16.gmra.mxu3 %v5421_v34  ;;  %v702_v16 = vadd.f32 %v609_v4, %v608_v40  ;;  %v977_v55 = vmul.f32 %v3943_v52, %v976_v13  ;;  %v6084_v13 = vld [vmem:[#allocation16_spill] sm:$0xff] }
 0x259   : > { %v2999_v36 = vpack.c.bf16 %v2203_v60, %v2025_v46  ;;  %703 = vadd.xlane.f32.xlu2 %v702_v16  ;;  %v981_v2 = vsel %vm980_vm15, %v3943_v52, %v977_v55 }
 0x25a   : > { %v1132_v52 = vmul.f32 %v981_v2, %v6083_v31 }
 0x25b   : > { %3095 = vst [vmem:[%s5063_s2 + $0xd8] sm:$0xff] %v2999_v36 }
 0x25e   : > { %v677_v8 = vpop.xlane.xlu1 %676 }
 0x25f   : > { %v729_v44 = vmul.f32 %v677_v8, %v4396_v33 }
 0x261   : > { %v761_v14 = vadd.f32 1e-05, %v729_v44 }
 0x262   : > { %v683_v24 = vpop.xlane.xlu2 %682 }
 0x263   : > { %v1938_v26 = vpop.f32.mrf.mxu0  ;;  %v2027_v12 = vpop.f32.mrf.mxu1  ;;  %3944 = vrsqrt.f32 %v761_v14  ;;  %v731_v23 = vmul.f32 %v683_v24, %v4396_v33  ;;  %v1133_v24 = vmul.f32 %v981_v2, %v6084_v13  ;;  %vm988_vm1 = vweird.f32 %v761_v14 }
 0x264   : > { %v2028_v37 = vadd.f32 %v2027_v12, %v1938_v26 }
 0x265   : > { %v5435_v49 = vadd.f32 1e-05, %v731_v23 }
 0x266   : > { %v680_v58 = vpop.xlane.xlu1 %679 }
 0x267   : > { %3946 = vrsqrt.f32 %v5435_v49  ;;  %v730_v20 = vmul.f32 %v680_v58, %v4396_v33  ;;  %vm1008_vm3 = vweird.f32 %v5435_v49 }
 0x269   : > { %v3945_v3 = vpop.eup %3944  ;;  %v5440_v41 = vadd.f32 1e-05, %v730_v20  ;;  %v1202_v20 = vmul.f32 %v4619_v10, %v1132_v52 }
 0x26a   : > { %v2116_v40 = vpop.f32.mrf.mxu2  ;;  %v983_v29 = vmul.f32 %v3945_v3, %v761_v14  ;;  %v686_v46 = vpop.xlane.xlu2 %685  ;;  %vm989_vm0 = vweird.f32 %v3945_v3 }
 0x26b   : > { %v5442_v4 = vpop.f32.mrf.mxu0  ;;  %v2205_v60 = vpop.f32.mrf.mxu3  ;;  %3948 = vrsqrt.f32 %v5440_v41  ;;  %v732_v16 = vmul.f32 %v686_v46, %v4396_v33  ;;  %vm990_vm2 = vmor %vm988_vm1, %vm989_vm0  ;;  %v1272_v34 = vadd.f32 %v4632_v21, %v1202_v20  ;;  %vm998_vm7 = vweird.f32 %v5440_v41 }
 0x26c   : > { %v689_v36 = vpop.xlane.xlu0 %688  ;;  %v2206_v32 = vadd.f32 %v2205_v60, %v2116_v40  ;;  %v5446_v61 = vpop.f32.mrf.mxu1  ;;  %v984_v7 = vmul.f32 %v3945_v3, %v983_v29 }
 0x26d   : > { %v733_v43 = vmul.f32 %v689_v36, %v4396_v33  ;;  %v5449_v11 = vpop.eup %3946  ;;  %v5452_v8 = vadd.f32 1e-05, %v732_v16 }
 0x26e   : > { %v3002_v57 = vpack.c.bf16 %v2206_v32, %v2028_v37  ;;  %v985_v45 = vmul.f32 0.5, %v984_v7  ;;  %v1003_v44 = vmul.f32 %v5449_v11, %v5435_v49  ;;  %v444_v18 = vpop.xlane.xlu1 %443  ;;  %v1203_v32 = vmul.f32 %v4621_v17, %v1133_v24  ;;  %v3727_v7 = vld [vmem:[#allocation8 + $0xcc] sm:$0xf] }
 0x26f   : > { %v5456_v26 = vadd.f32 1e-05, %v733_v43  ;;  %v483_v12 = vmul.f32 %v4396_v33, %v444_v18  ;;  %v3422_v43 = vld [vmem:[#allocation8 + $0xe0] sm:$0xf0]  ;;  %vm1009_vm4 = vweird.f32 %v5449_v11  ;;  %vm1018_vm9 = vweird.f32 %v5452_v8 }
 0x270   : > { %3098 = vst [vmem:[%s5063_s2 + $0xf0] sm:$0xff] %v3002_v57  ;;  %v986_v23 = vsub.f32 1.5, %v985_v45  ;;  %v1004_v55 = vmul.f32 %v5449_v11, %v1003_v44  ;;  %v3425_v45 = vor.u32 %v3727_v7, %v3422_v43  ;;  %v3775_v44 = vld [vmem:[#allocation8 + $0x24c] sm:$0xf]  ;;  %v3614_v18 = vld [vmem:[#allocation8 + $0x260] sm:$0xf0]  ;;  %v1273_v43 = vadd.f32 %v4636_v9, %v1203_v32  ;;  %vm1010_vm6 = vmor %vm1008_vm3, %vm1009_vm4 }
 0x271   : > { %3950 = vrsqrt.f32 %v5456_v26  ;;  %v5463_v58 = vpop.eup %3948  ;;  %v5468_v40 = vsub.f32 %v5266_v19, %v483_v12  ;;  %v5471_v2 = vsub.f32 %v5269_v6, %v483_v12  ;;  %vm1028_vm11 = vweird.f32 %v5456_v26 }
 0x272   : > { %3952 = vrsqrt.f32 %v5452_v8  ;;  %v2118_v29 = vpop.f32.mrf.mxu2  ;;  %v987_v60 = vmul.f32 %v3945_v3, %v986_v23  ;;  %v1005_v16 = vmul.f32 0.5, %v1004_v55  ;;  %v993_v37 = vmul.f32 %v5463_v58, %v5440_v41  ;;  %2441 = vmatpush.bf16.msrb.mxu2 %v3425_v45 }
 0x273   : > { %v5473_v46 = vpop.f32.mrf.mxu0  ;;  %v2207_v36 = vpop.f32.mrf.mxu3  ;;  %v610_v19 = vmul.f32 %v5468_v40, %v5468_v40  ;;  %v611_v6 = vmul.f32 %v5471_v2, %v5471_v2  ;;  %v3617_v23 = vor.u32 %v3775_v44, %v3614_v18  ;;  %vm999_vm5 = vweird.f32 %v5463_v58 }
 0x274   : > { %v5483_v31 = vpop.f32.mrf.mxu1  ;;  %v991_v14 = vsel %vm990_vm2, %v3945_v3, %v987_v60  ;;  %v1006_v52 = vsub.f32 1.5, %v1005_v16  ;;  %v994_v57 = vmul.f32 %v5463_v58, %v993_v37  ;;  %v695_v7 = vpop.xlane.xlu2 %694  ;;  %vm1000_vm8 = vmor %vm998_vm7, %vm999_vm5 }
 0x275   : > { %v1134_v13 = vmul.f32 %v991_v14, %v5109_v22  ;;  %v1135_v24 = vmul.f32 %v991_v14, %v5141_v54  ;;  %v705_v12 = vadd.f32 %v611_v6, %v610_v19  ;;  %2530 = vmatpush.bf16.msrb.mxu3 %v3617_v23  ;;  %v735_v41 = vmul.f32 %v695_v7, %v4396_v33 }
 0x276   : > { %v995_v3 = vmul.f32 0.5, %v994_v57  ;;  %v692_v60 = vpop.xlane.xlu1 %691  ;;  %v1007_v20 = vmul.f32 %v5449_v11, %v1006_v52 }
 0x277   : > { %v5488_v55 = vpop.eup %3950  ;;  %v1204_v37 = vmul.f32 %v4619_v10, %v1134_v13  ;;  %v1205_v22 = vmul.f32 %v4621_v17, %v1135_v24  ;;  %706 = vadd.xlane.f32.xlu0 %v705_v12  ;;  %v734_v6 = vmul.f32 %v692_v60, %v4396_v33  ;;  %v2208_v13 = vadd.f32 %v2207_v36, %v2118_v29  ;;  %v3420_v36 = vld [vmem:[#allocation8 + $0xc8] sm:$0xf] }
 0x278   : > { %v5493_v16 = vpop.eup %3952  ;;  %v1023_v54 = vmul.f32 %v5488_v55, %v5456_v26  ;;  %v996_v19 = vsub.f32 1.5, %v995_v3  ;;  %v1011_v60 = vsel %vm1010_vm6, %v5449_v11, %v1007_v20  ;;  %v2030_v29 = vadd.f32 %v5446_v61, %v5442_v4 }
 0x279   : > { %v1274_v14 = vadd.f32 %v4632_v21, %v1204_v37  ;;  %v1275_v57 = vadd.f32 %v4636_v9, %v1205_v22  ;;  %v1013_v18 = vmul.f32 %v5493_v16, %v5452_v8  ;;  %v5515_v32 = vadd.f32 1e-05, %v734_v6  ;;  %v3612_v22 = vld [vmem:[#allocation8 + $0x248] sm:$0xf] }
 0x27a   : > { %v2121_v52 = vpop.f32.mrf.mxu2  ;;  %v997_v44 = vmul.f32 %v5463_v58, %v996_v19  ;;  %v1024_v49 = vmul.f32 %v5488_v55, %v1023_v54  ;;  %v3778_v19 = vld [vmem:[#allocation8 + $0x25c] sm:$0xf0]  ;;  %v3005_v7 = vpack.c.bf16 %v2208_v13, %v2030_v29  ;;  %v1138_v4 = vmul.f32 %v1011_v60, %v5153_v51 }
 0x27b   : > { %v5510_v45 = vpop.f32.mrf.mxu0  ;;  %v2210_v24 = vpop.f32.mrf.mxu3  ;;  %v5517_v12 = vpack.c.bf16 %v1274_v14, %v1272_v34  ;;  %v5519_v23 = vpack.c.bf16 %v1275_v57, %v1273_v43  ;;  %3954 = vrsqrt.f32 %v5515_v32  ;;  %v3730_v34 = vld [vmem:[#allocation8 + $0xdc] sm:$0xf0]  ;;  %v1014_v6 = vmul.f32 %v5493_v16, %v1013_v18 }
 0x27c   : > { %v2034_v3 = vpop.f32.mrf.mxu1  ;;  %v1001_v37 = vsel %vm1000_vm8, %v5463_v58, %v997_v44  ;;  %v1025_v61 = vmul.f32 0.5, %v1024_v49  ;;  %v5537_v11 = vadd.f32 1e-05, %v735_v41  ;;  %v1139_v58 = vmul.f32 %v1011_v60, %v5173_v48  ;;  %3101 = vst [vmem:[%s5063_s2 + $0x108] sm:$0xff] %v3005_v7  ;;  %v3721_v60 = vld [vmem:[#allocation8 + $0x9c] sm:$0xf] }
 0x27d   : > { %1962 = vmatmul.bf16.gmra.mxu0 %v5517_v12  ;;  %v1136_v54 = vmul.f32 %v1001_v37, %v5199_v50  ;;  %2051 = vmatmul.bf16.gmra.mxu1 %v5519_v23  ;;  %v1137_v20 = vmul.f32 %v1001_v37, %v5202_v47  ;;  %v3421_v50 = vor.u32 %v3730_v34, %v3420_v36  ;;  %v1015_v44 = vmul.f32 0.5, %v1014_v6  ;;  %v3398_v34 = vld [vmem:[#allocation8 + $0xb0] sm:$0xf0]  ;;  %v3724_v6 = vld [vmem:[#allocation8 + $0xac] sm:$0xf0] }
 0x27e   : > { %2140 = vmatmul.bf16.gmra.mxu2 %v5517_v12  ;;  %2229 = vmatmul.bf16.gmra.mxu3 %v5519_v23  ;;  %v3613_v43 = vor.u32 %v3778_v19, %v3612_v22  ;;  %3956 = vrsqrt.f32 %v5537_v11  ;;  %v2211_v51 = vadd.f32 %v2210_v24, %v2121_v52  ;;  %v1026_v41 = vsub.f32 1.5, %v1025_v61  ;;  %v3769_v22 = vld [vmem:[#allocation8 + $0x21c] sm:$0xf]  ;;  %v3590_v52 = vld [vmem:[#allocation8 + $0x230] sm:$0xf0] }
 0x27f   : > { %v1206_v57 = vmul.f32 %v4619_v10, %v1136_v54  ;;  %2263 = vmatpush.bf16.msrb.mxu0 %v3421_v50  ;;  %v2033_v48 = vadd.f32 %v5483_v31, %v5473_v46  ;;  %v1208_v37 = vmul.f32 %v4619_v10, %v1138_v4  ;;  %v1209_v29 = vmul.f32 %v4621_v17, %v1139_v58  ;;  %v3396_v54 = vld [vmem:[#allocation8 + $0x98] sm:$0xf] }
 0x280   : > { %2352 = vmatpush.bf16.msrb.mxu1 %v3613_v43  ;;  %v1207_v36 = vmul.f32 %v4621_v17, %v1137_v20  ;;  %vm1019_vm10 = vweird.f32 %v5493_v16  ;;  %v1016_v31 = vsub.f32 1.5, %v1015_v44  ;;  %vm1029_vm12 = vweird.f32 %v5488_v55 }
 0x281   : > { %v5544_v49 = vpop.eup %3954  ;;  %v3008_v24 = vpack.c.bf16 %v2211_v51, %v2033_v48  ;;  %v1276_v46 = vadd.f32 %v4632_v21, %v1206_v57  ;;  %v2035_v7 = vadd.f32 %v2034_v3, %v5510_v45  ;;  %v3401_v61 = vor.u32 %v3721_v60, %v3398_v34  ;;  %v3588_v51 = vld [vmem:[#allocation8 + $0x218] sm:$0xf]  ;;  %v3772_v48 = vld [vmem:[#allocation8 + $0x22c] sm:$0xf0]  ;;  %vm5570_vm13 = vmor %vm1028_vm11, %vm1029_vm12 }
 0x282   : > { %v2123_v14 = vpop.f32.mrf.mxu2  ;;  %v1033_v19 = vmul.f32 %v5544_v49, %v5515_v32  ;;  %v3593_v58 = vor.u32 %v3769_v22, %v3590_v52  ;;  %v1278_v50 = vadd.f32 %v4632_v21, %v1208_v37  ;;  %v1279_v43 = vadd.f32 %v4636_v9, %v1209_v29  ;;  %vm1020_vm14 = vmor %vm1018_vm9, %vm1019_vm10 }
 0x283   : > { %v2212_v18 = vpop.f32.mrf.mxu3  ;;  %v1948_v13 = vpop.f32.mrf.mxu0  ;;  %3104 = vst [vmem:[%s5063_s2 + $0x120] sm:$0xff] %v3008_v24  ;;  %v1277_v57 = vadd.f32 %v4636_v9, %v1207_v36  ;;  %v1027_v44 = vmul.f32 %v5488_v55, %v1026_v41  ;;  %2442 = vmatpush.bf16.msrb.mxu2 %v3401_v61  ;;  %v3397_v60 = vor.u32 %v3724_v6, %v3396_v54  ;;  %vm1048_vm15 = vweird.f32 %v5537_v11 }
 0x284   : > { %v2037_v47 = vpop.f32.mrf.mxu1  ;;  %v2213_v4 = vadd.f32 %v2212_v18, %v2123_v14  ;;  %v5560_v20 = vpop.eup %3956  ;;  %2531 = vmatpush.bf16.msrb.mxu3 %v3593_v58  ;;  %v5576_v41 = vpack.c.bf16 %v1278_v50, %v1276_v46  ;;  %v1017_v37 = vmul.f32 %v5493_v16, %v1016_v31  ;;  %v1034_v29 = vmul.f32 %v5544_v49, %v1033_v19  ;;  %v3763_v58 = vld [vmem:[#allocation8 + $0x1ec] sm:$0xf]  ;;  %v3566_v50 = vld [vmem:[#allocation8 + $0x200] sm:$0xf0] }
 0x285   : > { %v1043_v3 = vmul.f32 %v5560_v20, %v5537_v11  ;;  %v2038_v36 = vadd.f32 %v2037_v47, %v1948_v13  ;;  %2264 = vmatpush.bf16.msrb.mxu0 %v3397_v60  ;;  %v3589_v52 = vor.u32 %v3772_v48, %v3588_v51  ;;  %v5586_v24 = vpack.c.bf16 %v1279_v43, %v1277_v57  ;;  %v3372_v43 = vld [vmem:[#allocation8 + $0x68] sm:$0xf]  ;;  %v3766_v48 = vld [vmem:[#allocation8 + $0x1fc] sm:$0xf0]  ;;  %v3709_v60 = vld [vmem:[#allocation8 + $0x3c] sm:$0xf] }
 0x286   : > { %v3011_v14 = vpack.c.bf16 %v2213_v4, %v2035_v7  ;;  %v1031_v46 = vsel %vm5570_vm13, %v5488_v55, %v1027_v44  ;;  %v1021_v8 = vsel %vm1020_vm14, %v5493_v16, %v1017_v37  ;;  %v1035_v19 = vmul.f32 0.5, %v1034_v29  ;;  %v3715_v55 = vld [vmem:[#allocation8 + $0x6c] sm:$0xf]  ;;  %v3374_v7 = vld [vmem:[#allocation8 + $0x80] sm:$0xf0] }
 0x287   : > { %v1044_v34 = vmul.f32 %v5560_v20, %v1043_v3  ;;  %2353 = vmatpush.bf16.msrb.mxu1 %v3589_v52  ;;  %v1142_v54 = vmul.f32 %v1031_v46, %v5228_v1  ;;  %v1143_v4 = vmul.f32 %v1031_v46, %v5235_v38  ;;  %v3377_v61 = vor.u32 %v3715_v55, %v3374_v7  ;;  %v3718_v44 = vld [vmem:[#allocation8 + $0x7c] sm:$0xf0]  ;;  %v3564_v51 = vld [vmem:[#allocation8 + $0x1e8] sm:$0xf]  ;;  %v3350_v37 = vld [vmem:[#allocation8 + $0x50] sm:$0xf0] }
 0x288   : > { %3107 = vst [vmem:[%s5063_s2 + $0x138] sm:$0xff] %v3011_v14  ;;  %v1140_v16 = vmul.f32 %v1021_v8, %v5211_v63  ;;  %v1141_v1 = vmul.f32 %v1021_v8, %v5214_v25  ;;  %v3569_v3 = vor.u32 %v3763_v58, %v3566_v50  ;;  %v3373_v14 = vor.u32 %v3718_v44, %v3372_v43  ;;  %v3757_v38 = vld [vmem:[#allocation8 + $0x1bc] sm:$0xf] }
 0x289   : > { %v1045_v6 = vmul.f32 0.5, %v1044_v34  ;;  %2443 = vmatpush.bf16.msrb.mxu2 %v3377_v61  ;;  %v1212_v29 = vmul.f32 %v4619_v10, %v1142_v54  ;;  %v3353_v25 = vor.u32 %v3709_v60, %v3350_v37  ;;  %v1036_v8 = vsub.f32 1.5, %v1035_v19  ;;  %v6088_v60 = vld [vmem:[#allocation45_spill] sm:$0xff] }
 0x28a   : > { %v2126_v18 = vpop.f32.mrf.mxu2  ;;  %2532 = vmatpush.bf16.msrb.mxu3 %v3569_v3  ;;  %v1210_v52 = vmul.f32 %v4619_v10, %v1140_v16  ;;  %2265 = vmatpush.bf16.msrb.mxu0 %v3373_v14  ;;  %vm1049_vm0 = vweird.f32 %v5560_v20  ;;  %vm1038_vm1 = vweird.f32 %v5515_v32  ;;  %vm1039_vm2 = vweird.f32 %v5544_v49 }
 0x28b   : > { %v2215_v26 = vpop.f32.mrf.mxu3  ;;  %v1950_v13 = vpop.f32.mrf.mxu0  ;;  %v1046_v63 = vsub.f32 1.5, %v1045_v6  ;;  %vm1050_vm3 = vmor %vm1048_vm15, %vm1049_vm0  ;;  %v1037_v58 = vmul.f32 %v5544_v49, %v1036_v8 }
 0x28c   : > { %v2216_v22 = vadd.f32 %v2215_v26, %v2126_v18  ;;  %v2039_v47 = vpop.f32.mrf.mxu1  ;;  %v3565_v18 = vor.u32 %v3766_v48, %v3564_v51  ;;  %v1213_v26 = vmul.f32 %v4621_v17, %v1143_v4  ;;  %v1280_v19 = vadd.f32 %v4632_v21, %v1210_v52  ;;  %vm1040_vm4 = vmor %vm1038_vm1, %vm1039_vm2  ;;  %v698_v52 = vpop.xlane.xlu0 %697 }
 0x28d   : > { %1967 = vmatmul.bf16.gmra.mxu0 %v5576_v41  ;;  %2056 = vmatmul.bf16.gmra.mxu1 %v5586_v24  ;;  %v2040_v34 = vadd.f32 %v2039_v47, %v1950_v13  ;;  %v1282_v13 = vadd.f32 %v4632_v21, %v1212_v29  ;;  %v1047_v7 = vmul.f32 %v5560_v20, %v1046_v63 }
 0x28e   : > { %v3014_v31 = vpack.c.bf16 %v2216_v22, %v2038_v36  ;;  %2145 = vmatmul.bf16.gmra.mxu2 %v5576_v41  ;;  %2234 = vmatmul.bf16.gmra.mxu3 %v5586_v24  ;;  %v3542_v36 = vld [vmem:[#allocation8 + $0x1d0] sm:$0xf0]  ;;  %v1283_v47 = vadd.f32 %v4636_v9, %v1213_v26  ;;  %v1041_v51 = vsel %vm1040_vm4, %v5544_v49, %v1037_v58 }
 0x28f   : > { %2354 = vmatpush.bf16.msrb.mxu1 %v3565_v18  ;;  %v3545_v46 = vor.u32 %v3757_v38, %v3542_v36  ;;  %2444 = vmatpush.bf16.msrb.mxu2 %v3353_v25  ;;  %v5618_v43 = vpack.c.bf16 %v1282_v13, %v1280_v19  ;;  %v1051_v44 = vsel %vm1050_vm3, %v5560_v20, %v1047_v7  ;;  %v6087_v20 = vld [vmem:[#allocation44_spill] sm:$0xff]  ;;  %v3712_v7 = vld [vmem:[#allocation8 + $0x4c] sm:$0xf0]  ;;  %v3540_v19 = vld [vmem:[#allocation8 + $0x1b8] sm:$0xf] }
 0x290   : > { %3110 = vst [vmem:[%s5063_s2 + $0x150] sm:$0xff] %v3014_v31  ;;  %v1211_v31 = vmul.f32 %v4621_v17, %v1141_v1  ;;  %v1146_v48 = vmul.f32 %v1051_v44, %v5302_v28  ;;  %v1147_v1 = vmul.f32 %v1051_v44, %v5305_v15  ;;  %v1144_v14 = vmul.f32 %v1041_v51, %v6087_v20 }
 0x291   : > { %2533 = vmatpush.bf16.msrb.mxu3 %v3545_v46  ;;  %v1145_v37 = vmul.f32 %v1041_v51, %v6088_v60  ;;  %v736_v8 = vmul.f32 %v698_v52, %v4396_v33 }
 0x292   : > { %v2128_v57 = vpop.f32.mrf.mxu2  ;;  %v1281_v61 = vadd.f32 %v4636_v9, %v1211_v31  ;;  %v1216_v38 = vmul.f32 %v4619_v10, %v1146_v48  ;;  %v1217_v28 = vmul.f32 %v4621_v17, %v1147_v1  ;;  %v1214_v26 = vmul.f32 %v4619_v10, %v1144_v14 }
 0x293   : > { %v2217_v45 = vpop.f32.mrf.mxu3  ;;  %v1953_v55 = vpop.f32.mrf.mxu0 }
 0x294   : > { %v2218_v22 = vadd.f32 %v2217_v45, %v2128_v57  ;;  %v2042_v6 = vpop.f32.mrf.mxu1  ;;  %v5620_v57 = vpack.c.bf16 %v1283_v47, %v1281_v61  ;;  %v1286_v15 = vadd.f32 %v4632_v21, %v1216_v38  ;;  %v1284_v25 = vadd.f32 %v4632_v21, %v1214_v26  ;;  %v3348_v47 = vld [vmem:[#allocation8 + $0x38] sm:$0xf]  ;;  %v3760_v61 = vld [vmem:[#allocation8 + $0x1cc] sm:$0xf0] }
 0x295   : > { %v2043_v32 = vadd.f32 %v2042_v6, %v1953_v55  ;;  %v768_v55 = vadd.f32 1e-05, %v736_v8 }
 0x296   : > { %v3017_v54 = vpack.c.bf16 %v2218_v22, %v2040_v34  ;;  %v1215_v34 = vmul.f32 %v4621_v17, %v1145_v37  ;;  %v1287_v22 = vadd.f32 %v4636_v9, %v1217_v28  ;;  %v5642_v31 = vpack.c.bf16 %v1286_v15, %v1284_v25 }
 0x297   : > { %3958 = vrsqrt.f32 %v768_v55  ;;  %vm1058_vm5 = vweird.f32 %v768_v55 }
 0x298   : > { %3113 = vst [vmem:[%s5063_s2 + $0x168] sm:$0xff] %v3017_v54  ;;  %v1285_v46 = vadd.f32 %v4636_v9, %v1215_v34 }
 0x29a   : > { %v2131_v4 = vpop.f32.mrf.mxu2  ;;  %v5645_v54 = vpack.c.bf16 %v1287_v22, %v1285_v46 }
 0x29b   : > { %v2220_v50 = vpop.f32.mrf.mxu3  ;;  %v1955_v45 = vpop.f32.mrf.mxu0 }
 0x29c   : > { %v2221_v16 = vadd.f32 %v2220_v50, %v2131_v4  ;;  %v2044_v3 = vpop.f32.mrf.mxu1  ;;  %v3349_v4 = vor.u32 %v3712_v7, %v3348_v47  ;;  %v3541_v50 = vor.u32 %v3760_v61, %v3540_v19 }
 0x29d   : > { %1972 = vmatmul.bf16.gmra.mxu0 %v5618_v43  ;;  %2061 = vmatmul.bf16.gmra.mxu1 %v5620_v57  ;;  %v2045_v29 = vadd.f32 %v2044_v3, %v1955_v45  ;;  %v3959_v6 = vpop.eup %3958 }
 0x29e   : > { %v3020_v11 = vpack.c.bf16 %v2221_v16, %v2043_v32  ;;  %2150 = vmatmul.bf16.gmra.mxu2 %v5618_v43  ;;  %2239 = vmatmul.bf16.gmra.mxu3 %v5620_v57  ;;  %v1053_v13 = vmul.f32 %v3959_v6, %v768_v55  ;;  %vm1059_vm6 = vweird.f32 %v3959_v6 }
 0x29f   : > { %2266 = vmatpush.bf16.msrb.mxu0 %v3349_v4  ;;  %2355 = vmatpush.bf16.msrb.mxu1 %v3541_v50  ;;  %vm1060_vm7 = vmor %vm1058_vm5, %vm1059_vm6 }
 0x2a0   : > { %3116 = vst [vmem:[%s5063_s2 + $0x180] sm:$0xff] %v3020_v11  ;;  %v1054_v58 = vmul.f32 %v3959_v6, %v1053_v13 }
 0x2a2   : > { %v2133_v18 = vpop.f32.mrf.mxu2  ;;  %v1055_v44 = vmul.f32 0.5, %v1054_v58 }
 0x2a3   : > { %v2222_v49 = vpop.f32.mrf.mxu3 }
 0x2a4   : > { %v2223_v36 = vadd.f32 %v2222_v49, %v2133_v18  ;;  %v1056_v51 = vsub.f32 1.5, %v1055_v44 }
 0x2a6   : > { %v3023_v63 = vpack.c.bf16 %v2223_v36, %v2045_v29  ;;  %v1057_v1 = vmul.f32 %v3959_v6, %v1056_v51 }
 0x2a8   : > { %3119 = vst [vmem:[%s5063_s2 + $0x198] sm:$0xff] %v3023_v63  ;;  %v1061_v20 = vsel %vm1060_vm7, %v3959_v6, %v1057_v1  ;;  %v3326_v1 = vld [vmem:[#allocation8 + $0x20] sm:$0xf0] }
 0x2a9   : > { %v1148_v60 = vmul.f32 %v1061_v20, %v5332_v59  ;;  %v1149_v49 = vmul.f32 %v1061_v20, %v5335_v5  ;;  %v3518_v20 = vld [vmem:[#allocation8 + $0x1a0] sm:$0xf0] }
 0x2ab   : > { %v1218_v26 = vmul.f32 %v4619_v10, %v1148_v60  ;;  %v1219_v34 = vmul.f32 %v4621_v17, %v1149_v49 }
 0x2ad   : > { %1977 = vmatmul.bf16.gmra.mxu0 %v5642_v31  ;;  %2066 = vmatmul.bf16.gmra.mxu1 %v5645_v54  ;;  %v1288_v6 = vadd.f32 %v4632_v21, %v1218_v26  ;;  %v1289_v47 = vadd.f32 %v4636_v9, %v1219_v34 }
 0x2ae   : > { %2155 = vmatmul.bf16.gmra.mxu2 %v5642_v31  ;;  %2244 = vmatmul.bf16.gmra.mxu3 %v5645_v54 }
 0x2c4   : > { %v701_v32 = vpop.xlane.xlu1 %700 }
 0x2c5   : > { %v737_v16 = vmul.f32 %v701_v32, %v4396_v33 }
 0x2c7   : > { %v769_v11 = vadd.f32 1e-05, %v737_v16 }
 0x2c9   : > { %3960 = vrsqrt.f32 %v769_v11  ;;  %vm1068_vm9 = vweird.f32 %v769_v11 }
 0x2cc   : > { %v704_v18 = vpop.xlane.xlu2 %703 }
 0x2cd   : > { %v738_v38 = vmul.f32 %v704_v18, %v4396_v33  ;;  %v3706_v18 = vld [vmem:[#allocation8 + $0x1c] sm:$0xf0] }
 0x2cf   : > { %v3961_v48 = vpop.eup %3960  ;;  %v770_v22 = vadd.f32 1e-05, %v738_v38  ;;  %v3516_v38 = vld [vmem:[#allocation8 + $0x188] sm:$0xf] }
 0x2d0   : > { %v1063_v45 = vmul.f32 %v3961_v48, %v769_v11  ;;  %vm1069_vm8 = vweird.f32 %v3961_v48 }
 0x2d1   : > { %vm1070_vm10 = vmor %vm1068_vm9, %vm1069_vm8  ;;  %3962 = vrsqrt.f32 %v770_v22  ;;  %vm1078_vm11 = vweird.f32 %v770_v22 }
 0x2d2   : > { %v1064_v3 = vmul.f32 %v3961_v48, %v1063_v45  ;;  %v3751_v45 = vld [vmem:[#allocation8 + $0x18c] sm:$0xf] }
 0x2d3   : > { %v1958_v29 = vpop.f32.mrf.mxu0  ;;  %v2047_v36 = vpop.f32.mrf.mxu1 }
 0x2d4   : > { %v1065_v14 = vmul.f32 0.5, %v1064_v3  ;;  %v2048_v25 = vadd.f32 %v2047_v36, %v1958_v29  ;;  %v3754_v29 = vld [vmem:[#allocation8 + $0x19c] sm:$0xf0] }
 0x2d6   : > { %v1066_v37 = vsub.f32 1.5, %v1065_v14  ;;  %v3324_v14 = vld [vmem:[#allocation8 + $0x8] sm:$0xf] }
 0x2d7   : > { %v3963_v44 = vpop.eup %3962  ;;  %v3325_v49 = vor.u32 %v3706_v18, %v3324_v14 }
 0x2d8   : > { %v1067_v28 = vmul.f32 %v3961_v48, %v1066_v37  ;;  %v1073_v51 = vmul.f32 %v3963_v44, %v770_v22  ;;  %v3521_v37 = vor.u32 %v3751_v45, %v3518_v20  ;;  %vm1079_vm12 = vweird.f32 %v3963_v44  ;;  %v3794_v22 = vld [vmem:[#allocation8 + $0x2e4] sm:$0xf]  ;;  %v3692_v45 = vld [vmem:[#allocation8 + $0x2e0] sm:$0xf] }
 0x2d9   : > { %2267 = vmatpush.bf16.msrb.mxu0 %v3325_v49  ;;  %vm1080_vm13 = vmor %vm1078_vm11, %vm1079_vm12 }
 0x2da   : > { %v1071_v63 = vsel %vm1070_vm10, %v3961_v48, %v1067_v28  ;;  %v2136_v52 = vpop.f32.mrf.mxu2  ;;  %v2225_v5 = vpop.f32.mrf.mxu3  ;;  %v3703_v48 = vld [vmem:[#allocation8 + $0xc] sm:$0xf]  ;;  %v1074_v60 = vmul.f32 %v3963_v44, %v1073_v51  ;;  %v3517_v28 = vor.u32 %v3754_v29, %v3516_v38  ;;  %2534 = vmatpush.bf16.msrb.mxu3 %v3521_v37 }
 0x2db   : > { %v1150_v15 = vmul.f32 %v1071_v63, %v5389_v62  ;;  %v1151_v59 = vmul.f32 %v1071_v63, %v5392_v42  ;;  %v2226_v46 = vadd.f32 %v2225_v5, %v2136_v52  ;;  %v1960_v4 = vpop.f32.mrf.mxu0  ;;  %v2049_v61 = vpop.f32.mrf.mxu1  ;;  %v3329_v3 = vor.u32 %v3703_v48, %v3326_v1 }
 0x2dc   : > { %v2050_v32 = vadd.f32 %v2049_v61, %v1960_v4  ;;  %2356 = vmatpush.bf16.msrb.mxu1 %v3517_v28  ;;  %v1075_v63 = vmul.f32 0.5, %v1074_v60  ;;  %v3502_v4 = vld [vmem:[#allocation8 + $0x178] sm:$0xf0] }
 0x2dd   : > { %v1220_v8 = vmul.f32 %v4619_v10, %v1150_v15  ;;  %v1221_v55 = vmul.f32 %v4621_v17, %v1151_v59  ;;  %v3026_v13 = vpack.c.bf16 %v2226_v46, %v2048_v25  ;;  %2445 = vmatpush.bf16.msrb.mxu2 %v3329_v3  ;;  %v3797_v3 = vld [vmem:[#allocation8 + $0x2f4] sm:$0xf0] }
 0x2de   : > { %v1076_v15 = vsub.f32 1.5, %v1075_v63  ;;  %v3693_v60 = vor.u32 %v3797_v3, %v3692_v45  ;;  %v3668_v45 = vld [vmem:[#allocation8 + $0x2b0] sm:$0xf]  ;;  %v3791_v3 = vld [vmem:[#allocation8 + $0x2c4] sm:$0xf0] }
 0x2df   : > { %v1290_v7 = vadd.f32 %v4632_v21, %v1220_v8  ;;  %v1291_v62 = vadd.f32 %v4636_v9, %v1221_v55  ;;  %3122 = vst [vmem:[%s5063_s2 + $0x1b0] sm:$0xff] %v3026_v13 }
 0x2e0   : > { %v1077_v52 = vmul.f32 %v3963_v44, %v1076_v15  ;;  %2705 = vmatpush.bf16.msra.mxu1 %v3693_v60 }
 0x2e1   : > { %v5666_v42 = vpack.c.bf16 %v1290_v7, %v1288_v6  ;;  %v5668_v19 = vpack.c.bf16 %v1291_v62, %v1289_v47  ;;  %v3746_v62 = vld [vmem:[#allocation8 + $0x164] sm:$0xf] }
 0x2e2   : > { %v2138_v58 = vpop.f32.mrf.mxu2  ;;  %v2227_v50 = vpop.f32.mrf.mxu3  ;;  %v1081_v46 = vsel %vm1080_vm13, %v3963_v44, %v1077_v52  ;;  %v3500_v44 = vld [vmem:[#allocation8 + $0x160] sm:$0xf] }
 0x2e3   : > { %1982 = vmatmul.bf16.gmra.mxu0 %v5666_v42  ;;  %2071 = vmatmul.bf16.gmra.mxu1 %v5668_v19  ;;  %v2228_v16 = vadd.f32 %v2227_v50, %v2138_v58  ;;  %v1153_v13 = vmul.f32 %v1081_v46, %v5417_v0 }
 0x2e4   : > { %2160 = vmatmul.bf16.gmra.mxu2 %v5666_v42  ;;  %2249 = vmatmul.bf16.gmra.mxu3 %v5668_v19 }
 0x2e5   : > { %v3029_v11 = vpack.c.bf16 %v2228_v16, %v2050_v32  ;;  %v1223_v58 = vmul.f32 %v4621_v17, %v1153_v13  ;;  %v3505_v32 = vor.u32 %v3746_v62, %v3502_v4  ;;  %v3694_v16 = vld [vmem:[#allocation8 + $0x2f8] sm:$0xf0] }
 0x2e6   : > { %v3697_v48 = vor.u32 %v3794_v22, %v3694_v16  ;;  %v3478_v16 = vld [vmem:[#allocation8 + $0x148] sm:$0xf0] }
 0x2e7   : > { %3125 = vst [vmem:[%s5063_s2 + $0x1c8] sm:$0xff] %v3029_v11  ;;  %v3749_v11 = vld [vmem:[#allocation8 + $0x174] sm:$0xf0]  ;;  %2794 = vmatpush.bf16.msra.mxu2 %v3505_v32  ;;  %v3740_v32 = vld [vmem:[#allocation8 + $0x134] sm:$0xf] }
 0x2e8   : > { %v3501_v1 = vor.u32 %v3749_v11, %v3500_v44  ;;  %2883 = vmatpush.bf16.msra.mxu3 %v3697_v48  ;;  %v3481_v44 = vor.u32 %v3740_v32, %v3478_v16  ;;  %v3788_v11 = vld [vmem:[#allocation8 + $0x2b4] sm:$0xf]  ;;  %v3646_v32 = vld [vmem:[#allocation8 + $0x298] sm:$0xf0]  ;;  %v3452_v16 = vld [vmem:[#allocation8 + $0x100] sm:$0xf] }
 0x2ea   : > { %v707_v36 = vpop.xlane.xlu0 %706  ;;  %2616 = vmatpush.bf16.msra.mxu0 %v3501_v1  ;;  %v3743_v1 = vld [vmem:[#allocation8 + $0x144] sm:$0xf0] }
 0x2eb   : > { %v739_v26 = vmul.f32 %v707_v36, %v4396_v33  ;;  %v1152_v33 = vmul.f32 %v1081_v46, %v5414_v30  ;;  %2795 = vmatpush.bf16.msra.mxu2 %v3481_v44  ;;  %v3737_v44 = vld [vmem:[#allocation8 + $0x114] sm:$0xf0] }
 0x2ed   : > { %v771_v34 = vadd.f32 1e-05, %v739_v26  ;;  %v1222_v61 = vmul.f32 %v4619_v10, %v1152_v33 }
 0x2ef   : > { %3964 = vrsqrt.f32 %v771_v34  ;;  %vm1088_vm15 = vweird.f32 %v771_v34 }
 0x2f5   : > { %v3965_v59 = vpop.eup %3964 }
 0x2f6   : > { %v1083_v5 = vmul.f32 %v3965_v59, %v771_v34  ;;  %vm1089_vm14 = vweird.f32 %v3965_v59 }
 0x2f7   : > { %vm1090_vm0 = vmor %vm1088_vm15, %vm1089_vm14 }
 0x2f8   : > { %v1084_v25 = vmul.f32 %v3965_v59, %v1083_v5 }
 0x2fa   : > { %v1085_v8 = vmul.f32 0.5, %v1084_v25  ;;  %v1963_v55 = vpop.f32.mrf.mxu0  ;;  %v2052_v6 = vpop.f32.mrf.mxu1 }
 0x2fb   : > { %v2053_v20 = vadd.f32 %v2052_v6, %v1963_v55 }
 0x2fc   : > { %v1086_v47 = vsub.f32 1.5, %v1085_v8 }
 0x2fe   : > { %v1087_v7 = vmul.f32 %v3965_v59, %v1086_v47  ;;  %v6089_v47 = vld [vmem:[#allocation24_spill] sm:$0xff] }
 0x300   : > { %v1091_v50 = vsel %vm1090_vm0, %v3965_v59, %v1087_v7  ;;  %v6090_v7 = vld [vmem:[#allocation25_spill] sm:$0xff] }
 0x301   : > { %v1154_v30 = vmul.f32 %v1091_v50, %v5468_v40  ;;  %v1155_v0 = vmul.f32 %v1091_v50, %v5471_v2  ;;  %v2141_v51 = vpop.f32.mrf.mxu2  ;;  %v2230_v14 = vpop.f32.mrf.mxu3  ;;  %v1292_v40 = vadd.f32 %v4632_v21, %v1222_v61  ;;  %v1293_v2 = vadd.f32 %v4636_v9, %v1223_v58 }
 0x302   : > { %v1965_v18 = vpop.f32.mrf.mxu0  ;;  %v2231_v38 = vadd.f32 %v2230_v14, %v2141_v51  ;;  %v2054_v29 = vpop.f32.mrf.mxu1 }
 0x303   : > { %v1224_v37 = vmul.f32 %v4619_v10, %v1154_v30  ;;  %v1225_v49 = vmul.f32 %v4621_v17, %v1155_v0  ;;  %v3670_v30 = vld [vmem:[#allocation8 + $0x2c8] sm:$0xf0]  ;;  %v3476_v0 = vld [vmem:[#allocation8 + $0x130] sm:$0xf] }
 0x304   : > { %v3032_v26 = vpack.c.bf16 %v2231_v38, %v2053_v20  ;;  %v3673_v48 = vor.u32 %v3788_v11, %v3670_v30  ;;  %v3477_v14 = vor.u32 %v3743_v1, %v3476_v0  ;;  %v3453_v30 = vor.u32 %v3737_v44, %v3452_v16  ;;  %v3644_v0 = vld [vmem:[#allocation8 + $0x280] sm:$0xf]  ;;  %v3722_v44 = vld [vmem:[#allocation8 + $0xa4] sm:$0xf] }
 0x305   : > { %v1294_v36 = vadd.f32 %v4632_v21, %v1224_v37  ;;  %v1295_v28 = vadd.f32 %v4636_v9, %v1225_v49  ;;  %v2055_v9 = vadd.f32 %v2054_v29, %v1965_v18  ;;  %v3669_v18 = vor.u32 %v3791_v3, %v3668_v45  ;;  %v6095_v45 = vld [vmem:[#allocation36_spill] sm:$0xff]  ;;  %v6096_v3 = vld [vmem:[#allocation37_spill] sm:$0xff]  ;;  %v6102_v16 = vld [vmem:[#allocation43_spill] sm:$0xff] }
 0x306   : > { %3128 = vst [vmem:[%s5063_s2 + $0x1e0] sm:$0xff] %v3032_v26  ;;  %2884 = vmatpush.bf16.msra.mxu3 %v3673_v48  ;;  %2617 = vmatpush.bf16.msra.mxu0 %v3477_v14  ;;  %v6098_v14 = vld [vmem:[#allocation22_spill] sm:$0xff] }
 0x307   : > { %v5688_v63 = vpack.c.bf16 %v1294_v36, %v1292_v40  ;;  %v5690_v10 = vpack.c.bf16 %v1295_v28, %v1293_v2  ;;  %2706 = vmatpush.bf16.msra.mxu1 %v3669_v18  ;;  %v6091_v2 = vld [vmem:[#allocation26_spill] sm:$0xff]  ;;  %v6092_v36 = vld [vmem:[#allocation27_spill] sm:$0xff]  ;;  %v3728_v18 = vld [vmem:[#allocation8 + $0xd4] sm:$0xf] }
 0x309   : > { %v2143_v17 = vpop.f32.mrf.mxu2  ;;  %1987 = vmatmul.bf16.gmra.mxu0 %v5688_v63  ;;  %2076 = vmatmul.bf16.gmra.mxu1 %v5690_v10  ;;  %v2232_v34 = vpop.f32.mrf.mxu3 }
 0x30a   : > { %2165 = vmatmul.bf16.gmra.mxu2 %v5688_v63  ;;  %2254 = vmatmul.bf16.gmra.mxu3 %v5690_v10  ;;  %v1968_v21 = vpop.f32.mrf.mxu0  ;;  %v2233_v15 = vadd.f32 %v2232_v34, %v2143_v17  ;;  %v2057_v59 = vpop.f32.mrf.mxu1 }
 0x30b   : > { %v2058_v8 = vadd.f32 %v2057_v59, %v1968_v21  ;;  %2618 = vmatpush.bf16.msra.mxu0 %v3453_v30  ;;  %v3770_v30 = vld [vmem:[#allocation8 + $0x224] sm:$0xf] }
 0x30c   : > { %v3035_v52 = vpack.c.bf16 %v2233_v15, %v2055_v9 }
 0x30e   : > { %3131 = vst [vmem:[%s5063_s2 + $0x1f8] sm:$0xff] %v3035_v52 }
 0x311   : > { %v2146_v5 = vpop.f32.mrf.mxu2  ;;  %v2235_v25 = vpop.f32.mrf.mxu3 }
 0x312   : > { %v1970_v46 = vpop.f32.mrf.mxu0  ;;  %v2236_v55 = vadd.f32 %v2235_v25, %v2146_v5  ;;  %v2059_v6 = vpop.f32.mrf.mxu1 }
 0x313   : > { %v2060_v22 = vadd.f32 %v2059_v6, %v1970_v46  ;;  %v6093_v6 = vld [vmem:[#allocation32_spill] sm:$0xff] }
 0x314   : > { %v3038_v33 = vpack.c.bf16 %v2236_v55, %v2058_v8 }
 0x316   : > { %3134 = vst [vmem:[%s5063_s2 + $0x210] sm:$0xff] %v3038_v33  ;;  %v6094_v33 = vld [vmem:[#allocation33_spill] sm:$0xff] }
 0x319   : > { %v2148_v13 = vpop.f32.mrf.mxu2  ;;  %2268 = vmatmul.bf16.vlgmr.msrb.gmra.mxu0 %v6089_v47  ;;  %2357 = vmatmul.bf16.vlgmr.msrb.gmra.mxu1 %v6090_v7  ;;  %v2237_v62 = vpop.f32.mrf.mxu3 }
 0x31a   : > { %2446 = vmatmul.bf16.vlgmr.msrb.gmra.mxu2 %v6089_v47  ;;  %2535 = vmatmul.bf16.vlgmr.msrb.gmra.mxu3 %v6090_v7  ;;  %v1973_v4 = vpop.f32.mrf.mxu0  ;;  %v2238_v61 = vadd.f32 %v2237_v62, %v2148_v13  ;;  %v2062_v58 = vpop.f32.mrf.mxu1  ;;  %v3734_v62 = vld [vmem:[#allocation8 + $0x104] sm:$0xf] }
 0x31b   : > { %v2063_v60 = vadd.f32 %v2062_v58, %v1973_v4  ;;  %v3454_v4 = vld [vmem:[#allocation8 + $0x118] sm:$0xf0] }
 0x31c   : > { %v3041_v50 = vpack.c.bf16 %v2238_v61, %v2060_v22  ;;  %v3782_v22 = vld [vmem:[#allocation8 + $0x284] sm:$0xf] }
 0x31d   : > { %v3649_v11 = vor.u32 %v3782_v22, %v3646_v32  ;;  %v6101_v32 = vld [vmem:[#allocation42_spill] sm:$0xff] }
 0x31e   : > { %3137 = vst [vmem:[%s5063_s2 + $0x228] sm:$0xff] %v3041_v50  ;;  %v3457_v50 = vor.u32 %v3734_v62, %v3454_v4 }
 0x31f   : > { %2885 = vmatpush.bf16.msra.mxu3 %v3649_v11  ;;  %v3406_v11 = vld [vmem:[#allocation8 + $0xb8] sm:$0xf0] }
 0x320   : > { %2796 = vmatpush.bf16.msra.mxu2 %v3457_v50 }
 0x321   : > { %v2151_v51 = vpop.f32.mrf.mxu2  ;;  %v2240_v20 = vpop.f32.mrf.mxu3 }
 0x322   : > { %v2241_v37 = vadd.f32 %v2240_v20, %v2151_v51  ;;  %v1975_v49 = vpop.f32.mrf.mxu0  ;;  %v2064_v38 = vpop.f32.mrf.mxu1  ;;  %v3785_v51 = vld [vmem:[#allocation8 + $0x294] sm:$0xf0]  ;;  %v6097_v20 = vld [vmem:[#allocation17_spill] sm:$0xff] }
 0x323   : > { %v2065_v26 = vadd.f32 %v2064_v38, %v1975_v49  ;;  %v3645_v1 = vor.u32 %v3785_v51, %v3644_v0  ;;  %v3622_v38 = vld [vmem:[#allocation8 + $0x268] sm:$0xf0]  ;;  %v3409_v0 = vor.u32 %v3722_v44, %v3406_v11  ;;  %v3598_v51 = vld [vmem:[#allocation8 + $0x238] sm:$0xf0] }
 0x324   : > { %v3044_v29 = vpack.c.bf16 %v2241_v37, %v2063_v60  ;;  %v3430_v60 = vld [vmem:[#allocation8 + $0xe8] sm:$0xf0]  ;;  %v3776_v37 = vld [vmem:[#allocation8 + $0x254] sm:$0xf] }
 0x325   : > { %2707 = vmatpush.bf16.msra.mxu1 %v3645_v1  ;;  %v3433_v49 = vor.u32 %v3728_v18, %v3430_v60  ;;  %v3404_v1 = vld [vmem:[#allocation8 + $0xa0] sm:$0xf]  ;;  %v3725_v18 = vld [vmem:[#allocation8 + $0xb4] sm:$0xf0] }
 0x326   : > { %3140 = vst [vmem:[%s5063_s2 + $0x240] sm:$0xff] %v3044_v29  ;;  %v3428_v29 = vld [vmem:[#allocation8 + $0xd0] sm:$0xf]  ;;  %v3596_v60 = vld [vmem:[#allocation8 + $0x220] sm:$0xf] }
 0x327   : > { %2797 = vmatpush.bf16.msra.mxu2 %v3433_v49  ;;  %v3773_v49 = vld [vmem:[#allocation8 + $0x234] sm:$0xf0] }
 0x329   : > { %v2153_v40 = vpop.f32.mrf.mxu2  ;;  %2273 = vmatmul.bf16.gmra.mxu0 %v6091_v2  ;;  %2362 = vmatmul.bf16.gmra.mxu1 %v6092_v36  ;;  %v2242_v28 = vpop.f32.mrf.mxu3 }
 0x32a   : > { %2451 = vmatmul.bf16.gmra.mxu2 %v6091_v2  ;;  %2540 = vmatmul.bf16.gmra.mxu3 %v6092_v36  ;;  %v2243_v17 = vadd.f32 %v2242_v28, %v2153_v40  ;;  %v1978_v21 = vpop.f32.mrf.mxu0  ;;  %v2067_v9 = vpop.f32.mrf.mxu1  ;;  %v3731_v40 = vld [vmem:[#allocation8 + $0xe4] sm:$0xf0]  ;;  %v3625_v28 = vor.u32 %v3776_v37, %v3622_v38  ;;  %v3405_v37 = vor.u32 %v3725_v18, %v3404_v1 }
 0x32b   : > { %v2068_v52 = vadd.f32 %v2067_v9, %v1978_v21  ;;  %2798 = vmatpush.bf16.msra.mxu2 %v3409_v0  ;;  %v3597_v38 = vor.u32 %v3773_v49, %v3596_v60  ;;  %v3380_v60 = vld [vmem:[#allocation8 + $0x70] sm:$0xf] }
 0x32c   : > { %v3047_v34 = vpack.c.bf16 %v2243_v17, %v2065_v26  ;;  %v3429_v26 = vor.u32 %v3731_v40, %v3428_v29  ;;  %v3620_v17 = vld [vmem:[#allocation8 + $0x250] sm:$0xf]  ;;  %2886 = vmatpush.bf16.msra.mxu3 %v3625_v28 }
 0x32e   : > { %3143 = vst [vmem:[%s5063_s2 + $0x258] sm:$0xff] %v3047_v34  ;;  %v3779_v34 = vld [vmem:[#allocation8 + $0x264] sm:$0xf0]  ;;  %2619 = vmatpush.bf16.msra.mxu0 %v3429_v26 }
 0x32f   : > { %v3621_v21 = vor.u32 %v3779_v34, %v3620_v17 }
 0x331   : > { %v2156_v15 = vpop.f32.mrf.mxu2  ;;  %v2245_v59 = vpop.f32.mrf.mxu3  ;;  %2708 = vmatpush.bf16.msra.mxu1 %v3621_v21 }
 0x332   : > { %v2246_v5 = vadd.f32 %v2245_v59, %v2156_v15  ;;  %v1980_v46 = vpop.f32.mrf.mxu0  ;;  %v2069_v8 = vpop.f32.mrf.mxu1  ;;  %2620 = vmatpush.bf16.msra.mxu0 %v3405_v37  ;;  %v3719_v37 = vld [vmem:[#allocation8 + $0x84] sm:$0xf0] }
 0x333   : > { %v2070_v61 = vadd.f32 %v2069_v8, %v1980_v46  ;;  %v6099_v8 = vld [vmem:[#allocation40_spill] sm:$0xff]  ;;  %v3381_v49 = vor.u32 %v3719_v37, %v3380_v60 }
 0x334   : > { %v3050_v25 = vpack.c.bf16 %v2246_v5, %v2068_v52 }
 0x335   : > { %2709 = vmatpush.bf16.msra.mxu1 %v3597_v38  ;;  %v3572_v38 = vld [vmem:[#allocation8 + $0x1f0] sm:$0xf] }
 0x336   : > { %3146 = vst [vmem:[%s5063_s2 + $0x270] sm:$0xff] %v3050_v25  ;;  %2621 = vmatpush.bf16.msra.mxu0 %v3381_v49 }
 0x339   : > { %v2158_v55 = vpop.f32.mrf.mxu2  ;;  %2278 = vmatmul.bf16.gmra.mxu0 %v6093_v6  ;;  %2367 = vmatmul.bf16.gmra.mxu1 %v6094_v33  ;;  %v2247_v13 = vpop.f32.mrf.mxu3 }
 0x33a   : > { %2456 = vmatmul.bf16.gmra.mxu2 %v6093_v6  ;;  %2545 = vmatmul.bf16.gmra.mxu3 %v6094_v33  ;;  %v2248_v58 = vadd.f32 %v2247_v13, %v2158_v55  ;;  %v6100_v55 = vld [vmem:[#allocation41_spill] sm:$0xff] }
 0x33c   : > { %v3053_v48 = vpack.c.bf16 %v2248_v58, %v2070_v61 }
 0x33e   : > { %3149 = vst [vmem:[%s5063_s2 + $0x288] sm:$0xff] %v3053_v48  ;;  %v3601_v48 = vor.u32 %v3770_v30, %v3598_v51 }
 0x340   : > { %2887 = vmatpush.bf16.msra.mxu3 %v3601_v48 }
 0x349   : > { %2283 = vmatmul.bf16.gmra.mxu0 %v6095_v45  ;;  %2372 = vmatmul.bf16.gmra.mxu1 %v6096_v3 }
 0x34a   : > { %2461 = vmatmul.bf16.gmra.mxu2 %v6095_v45  ;;  %2550 = vmatmul.bf16.gmra.mxu3 %v6096_v3 }
 0x359   : > { %2288 = vmatmul.bf16.gmra.mxu0 %v6097_v20  ;;  %2377 = vmatmul.bf16.gmra.mxu1 %v6098_v14 }
 0x35a   : > { %2466 = vmatmul.bf16.gmra.mxu2 %v6097_v20  ;;  %2555 = vmatmul.bf16.gmra.mxu3 %v6098_v14 }
 0x360   : > { %v1983_v9 = vpop.f32.mrf.mxu0  ;;  %v2072_v15 = vpop.f32.mrf.mxu1 }
 0x361   : > { %v2073_v5 = vadd.f32 %v2072_v15, %v1983_v9 }
 0x367   : > { %v2161_v59 = vpop.f32.mrf.mxu2  ;;  %v2250_v52 = vpop.f32.mrf.mxu3 }
 0x368   : > { %v2251_v25 = vadd.f32 %v2250_v52, %v2161_v59  ;;  %v1985_v13 = vpop.f32.mrf.mxu0  ;;  %v2074_v62 = vpop.f32.mrf.mxu1 }
 0x369   : > { %2293 = vmatmul.bf16.gmra.mxu0 %v6099_v8  ;;  %2382 = vmatmul.bf16.gmra.mxu1 %v6100_v55  ;;  %v2075_v61 = vadd.f32 %v2074_v62, %v1985_v13 }
 0x36a   : > { %v3056_v46 = vpack.c.bf16 %v2251_v25, %v2073_v5  ;;  %2471 = vmatmul.bf16.gmra.mxu2 %v6099_v8  ;;  %2560 = vmatmul.bf16.gmra.mxu3 %v6100_v55 }
 0x36c   : > { %3152 = vst [vmem:[%s5063_s2 + $0x2a0] sm:$0xff] %v3056_v46 }
 0x36f   : > { %v2163_v4 = vpop.f32.mrf.mxu2  ;;  %v2252_v22 = vpop.f32.mrf.mxu3 }
 0x370   : > { %v2253_v58 = vadd.f32 %v2252_v22, %v2163_v4  ;;  %v3716_v4 = vld [vmem:[#allocation8 + $0x74] sm:$0xf]  ;;  %v3382_v22 = vld [vmem:[#allocation8 + $0x88] sm:$0xf0] }
 0x372   : > { %v3059_v50 = vpack.c.bf16 %v2253_v58, %v2075_v61  ;;  %v3385_v61 = vor.u32 %v3716_v4, %v3382_v22  ;;  %v3764_v58 = vld [vmem:[#allocation8 + $0x1f4] sm:$0xf] }
 0x374   : > { %3155 = vst [vmem:[%s5063_s2 + $0x2b8] sm:$0xff] %v3059_v50  ;;  %v3574_v50 = vld [vmem:[#allocation8 + $0x208] sm:$0xf0]  ;;  %2799 = vmatpush.bf16.msra.mxu2 %v3385_v61 }
 0x375   : > { %v3577_v44 = vor.u32 %v3764_v58, %v3574_v50 }
 0x377   : > { %2888 = vmatpush.bf16.msra.mxu3 %v3577_v44 }
 0x379   : > { %2298 = vmatmul.bf16.gmra.mxu0 %v6101_v32  ;;  %2387 = vmatmul.bf16.gmra.mxu1 %v6102_v16 }
 0x37a   : > { %2476 = vmatmul.bf16.gmra.mxu2 %v6101_v32  ;;  %2565 = vmatmul.bf16.gmra.mxu3 %v6102_v16 }
 0x386   : > { %v1988_v29 = vpop.f32.mrf.mxu0  ;;  %v2077_v40 = vpop.f32.mrf.mxu1 }
 0x387   : > { %v2078_v17 = vadd.f32 %v2077_v40, %v1988_v29  ;;  %v3767_v29 = vld [vmem:[#allocation8 + $0x204] sm:$0xf0] }
 0x388   : > { %v3573_v40 = vor.u32 %v3767_v29, %v3572_v38 }
 0x389   : > { %2303 = vmatmul.bf16.gmra.mxu0 %v5339_v35  ;;  %2392 = vmatmul.bf16.gmra.mxu1 %v5343_v53 }
 0x38a   : > { %2481 = vmatmul.bf16.gmra.mxu2 %v5339_v35  ;;  %2570 = vmatmul.bf16.gmra.mxu3 %v5343_v53 }
 0x38b   : > { %2710 = vmatpush.bf16.msra.mxu1 %v3573_v40 }
 0x38d   : > { %v2166_v28 = vpop.f32.mrf.mxu2  ;;  %v2255_v26 = vpop.f32.mrf.mxu3 }
 0x38e   : > { %v2256_v34 = vadd.f32 %v2255_v26, %v2166_v28  ;;  %v1990_v21 = vpop.f32.mrf.mxu0  ;;  %v2079_v9 = vpop.f32.mrf.mxu1 }
 0x38f   : > { %v2080_v5 = vadd.f32 %v2079_v9, %v1990_v21 }
 0x390   : > { %v3062_v15 = vpack.c.bf16 %v2256_v34, %v2078_v17 }
 0x392   : > { %3158 = vst [vmem:[%s5063_s2 + $0x2d0] sm:$0xff] %v3062_v15 }
 0x395   : > { %v2168_v59 = vpop.f32.mrf.mxu2  ;;  %v2257_v52 = vpop.f32.mrf.mxu3 }
 0x396   : > { %v2258_v25 = vadd.f32 %v2257_v52, %v2168_v59  ;;  %v2269_v46 = vpop.f32.mrf.mxu0  ;;  %v2358_v13 = vpop.f32.mrf.mxu1  ;;  %v6103_v59 = vld [vmem:[#allocation38_spill] sm:$0xff] }
 0x397   : > { %v2359_v0 = vadd.f32 %v2358_v13, %v2269_v46 }
 0x398   : > { %v3065_v62 = vpack.c.bf16 %v2258_v25, %v2080_v5 }
 0x399   : > { %2308 = vmatmul.bf16.gmra.mxu0 %v5373_v56  ;;  %2397 = vmatmul.bf16.gmra.mxu1 %v5375_v39 }
 0x39a   : > { %3161 = vst [vmem:[%s5063_s2 + $0x2e8] sm:$0xff] %v3065_v62  ;;  %2486 = vmatmul.bf16.gmra.mxu2 %v5373_v56  ;;  %2575 = vmatmul.bf16.gmra.mxu3 %v5375_v39 }
 0x39d   : > { %v2447_v11 = vpop.f32.mrf.mxu2  ;;  %v2536_v30 = vpop.f32.mrf.mxu3 }
 0x39e   : > { %v2537_v51 = vadd.f32 %v2536_v30, %v2447_v11  ;;  %v2271_v48 = vpop.f32.mrf.mxu0  ;;  %v2360_v1 = vpop.f32.mrf.mxu1 }
 0x39f   : > { %v2361_v17 = vadd.f32 %v2360_v1, %v2271_v48  ;;  %v3758_v1 = vld [vmem:[#allocation8 + $0x1c4] sm:$0xf] }
 0x3a0   : > { %v2973_v18 = vpack.c.bf16 %v2537_v51, %v2359_v0  ;;  %v3710_v0 = vld [vmem:[#allocation8 + $0x44] sm:$0xf]  ;;  %v3358_v51 = vld [vmem:[#allocation8 + $0x58] sm:$0xf0] }
 0x3a1   : > { %v3361_v48 = vor.u32 %v3710_v0, %v3358_v51 }
 0x3a2   : > { %3069 = vst [vmem:[%s5063_s2 + $0x8] sm:$0xff] %v2973_v18  ;;  %v3550_v18 = vld [vmem:[#allocation8 + $0x1d8] sm:$0xf0] }
 0x3a3   : > { %v3553_v60 = vor.u32 %v3758_v1, %v3550_v18  ;;  %2800 = vmatpush.bf16.msra.mxu2 %v3361_v48 }
 0x3a5   : > { %v2449_v28 = vpop.f32.mrf.mxu2  ;;  %v2538_v26 = vpop.f32.mrf.mxu3  ;;  %2889 = vmatpush.bf16.msra.mxu3 %v3553_v60 }
 0x3a6   : > { %v2539_v34 = vadd.f32 %v2538_v26, %v2449_v28  ;;  %v2274_v21 = vpop.f32.mrf.mxu0  ;;  %v2363_v9 = vpop.f32.mrf.mxu1 }
 0x3a7   : > { %v2364_v25 = vadd.f32 %v2363_v9, %v2274_v21  ;;  %v3548_v9 = vld [vmem:[#allocation8 + $0x1c0] sm:$0xf] }
 0x3a8   : > { %v2976_v15 = vpack.c.bf16 %v2539_v34, %v2361_v17  ;;  %v3356_v17 = vld [vmem:[#allocation8 + $0x40] sm:$0xf]  ;;  %v3713_v34 = vld [vmem:[#allocation8 + $0x54] sm:$0xf0] }
 0x3a9   : > { %2313 = vmatmul.bf16.gmra.mxu0 %v5419_v27  ;;  %2402 = vmatmul.bf16.gmra.mxu1 %v6103_v59  ;;  %v3357_v21 = vor.u32 %v3713_v34, %v3356_v17 }
 0x3aa   : > { %3072 = vst [vmem:[%s5063_s2 + $0x20] sm:$0xff] %v2976_v15  ;;  %2491 = vmatmul.bf16.gmra.mxu2 %v5419_v27  ;;  %2580 = vmatmul.bf16.gmra.mxu3 %v6103_v59  ;;  %v3761_v15 = vld [vmem:[#allocation8 + $0x1d4] sm:$0xf0] }
 0x3ab   : > { %2622 = vmatpush.bf16.msra.mxu0 %v3357_v21 }
 0x3ad   : > { %v2452_v52 = vpop.f32.mrf.mxu2  ;;  %v2541_v5 = vpop.f32.mrf.mxu3 }
 0x3ae   : > { %v2542_v46 = vadd.f32 %v2541_v5, %v2452_v52  ;;  %v2276_v13 = vpop.f32.mrf.mxu0  ;;  %v2365_v62 = vpop.f32.mrf.mxu1  ;;  %v3549_v52 = vor.u32 %v3761_v15, %v3548_v9 }
 0x3af   : > { %v2366_v58 = vadd.f32 %v2365_v62, %v2276_v13 }
 0x3b0   : > { %v2979_v4 = vpack.c.bf16 %v2542_v46, %v2364_v25  ;;  %2711 = vmatpush.bf16.msra.mxu1 %v3549_v52 }
 0x3b2   : > { %3075 = vst [vmem:[%s5063_s2 + $0x38] sm:$0xff] %v2979_v4 }
 0x3b5   : > { %v2454_v22 = vpop.f32.mrf.mxu2  ;;  %v2543_v61 = vpop.f32.mrf.mxu3 }
 0x3b6   : > { %v2544_v50 = vadd.f32 %v2543_v61, %v2454_v22  ;;  %v2279_v44 = vpop.f32.mrf.mxu0  ;;  %v2368_v11 = vpop.f32.mrf.mxu1 }
 0x3b7   : > { %v2369_v38 = vadd.f32 %v2368_v11, %v2279_v44 }
 0x3b8   : > { %v2982_v30 = vpack.c.bf16 %v2544_v50, %v2366_v58 }
 0x3b9   : > { %2318 = vmatmul.bf16.gmra.mxu0 %v5517_v12  ;;  %2407 = vmatmul.bf16.gmra.mxu1 %v5519_v23 }
 0x3ba   : > { %3078 = vst [vmem:[%s5063_s2 + $0x50] sm:$0xff] %v2982_v30  ;;  %2496 = vmatmul.bf16.gmra.mxu2 %v5517_v12  ;;  %2585 = vmatmul.bf16.gmra.mxu3 %v5519_v23 }
 0x3bd   : > { %v2457_v37 = vpop.f32.mrf.mxu2  ;;  %v2546_v49 = vpop.f32.mrf.mxu3 }
 0x3be   : > { %v2547_v29 = vadd.f32 %v2546_v49, %v2457_v37  ;;  %v2281_v40 = vpop.f32.mrf.mxu0  ;;  %v2370_v28 = vpop.f32.mrf.mxu1 }
 0x3bf   : > { %v2371_v46 = vadd.f32 %v2370_v28, %v2281_v40  ;;  %v3752_v28 = vld [vmem:[#allocation8 + $0x194] sm:$0xf] }
 0x3c0   : > { %v2985_v26 = vpack.c.bf16 %v2547_v29, %v2369_v38  ;;  %v3704_v38 = vld [vmem:[#allocation8 + $0x14] sm:$0xf]  ;;  %v3334_v29 = vld [vmem:[#allocation8 + $0x28] sm:$0xf0] }
 0x3c1   : > { %v3337_v40 = vor.u32 %v3704_v38, %v3334_v29 }
 0x3c2   : > { %3081 = vst [vmem:[%s5063_s2 + $0x68] sm:$0xff] %v2985_v26  ;;  %v3526_v26 = vld [vmem:[#allocation8 + $0x1a8] sm:$0xf0] }
 0x3c3   : > { %v3529_v17 = vor.u32 %v3752_v28, %v3526_v26  ;;  %2801 = vmatpush.bf16.msra.mxu2 %v3337_v40 }
 0x3c5   : > { %v2459_v5 = vpop.f32.mrf.mxu2  ;;  %v2548_v25 = vpop.f32.mrf.mxu3  ;;  %2890 = vmatpush.bf16.msra.mxu3 %v3529_v17 }
 0x3c6   : > { %v2549_v13 = vadd.f32 %v2548_v25, %v2459_v5  ;;  %v2284_v62 = vpop.f32.mrf.mxu0  ;;  %v2373_v4 = vpop.f32.mrf.mxu1 }
 0x3c7   : > { %v2374_v50 = vadd.f32 %v2373_v4, %v2284_v62  ;;  %v3524_v4 = vld [vmem:[#allocation8 + $0x190] sm:$0xf] }
 0x3c8   : > { %v2988_v22 = vpack.c.bf16 %v2549_v13, %v2371_v46  ;;  %v3332_v46 = vld [vmem:[#allocation8 + $0x10] sm:$0xf]  ;;  %v3707_v13 = vld [vmem:[#allocation8 + $0x24] sm:$0xf0] }
 0x3c9   : > { %2323 = vmatmul.bf16.gmra.mxu0 %v5576_v41  ;;  %2412 = vmatmul.bf16.gmra.mxu1 %v5586_v24  ;;  %v3333_v62 = vor.u32 %v3707_v13, %v3332_v46 }
 0x3ca   : > { %3084 = vst [vmem:[%s5063_s2 + $0x80] sm:$0xff] %v2988_v22  ;;  %2501 = vmatmul.bf16.gmra.mxu2 %v5576_v41  ;;  %2590 = vmatmul.bf16.gmra.mxu3 %v5586_v24  ;;  %v3755_v22 = vld [vmem:[#allocation8 + $0x1a4] sm:$0xf0] }
 0x3cb   : > { %2623 = vmatpush.bf16.msra.mxu0 %v3333_v62 }
 0x3cd   : > { %v2462_v61 = vpop.f32.mrf.mxu2  ;;  %v2551_v58 = vpop.f32.mrf.mxu3 }
 0x3ce   : > { %v2552_v44 = vadd.f32 %v2551_v58, %v2462_v61  ;;  %v2286_v11 = vpop.f32.mrf.mxu0  ;;  %v2375_v30 = vpop.f32.mrf.mxu1  ;;  %v3525_v61 = vor.u32 %v3755_v22, %v3524_v4 }
 0x3cf   : > { %v2376_v1 = vadd.f32 %v2375_v30, %v2286_v11 }
 0x3d0   : > { %v2991_v0 = vpack.c.bf16 %v2552_v44, %v2374_v50  ;;  %2712 = vmatpush.bf16.msra.mxu1 %v3525_v61 }
 0x3d2   : > { %3087 = vst [vmem:[%s5063_s2 + $0x98] sm:$0xff] %v2991_v0 }
 0x3d5   : > { %v2464_v51 = vpop.f32.mrf.mxu2  ;;  %v2553_v48 = vpop.f32.mrf.mxu3 }
 0x3d6   : > { %v2554_v18 = vadd.f32 %v2553_v48, %v2464_v51  ;;  %v2289_v60 = vpop.f32.mrf.mxu0  ;;  %v2378_v37 = vpop.f32.mrf.mxu1 }
 0x3d7   : > { %v2379_v9 = vadd.f32 %v2378_v37, %v2289_v60 }
 0x3d8   : > { %v2994_v49 = vpack.c.bf16 %v2554_v18, %v2376_v1 }
 0x3d9   : > { %2328 = vmatmul.bf16.gmra.mxu0 %v5618_v43  ;;  %2417 = vmatmul.bf16.gmra.mxu1 %v5620_v57 }
 0x3da   : > { %3090 = vst [vmem:[%s5063_s2 + $0xb0] sm:$0xff] %v2994_v49  ;;  %2506 = vmatmul.bf16.gmra.mxu2 %v5618_v43  ;;  %2595 = vmatmul.bf16.gmra.mxu3 %v5620_v57 }
 0x3dd   : > { %v2467_v34 = vpop.f32.mrf.mxu2  ;;  %v2556_v21 = vpop.f32.mrf.mxu3 }
 0x3de   : > { %v2557_v15 = vadd.f32 %v2556_v21, %v2467_v34  ;;  %v2291_v52 = vpop.f32.mrf.mxu0  ;;  %v2380_v5 = vpop.f32.mrf.mxu1 }
 0x3df   : > { %v2381_v44 = vadd.f32 %v2380_v5, %v2291_v52 }
 0x3e0   : > { %v2997_v25 = vpack.c.bf16 %v2557_v15, %v2379_v9 }
 0x3e2   : > { %3093 = vst [vmem:[%s5063_s2 + $0xc8] sm:$0xff] %v2997_v25 }
 0x3e5   : > { %v2469_v58 = vpop.f32.mrf.mxu2  ;;  %v2558_v50 = vpop.f32.mrf.mxu3 }
 0x3e6   : > { %v2559_v11 = vadd.f32 %v2558_v50, %v2469_v58  ;;  %v2294_v30 = vpop.f32.mrf.mxu0  ;;  %v2383_v0 = vpop.f32.mrf.mxu1 }
 0x3e7   : > { %v2384_v18 = vadd.f32 %v2383_v0, %v2294_v30 }
 0x3e8   : > { %v3000_v51 = vpack.c.bf16 %v2559_v11, %v2381_v44 }
 0x3e9   : > { %2333 = vmatmul.bf16.gmra.mxu0 %v5642_v31  ;;  %2422 = vmatmul.bf16.gmra.mxu1 %v5645_v54 }
 0x3ea   : > { %3096 = vst [vmem:[%s5063_s2 + $0xe0] sm:$0xff] %v3000_v51  ;;  %2511 = vmatmul.bf16.gmra.mxu2 %v5642_v31  ;;  %2600 = vmatmul.bf16.gmra.mxu3 %v5645_v54 }
 0x3ed   : > { %v2472_v48 = vpop.f32.mrf.mxu2  ;;  %v2561_v1 = vpop.f32.mrf.mxu3 }
 0x3ee   : > { %v2562_v60 = vadd.f32 %v2561_v1, %v2472_v48  ;;  %v2296_v37 = vpop.f32.mrf.mxu0  ;;  %v2385_v49 = vpop.f32.mrf.mxu1 }
 0x3ef   : > { %v2386_v28 = vadd.f32 %v2385_v49, %v2296_v37 }
 0x3f0   : > { %v3003_v38 = vpack.c.bf16 %v2562_v60, %v2384_v18 }
 0x3f2   : > { %3099 = vst [vmem:[%s5063_s2 + $0xf8] sm:$0xff] %v3003_v38 }
 0x3f5   : > { %v2474_v29 = vpop.f32.mrf.mxu2  ;;  %v2563_v40 = vpop.f32.mrf.mxu3 }
 0x3f6   : > { %v2564_v26 = vadd.f32 %v2563_v40, %v2474_v29  ;;  %v2299_v17 = vpop.f32.mrf.mxu0  ;;  %v2388_v34 = vpop.f32.mrf.mxu1 }
 0x3f7   : > { %v2389_v52 = vadd.f32 %v2388_v34, %v2299_v17 }
 0x3f8   : > { %v3006_v21 = vpack.c.bf16 %v2564_v26, %v2386_v28 }
 0x3f9   : > { %2338 = vmatmul.bf16.gmra.mxu0 %v5666_v42  ;;  %2427 = vmatmul.bf16.gmra.mxu1 %v5668_v19 }
 0x3fa   : > { %3102 = vst [vmem:[%s5063_s2 + $0x110] sm:$0xff] %v3006_v21  ;;  %2516 = vmatmul.bf16.gmra.mxu2 %v5666_v42  ;;  %2605 = vmatmul.bf16.gmra.mxu3 %v5668_v19 }
 0x3fd   : > { %v2477_v9 = vpop.f32.mrf.mxu2  ;;  %v2566_v15 = vpop.f32.mrf.mxu3 }
 0x3fe   : > { %v2567_v5 = vadd.f32 %v2566_v15, %v2477_v9  ;;  %v2301_v25 = vpop.f32.mrf.mxu0  ;;  %v2390_v46 = vpop.f32.mrf.mxu1 }
 0x3ff   : > { %v2391_v22 = vadd.f32 %v2390_v46, %v2301_v25 }
 0x400   : > { %v3009_v13 = vpack.c.bf16 %v2567_v5, %v2389_v52 }
 0x402   : > { %3105 = vst [vmem:[%s5063_s2 + $0x128] sm:$0xff] %v3009_v13 }
 0x405   : > { %v2479_v62 = vpop.f32.mrf.mxu2  ;;  %v2568_v4 = vpop.f32.mrf.mxu3 }
 0x406   : > { %v2569_v61 = vadd.f32 %v2568_v4, %v2479_v62  ;;  %v2304_v58 = vpop.f32.mrf.mxu0  ;;  %v2393_v50 = vpop.f32.mrf.mxu1 }
 0x407   : > { %v2394_v0 = vadd.f32 %v2393_v50, %v2304_v58 }
 0x408   : > { %v3012_v44 = vpack.c.bf16 %v2569_v61, %v2391_v22 }
 0x409   : > { %2343 = vmatmul.bf16.gmra.mxu0 %v5688_v63  ;;  %2432 = vmatmul.bf16.gmra.mxu1 %v5690_v10 }
 0x40a   : > { %3108 = vst [vmem:[%s5063_s2 + $0x140] sm:$0xff] %v3012_v44  ;;  %2521 = vmatmul.bf16.gmra.mxu2 %v5688_v63  ;;  %2610 = vmatmul.bf16.gmra.mxu3 %v5690_v10 }
 0x40d   : > { %v2482_v11 = vpop.f32.mrf.mxu2  ;;  %v2571_v30 = vpop.f32.mrf.mxu3 }
 0x40e   : > { %v2572_v51 = vadd.f32 %v2571_v30, %v2482_v11  ;;  %v2306_v48 = vpop.f32.mrf.mxu0  ;;  %v2395_v1 = vpop.f32.mrf.mxu1 }
 0x40f   : > { %v2396_v49 = vadd.f32 %v2395_v1, %v2306_v48 }
 0x410   : > { %v3015_v18 = vpack.c.bf16 %v2572_v51, %v2394_v0 }
 0x412   : > { %3111 = vst [vmem:[%s5063_s2 + $0x158] sm:$0xff] %v3015_v18 }
 0x415   : > { %v2484_v60 = vpop.f32.mrf.mxu2  ;;  %v2573_v37 = vpop.f32.mrf.mxu3 }
 0x416   : > { %v2574_v38 = vadd.f32 %v2573_v37, %v2484_v60  ;;  %v2309_v29 = vpop.f32.mrf.mxu0  ;;  %v2398_v40 = vpop.f32.mrf.mxu1 }
 0x417   : > { %v2399_v34 = vadd.f32 %v2398_v40, %v2309_v29 }
 0x418   : > { %v3018_v28 = vpack.c.bf16 %v2574_v38, %v2396_v49 }
 0x419   : > { %2624 = vmatmul.bf16.vlgmr.msra.gmra.mxu0 %v6089_v47  ;;  %2713 = vmatmul.bf16.vlgmr.msra.gmra.mxu1 %v6090_v7 }
 0x41a   : > { %3114 = vst [vmem:[%s5063_s2 + $0x170] sm:$0xff] %v3018_v28  ;;  %2802 = vmatmul.bf16.vlgmr.msra.gmra.mxu2 %v6089_v47  ;;  %2891 = vmatmul.bf16.vlgmr.msra.gmra.mxu3 %v6090_v7 }
 0x41d   : > { %v2487_v26 = vpop.f32.mrf.mxu2  ;;  %v2576_v17 = vpop.f32.mrf.mxu3 }
 0x41e   : > { %v2577_v21 = vadd.f32 %v2576_v17, %v2487_v26  ;;  %v2311_v9 = vpop.f32.mrf.mxu0  ;;  %v2400_v15 = vpop.f32.mrf.mxu1 }
 0x41f   : > { %v2401_v46 = vadd.f32 %v2400_v15, %v2311_v9 }
 0x420   : > { %v3021_v52 = vpack.c.bf16 %v2577_v21, %v2399_v34 }
 0x422   : > { %3117 = vst [vmem:[%s5063_s2 + $0x188] sm:$0xff] %v3021_v52 }
 0x425   : > { %v2489_v5 = vpop.f32.mrf.mxu2  ;;  %v2578_v25 = vpop.f32.mrf.mxu3 }
 0x426   : > { %v2579_v13 = vadd.f32 %v2578_v25, %v2489_v5  ;;  %v2314_v62 = vpop.f32.mrf.mxu0  ;;  %v2403_v4 = vpop.f32.mrf.mxu1 }
 0x427   : > { %v2404_v61 = vadd.f32 %v2403_v4, %v2314_v62 }
 0x428   : > { %v3024_v22 = vpack.c.bf16 %v2579_v13, %v2401_v46 }
 0x429   : > { %2629 = vmatmul.bf16.gmra.mxu0 %v6091_v2  ;;  %2718 = vmatmul.bf16.gmra.mxu1 %v6092_v36 }
 0x42a   : > { %3120 = vst [vmem:[%s5063_s2 + $0x1a0] sm:$0xff] %v3024_v22  ;;  %2807 = vmatmul.bf16.gmra.mxu2 %v6091_v2  ;;  %2896 = vmatmul.bf16.gmra.mxu3 %v6092_v36 }
 0x42d   : > { %v2492_v47 = vpop.f32.mrf.mxu2  ;;  %v2581_v7 = vpop.f32.mrf.mxu3 }
 0x42e   : > { %v2582_v58 = vadd.f32 %v2581_v7, %v2492_v47  ;;  %v2316_v50 = vpop.f32.mrf.mxu0  ;;  %v2405_v44 = vpop.f32.mrf.mxu1 }
 0x42f   : > { %v2406_v51 = vadd.f32 %v2405_v44, %v2316_v50 }
 0x430   : > { %v3027_v11 = vpack.c.bf16 %v2582_v58, %v2404_v61 }
 0x432   : > { %3123 = vst [vmem:[%s5063_s2 + $0x1b8] sm:$0xff] %v3027_v11 }
 0x435   : > { %v2494_v30 = vpop.f32.mrf.mxu2  ;;  %v2583_v0 = vpop.f32.mrf.mxu3 }
 0x436   : > { %v2584_v48 = vadd.f32 %v2583_v0, %v2494_v30  ;;  %v2319_v1 = vpop.f32.mrf.mxu0  ;;  %v2408_v18 = vpop.f32.mrf.mxu1 }
 0x437   : > { %v2409_v37 = vadd.f32 %v2408_v18, %v2319_v1 }
 0x438   : > { %v3030_v60 = vpack.c.bf16 %v2584_v48, %v2406_v51 }
 0x439   : > { %2634 = vmatmul.bf16.gmra.mxu0 %v6093_v6  ;;  %2723 = vmatmul.bf16.gmra.mxu1 %v6094_v33 }
 0x43a   : > { %3126 = vst [vmem:[%s5063_s2 + $0x1d0] sm:$0xff] %v3030_v60  ;;  %2812 = vmatmul.bf16.gmra.mxu2 %v6093_v6  ;;  %2901 = vmatmul.bf16.gmra.mxu3 %v6094_v33 }
 0x43d   : > { %v2497_v2 = vpop.f32.mrf.mxu2  ;;  %v2586_v36 = vpop.f32.mrf.mxu3 }
 0x43e   : > { %v2587_v49 = vadd.f32 %v2586_v36, %v2497_v2  ;;  %v2321_v38 = vpop.f32.mrf.mxu0  ;;  %v2410_v29 = vpop.f32.mrf.mxu1 }
 0x43f   : > { %v2411_v17 = vadd.f32 %v2410_v29, %v2321_v38 }
 0x440   : > { %v3033_v40 = vpack.c.bf16 %v2587_v49, %v2409_v37 }
 0x442   : > { %3129 = vst [vmem:[%s5063_s2 + $0x1e8] sm:$0xff] %v3033_v40 }
 0x445   : > { %v2499_v28 = vpop.f32.mrf.mxu2  ;;  %v2588_v26 = vpop.f32.mrf.mxu3 }
 0x446   : > { %v2589_v34 = vadd.f32 %v2588_v26, %v2499_v28  ;;  %v2324_v21 = vpop.f32.mrf.mxu0  ;;  %v2413_v9 = vpop.f32.mrf.mxu1 }
 0x447   : > { %v2414_v52 = vadd.f32 %v2413_v9, %v2324_v21 }
 0x448   : > { %v3036_v15 = vpack.c.bf16 %v2589_v34, %v2411_v17 }
 0x449   : > { %2639 = vmatmul.bf16.gmra.mxu0 %v6095_v45  ;;  %2728 = vmatmul.bf16.gmra.mxu1 %v6096_v3 }
 0x44a   : > { %3132 = vst [vmem:[%s5063_s2 + $0x200] sm:$0xff] %v3036_v15  ;;  %2817 = vmatmul.bf16.gmra.mxu2 %v6095_v45  ;;  %2906 = vmatmul.bf16.gmra.mxu3 %v6096_v3 }
 0x44d   : > { %v2502_v6 = vpop.f32.mrf.mxu2  ;;  %v2591_v33 = vpop.f32.mrf.mxu3 }
 0x44e   : > { %v2592_v5 = vadd.f32 %v2591_v33, %v2502_v6  ;;  %v2326_v25 = vpop.f32.mrf.mxu0  ;;  %v2415_v46 = vpop.f32.mrf.mxu1 }
 0x44f   : > { %v2416_v22 = vadd.f32 %v2415_v46, %v2326_v25 }
 0x450   : > { %v3039_v13 = vpack.c.bf16 %v2592_v5, %v2414_v52 }
 0x452   : > { %3135 = vst [vmem:[%s5063_s2 + $0x218] sm:$0xff] %v3039_v13 }
 0x455   : > { %v2504_v62 = vpop.f32.mrf.mxu2  ;;  %v2593_v4 = vpop.f32.mrf.mxu3 }
 0x456   : > { %v2594_v47 = vadd.f32 %v2593_v4, %v2504_v62  ;;  %v2329_v7 = vpop.f32.mrf.mxu0  ;;  %v2418_v61 = vpop.f32.mrf.mxu1 }
 0x457   : > { %v2419_v50 = vadd.f32 %v2418_v61, %v2329_v7 }
 0x458   : > { %v3042_v58 = vpack.c.bf16 %v2594_v47, %v2416_v22 }
 0x459   : > { %2644 = vmatmul.bf16.gmra.mxu0 %v6097_v20  ;;  %2733 = vmatmul.bf16.gmra.mxu1 %v6098_v14 }
 0x45a   : > { %3138 = vst [vmem:[%s5063_s2 + $0x230] sm:$0xff] %v3042_v58  ;;  %2822 = vmatmul.bf16.gmra.mxu2 %v6097_v20  ;;  %2911 = vmatmul.bf16.gmra.mxu3 %v6098_v14 }
 0x45d   : > { %v2507_v45 = vpop.f32.mrf.mxu2  ;;  %v2596_v3 = vpop.f32.mrf.mxu3 }
 0x45e   : > { %v2597_v44 = vadd.f32 %v2596_v3, %v2507_v45  ;;  %v2331_v11 = vpop.f32.mrf.mxu0  ;;  %v2420_v30 = vpop.f32.mrf.mxu1 }
 0x45f   : > { %v2421_v1 = vadd.f32 %v2420_v30, %v2331_v11 }
 0x460   : > { %v3045_v0 = vpack.c.bf16 %v2597_v44, %v2419_v50 }
 0x462   : > { %3141 = vst [vmem:[%s5063_s2 + $0x248] sm:$0xff] %v3045_v0 }
 0x465   : > { %v2509_v51 = vpop.f32.mrf.mxu2  ;;  %v2598_v48 = vpop.f32.mrf.mxu3 }
 0x466   : > { %v2599_v18 = vadd.f32 %v2598_v48, %v2509_v51  ;;  %v2334_v60 = vpop.f32.mrf.mxu0  ;;  %v2423_v2 = vpop.f32.mrf.mxu1 }
 0x467   : > { %v2424_v37 = vadd.f32 %v2423_v2, %v2334_v60 }
 0x468   : > { %v3048_v36 = vpack.c.bf16 %v2599_v18, %v2421_v1 }
 0x469   : > { %2649 = vmatmul.bf16.gmra.mxu0 %v6099_v8  ;;  %2738 = vmatmul.bf16.gmra.mxu1 %v6100_v55 }
 0x46a   : > { %3144 = vst [vmem:[%s5063_s2 + $0x260] sm:$0xff] %v3048_v36  ;;  %2827 = vmatmul.bf16.gmra.mxu2 %v6099_v8  ;;  %2916 = vmatmul.bf16.gmra.mxu3 %v6100_v55 }
 0x46d   : > { %v2512_v20 = vpop.f32.mrf.mxu2  ;;  %v2601_v14 = vpop.f32.mrf.mxu3 }
 0x46e   : > { %v2602_v49 = vadd.f32 %v2601_v14, %v2512_v20  ;;  %v2336_v38 = vpop.f32.mrf.mxu0  ;;  %v2425_v29 = vpop.f32.mrf.mxu1 }
 0x46f   : > { %v2426_v17 = vadd.f32 %v2425_v29, %v2336_v38 }
 0x470   : > { %v3051_v40 = vpack.c.bf16 %v2602_v49, %v2424_v37 }
 0x472   : > { %3147 = vst [vmem:[%s5063_s2 + $0x278] sm:$0xff] %v3051_v40 }
 0x475   : > { %v2514_v28 = vpop.f32.mrf.mxu2  ;;  %v2603_v26 = vpop.f32.mrf.mxu3 }
 0x476   : > { %v2604_v34 = vadd.f32 %v2603_v26, %v2514_v28  ;;  %v2339_v21 = vpop.f32.mrf.mxu0  ;;  %v2428_v9 = vpop.f32.mrf.mxu1 }
 0x477   : > { %v2429_v6 = vadd.f32 %v2428_v9, %v2339_v21 }
 0x478   : > { %v3054_v15 = vpack.c.bf16 %v2604_v34, %v2426_v17 }
 0x479   : > { %2654 = vmatmul.bf16.gmra.mxu0 %v6101_v32  ;;  %2743 = vmatmul.bf16.gmra.mxu1 %v6102_v16 }
 0x47a   : > { %3150 = vst [vmem:[%s5063_s2 + $0x290] sm:$0xff] %v3054_v15  ;;  %2832 = vmatmul.bf16.gmra.mxu2 %v6101_v32  ;;  %2921 = vmatmul.bf16.gmra.mxu3 %v6102_v16 }
 0x47d   : > { %v2517_v8 = vpop.f32.mrf.mxu2  ;;  %v2606_v55 = vpop.f32.mrf.mxu3 }
 0x47e   : > { %v2607_v33 = vadd.f32 %v2606_v55, %v2517_v8  ;;  %v2341_v52 = vpop.f32.mrf.mxu0  ;;  %v2430_v5 = vpop.f32.mrf.mxu1 }
 0x47f   : > { %v2431_v62 = vadd.f32 %v2430_v5, %v2341_v52 }
 0x480   : > { %v3057_v25 = vpack.c.bf16 %v2607_v33, %v2429_v6 }
 0x482   : > { %3153 = vst [vmem:[%s5063_s2 + $0x2a8] sm:$0xff] %v3057_v25 }
 0x485   : > { %v2519_v46 = vpop.f32.mrf.mxu2  ;;  %v2608_v13 = vpop.f32.mrf.mxu3 }
 0x486   : > { %v2609_v4 = vadd.f32 %v2608_v13, %v2519_v46  ;;  %v2344_v22 = vpop.f32.mrf.mxu0  ;;  %v2433_v47 = vpop.f32.mrf.mxu1 }
 0x487   : > { %v2434_v61 = vadd.f32 %v2433_v47, %v2344_v22 }
 0x488   : > { %v3060_v7 = vpack.c.bf16 %v2609_v4, %v2431_v62 }
 0x489   : > { %2659 = vmatmul.bf16.gmra.mxu0 %v5339_v35  ;;  %2748 = vmatmul.bf16.gmra.mxu1 %v5343_v53 }
 0x48a   : > { %3156 = vst [vmem:[%s5063_s2 + $0x2c0] sm:$0xff] %v3060_v7  ;;  %2837 = vmatmul.bf16.gmra.mxu2 %v5339_v35  ;;  %2926 = vmatmul.bf16.gmra.mxu3 %v5343_v53 }
 0x48d   : > { %v2522_v32 = vpop.f32.mrf.mxu2  ;;  %v2611_v16 = vpop.f32.mrf.mxu3 }
 0x48e   : > { %v2612_v58 = vadd.f32 %v2611_v16, %v2522_v32  ;;  %v2346_v45 = vpop.f32.mrf.mxu0  ;;  %v2435_v3 = vpop.f32.mrf.mxu1 }
 0x48f   : > { %v2436_v30 = vadd.f32 %v2435_v3, %v2346_v45 }
 0x490   : > { %v3063_v50 = vpack.c.bf16 %v2612_v58, %v2434_v61 }
 0x492   : > { %3159 = vst [vmem:[%s5063_s2 + $0x2d8] sm:$0xff] %v3063_v50 }
 0x495   : > { %v2524_v44 = vpop.f32.mrf.mxu2  ;;  %v2613_v11 = vpop.f32.mrf.mxu3 }
 0x496   : > { %v2614_v0 = vadd.f32 %v2613_v11, %v2524_v44  ;;  %v2625_v51 = vpop.f32.mrf.mxu0  ;;  %v2714_v48 = vpop.f32.mrf.mxu1 }
 0x497   : > { %v2715_v18 = vadd.f32 %v2714_v48, %v2625_v51 }
 0x498   : > { %v3066_v1 = vpack.c.bf16 %v2614_v0, %v2436_v30 }
 0x499   : > { %2664 = vmatmul.bf16.gmra.mxu0 %v5373_v56  ;;  %2753 = vmatmul.bf16.gmra.mxu1 %v5375_v39 }
 0x49a   : > { %3162 = vst [vmem:[%s5063_s2 + $0x2f0] sm:$0xff] %v3066_v1  ;;  %2842 = vmatmul.bf16.gmra.mxu2 %v5373_v56  ;;  %2931 = vmatmul.bf16.gmra.mxu3 %v5375_v39 }
 0x49d   : > { %v2803_v35 = vpop.f32.mrf.mxu2  ;;  %v2892_v53 = vpop.f32.mrf.mxu3 }
 0x49e   : > { %v2893_v60 = vadd.f32 %v2892_v53, %v2803_v35  ;;  %v2627_v2 = vpop.f32.mrf.mxu0  ;;  %v2716_v36 = vpop.f32.mrf.mxu1 }
 0x49f   : > { %v2717_v49 = vadd.f32 %v2716_v36, %v2627_v2 }
 0x4a0   : > { %v2974_v20 = vpack.c.bf16 %v2893_v60, %v2715_v18 }
 0x4a2   : > { %3070 = vst [vmem:[%s5063_s2 + $0x10] sm:$0xff] %v2974_v20 }
 0x4a5   : > { %v2805_v14 = vpop.f32.mrf.mxu2  ;;  %v2894_v37 = vpop.f32.mrf.mxu3 }
 0x4a6   : > { %v2895_v38 = vadd.f32 %v2894_v37, %v2805_v14  ;;  %v2630_v29 = vpop.f32.mrf.mxu0  ;;  %v2719_v40 = vpop.f32.mrf.mxu1 }
 0x4a7   : > { %v2720_v26 = vadd.f32 %v2719_v40, %v2630_v29 }
 0x4a8   : > { %v2977_v28 = vpack.c.bf16 %v2895_v38, %v2717_v49 }
 0x4a9   : > { %2669 = vmatmul.bf16.gmra.mxu0 %v5419_v27  ;;  %2758 = vmatmul.bf16.gmra.mxu1 %v6103_v59 }
 0x4aa   : > { %3073 = vst [vmem:[%s5063_s2 + $0x28] sm:$0xff] %v2977_v28  ;;  %2847 = vmatmul.bf16.gmra.mxu2 %v5419_v27  ;;  %2936 = vmatmul.bf16.gmra.mxu3 %v6103_v59 }
 0x4ad   : > { %v2808_v56 = vpop.f32.mrf.mxu2  ;;  %v2897_v39 = vpop.f32.mrf.mxu3 }
 0x4ae   : > { %v2898_v17 = vadd.f32 %v2897_v39, %v2808_v56  ;;  %v2632_v34 = vpop.f32.mrf.mxu0  ;;  %v2721_v21 = vpop.f32.mrf.mxu1 }
 0x4af   : > { %v2722_v55 = vadd.f32 %v2721_v21, %v2632_v34 }
 0x4b0   : > { %v2980_v9 = vpack.c.bf16 %v2898_v17, %v2720_v26 }
 0x4b2   : > { %3076 = vst [vmem:[%s5063_s2 + $0x40] sm:$0xff] %v2980_v9 }
 0x4b5   : > { %v2810_v15 = vpop.f32.mrf.mxu2  ;;  %v2899_v8 = vpop.f32.mrf.mxu3 }
 0x4b6   : > { %v2900_v6 = vadd.f32 %v2899_v8, %v2810_v15  ;;  %v2635_v33 = vpop.f32.mrf.mxu0  ;;  %v2724_v52 = vpop.f32.mrf.mxu1 }
 0x4b7   : > { %v2725_v25 = vadd.f32 %v2724_v52, %v2635_v33 }
 0x4b8   : > { %v2983_v5 = vpack.c.bf16 %v2900_v6, %v2722_v55 }
 0x4b9   : > { %2674 = vmatmul.bf16.gmra.mxu0 %v5517_v12  ;;  %2763 = vmatmul.bf16.gmra.mxu1 %v5519_v23 }
 0x4ba   : > { %3079 = vst [vmem:[%s5063_s2 + $0x58] sm:$0xff] %v2983_v5  ;;  %2852 = vmatmul.bf16.gmra.mxu2 %v5517_v12  ;;  %2941 = vmatmul.bf16.gmra.mxu3 %v5519_v23 }
 0x4bd   : > { %v2813_v27 = vpop.f32.mrf.mxu2  ;;  %v2902_v59 = vpop.f32.mrf.mxu3 }
 0x4be   : > { %v2903_v46 = vadd.f32 %v2902_v59, %v2813_v27  ;;  %v2637_v13 = vpop.f32.mrf.mxu0  ;;  %v2726_v62 = vpop.f32.mrf.mxu1 }
 0x4bf   : > { %v2727_v7 = vadd.f32 %v2726_v62, %v2637_v13 }
 0x4c0   : > { %v2986_v4 = vpack.c.bf16 %v2903_v46, %v2725_v25 }
 0x4c2   : > { %3082 = vst [vmem:[%s5063_s2 + $0x70] sm:$0xff] %v2986_v4 }
 0x4c5   : > { %v2815_v22 = vpop.f32.mrf.mxu2  ;;  %v2904_v47 = vpop.f32.mrf.mxu3 }
 0x4c6   : > { %v2905_v32 = vadd.f32 %v2904_v47, %v2815_v22  ;;  %v2640_v16 = vpop.f32.mrf.mxu0  ;;  %v2729_v61 = vpop.f32.mrf.mxu1 }
 0x4c7   : > { %v2730_v45 = vadd.f32 %v2729_v61, %v2640_v16 }
 0x4c8   : > { %v2989_v58 = vpack.c.bf16 %v2905_v32, %v2727_v7 }
 0x4c9   : > { %2679 = vmatmul.bf16.gmra.mxu0 %v5576_v41  ;;  %2768 = vmatmul.bf16.gmra.mxu1 %v5586_v24 }
 0x4ca   : > { %3085 = vst [vmem:[%s5063_s2 + $0x88] sm:$0xff] %v2989_v58  ;;  %2857 = vmatmul.bf16.gmra.mxu2 %v5576_v41  ;;  %2946 = vmatmul.bf16.gmra.mxu3 %v5586_v24 }
 0x4cd   : > { %v2818_v12 = vpop.f32.mrf.mxu2  ;;  %v2907_v23 = vpop.f32.mrf.mxu3 }
 0x4ce   : > { %v2908_v3 = vadd.f32 %v2907_v23, %v2818_v12  ;;  %v2642_v50 = vpop.f32.mrf.mxu0  ;;  %v2731_v44 = vpop.f32.mrf.mxu1 }
 0x4cf   : > { %v2732_v51 = vadd.f32 %v2731_v44, %v2642_v50 }
 0x4d0   : > { %v2992_v11 = vpack.c.bf16 %v2908_v3, %v2730_v45 }
 0x4d2   : > { %3088 = vst [vmem:[%s5063_s2 + $0xa0] sm:$0xff] %v2992_v11 }
 0x4d5   : > { %v2820_v30 = vpop.f32.mrf.mxu2  ;;  %v2909_v0 = vpop.f32.mrf.mxu3 }
 0x4d6   : > { %v2910_v48 = vadd.f32 %v2909_v0, %v2820_v30  ;;  %v2645_v1 = vpop.f32.mrf.mxu0  ;;  %v2734_v35 = vpop.f32.mrf.mxu1 }
 0x4d7   : > { %v2735_v18 = vadd.f32 %v2734_v35, %v2645_v1 }
 0x4d8   : > { %v2995_v53 = vpack.c.bf16 %v2910_v48, %v2732_v51 }
 0x4d9   : > { %2684 = vmatmul.bf16.gmra.mxu0 %v5618_v43  ;;  %2773 = vmatmul.bf16.gmra.mxu1 %v5620_v57 }
 0x4da   : > { %3091 = vst [vmem:[%s5063_s2 + $0xb8] sm:$0xff] %v2995_v53  ;;  %2862 = vmatmul.bf16.gmra.mxu2 %v5618_v43  ;;  %2951 = vmatmul.bf16.gmra.mxu3 %v5620_v57 }
 0x4dd   : > { %v2823_v41 = vpop.f32.mrf.mxu2  ;;  %v2912_v24 = vpop.f32.mrf.mxu3 }
 0x4de   : > { %v2913_v60 = vadd.f32 %v2912_v24, %v2823_v41  ;;  %v2647_v2 = vpop.f32.mrf.mxu0  ;;  %v2736_v36 = vpop.f32.mrf.mxu1 }
 0x4df   : > { %v2737_v49 = vadd.f32 %v2736_v36, %v2647_v2 }
 0x4e0   : > { %v2998_v20 = vpack.c.bf16 %v2913_v60, %v2735_v18 }
 0x4e2   : > { %3094 = vst [vmem:[%s5063_s2 + $0xd0] sm:$0xff] %v2998_v20 }
 0x4e5   : > { %v2825_v14 = vpop.f32.mrf.mxu2  ;;  %v2914_v37 = vpop.f32.mrf.mxu3 }
 0x4e6   : > { %v2915_v38 = vadd.f32 %v2914_v37, %v2825_v14  ;;  %v2650_v29 = vpop.f32.mrf.mxu0  ;;  %v2739_v40 = vpop.f32.mrf.mxu1 }
 0x4e7   : > { %v2740_v56 = vadd.f32 %v2739_v40, %v2650_v29 }
 0x4e8   : > { %v3001_v28 = vpack.c.bf16 %v2915_v38, %v2737_v49 }
 0x4e9   : > { %2689 = vmatmul.bf16.gmra.mxu0 %v5642_v31  ;;  %2778 = vmatmul.bf16.gmra.mxu1 %v5645_v54 }
 0x4ea   : > { %3097 = vst [vmem:[%s5063_s2 + $0xe8] sm:$0xff] %v3001_v28  ;;  %2867 = vmatmul.bf16.gmra.mxu2 %v5642_v31  ;;  %2956 = vmatmul.bf16.gmra.mxu3 %v5645_v54 }
 0x4ed   : > { %v2828_v43 = vpop.f32.mrf.mxu2  ;;  %v2917_v57 = vpop.f32.mrf.mxu3 }
 0x4ee   : > { %v2918_v39 = vadd.f32 %v2917_v57, %v2828_v43  ;;  %v2652_v26 = vpop.f32.mrf.mxu0  ;;  %v2741_v17 = vpop.f32.mrf.mxu1 }
 0x4ef   : > { %v2742_v15 = vadd.f32 %v2741_v17, %v2652_v26 }
 0x4f0   : > { %v3004_v34 = vpack.c.bf16 %v2918_v39, %v2740_v56 }
 0x4f2   : > { %3100 = vst [vmem:[%s5063_s2 + $0x100] sm:$0xff] %v3004_v34 }
 0x4f5   : > { %v2830_v21 = vpop.f32.mrf.mxu2  ;;  %v2919_v9 = vpop.f32.mrf.mxu3 }
 0x4f6   : > { %v2920_v8 = vadd.f32 %v2919_v9, %v2830_v21  ;;  %v2655_v55 = vpop.f32.mrf.mxu0  ;;  %v2744_v6 = vpop.f32.mrf.mxu1 }
 0x4f7   : > { %v2745_v52 = vadd.f32 %v2744_v6, %v2655_v55 }
 0x4f8   : > { %v3007_v33 = vpack.c.bf16 %v2920_v8, %v2742_v15 }
 0x4f9   : > { %2694 = vmatmul.bf16.gmra.mxu0 %v5666_v42  ;;  %2783 = vmatmul.bf16.gmra.mxu1 %v5668_v19 }
 0x4fa   : > { %3103 = vst [vmem:[%s5063_s2 + $0x118] sm:$0xff] %v3007_v33  ;;  %2872 = vmatmul.bf16.gmra.mxu2 %v5666_v42  ;;  %2961 = vmatmul.bf16.gmra.mxu3 %v5668_v19 }
 0x4fd   : > { %v2833_v31 = vpop.f32.mrf.mxu2  ;;  %v2922_v54 = vpop.f32.mrf.mxu3 }
 0x4fe   : > { %v2923_v5 = vadd.f32 %v2922_v54, %v2833_v31  ;;  %v2657_v27 = vpop.f32.mrf.mxu0  ;;  %v2746_v59 = vpop.f32.mrf.mxu1 }
 0x4ff   : > { %v2747_v62 = vadd.f32 %v2746_v59, %v2657_v27 }
 0x500   : > { %v3010_v25 = vpack.c.bf16 %v2923_v5, %v2745_v52 }
 0x502   : > { %3106 = vst [vmem:[%s5063_s2 + $0x130] sm:$0xff] %v3010_v25 }
 0x505   : > { %v2835_v46 = vpop.f32.mrf.mxu2  ;;  %v2924_v13 = vpop.f32.mrf.mxu3 }
 0x506   : > { %v2925_v4 = vadd.f32 %v2924_v13, %v2835_v46  ;;  %v2660_v22 = vpop.f32.mrf.mxu0  ;;  %v2749_v47 = vpop.f32.mrf.mxu1 }
 0x507   : > { %v2750_v32 = vadd.f32 %v2749_v47, %v2660_v22 }
 0x508   : > { %v3013_v7 = vpack.c.bf16 %v2925_v4, %v2747_v62 }
 0x509   : > { %2699 = vmatmul.bf16.gmra.mxu0 %v5688_v63  ;;  %2788 = vmatmul.bf16.gmra.mxu1 %v5690_v10 }
 0x50a   : > { %3109 = vst [vmem:[%s5063_s2 + $0x148] sm:$0xff] %v3013_v7  ;;  %2877 = vmatmul.bf16.gmra.mxu2 %v5688_v63  ;;  %2966 = vmatmul.bf16.gmra.mxu3 %v5690_v10 }
 0x50d   : > { %v2838_v42 = vpop.f32.mrf.mxu2  ;;  %v2927_v19 = vpop.f32.mrf.mxu3 }
 0x50e   : > { %v2928_v16 = vadd.f32 %v2927_v19, %v2838_v42  ;;  %v2662_v61 = vpop.f32.mrf.mxu0  ;;  %v2751_v58 = vpop.f32.mrf.mxu1 }
 0x50f   : > { %v2752_v3 = vadd.f32 %v2751_v58, %v2662_v61 }
 0x510   : > { %v3016_v12 = vpack.c.bf16 %v2928_v16, %v2750_v32 }
 0x512   : > { %3112 = vst [vmem:[%s5063_s2 + $0x160] sm:$0xff] %v3016_v12 }
 0x515   : > { %v2840_v23 = vpop.f32.mrf.mxu2  ;;  %v2929_v45 = vpop.f32.mrf.mxu3 }
 0x516   : > { %v2930_v50 = vadd.f32 %v2929_v45, %v2840_v23  ;;  %v2665_v44 = vpop.f32.mrf.mxu0  ;;  %v2754_v11 = vpop.f32.mrf.mxu1 }
 0x517   : > { %v2755_v0 = vadd.f32 %v2754_v11, %v2665_v44 }
 0x518   : > { %v3019_v30 = vpack.c.bf16 %v2930_v50, %v2752_v3 }
 0x51a   : > { %3115 = vst [vmem:[%s5063_s2 + $0x178] sm:$0xff] %v3019_v30 }
 0x51d   : > { %v2843_v63 = vpop.f32.mrf.mxu2  ;;  %v2932_v10 = vpop.f32.mrf.mxu3 }
 0x51e   : > { %v2933_v51 = vadd.f32 %v2932_v10, %v2843_v63  ;;  %v2667_v48 = vpop.f32.mrf.mxu0  ;;  %v2756_v1 = vpop.f32.mrf.mxu1 }
 0x51f   : > { %v2757_v24 = vadd.f32 %v2756_v1, %v2667_v48 }
 0x520   : > { %v3022_v35 = vpack.c.bf16 %v2933_v51, %v2755_v0 }
 0x522   : > { %3118 = vst [vmem:[%s5063_s2 + $0x190] sm:$0xff] %v3022_v35 }
 0x525   : > { %v2845_v53 = vpop.f32.mrf.mxu2  ;;  %v2934_v41 = vpop.f32.mrf.mxu3 }
 0x526   : > { %v2935_v18 = vadd.f32 %v2934_v41, %v2845_v53  ;;  %v2670_v60 = vpop.f32.mrf.mxu0  ;;  %v2759_v2 = vpop.f32.mrf.mxu1 }
 0x527   : > { %v2760_v37 = vadd.f32 %v2759_v2, %v2670_v60 }
 0x528   : > { %v3025_v36 = vpack.c.bf16 %v2935_v18, %v2757_v24 }
 0x52a   : > { %3121 = vst [vmem:[%s5063_s2 + $0x1a8] sm:$0xff] %v3025_v36 }
 0x52d   : > { %v2848_v20 = vpop.f32.mrf.mxu2  ;;  %v2937_v14 = vpop.f32.mrf.mxu3 }
 0x52e   : > { %v2938_v49 = vadd.f32 %v2937_v14, %v2848_v20  ;;  %v2672_v38 = vpop.f32.mrf.mxu0  ;;  %v2761_v29 = vpop.f32.mrf.mxu1 }
 0x52f   : > { %v2762_v57 = vadd.f32 %v2761_v29, %v2672_v38 }
 0x530   : > { %v3028_v40 = vpack.c.bf16 %v2938_v49, %v2760_v37 }
 0x532   : > { %3124 = vst [vmem:[%s5063_s2 + $0x1c0] sm:$0xff] %v3028_v40 }
 0x535   : > { %v2850_v28 = vpop.f32.mrf.mxu2  ;;  %v2939_v43 = vpop.f32.mrf.mxu3 }
 0x536   : > { %v2940_v56 = vadd.f32 %v2939_v43, %v2850_v28  ;;  %v2675_v39 = vpop.f32.mrf.mxu0  ;;  %v2764_v26 = vpop.f32.mrf.mxu1 }
 0x537   : > { %v2765_v9 = vadd.f32 %v2764_v26, %v2675_v39 }
 0x538   : > { %v3031_v17 = vpack.c.bf16 %v2940_v56, %v2762_v57 }
 0x53a   : > { %3127 = vst [vmem:[%s5063_s2 + $0x1d8] sm:$0xff] %v3031_v17 }
 0x53d   : > { %v2853_v34 = vpop.f32.mrf.mxu2  ;;  %v2942_v21 = vpop.f32.mrf.mxu3 }
 0x53e   : > { %v2943_v15 = vadd.f32 %v2942_v21, %v2853_v34  ;;  %v2677_v8 = vpop.f32.mrf.mxu0  ;;  %v2766_v55 = vpop.f32.mrf.mxu1 }
 0x53f   : > { %v2767_v54 = vadd.f32 %v2766_v55, %v2677_v8 }
 0x540   : > { %v3034_v6 = vpack.c.bf16 %v2943_v15, %v2765_v9 }
 0x542   : > { %3130 = vst [vmem:[%s5063_s2 + $0x1f0] sm:$0xff] %v3034_v6 }
 0x545   : > { %v2855_v33 = vpop.f32.mrf.mxu2  ;;  %v2944_v31 = vpop.f32.mrf.mxu3 }
 0x546   : > { %v2945_v52 = vadd.f32 %v2944_v31, %v2855_v33  ;;  %v2680_v5 = vpop.f32.mrf.mxu0  ;;  %v2769_v27 = vpop.f32.mrf.mxu1 }
 0x547   : > { %v2770_v13 = vadd.f32 %v2769_v27, %v2680_v5 }
 0x548   : > { %v3037_v59 = vpack.c.bf16 %v2945_v52, %v2767_v54 }
 0x54a   : > { %3133 = vst [vmem:[%s5063_s2 + $0x208] sm:$0xff] %v3037_v59 }
 0x54d   : > { %v2858_v25 = vpop.f32.mrf.mxu2  ;;  %v2947_v46 = vpop.f32.mrf.mxu3 }
 0x54e   : > { %v2948_v62 = vadd.f32 %v2947_v46, %v2858_v25  ;;  %v2682_v4 = vpop.f32.mrf.mxu0  ;;  %v2771_v22 = vpop.f32.mrf.mxu1 }
 0x54f   : > { %v2772_v19 = vadd.f32 %v2771_v22, %v2682_v4 }
 0x550   : > { %v3040_v47 = vpack.c.bf16 %v2948_v62, %v2770_v13 }
 0x552   : > { %3136 = vst [vmem:[%s5063_s2 + $0x220] sm:$0xff] %v3040_v47 }
 0x555   : > { %v2860_v7 = vpop.f32.mrf.mxu2  ;;  %v2949_v42 = vpop.f32.mrf.mxu3 }
 0x556   : > { %v2950_v32 = vadd.f32 %v2949_v42, %v2860_v7  ;;  %v2685_v16 = vpop.f32.mrf.mxu0  ;;  %v2774_v61 = vpop.f32.mrf.mxu1 }
 0x557   : > { %v2775_v45 = vadd.f32 %v2774_v61, %v2685_v16 }
 0x558   : > { %v3043_v58 = vpack.c.bf16 %v2950_v32, %v2772_v19 }
 0x55a   : > { %3139 = vst [vmem:[%s5063_s2 + $0x238] sm:$0xff] %v3043_v58 }
 0x55d   : > { %v2863_v12 = vpop.f32.mrf.mxu2  ;;  %v2952_v23 = vpop.f32.mrf.mxu3 }
 0x55e   : > { %v2953_v3 = vadd.f32 %v2952_v23, %v2863_v12  ;;  %v2687_v50 = vpop.f32.mrf.mxu0  ;;  %v2776_v44 = vpop.f32.mrf.mxu1 }
 0x55f   : > { %v2777_v10 = vadd.f32 %v2776_v44, %v2687_v50 }
 0x560   : > { %v3046_v11 = vpack.c.bf16 %v2953_v3, %v2775_v45 }
 0x562   : > { %3142 = vst [vmem:[%s5063_s2 + $0x250] sm:$0xff] %v3046_v11 }
 0x565   : > { %v2865_v30 = vpop.f32.mrf.mxu2  ;;  %v2954_v63 = vpop.f32.mrf.mxu3 }
 0x566   : > { %v2955_v0 = vadd.f32 %v2954_v63, %v2865_v30  ;;  %v2690_v51 = vpop.f32.mrf.mxu0  ;;  %v2779_v48 = vpop.f32.mrf.mxu1 }
 0x567   : > { %v2780_v41 = vadd.f32 %v2779_v48, %v2690_v51 }
 0x568   : > { %v3049_v1 = vpack.c.bf16 %v2955_v0, %v2777_v10 }
 0x56a   : > { %3145 = vst [vmem:[%s5063_s2 + $0x268] sm:$0xff] %v3049_v1 }
 0x56d   : > { %v2868_v35 = vpop.f32.mrf.mxu2  ;;  %v2957_v53 = vpop.f32.mrf.mxu3 }
 0x56e   : > { %v2958_v24 = vadd.f32 %v2957_v53, %v2868_v35  ;;  %v2692_v18 = vpop.f32.mrf.mxu0  ;;  %v2781_v60 = vpop.f32.mrf.mxu1 }
 0x56f   : > { %v2782_v14 = vadd.f32 %v2781_v60, %v2692_v18 }
 0x570   : > { %v3052_v2 = vpack.c.bf16 %v2958_v24, %v2780_v41 }
 0x572   : > { %3148 = vst [vmem:[%s5063_s2 + $0x280] sm:$0xff] %v3052_v2 }
 0x575   : > { %v2870_v36 = vpop.f32.mrf.mxu2  ;;  %v2959_v20 = vpop.f32.mrf.mxu3 }
 0x576   : > { %v2960_v37 = vadd.f32 %v2959_v20, %v2870_v36  ;;  %v2695_v49 = vpop.f32.mrf.mxu0  ;;  %v2784_v38 = vpop.f32.mrf.mxu1 }
 0x577   : > { %v2785_v43 = vadd.f32 %v2784_v38, %v2695_v49 }
 0x578   : > { %v3055_v29 = vpack.c.bf16 %v2960_v37, %v2782_v14 }
 0x57a   : > { %3151 = vst [vmem:[%s5063_s2 + $0x298] sm:$0xff] %v3055_v29 }
 0x57d   : > { %v2873_v40 = vpop.f32.mrf.mxu2  ;;  %v2962_v28 = vpop.f32.mrf.mxu3 }
 0x57e   : > { %v2963_v57 = vadd.f32 %v2962_v28, %v2873_v40  ;;  %v2697_v56 = vpop.f32.mrf.mxu0  ;;  %v2786_v39 = vpop.f32.mrf.mxu1 }
 0x57f   : > { %v2787_v21 = vadd.f32 %v2786_v39, %v2697_v56 }
 0x580   : > { %v3058_v26 = vpack.c.bf16 %v2963_v57, %v2785_v43 }
 0x582   : > { %3154 = vst [vmem:[%s5063_s2 + $0x2b0] sm:$0xff] %v3058_v26 }
 0x585   : > { %v2875_v17 = vpop.f32.mrf.mxu2  ;;  %v2964_v34 = vpop.f32.mrf.mxu3 }
 0x586   : > { %v2965_v9 = vadd.f32 %v2964_v34, %v2875_v17  ;;  %v2700_v8 = vpop.f32.mrf.mxu0  ;;  %v2789_v55 = vpop.f32.mrf.mxu1 }
 0x587   : > { %v2790_v31 = vadd.f32 %v2789_v55, %v2700_v8 }
 0x588   : > { %v3061_v15 = vpack.c.bf16 %v2965_v9, %v2787_v21 }
 0x58a   : > { %3157 = vst [vmem:[%s5063_s2 + $0x2c8] sm:$0xff] %v3061_v15 }
 0x58d   : > { %v2878_v6 = vpop.f32.mrf.mxu2  ;;  %v2967_v33 = vpop.f32.mrf.mxu3 }
 0x58e   : > { %v2968_v54 = vadd.f32 %v2967_v33, %v2878_v6  ;;  %v2702_v5 = vpop.f32.mrf.mxu0  ;;  %v2791_v27 = vpop.f32.mrf.mxu1 }
 0x58f   : > { %v2792_v46 = vadd.f32 %v2791_v27, %v2702_v5 }
 0x590   : > { %v3064_v52 = vpack.c.bf16 %v2968_v54, %v2790_v31 }
 0x592   : > { %3160 = vst [vmem:[%s5063_s2 + $0x2e0] sm:$0xff] %v3064_v52 }
 0x595   : > { %v2880_v59 = vpop.f32.mrf.mxu2  ;;  %v2969_v25 = vpop.f32.mrf.mxu3 }
 0x596   : > { %v2970_v13 = vadd.f32 %v2969_v25, %v2880_v59 }
 0x598   : > { %v3067_v62 = vpack.c.bf16 %v2970_v13, %v2792_v46 }
 0x59a   : > { %3163 = vst [vmem:[%s5063_s2 + $0x2f8] sm:$0xff] %v3067_v62 }
 0x59b   : > { %4113 = shalt.err (!%p4110_p0)
}
 0x59c   : > { %s4186_s7 = smov 384   ;;  %s4187_s11 = smov 24  }
 0x59d   : > { %3814 = dma.vmem_to_hbm [thread:$0]  (%p4302_p3), %s3181_s9, 12288, %s3183_s13, %s3165_s18, %s4186_s7, %s4186_s7, %s4187_s11  }
 0x59e PF: > { %s3197_s12 = sand.u32 1, %s4156_s15   ;;  %p3831_p5 = pnand %p3305_p9, %p4262_p6 }
 0x59f   : > { %s3198_s1 = scalar_lea.sflag [#allocation4], %s3197_s12 }
 0x5a0   : > { %p3832_p7 = pneg %p3831_p5 }
 0x5a2   : > { %4151 = dma.done.wait (%p3832_p7), %s3198_s1, 12288  }
 0x5a3   : > { %4153 = vsyncadd (%p3832_p7), %s3198_s1, 4294955008  ;;  %s22_s20 = sadd.s32 1, %s4176_s20   ;;  %s6104_s15 = smov %s4160_s16 }
 0x5a4   : > { %p19_p10 = scmp.ge.s32.totalorder %s22_s20, 4   ;;  %s6105_s16 = smov %s4164_s17 }
 0x5a5   : > { %s6106_s17 = smov %s4318_s24  ;;  %s6107_s18 = smov %s4172_s19 }
 0x5a6   : > { %s6108_s19 = smov %s6110_s8  ;;  %21 = sbr.rel (!%p19_p10) target bundleno = 11 (0xb), region = 93 }
 0x5ab   :  { %3204 = vsyncpa [#allocation3], 1 }
 0x5ac   :  { %3206 = vsyncpa [#allocation3 + $0x1], 1 }
 0x5ad   :  { %3207 = vsyncpa [#allocation6], 1 }
 0x5ae   :  { %3208 = vsyncpa [#allocation9], 1 }
 0x5af   :  { %3209 = vsyncpa [#allocation4], 1 }
 0x5b0   :  { %3211 = vsyncpa [#allocation4 + $0x1], 1 }

// kernel: tpu_custom_call.1
= control target key start
LH: loop header
LB: loop body
LE: loop exit
PB: predicated region body
PF: predicated region fallthrough
CT: control target
= control target key end

     0   :  { %s5939_s0 = inlined_call_operand.hbm [shape: f32[2,256,256], index: 0, kind: input, shape index: {}]   ;;  %s5940_s1 = inlined_call_operand.hbm [shape: f32[1,256], index: 1, kind: input, shape index: {}]   ;;  %s5941_s2 = inlined_call_operand.hbm [shape: f32[1,256], index: 2, kind: input, shape index: {}]   ;;  %s5942_s3 = inlined_call_operand.hbm [shape: bf16[256,768], index: 3, kind: input, shape index: {}]   ;;  %s5943_s4 = inlined_call_operand.hbm [shape: bf16[2,256,768], index: 4, kind: output, shape index: {}]  }
   0x1   :  { %6000 = sst [smem:[#allocation46_spill]] %s5940_s1 }
   0x2   :  { %6001 = sst [smem:[#allocation47_spill]] %s5941_s2 }
   0x3   :  { %9 = vsyncpa [#allocation3], 0 }
   0x4   :  { %11 = vsyncpa [#allocation3 + $0x1], 0 }
   0x5   :  { %12 = vsyncpa [#allocation6], 0 }
   0x6   :  { %13 = vsyncpa [#allocation9], 0 }
   0x7   :  { %14 = vsyncpa [#allocation4], 0 }
   0x8   :  { %16 = vsyncpa [#allocation4 + $0x1], 0  ;;  %s4213_s15 = smov 0   ;;  %s4215_s16 = smov 0  }
   0x9   :  { %s4217_s17 = smov 0   ;;  %s4219_s18 = smov 0  }
   0xa   :  { %s4221_s19 = smov 0   ;;  %s4223_s20 = smov 0  }
   0xb LB: > { %s3299_s21 = sadd.s32 4294967295, %s4176_s20   ;;  %s3300_s22 = sadd.s32 4294967294, %s4176_s20   ;;  %s4176_s20 = sphi %s4223_s20, %s22_s20   ;;  %s4172_s19 = sphi %s4221_s19, %s6108_s19   ;;  %s4168_s18 = sphi %s4219_s18, %s6107_s18   ;;  %s4164_s17 = sphi %s4217_s17, %s6106_s17   ;;  %s4160_s16 = sphi %s4215_s16, %s6105_s16   ;;  %s4156_s15 = sphi %s4213_s15, %s6104_s15  }
   0xc   : > { %p56_p0 = scmp.ne.s32.totalorder %s4160_s16, %s4156_s15  ;;  %p4247_p1 = scmp.eq.s32.totalorder %s3299_s21, 0 }
   0xd   : > { %p4251_p2 = scmp.eq.s32.totalorder %s3299_s21, 1  ;;  %p151_p3 = scmp.eq.s32.totalorder %s3300_s22, 1 }
   0xe   : > { %p4257_p4 = por %p4247_p1, %p56_p0  ;;  %p3301_p5 = scmp.ge.s32.totalorder %s4176_s20, 1 }
   0xf   : > { %p4262_p6 = por %p151_p3, %p56_p0  ;;  %p158_p7 = scmp.lt.s32.totalorder %s4176_s20, 3 }
  0x10   : > { %s6006_s1 = sld [smem:[#allocation46_spill]]  ;;  %p3305_p9 = scmp.ge.s32.totalorder %s4176_s20, 2 }
  0x11   : > { %p4270_p8 = pnand %p3301_p5, %p158_p7  ;;  %s4178_s5 = smov [#allocation5]  }
  0x12   : > { %s172_s6 = sshll.u32 %s4178_s5, 4  ;;  %s6008_s2 = sld [smem:[#allocation47_spill]]  ;;  %s173_s6 = int_to_ptr.vmem [resolvable:$true] %s172_s6 }
  0x13   : > { %p3816_p10 = pneg %p4270_p8  ;;  %s193_s13 = sshll.u32 %s5942_s3, 4  ;;  %s194_s13 = int_to_ptr.hbm [resolvable:$true] %s193_s13 }
  0x14   : > { %s4179_s14 = smov [#allocation7]   ;;  %s4180_s22 = smov [#allocation8]  }
  0x15   : > { %p4282_p11 = pnand %p3816_p10, %p4247_p1  ;;  %s184_s21 = sshll.u32 %s4179_s14, 4  ;;  %s185_s21 = int_to_ptr.vmem [resolvable:$true] %s184_s21 }
  0x16   : > { %s170_s29 = sshll.u32 %s6006_s1, 4  ;;  %s195_s27 = sshll.u32 %s4180_s22, 4  ;;  %s171_s29 = int_to_ptr.hbm [resolvable:$true] %s170_s29  ;;  %s196_s27 = int_to_ptr.vmem [resolvable:$true] %s195_s27 }
  0x17   : > { %3819 = dma.hbm_to_vmem [thread:$0]  (!%p4282_p11), %s171_s29, 32, %s173_s6, [#allocation6]  }
  0x18   : > { %s182_s9 = sshll.u32 %s6008_s2, 4  ;;  %s4181_s28 = smov 384   ;;  %s183_s9 = int_to_ptr.hbm [resolvable:$true] %s182_s9 }
  0x19   : > { %3822 = dma.hbm_to_vmem [thread:$0]  (!%p4282_p11), %s183_s9, 32, %s185_s21, [#allocation6]  }
  0x1a   : > { %s4182_s5 = smov 24   ;;  %s43_s7 = sadd.s32 1, %s4164_s17 }
  0x1b   : > { %3825 = dma.hbm_to_vmem [thread:$0]  (!%p4282_p11), %s194_s13, 12288, %s196_s27, [#allocation9], %s4181_s28, %s4181_s28, %s4182_s5  }
  0x1c   : > { %s34_s8 = sadd.s32 1, %s4172_s19  ;;  %p50_p12 = scmp.ne.s32.totalorder %s4164_s17, %s4160_s16 }
  0x1d   : > { %p36_p13 = scmp.ge.s32.totalorder %s34_s8, 2  ;;  %p51_p0 = scmp.eq.s32.totalorder %s4176_s20, 0 }
  0x1e   : > { %p4302_p3 = por %p4251_p2, %p50_p12  ;;  %p3837_p5 = scmp.lt.s32.totalorder %s4176_s20, 2 }
  0x1f   : > { %s6110_s8 = smov (%p36_p13, %s34_s8), 0  ;;  %p4309_p7 = por %p51_p0, %p50_p12 }
  0x20   : > { %s209_s9 = sand.u32 1, %s4164_s17   ;;  %s38_s10 = ssub.s32 %s4172_s19, %s6110_s8 }
  0x21   : > { %p41_p10 = scmp.eq.s32.totalorder %s38_s10, 0  ;;  %s3306_s11 = sshll.u32 %s209_s9, 9 }
  0x22   : > { %s3701_s12 = sshll.u32 %s4172_s19, 9  ;;  %s213_s22 = scalar_lea.vmem [#allocation2], %s3306_s11 }
  0x23   : > { %s4318_s24 = scalar_select %p41_p10, %s4164_s17, %s43_s7  }
  0x24   : > { %s221_s21 = scalar_lea.hbm %s5939_s0, %s3701_s12  ;;  %s224_s27 = sshll.u32 %s213_s22, 4  ;;  %s225_s27 = int_to_ptr.vmem [resolvable:$true] %s224_s27 }
  0x25   : > { %s222_s28 = sshll.u32 %s221_s21, 4  ;;  %p3827_p2 = pnand %p3837_p5, %p4309_p7  ;;  %s223_s28 = int_to_ptr.hbm [resolvable:$true] %s222_s28 }
  0x26   : > { %s210_s5 = scalar_lea.sflag [#allocation3], %s209_s9  ;;  %s4183_s1 = smov 256  }
  0x27   : > { %s4184_s2 = smov 16   ;;  %236 = sbr.rel (%p4270_p8) target bundleno = 1438 (0x59e), region = 36 }
  0x28   : > { %3829 = dma.hbm_to_vmem [thread:$0]  (!%p3827_p2), %s223_s28, 8192, %s225_s27, %s210_s5, %s4183_s1, %s4183_s1, %s4184_s2  }
  0x2c   : > { %s4330_s7 = sand.u32 1, %s4160_s16  }
  0x2d   : > { %s3310_s10 = sshll.u32 %s4330_s7, 9  ;;  %s239_s11 = scalar_lea.sflag [#allocation3], %s4330_s7 }
  0x2e   : > { %s4334_s12 = scalar_lea.vmem [#allocation2], %s3310_s10 }
  0x2f   : > { %4139 = dma.done.wait (%p4257_p4), %s239_s11, 8192  }
  0x30   : > { %4141 = vsyncadd (%p4257_p4), %s239_s11, 4294959104 }
  0x31   : > { %4143 = dma.done.wait (%p4247_p1), [#allocation6], 64  }
  0x32   : > { %4145 = vsyncadd (%p4247_p1), [#allocation6], 4294967232 }
  0x33   : > { %4147 = dma.done.wait (%p4247_p1), [#allocation9], 12288  }
  0x34   : > { %4149 = vsyncadd (%p4247_p1), [#allocation9], 4294955008  ;;  %v4349_v0 = vld [vmem:[%s4334_s12 + $0x20] sm:$0xff]  ;;  %v4352_v1 = vld [vmem:[%s4334_s12 + $0x28] sm:$0xff]  ;;  %v4185_v27 = vmov 256.0   ;;  %s3798_s1 = smul.u32 768, %s4330_s7 }
  0x35   : > { %v285_v2 = vld [vmem:[%s4334_s12] sm:$0xff]  ;;  %v355_v3 = vadd.f32 %v4352_v1, %v4349_v0  ;;  %v286_v4 = vld [vmem:[%s4334_s12 + $0x8] sm:$0xff]  ;;  %v291_v8 = vld [vmem:[%s4334_s12 + $0x30] sm:$0xff]  ;;  %3900 = vrcp.f32 %v4185_v27  ;;  %s3799_s23 = smul.u32 768, %s4168_s18  ;;  %s3165_s18 = scalar_lea.sflag [#allocation4], %s4330_s7 }
  0x36   : > { %v349_v5 = vadd.f32 %v286_v4, %v285_v2  ;;  %v293_v6 = vld [vmem:[%s4334_s12 + $0x40] sm:$0xff]  ;;  %v294_v7 = vld [vmem:[%s4334_s12 + $0x48] sm:$0xff]  ;;  %v292_v9 = vld [vmem:[%s4334_s12 + $0x38] sm:$0xff]  ;;  %s5063_s2 = scalar_lea.vmem [#allocation10], %s3798_s1  ;;  %s4106_s28 = scalar_lea.hbm %s5943_s4, 1536 }
  0x37   : > { %356 = vadd.xlane.f32.xlu1 %v355_v3  ;;  %v361_v10 = vadd.f32 %v294_v7, %v293_v6  ;;  %v287_v11 = vld [vmem:[%s4334_s12 + $0x10] sm:$0xff]  ;;  %v288_v12 = vld [vmem:[%s4334_s12 + $0x18] sm:$0xff]  ;;  %v358_v13 = vadd.f32 %v292_v9, %v291_v8  ;;  %v4379_v20 = vld [vmem:[%s4334_s12 + $0x60] sm:$0xff]  ;;  %s3179_s6 = scalar_lea.hbm %s5943_s4, %s3799_s23  ;;  %s3180_s9 = sshll.u32 %s5063_s2, 4  ;;  %s3181_s9 = int_to_ptr.vmem [resolvable:$true] %s3180_s9 }
  0x38   : > { %350 = vadd.xlane.f32.xlu0 %v349_v5  ;;  %v4365_v14 = vld [vmem:[%s4334_s12 + $0x50] sm:$0xff]  ;;  %v4368_v15 = vld [vmem:[%s4334_s12 + $0x58] sm:$0xff]  ;;  %v352_v16 = vadd.f32 %v288_v12, %v287_v11  ;;  %v4382_v21 = vld [vmem:[%s4334_s12 + $0x68] sm:$0xff]  ;;  %s3182_s13 = sshll.u32 %s3179_s6, 4  ;;  %s3183_s13 = int_to_ptr.hbm [resolvable:$true] %s3182_s13 }
  0x39   : > { %362 = vadd.xlane.f32.xlu2 %v361_v10  ;;  %v364_v17 = vadd.f32 %v4368_v15, %v4365_v14  ;;  %v4373_v18 = vld [vmem:[%s4334_s12 + $0x70] sm:$0xff]  ;;  %v4376_v19 = vld [vmem:[%s4334_s12 + $0x78] sm:$0xff]  ;;  %v367_v23 = vadd.f32 %v4382_v21, %v4379_v20  ;;  %v4389_v24 = vld [vmem:[%s4334_s12 + $0x80] sm:$0xff]  ;;  %s4100_s14 = sshra.s32 %s3183_s13, 4  ;;  %s4101_s14 = int_to_ptr.hbm [resolvable:$true] %s4100_s14 }
  0x3a   : > { %v370_v22 = vadd.f32 %v4376_v19, %v4373_v18  ;;  %v4392_v25 = vld [vmem:[%s4334_s12 + $0x88] sm:$0xff]  ;;  %v4410_v47 = vld [vmem:[%s4334_s12 + $0x90] sm:$0xff]  ;;  %v4413_v48 = vld [vmem:[%s4334_s12 + $0x98] sm:$0xff]  ;;  %s4102_s21 = scalar_lea.hbm %s4101_s14, 768  ;;  %p4107_p11 = scmp.lt.s32.totalorder %s4101_s14, %s5943_s4 }
  0x3b   : > { %v373_v26 = vadd.f32 %v4392_v25, %v4389_v24  ;;  %v3901_v28 = vpop.eup %3900  ;;  %v376_v55 = vadd.f32 %v4413_v48, %v4410_v47  ;;  %v4480_v27 = vld [vmem:[%s4334_s12 + $0xb0] sm:$0xff]  ;;  %p4103_p1 = scmp.ne.s32.totalorder %s4101_s14, %s4102_s21  ;;  %p4108_p12 = scmp.lt.s32.totalorder %s4106_s28, %s4102_s21 }
  0x3c   : > { %v446_v29 = vmul.f32 256.0, %v3901_v28  ;;  %vm450_vm0 = vweird.f32 %v3901_v28 }
  0x3d   : > { %p4104_p4 = pnand %p4103_p1, %p4302_p3  ;;  %p4109_p13 = por %p4108_p12, %p4107_p11 }
  0x3e   : > { %v447_v30 = vsub.f32 1.0, %v446_v29 }
  0x3f   : > { %359 = vadd.xlane.f32.xlu1 %v358_v13  ;;  %p4105_p8 = pneg %p4104_p4 }
  0x40   : > { %353 = vadd.xlane.f32.xlu0 %v352_v16  ;;  %v448_v31 = vmul.f32 %v3901_v28, %v447_v30 }
  0x41   : > { %365 = vadd.xlane.f32.xlu2 %v364_v17  ;;  %p4110_p0 = pnand %p4109_p13, %p4105_p8 }
  0x42   : > { %v449_v32 = vadd.f32 %v3901_v28, %v448_v31 }
  0x44   : > { %v4396_v33 = vsel %vm450_vm0, %v3901_v28, %v449_v32  ;;  %v4483_v28 = vld [vmem:[%s4334_s12 + $0xb8] sm:$0xff] }
  0x47   : > { %371 = vadd.xlane.f32.xlu1 %v370_v22 }
  0x48   : > { %368 = vadd.xlane.f32.xlu0 %v367_v23  ;;  %v4470_v23 = vld [vmem:[%s4334_s12 + $0xd0] sm:$0xff] }
  0x4f   : > { %374 = vadd.xlane.f32.xlu1 %v373_v26  ;;  %v4473_v26 = vld [vmem:[%s4334_s12 + $0xd8] sm:$0xff] }
  0x50   : > { %v388_v29 = vadd.f32 %v4473_v26, %v4470_v23 }
  0xaa   : > { %v357_v34 = vpop.xlane.xlu1 %356 }
  0xab   : > { %v351_v35 = vpop.xlane.xlu0 %350  ;;  %v454_v49 = vmul.f32 %v4396_v33, %v357_v34 }
  0xac   : > { %v452_v36 = vmul.f32 %v4396_v33, %v351_v35  ;;  %v363_v39 = vpop.xlane.xlu2 %362  ;;  %v382_v35 = vadd.f32 %v4483_v28, %v4480_v27 }
  0xad   : > { %v456_v46 = vmul.f32 %v4396_v33, %v363_v39  ;;  %v4436_v60 = vsub.f32 %v4349_v0, %v454_v49  ;;  %v4439_v61 = vsub.f32 %v4352_v1, %v454_v49  ;;  %v4497_v39 = vld [vmem:[%s4334_s12 + $0xe0] sm:$0xff] }
  0xae   : > { %v4399_v37 = vsub.f32 %v285_v2, %v452_v36  ;;  %v4401_v38 = vsub.f32 %v286_v4, %v452_v36 }
  0xaf   : > { %v4427_v56 = vsub.f32 %v293_v6, %v456_v46  ;;  %v4429_v57 = vsub.f32 %v294_v7, %v456_v46  ;;  %v552_v6 = vmul.f32 %v4436_v60, %v4436_v60  ;;  %v553_v7 = vmul.f32 %v4439_v61, %v4439_v61 }
  0xb0   : > { %v548_v40 = vmul.f32 %v4399_v37, %v4399_v37  ;;  %v549_v41 = vmul.f32 %v4401_v38, %v4401_v38 }
  0xb1   : > { %v556_v5 = vmul.f32 %v4427_v56, %v4427_v56  ;;  %v557_v0 = vmul.f32 %v4429_v57, %v4429_v57  ;;  %v618_v16 = vadd.f32 %v553_v7, %v552_v6  ;;  %v4554_v6 = vld [vmem:[%s4334_s12 + $0x110] sm:$0xff]  ;;  %v4557_v7 = vld [vmem:[%s4334_s12 + $0x118] sm:$0xff] }
  0xb2   : > { %v360_v42 = vpop.xlane.xlu1 %359  ;;  %v612_v43 = vadd.f32 %v549_v41, %v548_v40  ;;  %v4500_v40 = vld [vmem:[%s4334_s12 + $0xe8] sm:$0xff]  ;;  %v4507_v41 = vld [vmem:[%s4334_s12 + $0xc0] sm:$0xff] }
  0xb3   : > { %v455_v44 = vmul.f32 %v4396_v33, %v360_v42  ;;  %v354_v45 = vpop.xlane.xlu0 %353  ;;  %v624_v10 = vadd.f32 %v557_v0, %v556_v5  ;;  %v4510_v42 = vld [vmem:[%s4334_s12 + $0xc8] sm:$0xff]  ;;  %v4546_v0 = vld [vmem:[%s4334_s12 + $0x100] sm:$0xff] }
  0xb4   : > { %v453_v50 = vmul.f32 %v4396_v33, %v354_v45  ;;  %613 = vadd.xlane.f32.xlu2 %v612_v43  ;;  %v366_v3 = vpop.xlane.xlu2 %365  ;;  %v391_v43 = vadd.f32 %v4500_v40, %v4497_v39  ;;  %v385_v46 = vadd.f32 %v4510_v42, %v4507_v41 }
  0xb5   : > { %v4417_v51 = vsub.f32 %v291_v8, %v455_v44  ;;  %v4419_v52 = vsub.f32 %v292_v9, %v455_v44  ;;  %v457_v1 = vmul.f32 %v4396_v33, %v366_v3  ;;  %v4455_v8 = vld [vmem:[%s4334_s12 + $0xa0] sm:$0xff]  ;;  %v4458_v9 = vld [vmem:[%s4334_s12 + $0xa8] sm:$0xff] }
  0xb6   : > { %v4421_v53 = vsub.f32 %v287_v11, %v453_v50  ;;  %v4423_v54 = vsub.f32 %v288_v12, %v453_v50  ;;  %v379_v13 = vadd.f32 %v4458_v9, %v4455_v8 }
  0xb7   : > { %v554_v58 = vmul.f32 %v4417_v51, %v4417_v51  ;;  %v555_v59 = vmul.f32 %v4419_v52, %v4419_v52  ;;  %v4461_v11 = vsub.f32 %v4365_v14, %v457_v1  ;;  %v4464_v12 = vsub.f32 %v4368_v15, %v457_v1 }
  0xb8   : > { %v550_v62 = vmul.f32 %v4421_v53, %v4421_v53  ;;  %v551_v63 = vmul.f32 %v4423_v54, %v4423_v54 }
  0xb9   : > { %v621_v2 = vadd.f32 %v555_v59, %v554_v58  ;;  %v558_v14 = vmul.f32 %v4461_v11, %v4461_v11  ;;  %v559_v15 = vmul.f32 %v4464_v12, %v4464_v12  ;;  %v4531_v59 = vld [vmem:[%s4334_s12 + $0xf8] sm:$0xff] }
  0xba   : > { %v615_v4 = vadd.f32 %v551_v63, %v550_v62  ;;  %v372_v30 = vpop.xlane.xlu1 %371 }
  0xbb   : > { %622 = vadd.xlane.f32.xlu1 %v621_v2  ;;  %v369_v17 = vpop.xlane.xlu0 %368  ;;  %v627_v34 = vadd.f32 %v559_v15, %v558_v14  ;;  %v459_v36 = vmul.f32 %v4396_v33, %v372_v30  ;;  %v3747_v14 = vld [vmem:[#allocation8 + $0x164] sm:$0xf0]  ;;  %v3676_v15 = vld [vmem:[#allocation8 + $0x2d0] sm:$0xf] }
  0xbc   : > { %377 = vadd.xlane.f32.xlu2 %v376_v55  ;;  %616 = vadd.xlane.f32.xlu0 %v615_v4  ;;  %v458_v22 = vmul.f32 %v4396_v33, %v369_v17  ;;  %v3795_v30 = vld [vmem:[#allocation8 + $0x2e4] sm:$0xf0] }
  0xbd   : > { %v4515_v44 = vsub.f32 %v4373_v18, %v459_v36  ;;  %v4518_v45 = vsub.f32 %v4376_v19, %v459_v36  ;;  %v4528_v19 = vld [vmem:[%s4334_s12 + $0xf0] sm:$0xff]  ;;  %v3677_v36 = vor.u32 %v3795_v30, %v3676_v15  ;;  %v3732_v30 = vld [vmem:[#allocation8 + $0xf4] sm:$0xf] }
  0xbe   : > { %v4488_v31 = vsub.f32 %v4379_v20, %v458_v22  ;;  %v4491_v32 = vsub.f32 %v4382_v21, %v458_v22  ;;  %v394_v3 = vadd.f32 %v4531_v59, %v4528_v19  ;;  %v3484_v22 = vld [vmem:[#allocation8 + $0x150] sm:$0xf] }
  0xbf   : > { %v562_v58 = vmul.f32 %v4515_v44, %v4515_v44  ;;  %v563_v18 = vmul.f32 %v4518_v45, %v4518_v45  ;;  %1993 = vmatpush.bf16.msra.mxu1 %v3677_v36 }
  0xc0   : > { %v560_v20 = vmul.f32 %v4488_v31, %v4488_v31  ;;  %v561_v21 = vmul.f32 %v4491_v32, %v4491_v32 }
  0xc1   : > { %v633_v2 = vadd.f32 %v563_v18, %v562_v58  ;;  %v3789_v18 = vld [vmem:[#allocation8 + $0x2b4] sm:$0xf0] }
  0xc2   : > { %v630_v49 = vadd.f32 %v561_v21, %v560_v20  ;;  %v375_v50 = vpop.xlane.xlu1 %374  ;;  %v3792_v21 = vld [vmem:[#allocation8 + $0x2d4] sm:$0xf] }
  0xc3   : > { %625 = vadd.xlane.f32.xlu1 %v624_v10  ;;  %v460_v55 = vmul.f32 %v4396_v33, %v375_v50  ;;  %v400_v10 = vadd.f32 %v4557_v7, %v4554_v6  ;;  %v3741_v50 = vld [vmem:[#allocation8 + $0x134] sm:$0xf0] }
  0xc4   : > { %380 = vadd.xlane.f32.xlu2 %v379_v13  ;;  %619 = vadd.xlane.f32.xlu0 %v618_v16  ;;  %v4562_v13 = vld [vmem:[%s4334_s12 + $0x120] sm:$0xff]  ;;  %v4565_v16 = vld [vmem:[%s4334_s12 + $0x128] sm:$0xff] }
  0xc5   : > { %v4534_v62 = vsub.f32 %v4389_v24, %v460_v55  ;;  %v4537_v63 = vsub.f32 %v4392_v25, %v460_v55  ;;  %v4549_v24 = vld [vmem:[%s4334_s12 + $0x108] sm:$0xff]  ;;  %v403_v17 = vadd.f32 %v4565_v16, %v4562_v13  ;;  %v3652_v55 = vld [vmem:[#allocation8 + $0x2a0] sm:$0xf] }
  0xc6   : > { %v397_v1 = vadd.f32 %v4549_v24, %v4546_v0 }
  0xc7   : > { %6012 = vst [vmem:[#allocation15_spill] sm:$0xff] %v4537_v63  ;;  %v564_v4 = vmul.f32 %v4534_v62, %v4534_v62  ;;  %v565_v5 = vmul.f32 %v4537_v63, %v4537_v63 }
  0xc9   : > { %v636_v25 = vadd.f32 %v565_v5, %v564_v4  ;;  %v3653_v4 = vor.u32 %v3789_v18, %v3652_v55  ;;  %v3726_v18 = vld [vmem:[#allocation8 + $0xc4] sm:$0xf] }
  0xcb   : > { %389 = vadd.xlane.f32.xlu1 %v388_v29  ;;  %v3485_v29 = vor.u32 %v3747_v14, %v3484_v22  ;;  %1994 = vmatpush.bf16.msra.mxu1 %v3653_v4  ;;  %v3735_v22 = vld [vmem:[#allocation8 + $0x104] sm:$0xf0]  ;;  %v3628_v14 = vld [vmem:[#allocation8 + $0x270] sm:$0xf] }
  0xcc   : > { %628 = vadd.xlane.f32.xlu2 %v627_v34  ;;  %383 = vadd.xlane.f32.xlu0 %v382_v35  ;;  %v3744_v34 = vld [vmem:[#allocation8 + $0x154] sm:$0xf]  ;;  %v3486_v35 = vld [vmem:[#allocation8 + $0x168] sm:$0xf0] }
  0xcd   : > { %v3489_v20 = vor.u32 %v3744_v34, %v3486_v35  ;;  %1904 = vmatpush.bf16.msra.mxu0 %v3485_v29  ;;  %v3783_v29 = vld [vmem:[#allocation8 + $0x284] sm:$0xf0]  ;;  %v3438_v34 = vld [vmem:[#allocation8 + $0x108] sm:$0xf0] }
  0xce   : > { %v3629_v35 = vor.u32 %v3783_v29, %v3628_v14  ;;  %v3441_v36 = vor.u32 %v3732_v30, %v3438_v34  ;;  %v3720_v29 = vld [vmem:[#allocation8 + $0x94] sm:$0xf]  ;;  %v3390_v30 = vld [vmem:[#allocation8 + $0xa8] sm:$0xf0] }
  0xcf   : > { %2082 = vmatpush.bf16.msra.mxu2 %v3489_v20  ;;  %v3780_v20 = vld [vmem:[#allocation8 + $0x274] sm:$0xf] }
  0xd0   : > { %1995 = vmatpush.bf16.msra.mxu1 %v3629_v35  ;;  %v3393_v35 = vor.u32 %v3720_v29, %v3390_v30  ;;  %v3759_v29 = vld [vmem:[#allocation8 + $0x1c4] sm:$0xf0]  ;;  %v3708_v30 = vld [vmem:[#allocation8 + $0x34] sm:$0xf] }
  0xd3   : > { %392 = vadd.xlane.f32.xlu1 %v391_v43  ;;  %v3678_v43 = vld [vmem:[#allocation8 + $0x2e8] sm:$0xf0] }
  0xd4   : > { %386 = vadd.xlane.f32.xlu0 %v385_v46  ;;  %631 = vadd.xlane.f32.xlu2 %v630_v49  ;;  %v3681_v46 = vor.u32 %v3792_v21, %v3678_v43  ;;  %v3460_v49 = vld [vmem:[#allocation8 + $0x120] sm:$0xf]  ;;  %v3630_v21 = vld [vmem:[#allocation8 + $0x288] sm:$0xf0] }
  0xd5   : > { %v3461_v58 = vor.u32 %v3741_v50, %v3460_v49  ;;  %v3633_v43 = vor.u32 %v3780_v20, %v3630_v21  ;;  %v3729_v49 = vld [vmem:[#allocation8 + $0xd4] sm:$0xf0]  ;;  %v3604_v50 = vld [vmem:[#allocation8 + $0x240] sm:$0xf]  ;;  %v3582_v20 = vld [vmem:[#allocation8 + $0x228] sm:$0xf0] }
  0xd6   : > { %2171 = vmatpush.bf16.msra.mxu3 %v3681_v46  ;;  %v3412_v46 = vld [vmem:[#allocation8 + $0xc0] sm:$0xf] }
  0xd7   : > { %1905 = vmatpush.bf16.msra.mxu0 %v3461_v58  ;;  %v3413_v55 = vor.u32 %v3729_v49, %v3412_v46  ;;  %v3777_v58 = vld [vmem:[#allocation8 + $0x254] sm:$0xf0]  ;;  %v3556_v49 = vld [vmem:[#allocation8 + $0x1e0] sm:$0xf] }
  0xd8   : > { %v3717_v46 = vld [vmem:[#allocation8 + $0x74] sm:$0xf0] }
  0xdc   : > { %634 = vadd.xlane.f32.xlu0 %v633_v2  ;;  %395 = vadd.xlane.f32.xlu2 %v394_v3  ;;  %v3738_v2 = vld [vmem:[#allocation8 + $0x124] sm:$0xf]  ;;  %v3462_v3 = vld [vmem:[#allocation8 + $0x138] sm:$0xf0] }
  0xdd   : > { %v3465_v5 = vor.u32 %v3738_v2, %v3462_v3  ;;  %v3414_v2 = vld [vmem:[#allocation8 + $0xd8] sm:$0xf0]  ;;  %v3605_v3 = vor.u32 %v3777_v58, %v3604_v50  ;;  %v3714_v58 = vld [vmem:[#allocation8 + $0x64] sm:$0xf] }
  0xde   : > { %v3417_v4 = vor.u32 %v3726_v18, %v3414_v2  ;;  %v3366_v18 = vld [vmem:[#allocation8 + $0x78] sm:$0xf0] }
  0xdf   : > { %2083 = vmatpush.bf16.msra.mxu2 %v3465_v5  ;;  %v3774_v5 = vld [vmem:[#allocation8 + $0x244] sm:$0xf]  ;;  %1996 = vmatpush.bf16.msra.mxu1 %v3605_v3  ;;  %v3369_v3 = vor.u32 %v3714_v58, %v3366_v18 }
  0xe3   : > { %2084 = vmatpush.bf16.msra.mxu2 %v3441_v36  ;;  %v3768_v36 = vld [vmem:[#allocation8 + $0x214] sm:$0xf] }
  0xe4   : > { %637 = vadd.xlane.f32.xlu0 %v636_v25  ;;  %398 = vadd.xlane.f32.xlu2 %v397_v1  ;;  %v3786_v25 = vld [vmem:[#allocation8 + $0x2a4] sm:$0xf]  ;;  %v3654_v1 = vld [vmem:[#allocation8 + $0x2b8] sm:$0xf0]  ;;  %v3585_v21 = vor.u32 %v3768_v36, %v3582_v20  ;;  %v3756_v20 = vld [vmem:[#allocation8 + $0x1b4] sm:$0xf] }
  0xe7   : > { %2085 = vmatpush.bf16.msra.mxu2 %v3417_v4  ;;  %v3762_v4 = vld [vmem:[#allocation8 + $0x1e4] sm:$0xf] }
  0xeb   : > { %2086 = vmatpush.bf16.msra.mxu2 %v3393_v35 }
  0xec   : > { %401 = vadd.xlane.f32.xlu0 %v400_v10  ;;  %v3657_v10 = vor.u32 %v3786_v25, %v3654_v1  ;;  %v3606_v25 = vld [vmem:[#allocation8 + $0x258] sm:$0xf0] }
  0xed   : > { %v3609_v1 = vor.u32 %v3774_v5, %v3606_v25  ;;  %v3558_v5 = vld [vmem:[#allocation8 + $0x1f8] sm:$0xf0] }
  0xee   : > { %2172 = vmatpush.bf16.msra.mxu3 %v3657_v10  ;;  %v3388_v10 = vld [vmem:[#allocation8 + $0x90] sm:$0xf]  ;;  %v3561_v25 = vor.u32 %v3762_v4, %v3558_v5 }
  0xef   : > { %2087 = vmatpush.bf16.msra.mxu2 %v3369_v3 }
  0xf2   : > { %2173 = vmatpush.bf16.msra.mxu3 %v3633_v43  ;;  %v3364_v43 = vld [vmem:[#allocation8 + $0x60] sm:$0xf] }
  0xf3   : > { %v3365_v50 = vor.u32 %v3717_v46, %v3364_v43 }
  0xf4   : > { %404 = vadd.xlane.f32.xlu0 %v403_v17  ;;  %v3436_v17 = vld [vmem:[#allocation8 + $0xf0] sm:$0xf] }
  0xf5   : > { %v3437_v15 = vor.u32 %v3735_v22, %v3436_v17  ;;  %v3723_v17 = vld [vmem:[#allocation8 + $0xa4] sm:$0xf0]  ;;  %v3580_v22 = vld [vmem:[#allocation8 + $0x210] sm:$0xf] }
  0xf6   : > { %2174 = vmatpush.bf16.msra.mxu3 %v3609_v1  ;;  %v3389_v14 = vor.u32 %v3723_v17, %v3388_v10  ;;  %v3340_v10 = vld [vmem:[#allocation8 + $0x30] sm:$0xf]  ;;  %v3711_v17 = vld [vmem:[#allocation8 + $0x44] sm:$0xf0] }
  0xf7   : > { %1906 = vmatpush.bf16.msra.mxu0 %v3437_v15  ;;  %v3771_v15 = vld [vmem:[#allocation8 + $0x224] sm:$0xf0] }
  0xf8   : > { %v3581_v34 = vor.u32 %v3771_v15, %v3580_v22  ;;  %v3532_v22 = vld [vmem:[#allocation8 + $0x1b0] sm:$0xf]  ;;  %v3341_v15 = vor.u32 %v3711_v17, %v3340_v10 }
  0xf9   : > { %v3533_v35 = vor.u32 %v3759_v29, %v3532_v22  ;;  %v3508_v29 = vld [vmem:[#allocation8 + $0x180] sm:$0xf] }
  0xfa   : > { %1997 = vmatpush.bf16.msra.mxu1 %v3581_v34  ;;  %2175 = vmatpush.bf16.msra.mxu3 %v3585_v21  ;;  %v3342_v34 = vld [vmem:[#allocation8 + $0x48] sm:$0xf0] }
  0xfb   : > { %1907 = vmatpush.bf16.msra.mxu0 %v3413_v55  ;;  %v3765_v55 = vld [vmem:[#allocation8 + $0x1f4] sm:$0xf0]  ;;  %v3345_v36 = vor.u32 %v3708_v30, %v3342_v34  ;;  %v3534_v21 = vld [vmem:[#allocation8 + $0x1c8] sm:$0xf0] }
  0xfc   : > { %v3557_v2 = vor.u32 %v3765_v55, %v3556_v49  ;;  %v3537_v46 = vor.u32 %v3756_v20, %v3534_v21  ;;  %v3318_v20 = vld [vmem:[#allocation8 + $0x18] sm:$0xf0] }
  0xfd   : > { %2088 = vmatpush.bf16.msra.mxu2 %v3345_v36  ;;  %v3702_v36 = vld [vmem:[#allocation8 + $0x4] sm:$0xf] }
  0xfe   : > { %1998 = vmatpush.bf16.msra.mxu1 %v3557_v2  ;;  %2176 = vmatpush.bf16.msra.mxu3 %v3561_v25 }
  0xff   : > { %1908 = vmatpush.bf16.msra.mxu0 %v3389_v14 }
 0x102   : > { %1999 = vmatpush.bf16.msra.mxu1 %v3533_v35  ;;  %2177 = vmatpush.bf16.msra.mxu3 %v3537_v46  ;;  %v3753_v35 = vld [vmem:[#allocation8 + $0x194] sm:$0xf0] }
 0x103   : > { %1909 = vmatpush.bf16.msra.mxu0 %v3365_v50 }
 0x107   : > { %1910 = vmatpush.bf16.msra.mxu0 %v3341_v15  ;;  %v3705_v15 = vld [vmem:[#allocation8 + $0x14] sm:$0xf0] }
 0x127   : > { %v614_v1 = vpop.xlane.xlu2 %613 }
 0x128   : > { %v708_v14 = vmul.f32 %v614_v1, %v4396_v33 }
 0x12a   : > { %v4570_v43 = vadd.f32 1e-05, %v708_v14 }
 0x12c   : > { %3902 = vrsqrt.f32 %v4570_v43  ;;  %vm778_vm2 = vweird.f32 %v4570_v43 }
 0x12e   : > { %v623_v49 = vpop.xlane.xlu1 %622 }
 0x12f   : > { %v711_v50 = vmul.f32 %v623_v49, %v4396_v33  ;;  %v378_v55 = vpop.xlane.xlu2 %377  ;;  %v617_v58 = vpop.xlane.xlu0 %616 }
 0x130   : > { %v461_v18 = vmul.f32 %v4396_v33, %v378_v55  ;;  %v709_v2 = vmul.f32 %v617_v58, %v4396_v33  ;;  %v3509_v55 = vor.u32 %v3753_v35, %v3508_v29  ;;  %v3321_v58 = vor.u32 %v3702_v36, %v3318_v20 }
 0x131   : > { %v4576_v3 = vadd.f32 1e-05, %v711_v50 }
 0x132   : > { %v3903_v4 = vpop.eup %3902  ;;  %v4579_v5 = vsub.f32 %v4410_v47, %v461_v18  ;;  %v4582_v25 = vsub.f32 %v4413_v48, %v461_v18  ;;  %v4584_v1 = vadd.f32 1e-05, %v709_v2  ;;  %v3316_v47 = vld [vmem:[#allocation8] sm:$0xf]  ;;  %v3750_v18 = vld [vmem:[#allocation8 + $0x184] sm:$0xf]  ;;  %2000 = vmatpush.bf16.msra.mxu1 %v3509_v55  ;;  %2089 = vmatpush.bf16.msra.mxu2 %v3321_v58 }
 0x133   : > { %v773_v10 = vmul.f32 %v3903_v4, %v4570_v43  ;;  %3904 = vrsqrt.f32 %v4576_v3  ;;  %v3317_v34 = vor.u32 %v3705_v15, %v3316_v47  ;;  %v3510_v2 = vld [vmem:[#allocation8 + $0x198] sm:$0xf0]  ;;  %vm779_vm1 = vweird.f32 %v3903_v4 }
 0x134   : > { %6013 = vst [vmem:[#allocation16_spill] sm:$0xff] %v4579_v5  ;;  %3906 = vrsqrt.f32 %v4584_v1  ;;  %v566_v17 = vmul.f32 %v4579_v5, %v4579_v5  ;;  %v567_v22 = vmul.f32 %v4582_v25, %v4582_v25  ;;  %vm780_vm3 = vmor %vm778_vm2, %vm779_vm1  ;;  %vm788_vm5 = vweird.f32 %v4584_v1 }
 0x135   : > { %6014 = vst [vmem:[#allocation17_spill] sm:$0xff] %v4582_v25  ;;  %v774_v14 = vmul.f32 %v3903_v4, %v773_v10  ;;  %1911 = vmatpush.bf16.msra.mxu0 %v3317_v34  ;;  %vm808_vm6 = vweird.f32 %v4576_v3 }
 0x136   : > { %v626_v48 = vpop.xlane.xlu1 %625  ;;  %v639_v30 = vadd.f32 %v567_v22, %v566_v17  ;;  %v3513_v17 = vor.u32 %v3750_v18, %v3510_v2 }
 0x137   : > { %v775_v21 = vmul.f32 0.5, %v774_v14  ;;  %v712_v46 = vmul.f32 %v626_v48, %v4396_v33  ;;  %v381_v49 = vpop.xlane.xlu2 %380  ;;  %v620_v50 = vpop.xlane.xlu0 %619 }
 0x138   : > { %v462_v10 = vmul.f32 %v4396_v33, %v381_v49  ;;  %v710_v25 = vmul.f32 %v620_v50, %v4396_v33  ;;  %640 = vadd.xlane.f32.xlu1 %v639_v30  ;;  %2178 = vmatpush.bf16.msra.mxu3 %v3513_v17 }
 0x139   : > { %v4596_v22 = vpop.eup %3904  ;;  %v776_v47 = vsub.f32 1.5, %v775_v21  ;;  %v4598_v15 = vadd.f32 1e-05, %v712_v46  ;;  %v1156_v46 = vld [vmem:[#allocation5] sm:$0x3] }
 0x13a   : > { %v3907_v14 = vpop.eup %3906  ;;  %v803_v29 = vmul.f32 %v4596_v22, %v4576_v3  ;;  %v4603_v48 = vsub.f32 %v4455_v8, %v462_v10  ;;  %v4606_v35 = vsub.f32 %v4458_v9, %v462_v10  ;;  %v4611_v20 = vadd.f32 1e-05, %v710_v25  ;;  %v1226_v25 = vld [vmem:[#allocation7] sm:$0x3] }
 0x13b   : > { %v777_v30 = vmul.f32 %v3903_v4, %v776_v47  ;;  %v783_v34 = vmul.f32 %v3907_v14, %v4584_v1  ;;  %3908 = vrsqrt.f32 %v4598_v15  ;;  %v4619_v10 = vperm.slane %v1156_v46, 0 }
 0x13c   : > { %6015 = vst [vmem:[#allocation18_spill] sm:$0xff] %v4603_v48  ;;  %v804_v36 = vmul.f32 %v4596_v22, %v803_v29  ;;  %v568_v21 = vmul.f32 %v4603_v48, %v4603_v48  ;;  %v569_v9 = vmul.f32 %v4606_v35, %v4606_v35  ;;  %3910 = vrsqrt.f32 %v4611_v20 }
 0x13d   : > { %6016 = vst [vmem:[#allocation19_spill] sm:$0xff] %v4606_v35  ;;  %v784_v8 = vmul.f32 %v3907_v14, %v783_v34  ;;  %v781_v49 = vsel %vm780_vm3, %v3903_v4, %v777_v30  ;;  %v4621_v17 = vperm.slane %v1156_v46, 1  ;;  %vm789_vm4 = vweird.f32 %v3907_v14  ;;  %v4627_v34 = vld [vmem:[%s4334_s12 + $0x130] sm:$0xff] }
 0x13e   : > { %v805_v50 = vmul.f32 0.5, %v804_v36  ;;  %v390_v43 = vpop.xlane.xlu1 %389  ;;  %v642_v2 = vadd.f32 %v569_v9, %v568_v21  ;;  %v1092_v4 = vmul.f32 %v781_v49, %v4399_v37  ;;  %v1093_v29 = vmul.f32 %v781_v49, %v4401_v38  ;;  %6017 = vst [vmem:[#allocation20_spill] sm:$0xff] %v4627_v34  ;;  %v4630_v36 = vld [vmem:[%s4334_s12 + $0x138] sm:$0xff]  ;;  %v4642_v38 = vld [vmem:[%s4334_s12 + $0x140] sm:$0xff]  ;;  %v4645_v49 = vld [vmem:[%s4334_s12 + $0x148] sm:$0xff] }
 0x13f   : > { %v785_v55 = vmul.f32 0.5, %v784_v8  ;;  %v629_v58 = vpop.xlane.xlu2 %628  ;;  %v384_v18 = vpop.xlane.xlu0 %383  ;;  %6018 = vst [vmem:[#allocation21_spill] sm:$0xff] %v4630_v36  ;;  %v4632_v21 = vperm.slane %v1226_v25, 0  ;;  %v4636_v9 = vperm.slane %v1226_v25, 1  ;;  %vm809_vm7 = vweird.f32 %v4596_v22  ;;  %vm790_vm8 = vmor %vm788_vm5, %vm789_vm4 }
 0x140   : > { %v713_v47 = vmul.f32 %v629_v58, %v4396_v33  ;;  %643 = vadd.xlane.f32.xlu1 %v642_v2  ;;  %v806_v8 = vsub.f32 1.5, %v805_v50  ;;  %6019 = vst [vmem:[#allocation22_spill] sm:$0xff] %v4642_v38  ;;  %v465_v50 = vmul.f32 %v4396_v33, %v390_v43  ;;  %v406_v25 = vadd.f32 %v4630_v36, %v4627_v34  ;;  %vm4661_vm9 = vmor %vm808_vm6, %vm809_vm7 }
 0x141   : > { %v786_v30 = vsub.f32 1.5, %v785_v55  ;;  %v4634_v46 = vpop.eup %3908  ;;  %6020 = vst [vmem:[#allocation23_spill] sm:$0xff] %v4645_v49  ;;  %v1162_v1 = vmul.f32 %v4619_v10, %v1092_v4  ;;  %v1163_v2 = vmul.f32 %v4621_v17, %v1093_v29  ;;  %v409_v5 = vadd.f32 %v4645_v49, %v4642_v38 }
 0x142   : > { %v4639_v37 = vadd.f32 1e-05, %v713_v47  ;;  %v3911_v55 = vpop.eup %3910  ;;  %v807_v35 = vmul.f32 %v4596_v22, %v806_v8  ;;  %v813_v4 = vmul.f32 %v4634_v46, %v4598_v15  ;;  %vm798_vm10 = vweird.f32 %v4611_v20 }
 0x143   : > { %v787_v58 = vmul.f32 %v3907_v14, %v786_v30  ;;  %v793_v30 = vmul.f32 %v3911_v55, %v4611_v20  ;;  %v1232_v38 = vadd.f32 %v4632_v21, %v1162_v1  ;;  %v4678_v34 = vsub.f32 %v4473_v26, %v465_v50 }
 0x144   : > { %3912 = vrsqrt.f32 %v4639_v37  ;;  %v814_v63 = vmul.f32 %v4634_v46, %v813_v4  ;;  %vm799_vm11 = vweird.f32 %v3911_v55  ;;  %vm818_vm13 = vweird.f32 %v4598_v15 }
 0x145   : > { %v791_v47 = vsel %vm790_vm8, %v3907_v14, %v787_v58  ;;  %v794_v29 = vmul.f32 %v3911_v55, %v793_v30  ;;  %v4672_v58 = vsub.f32 %v4470_v23, %v465_v50  ;;  %v1233_v30 = vadd.f32 %v4636_v9, %v1163_v2  ;;  %vm800_vm12 = vmor %vm798_vm10, %vm799_vm11 }
 0x146   : > { %v1094_v3 = vmul.f32 %v791_v47, %v4421_v53  ;;  %v1095_v48 = vmul.f32 %v791_v47, %v4423_v54  ;;  %v463_v47 = vmul.f32 %v4396_v33, %v384_v18  ;;  %v393_v49 = vpop.xlane.xlu1 %392  ;;  %vm819_vm14 = vweird.f32 %v4634_v46 }
 0x147   : > { %v632_v14 = vpop.xlane.xlu2 %631  ;;  %v387_v8 = vpop.xlane.xlu0 %386  ;;  %v795_v36 = vmul.f32 0.5, %v794_v29  ;;  %v466_v2 = vmul.f32 %v4396_v33, %v393_v49  ;;  %v574_v49 = vmul.f32 %v4672_v58, %v4672_v58  ;;  %vm828_vm15 = vweird.f32 %v4639_v37  ;;  %vm820_vm2 = vmor %vm818_vm13, %vm819_vm14 }
 0x148   : > { %v1164_v53 = vmul.f32 %v4619_v10, %v1094_v3  ;;  %v1165_v54 = vmul.f32 %v4621_v17, %v1095_v48  ;;  %407 = vadd.xlane.f32.xlu1 %v406_v25  ;;  %v811_v3 = vsel %vm4661_vm9, %v4596_v22, %v807_v35  ;;  %v714_v18 = vmul.f32 %v632_v14, %v4396_v33 }
 0x149   : > { %v796_v1 = vsub.f32 1.5, %v795_v36  ;;  %v4693_v50 = vsub.f32 %v4480_v27, %v463_v47  ;;  %v4696_v22 = vsub.f32 %v4483_v28, %v463_v47  ;;  %v464_v36 = vmul.f32 %v4396_v33, %v387_v8 }
 0x14a   : > { %v1234_v48 = vadd.f32 %v4632_v21, %v1164_v53  ;;  %v1235_v23 = vadd.f32 %v4636_v9, %v1165_v54  ;;  %v4698_v35 = vpop.eup %3912  ;;  %v4700_v43 = vadd.f32 1e-05, %v714_v18  ;;  %v1099_v4 = vmul.f32 %v811_v3, %v4419_v52 }
 0x14b   : > { %v797_v25 = vmul.f32 %v3911_v55, %v796_v1  ;;  %v823_v27 = vmul.f32 %v4698_v35, %v4639_v37  ;;  %v815_v28 = vmul.f32 0.5, %v814_v63  ;;  %v4714_v8 = vsub.f32 %v4497_v39, %v466_v2 }
 0x14c   : > { %v4688_v29 = vpack.c.bf16 %v1234_v48, %v1232_v38  ;;  %v4690_v26 = vpack.c.bf16 %v1235_v23, %v1233_v30  ;;  %v1098_v38 = vmul.f32 %v811_v3, %v4417_v51  ;;  %v4717_v53 = vsub.f32 %v4500_v40, %v466_v2 }
 0x14d   : > { %v801_v14 = vsel %vm800_vm12, %v3911_v55, %v797_v25  ;;  %v824_v47 = vmul.f32 %v4698_v35, %v823_v27  ;;  %v575_v63 = vmul.f32 %v4678_v34, %v4678_v34  ;;  %3914 = vrsqrt.f32 %v4700_v43 }
 0x14e   : > { %6023 = vst [vmem:[#allocation24_spill] sm:$0xff] %v4688_v29  ;;  %1912 = vmatmul.bf16.vlgmr.msra.gmra.mxu0 %v4688_v29  ;;  %2001 = vmatmul.bf16.vlgmr.msra.gmra.mxu1 %v4690_v26  ;;  %v1096_v20 = vmul.f32 %v801_v14, %v4436_v60  ;;  %v1097_v54 = vmul.f32 %v801_v14, %v4439_v61  ;;  %vm829_vm0 = vweird.f32 %v4698_v35  ;;  %vm838_vm3 = vweird.f32 %v4700_v43 }
 0x14f   : > { %6024 = vst [vmem:[#allocation25_spill] sm:$0xff] %v4690_v26  ;;  %2090 = vmatmul.bf16.vlgmr.msra.gmra.mxu2 %v4688_v29  ;;  %v396_v51 = vpop.xlane.xlu2 %395  ;;  %v635_v52 = vpop.xlane.xlu0 %634  ;;  %2179 = vmatmul.bf16.vlgmr.msra.gmra.mxu3 %v4690_v26  ;;  %v4729_v39 = vsub.f32 %v4507_v41, %v464_v36  ;;  %v570_v40 = vmul.f32 %v4693_v50, %v4693_v50  ;;  %v825_v30 = vmul.f32 0.5, %v824_v47  ;;  %vm830_vm1 = vmor %vm828_vm15, %vm829_vm0 }
 0x150   : > { %v571_v60 = vmul.f32 %v4696_v22, %v4696_v22  ;;  %410 = vadd.xlane.f32.xlu1 %v409_v5  ;;  %v1166_v61 = vmul.f32 %v4619_v10, %v1096_v20  ;;  %v1167_v55 = vmul.f32 %v4621_v17, %v1097_v54  ;;  %v651_v3 = vadd.f32 %v575_v63, %v574_v49 }
 0x151   : > { %v4738_v48 = vsub.f32 %v4510_v42, %v464_v36  ;;  %v467_v41 = vmul.f32 %v4396_v33, %v396_v51  ;;  %v715_v18 = vmul.f32 %v635_v52, %v4396_v33  ;;  %v826_v1 = vsub.f32 1.5, %v825_v30 }
 0x152   : > { %v645_v23 = vadd.f32 %v571_v60, %v570_v40  ;;  %652 = vadd.xlane.f32.xlu0 %v651_v3  ;;  %v576_v5 = vmul.f32 %v4714_v8, %v4714_v8  ;;  %v577_v2 = vmul.f32 %v4717_v53, %v4717_v53  ;;  %v1168_v25 = vmul.f32 %v4619_v10, %v1098_v38 }
 0x153   : > { %v1169_v42 = vmul.f32 %v4621_v17, %v1099_v4  ;;  %v816_v36 = vsub.f32 1.5, %v815_v28  ;;  %v1236_v49 = vadd.f32 %v4632_v21, %v1166_v61  ;;  %v1237_v27 = vadd.f32 %v4636_v9, %v1167_v55  ;;  %v4755_v51 = vpop.eup %3914 }
 0x154   : > { %646 = vadd.xlane.f32.xlu2 %v645_v23  ;;  %v4753_v14 = vadd.f32 1e-05, %v715_v18  ;;  %v4758_v52 = vsub.f32 %v4528_v19, %v467_v41  ;;  %v4761_v38 = vsub.f32 %v4531_v59, %v467_v41  ;;  %v572_v4 = vmul.f32 %v4729_v39, %v4729_v39 }
 0x155   : > { %v573_v28 = vmul.f32 %v4738_v48, %v4738_v48  ;;  %v827_v47 = vmul.f32 %v4698_v35, %v826_v1  ;;  %v654_v63 = vadd.f32 %v577_v2, %v576_v5  ;;  %v1238_v40 = vadd.f32 %v4632_v21, %v1168_v25  ;;  %v4801_v1 = vld [vmem:[%s4334_s12 + $0x170] sm:$0xff]  ;;  %v4804_v5 = vld [vmem:[%s4334_s12 + $0x178] sm:$0xff] }
 0x156   : > { %3916 = vrsqrt.f32 %v4753_v14  ;;  %v1239_v59 = vadd.f32 %v4636_v9, %v1169_v42  ;;  %v817_v61 = vmul.f32 %v4634_v46, %v816_v36  ;;  %v833_v3 = vmul.f32 %v4755_v51, %v4700_v43  ;;  %v4810_v42 = vld [vmem:[%s4334_s12 + $0x150] sm:$0xff] }
 0x157   : > { %v399_v20 = vpop.xlane.xlu2 %398  ;;  %v4767_v54 = vpop.xlane.xlu0 %637  ;;  %v648_v60 = vadd.f32 %v573_v28, %v572_v4  ;;  %v4783_v55 = vpack.c.bf16 %v1238_v40, %v1236_v49  ;;  %v578_v37 = vmul.f32 %v4758_v52, %v4758_v52  ;;  %v831_v23 = vsel %vm830_vm1, %v4698_v35, %v827_v47 }
 0x158   : > { %v468_v19 = vmul.f32 %v4396_v33, %v399_v20  ;;  %v4785_v30 = vpack.c.bf16 %v1239_v59, %v1237_v27  ;;  %v579_v18 = vmul.f32 %v4761_v38, %v4761_v38  ;;  %v821_v25 = vsel %vm820_vm2, %v4634_v46, %v817_v61 }
 0x159   : > { %6025 = vst [vmem:[#allocation26_spill] sm:$0xff] %v4783_v55  ;;  %v1103_v36 = vmul.f32 %v831_v23, %v4464_v12  ;;  %v834_v49 = vmul.f32 %v4755_v51, %v833_v3  ;;  %v418_v46 = vadd.f32 %v4804_v5, %v4801_v1  ;;  %v1100_v47 = vmul.f32 %v821_v25, %v4427_v56 }
 0x15a   : > { %6026 = vst [vmem:[#allocation27_spill] sm:$0xff] %v4785_v30  ;;  %655 = vadd.xlane.f32.xlu0 %v654_v63  ;;  %v4793_v41 = vsub.f32 %v4546_v0, %v468_v19  ;;  %v4796_v15 = vsub.f32 %v4549_v24, %v468_v19  ;;  %v657_v35 = vadd.f32 %v579_v18, %v578_v37  ;;  %v4813_v0 = vld [vmem:[%s4334_s12 + $0x158] sm:$0xff]  ;;  %v4842_v18 = vld [vmem:[%s4334_s12 + $0x188] sm:$0xff]  ;;  %vm848_vm4 = vweird.f32 %v4753_v14 }
 0x15b   : > { %v1102_v24 = vmul.f32 %v831_v23, %v4461_v11  ;;  %v412_v20 = vadd.f32 %v4813_v0, %v4810_v42  ;;  %v1101_v63 = vmul.f32 %v821_v25, %v4429_v57  ;;  %v835_v19 = vmul.f32 0.5, %v834_v49  ;;  %v4839_v23 = vld [vmem:[%s4334_s12 + $0x180] sm:$0xff] }
 0x15c   : > { %6027 = vst [vmem:[#allocation28_spill] sm:$0xff] %v4793_v41  ;;  %649 = vadd.xlane.f32.xlu2 %v648_v60  ;;  %v4806_v2 = vpop.eup %3916  ;;  %658 = vadd.xlane.f32.xlu1 %v657_v35  ;;  %v580_v11 = vmul.f32 %v4793_v41, %v4793_v41  ;;  %v581_v12 = vmul.f32 %v4796_v15, %v4796_v15  ;;  %v4847_v25 = vld [vmem:[%s4334_s12 + $0x160] sm:$0xff]  ;;  %v4850_v35 = vld [vmem:[%s4334_s12 + $0x168] sm:$0xff]  ;;  %vm839_vm6 = vweird.f32 %v4755_v51 }
 0x15d   : > { %6028 = vst [vmem:[#allocation29_spill] sm:$0xff] %v4796_v15  ;;  %v843_v27 = vmul.f32 %v4806_v2, %v4753_v14  ;;  %v1172_v59 = vmul.f32 %v4619_v10, %v1102_v24  ;;  %v1173_v60 = vmul.f32 %v4621_v17, %v1103_v36  ;;  %v1170_v56 = vmul.f32 %v4619_v10, %v1100_v47  ;;  %vm840_vm8 = vmor %vm838_vm3, %vm839_vm6 }
 0x15e   : > { %1917 = vmatmul.bf16.gmra.mxu0 %v4783_v55  ;;  %2006 = vmatmul.bf16.gmra.mxu1 %v4785_v30  ;;  %v660_v61 = vadd.f32 %v581_v12, %v580_v11  ;;  %v1171_v57 = vmul.f32 %v4621_v17, %v1101_v63  ;;  %v836_v24 = vsub.f32 1.5, %v835_v19  ;;  %vm849_vm5 = vweird.f32 %v4806_v2 }
 0x15f   : > { %2095 = vmatmul.bf16.gmra.mxu2 %v4783_v55  ;;  %2184 = vmatmul.bf16.gmra.mxu3 %v4785_v30  ;;  %v402_v4 = vpop.xlane.xlu0 %401  ;;  %v844_v28 = vmul.f32 %v4806_v2, %v843_v27  ;;  %v1242_v36 = vadd.f32 %v4632_v21, %v1172_v59  ;;  %v1243_v49 = vadd.f32 %v4636_v9, %v1173_v60  ;;  %vm850_vm7 = vmor %vm848_vm4, %vm849_vm5 }
 0x160   : > { %v469_v37 = vmul.f32 %v4396_v33, %v402_v4  ;;  %v421_v27 = vadd.f32 %v4842_v18, %v4839_v23  ;;  %v415_v12 = vadd.f32 %v4850_v35, %v4847_v25  ;;  %v1240_v47 = vadd.f32 %v4632_v21, %v1170_v56 }
 0x161   : > { %v845_v40 = vmul.f32 0.5, %v844_v28  ;;  %v4870_v28 = vld [vmem:[%s4334_s12 + $0x190] sm:$0xff]  ;;  %v1241_v63 = vadd.f32 %v4636_v9, %v1171_v57 }
 0x162   : > { %419 = vadd.xlane.f32.xlu0 %v418_v46  ;;  %v4862_v4 = vsub.f32 %v4554_v6, %v469_v37  ;;  %v4865_v11 = vsub.f32 %v4557_v7, %v469_v37  ;;  %v837_v6 = vmul.f32 %v4755_v51, %v836_v24 }
 0x163   : > { %v846_v3 = vsub.f32 1.5, %v845_v40  ;;  %v4880_v40 = vpack.c.bf16 %v1242_v36, %v1240_v47  ;;  %v4882_v7 = vpack.c.bf16 %v1243_v49, %v1241_v63  ;;  %v4910_v36 = vld [vmem:[%s4334_s12 + $0x1a0] sm:$0xff]  ;;  %v4913_v49 = vld [vmem:[%s4334_s12 + $0x1a8] sm:$0xff] }
 0x164   : > { %413 = vadd.xlane.f32.xlu2 %v412_v20  ;;  %661 = vadd.xlane.f32.xlu1 %v660_v61  ;;  %6029 = vst [vmem:[#allocation30_spill] sm:$0xff] %v4862_v4  ;;  %v4873_v20 = vld [vmem:[%s4334_s12 + $0x198] sm:$0xff]  ;;  %v582_v61 = vmul.f32 %v4862_v4, %v4862_v4  ;;  %v841_v43 = vsel %vm840_vm8, %v4755_v51, %v837_v6 }
 0x165   : > { %v847_v46 = vmul.f32 %v4806_v2, %v846_v3  ;;  %6030 = vst [vmem:[#allocation31_spill] sm:$0xff] %v4865_v11  ;;  %v424_v59 = vadd.f32 %v4873_v20, %v4870_v28  ;;  %v583_v3 = vmul.f32 %v4865_v11, %v4865_v11  ;;  %v1104_v51 = vmul.f32 %v841_v43, %v4488_v31 }
 0x166   : > { %6031 = vst [vmem:[#allocation32_spill] sm:$0xff] %v4880_v40 }
 0x167   : > { %v405_v19 = vpop.xlane.xlu0 %404  ;;  %6032 = vst [vmem:[#allocation33_spill] sm:$0xff] %v4882_v7  ;;  %v851_v60 = vsel %vm850_vm7, %v4806_v2, %v847_v46  ;;  %v663_v24 = vadd.f32 %v583_v3, %v582_v61  ;;  %v1174_v31 = vmul.f32 %v4619_v10, %v1104_v51  ;;  %v4939_v61 = vld [vmem:[%s4334_s12 + $0x1b8] sm:$0xff] }
 0x168   : > { %v470_v14 = vmul.f32 %v4396_v33, %v405_v19  ;;  %v1106_v2 = vmul.f32 %v851_v60, %v4515_v44  ;;  %v1107_v37 = vmul.f32 %v851_v60, %v4518_v45  ;;  %v1105_v44 = vmul.f32 %v841_v43, %v4491_v32  ;;  %v4948_v43 = vld [vmem:[%s4334_s12 + $0x1c0] sm:$0xff] }
 0x169   : > { %v1244_v19 = vadd.f32 %v4632_v21, %v1174_v31 }
 0x16a   : > { %422 = vadd.xlane.f32.xlu0 %v421_v27  ;;  %v4903_v56 = vsub.f32 %v4562_v13, %v470_v14  ;;  %v4906_v57 = vsub.f32 %v4565_v16, %v470_v14  ;;  %v1176_v45 = vmul.f32 %v4619_v10, %v1106_v2  ;;  %v1177_v27 = vmul.f32 %v4621_v17, %v1107_v37  ;;  %v4936_v14 = vld [vmem:[%s4334_s12 + $0x1b0] sm:$0xff]  ;;  %v4951_v2 = vld [vmem:[%s4334_s12 + $0x1c8] sm:$0xff] }
 0x16b   : > { %v427_v13 = vadd.f32 %v4913_v49, %v4910_v36  ;;  %v1175_v32 = vmul.f32 %v4621_v17, %v1105_v44  ;;  %v430_v3 = vadd.f32 %v4939_v61, %v4936_v14  ;;  %6037 = vst [vmem:[#allocation38_spill] sm:$0xff] %v4951_v2  ;;  %v433_v37 = vadd.f32 %v4951_v2, %v4948_v43 }
 0x16c   : > { %416 = vadd.xlane.f32.xlu2 %v415_v12  ;;  %425 = vadd.xlane.f32.xlu1 %v424_v59  ;;  %6033 = vst [vmem:[#allocation34_spill] sm:$0xff] %v4903_v56  ;;  %v584_v16 = vmul.f32 %v4903_v56, %v4903_v56  ;;  %v585_v46 = vmul.f32 %v4906_v57, %v4906_v57 }
 0x16d   : > { %6034 = vst [vmem:[#allocation35_spill] sm:$0xff] %v4906_v57  ;;  %v1246_v12 = vadd.f32 %v4632_v21, %v1176_v45  ;;  %v1247_v47 = vadd.f32 %v4636_v9, %v1177_v27  ;;  %v1245_v6 = vadd.f32 %v4636_v9, %v1175_v32  ;;  %v5051_v57 = vld [vmem:[%s4334_s12 + $0x1e8] sm:$0xff] }
 0x16e   : > { %1922 = vmatmul.bf16.gmra.mxu0 %v4880_v40  ;;  %2011 = vmatmul.bf16.gmra.mxu1 %v4882_v7  ;;  %v666_v63 = vadd.f32 %v585_v46, %v584_v16 }
 0x16f   : > { %2100 = vmatmul.bf16.gmra.mxu2 %v4880_v40  ;;  %2189 = vmatmul.bf16.gmra.mxu3 %v4882_v7  ;;  %v4931_v59 = vpack.c.bf16 %v1246_v12, %v1244_v19  ;;  %v4933_v60 = vpack.c.bf16 %v1247_v47, %v1245_v6 }
 0x171   : > { %6035 = vst [vmem:[#allocation36_spill] sm:$0xff] %v4931_v59 }
 0x172   : > { %6036 = vst [vmem:[#allocation37_spill] sm:$0xff] %v4933_v60 }
 0x174   : > { %664 = vadd.xlane.f32.xlu2 %v663_v24  ;;  %428 = vadd.xlane.f32.xlu1 %v427_v13  ;;  %v716_v24 = vmul.f32 %v4767_v54, %v4396_v33 }
 0x176   : > { %v748_v51 = vadd.f32 1e-05, %v716_v24 }
 0x178   : > { %3918 = vrsqrt.f32 %v748_v51  ;;  %vm858_vm9 = vweird.f32 %v748_v51 }
 0x17c   : > { %667 = vadd.xlane.f32.xlu2 %v666_v63 }
 0x17e   : > { %1927 = vmatmul.bf16.gmra.mxu0 %v4931_v59  ;;  %2016 = vmatmul.bf16.gmra.mxu1 %v4933_v60  ;;  %v3919_v44 = vpop.eup %3918 }
 0x17f   : > { %2105 = vmatmul.bf16.gmra.mxu2 %v4931_v59  ;;  %2194 = vmatmul.bf16.gmra.mxu3 %v4933_v60  ;;  %v853_v45 = vmul.f32 %v3919_v44, %v748_v51  ;;  %vm859_vm10 = vweird.f32 %v3919_v44  ;;  %v6039_v60 = vld [vmem:[#allocation20_spill] sm:$0xff] }
 0x180   : > { %vm860_vm11 = vmor %vm858_vm9, %vm859_vm10 }
 0x181   : > { %v854_v27 = vmul.f32 %v3919_v44, %v853_v45 }
 0x183   : > { %v855_v46 = vmul.f32 0.5, %v854_v27 }
 0x184   : > { %431 = vadd.xlane.f32.xlu2 %v430_v3 }
 0x185   : > { %v856_v32 = vsub.f32 1.5, %v855_v46 }
 0x187   : > { %v857_v19 = vmul.f32 %v3919_v44, %v856_v32 }
 0x18c   : > { %434 = vadd.xlane.f32.xlu2 %v433_v37  ;;  %v861_v37 = vsel %vm860_vm11, %v3919_v44, %v857_v19 }
 0x18d   : > { %v1108_v27 = vmul.f32 %v861_v37, %v4534_v62 }
 0x18f   : > { %v1178_v62 = vmul.f32 %v4619_v10, %v1108_v27 }
 0x191   : > { %v1248_v40 = vadd.f32 %v4632_v21, %v1178_v62 }
 0x1ab   : > { %v641_v13 = vpop.xlane.xlu1 %640 }
 0x1ac   : > { %v717_v16 = vmul.f32 %v641_v13, %v4396_v33 }
 0x1ae   : > { %v749_v31 = vadd.f32 1e-05, %v717_v16  ;;  %v6038_v16 = vld [vmem:[#allocation15_spill] sm:$0xff] }
 0x1af   : > { %v1109_v46 = vmul.f32 %v861_v37, %v6038_v16 }
 0x1b0   : > { %3920 = vrsqrt.f32 %v749_v31  ;;  %vm868_vm13 = vweird.f32 %v749_v31 }
 0x1b3   : > { %v644_v12 = vpop.xlane.xlu1 %643 }
 0x1b4   : > { %v718_v47 = vmul.f32 %v644_v12, %v4396_v33 }
 0x1b6   : > { %v3921_v63 = vpop.eup %3920  ;;  %v4959_v6 = vadd.f32 1e-05, %v718_v47 }
 0x1b7   : > { %v863_v54 = vmul.f32 %v3921_v63, %v749_v31  ;;  %vm869_vm12 = vweird.f32 %v3921_v63  ;;  %v1179_v31 = vmul.f32 %v4621_v17, %v1109_v46 }
 0x1b8   : > { %3922 = vrsqrt.f32 %v4959_v6  ;;  %vm870_vm14 = vmor %vm868_vm13, %vm869_vm12  ;;  %vm878_vm0 = vweird.f32 %v4959_v6 }
 0x1b9   : > { %v864_v3 = vmul.f32 %v3921_v63, %v863_v54  ;;  %v6041_v54 = vld [vmem:[#allocation21_spill] sm:$0xff]  ;;  %v1249_v30 = vadd.f32 %v4636_v9, %v1179_v31 }
 0x1bb   : > { %v865_v24 = vmul.f32 0.5, %v864_v3  ;;  %v408_v45 = vpop.xlane.xlu1 %407 }
 0x1bc   : > { %v471_v51 = vmul.f32 %v4396_v33, %v408_v45  ;;  %v6044_v45 = vld [vmem:[#allocation17_spill] sm:$0xff] }
 0x1bd   : > { %v866_v13 = vsub.f32 1.5, %v865_v24  ;;  %v6043_v24 = vld [vmem:[#allocation16_spill] sm:$0xff] }
 0x1be   : > { %v3923_v12 = vpop.eup %3922  ;;  %v4966_v47 = vsub.f32 %v6039_v60, %v471_v51  ;;  %v4969_v59 = vsub.f32 %v6041_v54, %v471_v51 }
 0x1bf   : > { %v867_v32 = vmul.f32 %v3921_v63, %v866_v13  ;;  %v873_v44 = vmul.f32 %v3923_v12, %v4959_v6  ;;  %vm879_vm15 = vweird.f32 %v3923_v12 }
 0x1c0   : > { %6040 = vst [vmem:[#allocation15_spill] sm:$0xff] %v4966_v47  ;;  %v586_v3 = vmul.f32 %v4966_v47, %v4966_v47  ;;  %v587_v37 = vmul.f32 %v4969_v59, %v4969_v59  ;;  %vm880_vm1 = vmor %vm878_vm0, %vm879_vm15 }
 0x1c1   : > { %6042 = vst [vmem:[#allocation20_spill] sm:$0xff] %v4969_v59  ;;  %v871_v19 = vsel %vm870_vm14, %v3921_v63, %v867_v32  ;;  %v874_v51 = vmul.f32 %v3923_v12, %v873_v44  ;;  %v6045_v44 = vld [vmem:[#allocation22_spill] sm:$0xff] }
 0x1c2   : > { %v1110_v60 = vmul.f32 %v871_v19, %v6043_v24  ;;  %v1111_v13 = vmul.f32 %v871_v19, %v6044_v45  ;;  %v669_v16 = vadd.f32 %v587_v37, %v586_v3  ;;  %v6047_v37 = vld [vmem:[#allocation23_spill] sm:$0xff] }
 0x1c3   : > { %v875_v27 = vmul.f32 0.5, %v874_v51  ;;  %v411_v63 = vpop.xlane.xlu1 %410 }
 0x1c4   : > { %v1180_v54 = vmul.f32 %v4619_v10, %v1110_v60  ;;  %v1181_v7 = vmul.f32 %v4621_v17, %v1111_v13  ;;  %v472_v32 = vmul.f32 %v4396_v33, %v411_v63  ;;  %670 = vadd.xlane.f32.xlu0 %v669_v16 }
 0x1c5   : > { %v653_v19 = vpop.xlane.xlu0 %652  ;;  %v876_v51 = vsub.f32 1.5, %v875_v27 }
 0x1c6   : > { %v1250_v46 = vadd.f32 %v4632_v21, %v1180_v54  ;;  %v1251_v24 = vadd.f32 %v4636_v9, %v1181_v7  ;;  %v4988_v3 = vsub.f32 %v6045_v44, %v472_v32  ;;  %v4991_v60 = vsub.f32 %v6047_v37, %v472_v32 }
 0x1c7   : > { %v647_v16 = vpop.xlane.xlu2 %646  ;;  %v721_v62 = vmul.f32 %v653_v19, %v4396_v33  ;;  %v5018_v19 = vld [vmem:[%s4334_s12 + $0x1d8] sm:$0xff] }
 0x1c8   : > { %6046 = vst [vmem:[#allocation21_spill] sm:$0xff] %v4988_v3  ;;  %v4993_v45 = vpack.c.bf16 %v1250_v46, %v1248_v40  ;;  %v4995_v13 = vpack.c.bf16 %v1251_v24, %v1249_v30  ;;  %v719_v31 = vmul.f32 %v647_v16, %v4396_v33  ;;  %v588_v7 = vmul.f32 %v4988_v3, %v4988_v3  ;;  %v5015_v24 = vld [vmem:[%s4334_s12 + $0x1d0] sm:$0xff] }
 0x1c9   : > { %6048 = vst [vmem:[#allocation16_spill] sm:$0xff] %v4991_v60  ;;  %v589_v54 = vmul.f32 %v4991_v60, %v4991_v60  ;;  %v5003_v63 = vadd.f32 1e-05, %v721_v62  ;;  %v877_v46 = vmul.f32 %v3923_v12, %v876_v51 }
 0x1ca   : > { %6049 = vst [vmem:[#allocation17_spill] sm:$0xff] %v4993_v45  ;;  %1932 = vmatmul.bf16.gmra.mxu0 %v4993_v45  ;;  %2021 = vmatmul.bf16.gmra.mxu1 %v4995_v13  ;;  %v5007_v30 = vadd.f32 1e-05, %v719_v31  ;;  %v436_v31 = vadd.f32 %v5018_v19, %v5015_v24 }
 0x1cb   : > { %6050 = vst [vmem:[#allocation22_spill] sm:$0xff] %v4995_v13  ;;  %2110 = vmatmul.bf16.gmra.mxu2 %v4993_v45  ;;  %2199 = vmatmul.bf16.gmra.mxu3 %v4995_v13  ;;  %v1913_v40 = vpop.f32.mrf.mxu0  ;;  %v2002_v27 = vpop.f32.mrf.mxu1  ;;  %v672_v32 = vadd.f32 %v589_v54, %v588_v7  ;;  %3924 = vrsqrt.f32 %v5003_v63  ;;  %v881_v37 = vsel %vm880_vm1, %v3923_v12, %v877_v46  ;;  %v6053_v13 = vld [vmem:[#allocation18_spill] sm:$0xff]  ;;  %vm908_vm2 = vweird.f32 %v5003_v63 }
 0x1cc   : > { %3926 = vrsqrt.f32 %v5007_v30  ;;  %6051 = vst [vmem:[#allocation23_spill] sm:$0xff] %v5015_v24  ;;  %v1112_v45 = vmul.f32 %v881_v37, %v6053_v13  ;;  %v2003_v59 = vadd.f32 %v2002_v27, %v1913_v40  ;;  %v5048_v24 = vld [vmem:[%s4334_s12 + $0x1e0] sm:$0xff]  ;;  %vm888_vm5 = vweird.f32 %v5007_v30 }
 0x1cd   : > { %673 = vadd.xlane.f32.xlu0 %v672_v32  ;;  %6052 = vst [vmem:[#allocation39_spill] sm:$0xff] %v5018_v19  ;;  %v656_v44 = vpop.xlane.xlu0 %655 }
 0x1ce   : > { %v722_v62 = vmul.f32 %v656_v44, %v4396_v33  ;;  %6055 = vst [vmem:[#allocation18_spill] sm:$0xff] %v5048_v24 }
 0x1cf   : > { %v650_v16 = vpop.xlane.xlu2 %649  ;;  %v659_v46 = vpop.xlane.xlu1 %658 }
 0x1d0   : > { %v720_v51 = vmul.f32 %v650_v16, %v4396_v33  ;;  %v5026_v54 = vadd.f32 1e-05, %v722_v62  ;;  %v6054_v16 = vld [vmem:[#allocation19_spill] sm:$0xff] }
 0x1d1   : > { %v5024_v7 = vpop.eup %3924  ;;  %v1113_v26 = vmul.f32 %v881_v37, %v6054_v16  ;;  %v1182_v37 = vmul.f32 %v4619_v10, %v1112_v45  ;;  %6056 = vst [vmem:[#allocation19_spill] sm:$0xff] %v5051_v57  ;;  %v439_v45 = vadd.f32 %v5051_v57, %v5048_v24 }
 0x1d2   : > { %v2091_v6 = vpop.f32.mrf.mxu2  ;;  %v3927_v32 = vpop.eup %3926  ;;  %v903_v55 = vmul.f32 %v5024_v7, %v5003_v63  ;;  %v5031_v12 = vadd.f32 1e-05, %v720_v51  ;;  %3928 = vrsqrt.f32 %v5026_v54  ;;  %v723_v51 = vmul.f32 %v659_v46, %v4396_v33 }
 0x1d3   : > { %v2180_v44 = vpop.f32.mrf.mxu3  ;;  %v883_v29 = vmul.f32 %v3927_v32, %v5007_v30  ;;  %v5037_v62 = vpop.f32.mrf.mxu0  ;;  %vm909_vm3 = vweird.f32 %v5024_v7  ;;  %vm889_vm4 = vweird.f32 %v3927_v32  ;;  %vm918_vm7 = vweird.f32 %v5026_v54 }
 0x1d4   : > { %v5039_v60 = vpop.f32.mrf.mxu1  ;;  %v904_v13 = vmul.f32 %v5024_v7, %v903_v55  ;;  %3930 = vrsqrt.f32 %v5031_v12  ;;  %v2181_v47 = vadd.f32 %v2180_v44, %v2091_v6  ;;  %v5045_v19 = vadd.f32 1e-05, %v723_v51  ;;  %vm5080_vm6 = vmor %vm908_vm2, %vm909_vm3 }
 0x1d5   : > { %437 = vadd.xlane.f32.xlu0 %v436_v31  ;;  %v884_v3 = vmul.f32 %v3927_v32, %v883_v29  ;;  %v1183_v55 = vmul.f32 %v4621_v17, %v1113_v26  ;;  %v420_v6 = vpop.xlane.xlu0 %419  ;;  %vm890_vm8 = vmor %vm888_vm5, %vm889_vm4  ;;  %vm898_vm9 = vweird.f32 %v5031_v12 }
 0x1d6   : > { %v905_v16 = vmul.f32 0.5, %v904_v13  ;;  %v2972_v31 = vpack.c.bf16 %v2181_v47, %v2003_v59  ;;  %3932 = vrsqrt.f32 %v5045_v19  ;;  %v1252_v47 = vadd.f32 %v4632_v21, %v1182_v37 }
 0x1d7   : > { %v885_v56 = vmul.f32 0.5, %v884_v3  ;;  %v414_v46 = vpop.xlane.xlu2 %413  ;;  %v1253_v51 = vadd.f32 %v4636_v9, %v1183_v55  ;;  %vm928_vm10 = vweird.f32 %v5045_v19  ;;  %v475_v15 = vmul.f32 %v4396_v33, %v420_v6 }
 0x1d8   : > { %v906_v29 = vsub.f32 1.5, %v905_v16  ;;  %v5059_v40 = vpop.eup %3928  ;;  %3068 = vst [vmem:[%s5063_s2] sm:$0xff] %v2972_v31  ;;  %v473_v63 = vmul.f32 %v4396_v33, %v414_v46 }
 0x1d9   : > { %v886_v27 = vsub.f32 1.5, %v885_v56  ;;  %v913_v44 = vmul.f32 %v5059_v40, %v5026_v54  ;;  %v662_v56 = vpop.xlane.xlu1 %661  ;;  %vm919_vm11 = vweird.f32 %v5059_v40 }
 0x1da   : > { %v5066_v26 = vpop.f32.mrf.mxu2  ;;  %v3931_v59 = vpop.eup %3930  ;;  %v907_v3 = vmul.f32 %v5024_v7, %v906_v29  ;;  %vm5124_vm14 = vmor %vm918_vm7, %vm919_vm11  ;;  %v5141_v54 = vsub.f32 %v4813_v0, %v473_v63 }
 0x1db   : > { %v5073_v13 = vpop.f32.mrf.mxu3  ;;  %v887_v16 = vmul.f32 %v3927_v32, %v886_v27  ;;  %v893_v30 = vmul.f32 %v3931_v59, %v5031_v12  ;;  %v5086_v37 = vpop.f32.mrf.mxu0  ;;  %v914_v55 = vmul.f32 %v5059_v40, %v913_v44  ;;  %v724_v27 = vmul.f32 %v662_v56, %v4396_v33 }
 0x1dc   : > { %v5088_v29 = vpop.f32.mrf.mxu1  ;;  %v3933_v41 = vpop.eup %3932  ;;  %v911_v44 = vsel %vm5080_vm6, %v5024_v7, %v907_v3  ;;  %vm899_vm12 = vweird.f32 %v3931_v59 }
 0x1dd   : > { %440 = vadd.xlane.f32.xlu0 %v439_v45  ;;  %v891_v57 = vsel %vm890_vm8, %v3927_v32, %v887_v16  ;;  %v894_v24 = vmul.f32 %v3931_v59, %v893_v30  ;;  %v915_v2 = vmul.f32 0.5, %v914_v55  ;;  %v923_v32 = vmul.f32 %v3933_v41, %v5045_v19  ;;  %vm900_vm15 = vmor %vm898_vm9, %vm899_vm12 }
 0x1de   : > { %v1114_v11 = vmul.f32 %v891_v57, %v4693_v50  ;;  %v1115_v4 = vmul.f32 %v891_v57, %v4696_v22  ;;  %v5104_v45 = vadd.f32 1e-05, %v724_v27  ;;  %v5109_v22 = vsub.f32 %v4810_v42, %v473_v63 }
 0x1df   : > { %v895_v46 = vmul.f32 0.5, %v894_v24  ;;  %v417_v56 = vpop.xlane.xlu2 %416  ;;  %v916_v50 = vsub.f32 1.5, %v915_v2  ;;  %v1118_v57 = vmul.f32 %v911_v44, %v4672_v58  ;;  %v924_v24 = vmul.f32 %v3933_v41, %v923_v32 }
 0x1e0   : > { %v1184_v6 = vmul.f32 %v4619_v10, %v1114_v11  ;;  %v1185_v16 = vmul.f32 %v4621_v17, %v1115_v4  ;;  %v1119_v55 = vmul.f32 %v911_v44, %v4678_v34  ;;  %vm929_vm13 = vweird.f32 %v3933_v41 }
 0x1e1   : > { %v896_v7 = vsub.f32 1.5, %v895_v46  ;;  %v917_v42 = vmul.f32 %v5059_v40, %v916_v50  ;;  %v925_v2 = vmul.f32 0.5, %v924_v24  ;;  %3934 = vrsqrt.f32 %v5104_v45  ;;  %vm5148_vm0 = vmor %vm928_vm10, %vm929_vm13  ;;  %v426_v12 = vpop.xlane.xlu1 %425 }
 0x1e2   : > { %v5112_v3 = vpop.f32.mrf.mxu2  ;;  %v1254_v31 = vadd.f32 %v4632_v21, %v1184_v6  ;;  %v1255_v30 = vadd.f32 %v4636_v9, %v1185_v16  ;;  %v1188_v16 = vmul.f32 %v4619_v10, %v1118_v57  ;;  %v1189_v50 = vmul.f32 %v4621_v17, %v1119_v55 }
 0x1e3   : > { %v5117_v11 = vpop.f32.mrf.mxu3  ;;  %v897_v4 = vmul.f32 %v3931_v59, %v896_v7  ;;  %v5129_v27 = vpop.f32.mrf.mxu0  ;;  %v926_v6 = vsub.f32 1.5, %v925_v2  ;;  %v590_v0 = vmul.f32 %v5109_v22, %v5109_v22  ;;  %v921_v19 = vsel %vm5124_vm14, %v5059_v40, %v917_v42 }
 0x1e4   : > { %v5131_v34 = vpop.f32.mrf.mxu1  ;;  %v5133_v44 = vpack.c.bf16 %v1254_v31, %v1252_v47  ;;  %v5135_v46 = vpack.c.bf16 %v1255_v30, %v1253_v51  ;;  %v5153_v51 = vsub.f32 %v4801_v1, %v475_v15  ;;  %v423_v7 = vpop.xlane.xlu0 %422  ;;  %v474_v24 = vmul.f32 %v4396_v33, %v417_v56 }
 0x1e5   : > { %v901_v32 = vsel %vm900_vm15, %v3931_v59, %v897_v4  ;;  %v927_v57 = vmul.f32 %v3933_v41, %v926_v6  ;;  %v591_v31 = vmul.f32 %v5141_v54, %v5141_v54  ;;  %v2005_v40 = vadd.f32 %v5039_v60, %v5037_v62 }
 0x1e6   : > { %6061 = vst [vmem:[#allocation40_spill] sm:$0xff] %v5133_v44  ;;  %1937 = vmatmul.bf16.gmra.mxu0 %v5133_v44  ;;  %v1116_v59 = vmul.f32 %v901_v32, %v4729_v39  ;;  %v1117_v63 = vmul.f32 %v901_v32, %v4738_v48  ;;  %2026 = vmatmul.bf16.gmra.mxu1 %v5135_v46  ;;  %vm938_vm1 = vweird.f32 %v5104_v45 }
 0x1e7   : > { %6062 = vst [vmem:[#allocation41_spill] sm:$0xff] %v5135_v46  ;;  %v665_v1 = vpop.xlane.xlu2 %664  ;;  %2115 = vmatmul.bf16.gmra.mxu2 %v5133_v44  ;;  %v5168_v30 = vpop.eup %3934  ;;  %v931_v39 = vsel %vm5148_vm0, %v3933_v41, %v927_v57  ;;  %v5173_v48 = vsub.f32 %v4804_v5, %v475_v15  ;;  %2204 = vmatmul.bf16.gmra.mxu3 %v5135_v46 }
 0x1e8   : > { %v1258_v56 = vadd.f32 %v4632_v21, %v1188_v16  ;;  %v1259_v4 = vadd.f32 %v4636_v9, %v1189_v50  ;;  %v1120_v42 = vmul.f32 %v921_v19, %v4714_v8  ;;  %v476_v58 = vmul.f32 %v4396_v33, %v423_v7 }
 0x1e9   : > { %v1186_v41 = vmul.f32 %v4619_v10, %v1116_v59  ;;  %v1187_v15 = vmul.f32 %v4621_v17, %v1117_v63  ;;  %v675_v5 = vadd.f32 %v591_v31, %v590_v0  ;;  %v594_v60 = vmul.f32 %v5153_v51, %v5153_v51 }
 0x1ea   : > { %v5178_v55 = vpop.f32.mrf.mxu2  ;;  %v1121_v6 = vmul.f32 %v921_v19, %v4717_v53  ;;  %v1122_v8 = vmul.f32 %v931_v39, %v4758_v52  ;;  %v933_v16 = vmul.f32 %v5168_v30, %v5104_v45  ;;  %v5199_v50 = vsub.f32 %v4847_v25, %v474_v24 }
 0x1eb   : > { %v5184_v2 = vpop.f32.mrf.mxu3  ;;  %v5190_v62 = vpop.f32.mrf.mxu0  ;;  %v5202_v47 = vsub.f32 %v4850_v35, %v474_v24  ;;  %676 = vadd.xlane.f32.xlu1 %v675_v5  ;;  %v595_v0 = vmul.f32 %v5173_v48, %v5173_v48  ;;  %v2183_v59 = vadd.f32 %v5073_v13, %v5066_v26  ;;  %v477_v53 = vmul.f32 %v4396_v33, %v426_v12 }
 0x1ec   : > { %v5192_v32 = vpop.f32.mrf.mxu1  ;;  %v1190_v52 = vmul.f32 %v4619_v10, %v1120_v42  ;;  %v5211_v63 = vsub.f32 %v4839_v23, %v476_v58  ;;  %v5214_v25 = vsub.f32 %v4842_v18, %v476_v58  ;;  %v725_v35 = vmul.f32 %v665_v1, %v4396_v33  ;;  %v429_v18 = vpop.xlane.xlu1 %428 }
 0x1ed   : > { %v1256_v19 = vadd.f32 %v4632_v21, %v1186_v41  ;;  %v1257_v57 = vadd.f32 %v4636_v9, %v1187_v15  ;;  %v681_v7 = vadd.f32 %v595_v0, %v594_v60  ;;  %v2975_v24 = vpack.c.bf16 %v2183_v59, %v2005_v40 }
 0x1ee   : > { %v1123_v13 = vmul.f32 %v931_v39, %v4761_v38  ;;  %v1192_v12 = vmul.f32 %v4619_v10, %v1122_v8  ;;  %v934_v23 = vmul.f32 %v5168_v30, %v933_v16  ;;  %v5224_v31 = vadd.f32 1e-05, %v725_v35 }
 0x1ef   : > { %v5219_v26 = vpop.xlane.xlu2 %667  ;;  %682 = vadd.xlane.f32.xlu2 %v681_v7  ;;  %3071 = vst [vmem:[%s5063_s2 + $0x18] sm:$0xff] %v2975_v24  ;;  %v5228_v1 = vsub.f32 %v4870_v28, %v477_v53  ;;  %v592_v42 = vmul.f32 %v5199_v50, %v5199_v50  ;;  %v593_v40 = vmul.f32 %v5202_v47, %v5202_v47  ;;  %vm939_vm4 = vweird.f32 %v5168_v30 }
 0x1f0   : > { %v5235_v38 = vsub.f32 %v4873_v20, %v477_v53  ;;  %3936 = vrsqrt.f32 %v5224_v31  ;;  %v596_v39 = vmul.f32 %v5211_v63, %v5211_v63  ;;  %v597_v41 = vmul.f32 %v5214_v25, %v5214_v25  ;;  %vm940_vm6 = vmor %vm938_vm1, %vm939_vm4 }
 0x1f1   : > { %v2008_v28 = vadd.f32 %v5088_v29, %v5086_v37  ;;  %v678_v15 = vadd.f32 %v593_v40, %v592_v42  ;;  %v2186_v5 = vadd.f32 %v5117_v11, %v5112_v3  ;;  %v478_v60 = vmul.f32 %v4396_v33, %v429_v18  ;;  %v3494_v40 = vld [vmem:[#allocation8 + $0x170] sm:$0xf0] }
 0x1f2   : > { %v2101_v58 = vpop.f32.mrf.mxu2  ;;  %v5247_v8 = vpack.c.bf16 %v1258_v56, %v1256_v19  ;;  %v1193_v16 = vmul.f32 %v4621_v17, %v1123_v13  ;;  %v5250_v59 = vpack.c.bf16 %v1259_v4, %v1257_v57  ;;  %v5253_v53 = vmul.f32 %v4621_v17, %v1121_v6  ;;  %v5266_v19 = vld [vmem:[%s4334_s12 + $0x1f0] sm:$0xff]  ;;  %v5269_v6 = vld [vmem:[%s4334_s12 + $0x1f8] sm:$0xff] }
 0x1f3   : > { %v2190_v20 = vpop.f32.mrf.mxu3  ;;  %v1925_v0 = vpop.f32.mrf.mxu0  ;;  %679 = vadd.xlane.f32.xlu1 %v678_v15  ;;  %v684_v37 = vadd.f32 %v597_v41, %v596_v39  ;;  %v2978_v29 = vpack.c.bf16 %v2186_v5, %v2008_v28  ;;  %v5256_v11 = vadd.f32 %v4632_v21, %v1190_v52  ;;  %v5259_v35 = vsub.f32 %v4910_v36, %v478_v60  ;;  %v3793_v39 = vld [vmem:[#allocation8 + $0x2dc] sm:$0xf] }
 0x1f4   : > { %6065 = vst [vmem:[#allocation42_spill] sm:$0xff] %v5247_v8  ;;  %v2014_v3 = vpop.f32.mrf.mxu1  ;;  %v598_v56 = vmul.f32 %v5228_v1, %v5228_v1  ;;  %v599_v4 = vmul.f32 %v5235_v38, %v5235_v38  ;;  %v5273_v57 = vadd.f32 %v4632_v21, %v1192_v12  ;;  %v5275_v52 = vmul.f32 0.5, %v934_v23 }
 0x1f5   : > { %6066 = vst [vmem:[#allocation43_spill] sm:$0xff] %v5250_v59  ;;  %v5279_v36 = vsub.f32 %v4913_v49, %v478_v60  ;;  %v2188_v7 = vadd.f32 %v5184_v2, %v5178_v55  ;;  %v5287_v18 = vadd.f32 %v4636_v9, %v1193_v16  ;;  %v2010_v12 = vadd.f32 %v5131_v34, %v5129_v27  ;;  %v3745_v34 = vld [vmem:[#allocation8 + $0x15c] sm:$0xf]  ;;  %v3686_v60 = vld [vmem:[#allocation8 + $0x2f0] sm:$0xf0] }
 0x1f6   : > { %6067 = vst [vmem:[#allocation44_spill] sm:$0xff] %v5259_v35  ;;  %1942 = vmatmul.bf16.gmra.mxu0 %v5247_v8  ;;  %2031 = vmatmul.bf16.gmra.mxu1 %v5250_v59  ;;  %v5284_v13 = vpop.eup %3936  ;;  %v687_v23 = vadd.f32 %v599_v4, %v598_v56  ;;  %v442_v2 = vadd.f32 %v5269_v6, %v5266_v19  ;;  %v3492_v16 = vld [vmem:[#allocation8 + $0x158] sm:$0xf]  ;;  %vm948_vm2 = vweird.f32 %v5224_v31 }
 0x1f7   : > { %3074 = vst [vmem:[%s5063_s2 + $0x30] sm:$0xff] %v2978_v29  ;;  %v432_v24 = vpop.xlane.xlu2 %431  ;;  %2120 = vmatmul.bf16.gmra.mxu2 %v5247_v8  ;;  %v943_v55 = vmul.f32 %v5284_v13, %v5224_v31  ;;  %685 = vadd.xlane.f32.xlu2 %v684_v37  ;;  %v2013_v42 = vadd.f32 %v5192_v32, %v5190_v62  ;;  %v3748_v37 = vld [vmem:[#allocation8 + $0x16c] sm:$0xf0]  ;;  %v936_v8 = vsub.f32 1.5, %v5275_v52  ;;  %vm949_vm3 = vweird.f32 %v5284_v13 }
 0x1f8   : > { %6068 = vst [vmem:[#allocation45_spill] sm:$0xff] %v5279_v36  ;;  %v479_v49 = vmul.f32 %v4396_v33, %v432_v24  ;;  %2209 = vmatmul.bf16.gmra.mxu3 %v5250_v59  ;;  %688 = vadd.xlane.f32.xlu0 %v687_v23  ;;  %v2981_v41 = vpack.c.bf16 %v2188_v7, %v2010_v12  ;;  %v3684_v7 = vld [vmem:[#allocation8 + $0x2d8] sm:$0xf]  ;;  %v3739_v24 = vld [vmem:[#allocation8 + $0x12c] sm:$0xf]  ;;  %vm950_vm5 = vmor %vm948_vm2, %vm949_vm3 }
 0x1f9   : > { %v600_v5 = vmul.f32 %v5259_v35, %v5259_v35  ;;  %v944_v62 = vmul.f32 %v5284_v13, %v943_v55  ;;  %v601_v32 = vmul.f32 %v5279_v36, %v5279_v36  ;;  %v2191_v29 = vadd.f32 %v2190_v20, %v2101_v58  ;;  %v3470_v59 = vld [vmem:[#allocation8 + $0x140] sm:$0xf0]  ;;  %v3787_v55 = vld [vmem:[#allocation8 + $0x2ac] sm:$0xf] }
 0x1fa   : > { %v2103_v27 = vpop.f32.mrf.mxu2  ;;  %v5302_v28 = vsub.f32 %v4936_v14, %v479_v49  ;;  %v5305_v15 = vsub.f32 %v4939_v61, %v479_v49  ;;  %v2015_v56 = vadd.f32 %v2014_v3, %v1925_v0  ;;  %v3796_v14 = vld [vmem:[#allocation8 + $0x2ec] sm:$0xf0]  ;;  %3077 = vst [vmem:[%s5063_s2 + $0x48] sm:$0xff] %v2981_v41  ;;  %v3497_v49 = vor.u32 %v3745_v34, %v3494_v40  ;;  %v3662_v20 = vld [vmem:[#allocation8 + $0x2c0] sm:$0xf0] }
 0x1fb   : > { %v2192_v4 = vpop.f32.mrf.mxu3  ;;  %v945_v46 = vmul.f32 0.5, %v944_v62  ;;  %443 = vadd.xlane.f32.xlu1 %v442_v2  ;;  %v2984_v58 = vpack.c.bf16 %v2191_v29, %v2013_v42  ;;  %v3468_v0 = vld [vmem:[#allocation8 + $0x128] sm:$0xf]  ;;  %v1928_v44 = vpop.f32.mrf.mxu0  ;;  %v3689_v36 = vor.u32 %v3793_v39, %v3686_v60  ;;  %v3742_v34 = vld [vmem:[#allocation8 + $0x13c] sm:$0xf0]  ;;  %v3685_v2 = vor.u32 %v3796_v14, %v3684_v7  ;;  %v6070_v14 = vld [vmem:[#allocation30_spill] sm:$0xff] }
 0x1fc   : > { %v602_v61 = vmul.f32 %v5302_v28, %v5302_v28  ;;  %v603_v12 = vmul.f32 %v5305_v15, %v5305_v15  ;;  %v2193_v23 = vadd.f32 %v2192_v4, %v2103_v27  ;;  %2438 = vmatpush.bf16.msrb.mxu2 %v3497_v49  ;;  %v3493_v27 = vor.u32 %v3748_v37, %v3492_v16  ;;  %v3660_v40 = vld [vmem:[#allocation8 + $0x2a8] sm:$0xf]  ;;  %v3790_v4 = vld [vmem:[#allocation8 + $0x2bc] sm:$0xf0]  ;;  %v2017_v62 = vpop.f32.mrf.mxu1 }
 0x1fd   : > { %v946_v35 = vsub.f32 1.5, %v945_v46  ;;  %3080 = vst [vmem:[%s5063_s2 + $0x60] sm:$0xff] %v2984_v58  ;;  %v3473_v42 = vor.u32 %v3739_v24, %v3470_v59  ;;  %v690_v29 = vadd.f32 %v601_v32, %v600_v5  ;;  %2527 = vmatpush.bf16.msrb.mxu3 %v3689_v36  ;;  %2349 = vmatpush.bf16.msrb.mxu1 %v3685_v2  ;;  %v6069_v36 = vld [vmem:[#allocation38_spill] sm:$0xff]  ;;  %v6072_v58 = vld [vmem:[#allocation28_spill] sm:$0xff] }
 0x1fe   : > { %v693_v3 = vadd.f32 %v603_v12, %v602_v61  ;;  %v2987_v41 = vpack.c.bf16 %v2193_v23, %v2015_v56  ;;  %2260 = vmatpush.bf16.msrb.mxu0 %v3493_v27  ;;  %v3665_v56 = vor.u32 %v3787_v55, %v3662_v20  ;;  %v3469_v60 = vor.u32 %v3742_v34, %v3468_v0  ;;  %v6071_v12 = vld [vmem:[#allocation31_spill] sm:$0xff]  ;;  %v6073_v20 = vld [vmem:[#allocation29_spill] sm:$0xff] }
 0x1ff   : > { %v435_v52 = vpop.xlane.xlu2 %434  ;;  %v947_v39 = vmul.f32 %v5284_v13, %v946_v35  ;;  %v3661_v16 = vor.u32 %v3790_v4, %v3660_v40  ;;  %v1261_v37 = vadd.f32 %v4636_v9, %v5253_v53  ;;  %v5339_v35 = vpack.c.bf16 %v5273_v57, %v5256_v11 }
 0x200   : > { %v480_v61 = vmul.f32 %v4396_v33, %v435_v52  ;;  %3083 = vst [vmem:[%s5063_s2 + $0x78] sm:$0xff] %v2987_v41  ;;  %694 = vadd.xlane.f32.xlu2 %v693_v3  ;;  %2439 = vmatpush.bf16.msrb.mxu2 %v3473_v42  ;;  %v937_v32 = vmul.f32 %v5168_v30, %v936_v8 }
 0x201   : > { %v5343_v53 = vpack.c.bf16 %v5287_v18, %v1261_v37  ;;  %2528 = vmatpush.bf16.msrb.mxu3 %v3665_v56  ;;  %v951_v11 = vsel %vm950_vm5, %v5284_v13, %v947_v39  ;;  %2350 = vmatpush.bf16.msrb.mxu1 %v3661_v16 }
 0x202   : > { %v2106_v46 = vpop.f32.mrf.mxu2  ;;  %v5332_v59 = vsub.f32 %v4948_v43, %v480_v61  ;;  %v5335_v5 = vsub.f32 %v6069_v36, %v480_v61  ;;  %v2018_v43 = vadd.f32 %v2017_v62, %v1928_v44  ;;  %2261 = vmatpush.bf16.msrb.mxu0 %v3469_v60  ;;  %v941_v45 = vsel %vm940_vm6, %v5168_v30, %v937_v32 }
 0x203   : > { %v2195_v7 = vpop.f32.mrf.mxu3  ;;  %691 = vadd.xlane.f32.xlu1 %v690_v29  ;;  %v1126_v24 = vmul.f32 %v951_v11, %v6070_v14  ;;  %v1930_v13 = vpop.f32.mrf.mxu0  ;;  %v1127_v23 = vmul.f32 %v951_v11, %v6071_v12  ;;  %v1124_v30 = vmul.f32 %v941_v45, %v6072_v58  ;;  %v1125_v0 = vmul.f32 %v941_v45, %v6073_v20  ;;  %v3733_v11 = vld [vmem:[#allocation8 + $0xfc] sm:$0xf] }
 0x204   : > { %v604_v31 = vmul.f32 %v5332_v59, %v5332_v59  ;;  %v605_v8 = vmul.f32 %v5335_v5, %v5335_v5  ;;  %v2196_v57 = vadd.f32 %v2195_v7, %v2106_v46  ;;  %v2019_v49 = vpop.f32.mrf.mxu1  ;;  %v726_v46 = vmul.f32 %v5219_v26, %v4396_v33  ;;  %v3781_v45 = vld [vmem:[#allocation8 + $0x27c] sm:$0xf] }
 0x205   : > { %v1196_v41 = vmul.f32 %v4619_v10, %v1126_v24  ;;  %v2020_v27 = vadd.f32 %v2019_v49, %v1930_v13  ;;  %v1197_v40 = vmul.f32 %v4621_v17, %v1127_v23  ;;  %v1194_v4 = vmul.f32 %v4619_v10, %v1124_v30 }
 0x206   : > { %1947 = vmatmul.bf16.gmra.mxu0 %v5339_v35  ;;  %2036 = vmatmul.bf16.gmra.mxu1 %v5343_v53  ;;  %v696_v44 = vadd.f32 %v605_v8, %v604_v31  ;;  %v2990_v18 = vpack.c.bf16 %v2196_v57, %v2018_v43  ;;  %v1195_v62 = vmul.f32 %v4621_v17, %v1125_v0  ;;  %v758_v60 = vadd.f32 1e-05, %v726_v46  ;;  %v3446_v8 = vld [vmem:[#allocation8 + $0x110] sm:$0xf0]  ;;  %v6074_v0 = vld [vmem:[#allocation34_spill] sm:$0xff] }
 0x207   : > { %2125 = vmatmul.bf16.gmra.mxu2 %v5339_v35  ;;  %v1266_v2 = vadd.f32 %v4632_v21, %v1196_v41  ;;  %v1267_v42 = vadd.f32 %v4636_v9, %v1197_v40  ;;  %v1264_v29 = vadd.f32 %v4632_v21, %v1194_v4  ;;  %v3449_v57 = vor.u32 %v3733_v11, %v3446_v8  ;;  %v6075_v41 = vld [vmem:[#allocation35_spill] sm:$0xff]  ;;  %v6079_v8 = vld [vmem:[#allocation20_spill] sm:$0xff] }
 0x208   : > { %2214 = vmatmul.bf16.gmra.mxu3 %v5343_v53  ;;  %697 = vadd.xlane.f32.xlu0 %v696_v44  ;;  %3086 = vst [vmem:[%s5063_s2 + $0x90] sm:$0xff] %v2990_v18  ;;  %v1265_v61 = vadd.f32 %v4636_v9, %v1195_v62  ;;  %3938 = vrsqrt.f32 %v758_v60  ;;  %v3638_v44 = vld [vmem:[#allocation8 + $0x290] sm:$0xf0]  ;;  %vm958_vm7 = vweird.f32 %v758_v60  ;;  %v6078_v11 = vld [vmem:[#allocation15_spill] sm:$0xff] }
 0x209   : > { %v5373_v56 = vpack.c.bf16 %v1266_v2, %v1264_v29  ;;  %v3641_v18 = vor.u32 %v3781_v45, %v3638_v44  ;;  %2440 = vmatpush.bf16.msrb.mxu2 %v3449_v57  ;;  %v6077_v2 = vld [vmem:[#allocation39_spill] sm:$0xff] }
 0x20a   : > { %v2108_v55 = vpop.f32.mrf.mxu2  ;;  %v5375_v39 = vpack.c.bf16 %v1267_v42, %v1265_v61 }
 0x20b   : > { %v2197_v3 = vpop.f32.mrf.mxu3  ;;  %2529 = vmatpush.bf16.msrb.mxu3 %v3641_v18 }
 0x20c   : > { %v2198_v34 = vadd.f32 %v2197_v3, %v2108_v55 }
 0x20e   : > { %v2993_v52 = vpack.c.bf16 %v2198_v34, %v2020_v27  ;;  %v3939_v16 = vpop.eup %3938 }
 0x20f   : > { %v953_v37 = vmul.f32 %v3939_v16, %v758_v60  ;;  %vm959_vm8 = vweird.f32 %v3939_v16 }
 0x210   : > { %3089 = vst [vmem:[%s5063_s2 + $0xa8] sm:$0xff] %v2993_v52  ;;  %vm960_vm9 = vmor %vm958_vm7, %vm959_vm8  ;;  %v6076_v52 = vld [vmem:[#allocation23_spill] sm:$0xff] }
 0x211   : > { %v954_v36 = vmul.f32 %v3939_v16, %v953_v37 }
 0x213   : > { %v955_v43 = vmul.f32 0.5, %v954_v36 }
 0x215   : > { %v956_v14 = vsub.f32 1.5, %v955_v43 }
 0x216   : > { %1952 = vmatmul.bf16.gmra.mxu0 %v5373_v56  ;;  %2041 = vmatmul.bf16.gmra.mxu1 %v5375_v39 }
 0x217   : > { %2130 = vmatmul.bf16.gmra.mxu2 %v5373_v56  ;;  %v957_v13 = vmul.f32 %v3939_v16, %v956_v14 }
 0x218   : > { %2219 = vmatmul.bf16.gmra.mxu3 %v5375_v39 }
 0x219   : > { %v961_v49 = vsel %vm960_vm9, %v3939_v16, %v957_v13 }
 0x21a   : > { %v1128_v3 = vmul.f32 %v961_v49, %v6074_v0  ;;  %v1129_v27 = vmul.f32 %v961_v49, %v6075_v41 }
 0x21c   : > { %v1198_v16 = vmul.f32 %v4619_v10, %v1128_v3  ;;  %v1199_v37 = vmul.f32 %v4621_v17, %v1129_v27 }
 0x237   : > { %v671_v32 = vpop.xlane.xlu0 %670 }
 0x238   : > { %v727_v7 = vmul.f32 %v671_v32, %v4396_v33 }
 0x23a   : > { %v759_v31 = vadd.f32 1e-05, %v727_v7 }
 0x23c   : > { %3940 = vrsqrt.f32 %v759_v31  ;;  %vm968_vm11 = vweird.f32 %v759_v31 }
 0x240   : > { %v674_v26 = vpop.xlane.xlu0 %673 }
 0x241   : > { %v728_v58 = vmul.f32 %v674_v26, %v4396_v33 }
 0x242   : > { %v3941_v24 = vpop.eup %3940 }
 0x243   : > { %v963_v12 = vmul.f32 %v3941_v24, %v759_v31  ;;  %vm969_vm10 = vweird.f32 %v3941_v24  ;;  %v5394_v61 = vadd.f32 1e-05, %v728_v58  ;;  %v6080_v58 = vld [vmem:[#allocation18_spill] sm:$0xff] }
 0x244   : > { %vm970_vm12 = vmor %vm968_vm11, %vm969_vm10 }
 0x245   : > { %v964_v23 = vmul.f32 %v3941_v24, %v963_v12  ;;  %3942 = vrsqrt.f32 %v5394_v61  ;;  %v1268_v12 = vadd.f32 %v4632_v21, %v1198_v16  ;;  %vm978_vm14 = vweird.f32 %v5394_v61 }
 0x247   : > { %v965_v55 = vmul.f32 0.5, %v964_v23  ;;  %v1933_v40 = vpop.f32.mrf.mxu0  ;;  %v2022_v4 = vpop.f32.mrf.mxu1  ;;  %v1269_v23 = vadd.f32 %v4636_v9, %v1199_v37 }
 0x248   : > { %v438_v30 = vpop.xlane.xlu0 %437  ;;  %v2023_v32 = vadd.f32 %v2022_v4, %v1933_v40 }
 0x249   : > { %v481_v20 = vmul.f32 %v4396_v33, %v438_v30  ;;  %v966_v34 = vsub.f32 1.5, %v965_v55 }
 0x24b   : > { %v5389_v62 = vsub.f32 %v6076_v52, %v481_v20  ;;  %v5392_v42 = vsub.f32 %v6077_v2, %v481_v20  ;;  %v967_v29 = vmul.f32 %v3941_v24, %v966_v34  ;;  %v6081_v20 = vld [vmem:[#allocation19_spill] sm:$0xff]  ;;  %v3943_v52 = vpop.eup %3942 }
 0x24c   : > { %v973_v37 = vmul.f32 %v3943_v52, %v5394_v61  ;;  %vm979_vm13 = vweird.f32 %v3943_v52 }
 0x24d   : > { %v606_v46 = vmul.f32 %v5389_v62, %v5389_v62  ;;  %v607_v60 = vmul.f32 %v5392_v42, %v5392_v42  ;;  %v971_v36 = vsel %vm970_vm12, %v3941_v24, %v967_v29  ;;  %vm980_vm15 = vmor %vm978_vm14, %vm979_vm13 }
 0x24e   : > { %v2111_v7 = vpop.f32.mrf.mxu2  ;;  %v2200_v43 = vpop.f32.mrf.mxu3  ;;  %v1130_v31 = vmul.f32 %v971_v36, %v6078_v11  ;;  %v1131_v57 = vmul.f32 %v971_v36, %v6079_v8  ;;  %v3636_v11 = vld [vmem:[#allocation8 + $0x278] sm:$0xf] }
 0x24f   : > { %v2201_v45 = vadd.f32 %v2200_v43, %v2111_v7  ;;  %v699_v44 = vadd.f32 %v607_v60, %v606_v46  ;;  %v1935_v3 = vpop.f32.mrf.mxu0  ;;  %v2024_v41 = vpop.f32.mrf.mxu1  ;;  %v3444_v7 = vld [vmem:[#allocation8 + $0xf8] sm:$0xf]  ;;  %v3736_v43 = vld [vmem:[#allocation8 + $0x10c] sm:$0xf0] }
 0x250   : > { %v441_v18 = vpop.xlane.xlu0 %440  ;;  %v1200_v14 = vmul.f32 %v4619_v10, %v1130_v31  ;;  %v1201_v26 = vmul.f32 %v4621_v17, %v1131_v57  ;;  %v2025_v46 = vadd.f32 %v2024_v41, %v1935_v3  ;;  %v3445_v57 = vor.u32 %v3736_v43, %v3444_v7 }
 0x251   : > { %v2996_v13 = vpack.c.bf16 %v2201_v45, %v2023_v32  ;;  %v482_v24 = vmul.f32 %v4396_v33, %v441_v18  ;;  %700 = vadd.xlane.f32.xlu1 %v699_v44  ;;  %v974_v32 = vmul.f32 %v3943_v52, %v973_v37  ;;  %v3784_v45 = vld [vmem:[#allocation8 + $0x28c] sm:$0xf0] }
 0x252   : > { %v1270_v49 = vadd.f32 %v4632_v21, %v1200_v14  ;;  %v1271_v55 = vadd.f32 %v4636_v9, %v1201_v26  ;;  %v3637_v18 = vor.u32 %v3784_v45, %v3636_v11  ;;  %2262 = vmatpush.bf16.msrb.mxu0 %v3445_v57 }
 0x253   : > { %3092 = vst [vmem:[%s5063_s2 + $0xc0] sm:$0xff] %v2996_v13  ;;  %v5414_v30 = vsub.f32 %v6080_v58, %v482_v24  ;;  %v5417_v0 = vsub.f32 %v6081_v20, %v482_v24  ;;  %v975_v31 = vmul.f32 0.5, %v974_v32 }
 0x254   : > { %v5419_v27 = vpack.c.bf16 %v1270_v49, %v1268_v12  ;;  %v5421_v34 = vpack.c.bf16 %v1271_v55, %v1269_v23  ;;  %2351 = vmatpush.bf16.msrb.mxu1 %v3637_v18 }
 0x255   : > { %v608_v40 = vmul.f32 %v5414_v30, %v5414_v30  ;;  %v609_v4 = vmul.f32 %v5417_v0, %v5417_v0  ;;  %v976_v13 = vsub.f32 1.5, %v975_v31  ;;  %v6083_v31 = vld [vmem:[#allocation21_spill] sm:$0xff] }
 0x256   : > { %6082 = vst [vmem:[#allocation38_spill] sm:$0xff] %v5421_v34  ;;  %v2113_v2 = vpop.f32.mrf.mxu2  ;;  %v2202_v29 = vpop.f32.mrf.mxu3  ;;  %1957 = vmatmul.bf16.gmra.mxu0 %v5419_v27  ;;  %2046 = vmatmul.bf16.gmra.mxu1 %v5421_v34 }
 0x257   : > { %v2203_v60 = vadd.f32 %v2202_v29, %v2113_v2  ;;  %2135 = vmatmul.bf16.gmra.mxu2 %v5419_v27  ;;  %2224 = vmatmul.bf16.gmra.mxu3 %v5421_v34  ;;  %v702_v16 = vadd.f32 %v609_v4, %v608_v40  ;;  %v977_v55 = vmul.f32 %v3943_v52, %v976_v13  ;;  %v6084_v13 = vld [vmem:[#allocation16_spill] sm:$0xff] }
 0x259   : > { %v2999_v36 = vpack.c.bf16 %v2203_v60, %v2025_v46  ;;  %703 = vadd.xlane.f32.xlu2 %v702_v16  ;;  %v981_v2 = vsel %vm980_vm15, %v3943_v52, %v977_v55 }
 0x25a   : > { %v1132_v52 = vmul.f32 %v981_v2, %v6083_v31 }
 0x25b   : > { %3095 = vst [vmem:[%s5063_s2 + $0xd8] sm:$0xff] %v2999_v36 }
 0x25e   : > { %v677_v8 = vpop.xlane.xlu1 %676 }
 0x25f   : > { %v729_v44 = vmul.f32 %v677_v8, %v4396_v33 }
 0x261   : > { %v761_v14 = vadd.f32 1e-05, %v729_v44 }
 0x262   : > { %v683_v24 = vpop.xlane.xlu2 %682 }
 0x263   : > { %v1938_v26 = vpop.f32.mrf.mxu0  ;;  %v2027_v12 = vpop.f32.mrf.mxu1  ;;  %3944 = vrsqrt.f32 %v761_v14  ;;  %v731_v23 = vmul.f32 %v683_v24, %v4396_v33  ;;  %v1133_v24 = vmul.f32 %v981_v2, %v6084_v13  ;;  %vm988_vm1 = vweird.f32 %v761_v14 }
 0x264   : > { %v2028_v37 = vadd.f32 %v2027_v12, %v1938_v26 }
 0x265   : > { %v5435_v49 = vadd.f32 1e-05, %v731_v23 }
 0x266   : > { %v680_v58 = vpop.xlane.xlu1 %679 }
 0x267   : > { %3946 = vrsqrt.f32 %v5435_v49  ;;  %v730_v20 = vmul.f32 %v680_v58, %v4396_v33  ;;  %vm1008_vm3 = vweird.f32 %v5435_v49 }
 0x269   : > { %v3945_v3 = vpop.eup %3944  ;;  %v5440_v41 = vadd.f32 1e-05, %v730_v20  ;;  %v1202_v20 = vmul.f32 %v4619_v10, %v1132_v52 }
 0x26a   : > { %v2116_v40 = vpop.f32.mrf.mxu2  ;;  %v983_v29 = vmul.f32 %v3945_v3, %v761_v14  ;;  %v686_v46 = vpop.xlane.xlu2 %685  ;;  %vm989_vm0 = vweird.f32 %v3945_v3 }
 0x26b   : > { %v5442_v4 = vpop.f32.mrf.mxu0  ;;  %v2205_v60 = vpop.f32.mrf.mxu3  ;;  %3948 = vrsqrt.f32 %v5440_v41  ;;  %v732_v16 = vmul.f32 %v686_v46, %v4396_v33  ;;  %vm990_vm2 = vmor %vm988_vm1, %vm989_vm0  ;;  %v1272_v34 = vadd.f32 %v4632_v21, %v1202_v20  ;;  %vm998_vm7 = vweird.f32 %v5440_v41 }
 0x26c   : > { %v689_v36 = vpop.xlane.xlu0 %688  ;;  %v2206_v32 = vadd.f32 %v2205_v60, %v2116_v40  ;;  %v5446_v61 = vpop.f32.mrf.mxu1  ;;  %v984_v7 = vmul.f32 %v3945_v3, %v983_v29 }
 0x26d   : > { %v733_v43 = vmul.f32 %v689_v36, %v4396_v33  ;;  %v5449_v11 = vpop.eup %3946  ;;  %v5452_v8 = vadd.f32 1e-05, %v732_v16 }
 0x26e   : > { %v3002_v57 = vpack.c.bf16 %v2206_v32, %v2028_v37  ;;  %v985_v45 = vmul.f32 0.5, %v984_v7  ;;  %v1003_v44 = vmul.f32 %v5449_v11, %v5435_v49  ;;  %v444_v18 = vpop.xlane.xlu1 %443  ;;  %v1203_v32 = vmul.f32 %v4621_v17, %v1133_v24  ;;  %v3727_v7 = vld [vmem:[#allocation8 + $0xcc] sm:$0xf] }
 0x26f   : > { %v5456_v26 = vadd.f32 1e-05, %v733_v43  ;;  %v483_v12 = vmul.f32 %v4396_v33, %v444_v18  ;;  %v3422_v43 = vld [vmem:[#allocation8 + $0xe0] sm:$0xf0]  ;;  %vm1009_vm4 = vweird.f32 %v5449_v11  ;;  %vm1018_vm9 = vweird.f32 %v5452_v8 }
 0x270   : > { %3098 = vst [vmem:[%s5063_s2 + $0xf0] sm:$0xff] %v3002_v57  ;;  %v986_v23 = vsub.f32 1.5, %v985_v45  ;;  %v1004_v55 = vmul.f32 %v5449_v11, %v1003_v44  ;;  %v3425_v45 = vor.u32 %v3727_v7, %v3422_v43  ;;  %v3775_v44 = vld [vmem:[#allocation8 + $0x24c] sm:$0xf]  ;;  %v3614_v18 = vld [vmem:[#allocation8 + $0x260] sm:$0xf0]  ;;  %v1273_v43 = vadd.f32 %v4636_v9, %v1203_v32  ;;  %vm1010_vm6 = vmor %vm1008_vm3, %vm1009_vm4 }
 0x271   : > { %3950 = vrsqrt.f32 %v5456_v26  ;;  %v5463_v58 = vpop.eup %3948  ;;  %v5468_v40 = vsub.f32 %v5266_v19, %v483_v12  ;;  %v5471_v2 = vsub.f32 %v5269_v6, %v483_v12  ;;  %vm1028_vm11 = vweird.f32 %v5456_v26 }
 0x272   : > { %3952 = vrsqrt.f32 %v5452_v8  ;;  %v2118_v29 = vpop.f32.mrf.mxu2  ;;  %v987_v60 = vmul.f32 %v3945_v3, %v986_v23  ;;  %v1005_v16 = vmul.f32 0.5, %v1004_v55  ;;  %v993_v37 = vmul.f32 %v5463_v58, %v5440_v41  ;;  %2441 = vmatpush.bf16.msrb.mxu2 %v3425_v45 }
 0x273   : > { %v5473_v46 = vpop.f32.mrf.mxu0  ;;  %v2207_v36 = vpop.f32.mrf.mxu3  ;;  %v610_v19 = vmul.f32 %v5468_v40, %v5468_v40  ;;  %v611_v6 = vmul.f32 %v5471_v2, %v5471_v2  ;;  %v3617_v23 = vor.u32 %v3775_v44, %v3614_v18  ;;  %vm999_vm5 = vweird.f32 %v5463_v58 }
 0x274   : > { %v5483_v31 = vpop.f32.mrf.mxu1  ;;  %v991_v14 = vsel %vm990_vm2, %v3945_v3, %v987_v60  ;;  %v1006_v52 = vsub.f32 1.5, %v1005_v16  ;;  %v994_v57 = vmul.f32 %v5463_v58, %v993_v37  ;;  %v695_v7 = vpop.xlane.xlu2 %694  ;;  %vm1000_vm8 = vmor %vm998_vm7, %vm999_vm5 }
 0x275   : > { %v1134_v13 = vmul.f32 %v991_v14, %v5109_v22  ;;  %v1135_v24 = vmul.f32 %v991_v14, %v5141_v54  ;;  %v705_v12 = vadd.f32 %v611_v6, %v610_v19  ;;  %2530 = vmatpush.bf16.msrb.mxu3 %v3617_v23  ;;  %v735_v41 = vmul.f32 %v695_v7, %v4396_v33 }
 0x276   : > { %v995_v3 = vmul.f32 0.5, %v994_v57  ;;  %v692_v60 = vpop.xlane.xlu1 %691  ;;  %v1007_v20 = vmul.f32 %v5449_v11, %v1006_v52 }
 0x277   : > { %v5488_v55 = vpop.eup %3950  ;;  %v1204_v37 = vmul.f32 %v4619_v10, %v1134_v13  ;;  %v1205_v22 = vmul.f32 %v4621_v17, %v1135_v24  ;;  %706 = vadd.xlane.f32.xlu0 %v705_v12  ;;  %v734_v6 = vmul.f32 %v692_v60, %v4396_v33  ;;  %v2208_v13 = vadd.f32 %v2207_v36, %v2118_v29  ;;  %v3420_v36 = vld [vmem:[#allocation8 + $0xc8] sm:$0xf] }
 0x278   : > { %v5493_v16 = vpop.eup %3952  ;;  %v1023_v54 = vmul.f32 %v5488_v55, %v5456_v26  ;;  %v996_v19 = vsub.f32 1.5, %v995_v3  ;;  %v1011_v60 = vsel %vm1010_vm6, %v5449_v11, %v1007_v20  ;;  %v2030_v29 = vadd.f32 %v5446_v61, %v5442_v4 }
 0x279   : > { %v1274_v14 = vadd.f32 %v4632_v21, %v1204_v37  ;;  %v1275_v57 = vadd.f32 %v4636_v9, %v1205_v22  ;;  %v1013_v18 = vmul.f32 %v5493_v16, %v5452_v8  ;;  %v5515_v32 = vadd.f32 1e-05, %v734_v6  ;;  %v3612_v22 = vld [vmem:[#allocation8 + $0x248] sm:$0xf] }
 0x27a   : > { %v2121_v52 = vpop.f32.mrf.mxu2  ;;  %v997_v44 = vmul.f32 %v5463_v58, %v996_v19  ;;  %v1024_v49 = vmul.f32 %v5488_v55, %v1023_v54  ;;  %v3778_v19 = vld [vmem:[#allocation8 + $0x25c] sm:$0xf0]  ;;  %v3005_v7 = vpack.c.bf16 %v2208_v13, %v2030_v29  ;;  %v1138_v4 = vmul.f32 %v1011_v60, %v5153_v51 }
 0x27b   : > { %v5510_v45 = vpop.f32.mrf.mxu0  ;;  %v2210_v24 = vpop.f32.mrf.mxu3  ;;  %v5517_v12 = vpack.c.bf16 %v1274_v14, %v1272_v34  ;;  %v5519_v23 = vpack.c.bf16 %v1275_v57, %v1273_v43  ;;  %3954 = vrsqrt.f32 %v5515_v32  ;;  %v3730_v34 = vld [vmem:[#allocation8 + $0xdc] sm:$0xf0]  ;;  %v1014_v6 = vmul.f32 %v5493_v16, %v1013_v18 }
 0x27c   : > { %v2034_v3 = vpop.f32.mrf.mxu1  ;;  %v1001_v37 = vsel %vm1000_vm8, %v5463_v58, %v997_v44  ;;  %v1025_v61 = vmul.f32 0.5, %v1024_v49  ;;  %v5537_v11 = vadd.f32 1e-05, %v735_v41  ;;  %v1139_v58 = vmul.f32 %v1011_v60, %v5173_v48  ;;  %3101 = vst [vmem:[%s5063_s2 + $0x108] sm:$0xff] %v3005_v7  ;;  %v3721_v60 = vld [vmem:[#allocation8 + $0x9c] sm:$0xf] }
 0x27d   : > { %1962 = vmatmul.bf16.gmra.mxu0 %v5517_v12  ;;  %v1136_v54 = vmul.f32 %v1001_v37, %v5199_v50  ;;  %2051 = vmatmul.bf16.gmra.mxu1 %v5519_v23  ;;  %v1137_v20 = vmul.f32 %v1001_v37, %v5202_v47  ;;  %v3421_v50 = vor.u32 %v3730_v34, %v3420_v36  ;;  %v1015_v44 = vmul.f32 0.5, %v1014_v6  ;;  %v3398_v34 = vld [vmem:[#allocation8 + $0xb0] sm:$0xf0]  ;;  %v3724_v6 = vld [vmem:[#allocation8 + $0xac] sm:$0xf0] }
 0x27e   : > { %2140 = vmatmul.bf16.gmra.mxu2 %v5517_v12  ;;  %2229 = vmatmul.bf16.gmra.mxu3 %v5519_v23  ;;  %v3613_v43 = vor.u32 %v3778_v19, %v3612_v22  ;;  %3956 = vrsqrt.f32 %v5537_v11  ;;  %v2211_v51 = vadd.f32 %v2210_v24, %v2121_v52  ;;  %v1026_v41 = vsub.f32 1.5, %v1025_v61  ;;  %v3769_v22 = vld [vmem:[#allocation8 + $0x21c] sm:$0xf]  ;;  %v3590_v52 = vld [vmem:[#allocation8 + $0x230] sm:$0xf0] }
 0x27f   : > { %v1206_v57 = vmul.f32 %v4619_v10, %v1136_v54  ;;  %2263 = vmatpush.bf16.msrb.mxu0 %v3421_v50  ;;  %v2033_v48 = vadd.f32 %v5483_v31, %v5473_v46  ;;  %v1208_v37 = vmul.f32 %v4619_v10, %v1138_v4  ;;  %v1209_v29 = vmul.f32 %v4621_v17, %v1139_v58  ;;  %v3396_v54 = vld [vmem:[#allocation8 + $0x98] sm:$0xf] }
 0x280   : > { %2352 = vmatpush.bf16.msrb.mxu1 %v3613_v43  ;;  %v1207_v36 = vmul.f32 %v4621_v17, %v1137_v20  ;;  %vm1019_vm10 = vweird.f32 %v5493_v16  ;;  %v1016_v31 = vsub.f32 1.5, %v1015_v44  ;;  %vm1029_vm12 = vweird.f32 %v5488_v55 }
 0x281   : > { %v5544_v49 = vpop.eup %3954  ;;  %v3008_v24 = vpack.c.bf16 %v2211_v51, %v2033_v48  ;;  %v1276_v46 = vadd.f32 %v4632_v21, %v1206_v57  ;;  %v2035_v7 = vadd.f32 %v2034_v3, %v5510_v45  ;;  %v3401_v61 = vor.u32 %v3721_v60, %v3398_v34  ;;  %v3588_v51 = vld [vmem:[#allocation8 + $0x218] sm:$0xf]  ;;  %v3772_v48 = vld [vmem:[#allocation8 + $0x22c] sm:$0xf0]  ;;  %vm5570_vm13 = vmor %vm1028_vm11, %vm1029_vm12 }
 0x282   : > { %v2123_v14 = vpop.f32.mrf.mxu2  ;;  %v1033_v19 = vmul.f32 %v5544_v49, %v5515_v32  ;;  %v3593_v58 = vor.u32 %v3769_v22, %v3590_v52  ;;  %v1278_v50 = vadd.f32 %v4632_v21, %v1208_v37  ;;  %v1279_v43 = vadd.f32 %v4636_v9, %v1209_v29  ;;  %vm1020_vm14 = vmor %vm1018_vm9, %vm1019_vm10 }
 0x283   : > { %v2212_v18 = vpop.f32.mrf.mxu3  ;;  %v1948_v13 = vpop.f32.mrf.mxu0  ;;  %3104 = vst [vmem:[%s5063_s2 + $0x120] sm:$0xff] %v3008_v24  ;;  %v1277_v57 = vadd.f32 %v4636_v9, %v1207_v36  ;;  %v1027_v44 = vmul.f32 %v5488_v55, %v1026_v41  ;;  %2442 = vmatpush.bf16.msrb.mxu2 %v3401_v61  ;;  %v3397_v60 = vor.u32 %v3724_v6, %v3396_v54  ;;  %vm1048_vm15 = vweird.f32 %v5537_v11 }
 0x284   : > { %v2037_v47 = vpop.f32.mrf.mxu1  ;;  %v2213_v4 = vadd.f32 %v2212_v18, %v2123_v14  ;;  %v5560_v20 = vpop.eup %3956  ;;  %2531 = vmatpush.bf16.msrb.mxu3 %v3593_v58  ;;  %v5576_v41 = vpack.c.bf16 %v1278_v50, %v1276_v46  ;;  %v1017_v37 = vmul.f32 %v5493_v16, %v1016_v31  ;;  %v1034_v29 = vmul.f32 %v5544_v49, %v1033_v19  ;;  %v3763_v58 = vld [vmem:[#allocation8 + $0x1ec] sm:$0xf]  ;;  %v3566_v50 = vld [vmem:[#allocation8 + $0x200] sm:$0xf0] }
 0x285   : > { %v1043_v3 = vmul.f32 %v5560_v20, %v5537_v11  ;;  %v2038_v36 = vadd.f32 %v2037_v47, %v1948_v13  ;;  %2264 = vmatpush.bf16.msrb.mxu0 %v3397_v60  ;;  %v3589_v52 = vor.u32 %v3772_v48, %v3588_v51  ;;  %v5586_v24 = vpack.c.bf16 %v1279_v43, %v1277_v57  ;;  %v3372_v43 = vld [vmem:[#allocation8 + $0x68] sm:$0xf]  ;;  %v3766_v48 = vld [vmem:[#allocation8 + $0x1fc] sm:$0xf0]  ;;  %v3709_v60 = vld [vmem:[#allocation8 + $0x3c] sm:$0xf] }
 0x286   : > { %v3011_v14 = vpack.c.bf16 %v2213_v4, %v2035_v7  ;;  %v1031_v46 = vsel %vm5570_vm13, %v5488_v55, %v1027_v44  ;;  %v1021_v8 = vsel %vm1020_vm14, %v5493_v16, %v1017_v37  ;;  %v1035_v19 = vmul.f32 0.5, %v1034_v29  ;;  %v3715_v55 = vld [vmem:[#allocation8 + $0x6c] sm:$0xf]  ;;  %v3374_v7 = vld [vmem:[#allocation8 + $0x80] sm:$0xf0] }
 0x287   : > { %v1044_v34 = vmul.f32 %v5560_v20, %v1043_v3  ;;  %2353 = vmatpush.bf16.msrb.mxu1 %v3589_v52  ;;  %v1142_v54 = vmul.f32 %v1031_v46, %v5228_v1  ;;  %v1143_v4 = vmul.f32 %v1031_v46, %v5235_v38  ;;  %v3377_v61 = vor.u32 %v3715_v55, %v3374_v7  ;;  %v3718_v44 = vld [vmem:[#allocation8 + $0x7c] sm:$0xf0]  ;;  %v3564_v51 = vld [vmem:[#allocation8 + $0x1e8] sm:$0xf]  ;;  %v3350_v37 = vld [vmem:[#allocation8 + $0x50] sm:$0xf0] }
 0x288   : > { %3107 = vst [vmem:[%s5063_s2 + $0x138] sm:$0xff] %v3011_v14  ;;  %v1140_v16 = vmul.f32 %v1021_v8, %v5211_v63  ;;  %v1141_v1 = vmul.f32 %v1021_v8, %v5214_v25  ;;  %v3569_v3 = vor.u32 %v3763_v58, %v3566_v50  ;;  %v3373_v14 = vor.u32 %v3718_v44, %v3372_v43  ;;  %v3757_v38 = vld [vmem:[#allocation8 + $0x1bc] sm:$0xf] }
 0x289   : > { %v1045_v6 = vmul.f32 0.5, %v1044_v34  ;;  %2443 = vmatpush.bf16.msrb.mxu2 %v3377_v61  ;;  %v1212_v29 = vmul.f32 %v4619_v10, %v1142_v54  ;;  %v3353_v25 = vor.u32 %v3709_v60, %v3350_v37  ;;  %v1036_v8 = vsub.f32 1.5, %v1035_v19  ;;  %v6088_v60 = vld [vmem:[#allocation45_spill] sm:$0xff] }
 0x28a   : > { %v2126_v18 = vpop.f32.mrf.mxu2  ;;  %2532 = vmatpush.bf16.msrb.mxu3 %v3569_v3  ;;  %v1210_v52 = vmul.f32 %v4619_v10, %v1140_v16  ;;  %2265 = vmatpush.bf16.msrb.mxu0 %v3373_v14  ;;  %vm1049_vm0 = vweird.f32 %v5560_v20  ;;  %vm1038_vm1 = vweird.f32 %v5515_v32  ;;  %vm1039_vm2 = vweird.f32 %v5544_v49 }
 0x28b   : > { %v2215_v26 = vpop.f32.mrf.mxu3  ;;  %v1950_v13 = vpop.f32.mrf.mxu0  ;;  %v1046_v63 = vsub.f32 1.5, %v1045_v6  ;;  %vm1050_vm3 = vmor %vm1048_vm15, %vm1049_vm0  ;;  %v1037_v58 = vmul.f32 %v5544_v49, %v1036_v8 }
 0x28c   : > { %v2216_v22 = vadd.f32 %v2215_v26, %v2126_v18  ;;  %v2039_v47 = vpop.f32.mrf.mxu1  ;;  %v3565_v18 = vor.u32 %v3766_v48, %v3564_v51  ;;  %v1213_v26 = vmul.f32 %v4621_v17, %v1143_v4  ;;  %v1280_v19 = vadd.f32 %v4632_v21, %v1210_v52  ;;  %vm1040_vm4 = vmor %vm1038_vm1, %vm1039_vm2  ;;  %v698_v52 = vpop.xlane.xlu0 %697 }
 0x28d   : > { %1967 = vmatmul.bf16.gmra.mxu0 %v5576_v41  ;;  %2056 = vmatmul.bf16.gmra.mxu1 %v5586_v24  ;;  %v2040_v34 = vadd.f32 %v2039_v47, %v1950_v13  ;;  %v1282_v13 = vadd.f32 %v4632_v21, %v1212_v29  ;;  %v1047_v7 = vmul.f32 %v5560_v20, %v1046_v63 }
 0x28e   : > { %v3014_v31 = vpack.c.bf16 %v2216_v22, %v2038_v36  ;;  %2145 = vmatmul.bf16.gmra.mxu2 %v5576_v41  ;;  %2234 = vmatmul.bf16.gmra.mxu3 %v5586_v24  ;;  %v3542_v36 = vld [vmem:[#allocation8 + $0x1d0] sm:$0xf0]  ;;  %v1283_v47 = vadd.f32 %v4636_v9, %v1213_v26  ;;  %v1041_v51 = vsel %vm1040_vm4, %v5544_v49, %v1037_v58 }
 0x28f   : > { %2354 = vmatpush.bf16.msrb.mxu1 %v3565_v18  ;;  %v3545_v46 = vor.u32 %v3757_v38, %v3542_v36  ;;  %2444 = vmatpush.bf16.msrb.mxu2 %v3353_v25  ;;  %v5618_v43 = vpack.c.bf16 %v1282_v13, %v1280_v19  ;;  %v1051_v44 = vsel %vm1050_vm3, %v5560_v20, %v1047_v7  ;;  %v6087_v20 = vld [vmem:[#allocation44_spill] sm:$0xff]  ;;  %v3712_v7 = vld [vmem:[#allocation8 + $0x4c] sm:$0xf0]  ;;  %v3540_v19 = vld [vmem:[#allocation8 + $0x1b8] sm:$0xf] }
 0x290   : > { %3110 = vst [vmem:[%s5063_s2 + $0x150] sm:$0xff] %v3014_v31  ;;  %v1211_v31 = vmul.f32 %v4621_v17, %v1141_v1  ;;  %v1146_v48 = vmul.f32 %v1051_v44, %v5302_v28  ;;  %v1147_v1 = vmul.f32 %v1051_v44, %v5305_v15  ;;  %v1144_v14 = vmul.f32 %v1041_v51, %v6087_v20 }
 0x291   : > { %2533 = vmatpush.bf16.msrb.mxu3 %v3545_v46  ;;  %v1145_v37 = vmul.f32 %v1041_v51, %v6088_v60  ;;  %v736_v8 = vmul.f32 %v698_v52, %v4396_v33 }
 0x292   : > { %v2128_v57 = vpop.f32.mrf.mxu2  ;;  %v1281_v61 = vadd.f32 %v4636_v9, %v1211_v31  ;;  %v1216_v38 = vmul.f32 %v4619_v10, %v1146_v48  ;;  %v1217_v28 = vmul.f32 %v4621_v17, %v1147_v1  ;;  %v1214_v26 = vmul.f32 %v4619_v10, %v1144_v14 }
 0x293   : > { %v2217_v45 = vpop.f32.mrf.mxu3  ;;  %v1953_v55 = vpop.f32.mrf.mxu0 }
 0x294   : > { %v2218_v22 = vadd.f32 %v2217_v45, %v2128_v57  ;;  %v2042_v6 = vpop.f32.mrf.mxu1  ;;  %v5620_v57 = vpack.c.bf16 %v1283_v47, %v1281_v61  ;;  %v1286_v15 = vadd.f32 %v4632_v21, %v1216_v38  ;;  %v1284_v25 = vadd.f32 %v4632_v21, %v1214_v26  ;;  %v3348_v47 = vld [vmem:[#allocation8 + $0x38] sm:$0xf]  ;;  %v3760_v61 = vld [vmem:[#allocation8 + $0x1cc] sm:$0xf0] }
 0x295   : > { %v2043_v32 = vadd.f32 %v2042_v6, %v1953_v55  ;;  %v768_v55 = vadd.f32 1e-05, %v736_v8 }
 0x296   : > { %v3017_v54 = vpack.c.bf16 %v2218_v22, %v2040_v34  ;;  %v1215_v34 = vmul.f32 %v4621_v17, %v1145_v37  ;;  %v1287_v22 = vadd.f32 %v4636_v9, %v1217_v28  ;;  %v5642_v31 = vpack.c.bf16 %v1286_v15, %v1284_v25 }
 0x297   : > { %3958 = vrsqrt.f32 %v768_v55  ;;  %vm1058_vm5 = vweird.f32 %v768_v55 }
 0x298   : > { %3113 = vst [vmem:[%s5063_s2 + $0x168] sm:$0xff] %v3017_v54  ;;  %v1285_v46 = vadd.f32 %v4636_v9, %v1215_v34 }
 0x29a   : > { %v2131_v4 = vpop.f32.mrf.mxu2  ;;  %v5645_v54 = vpack.c.bf16 %v1287_v22, %v1285_v46 }
 0x29b   : > { %v2220_v50 = vpop.f32.mrf.mxu3  ;;  %v1955_v45 = vpop.f32.mrf.mxu0 }
 0x29c   : > { %v2221_v16 = vadd.f32 %v2220_v50, %v2131_v4  ;;  %v2044_v3 = vpop.f32.mrf.mxu1  ;;  %v3349_v4 = vor.u32 %v3712_v7, %v3348_v47  ;;  %v3541_v50 = vor.u32 %v3760_v61, %v3540_v19 }
 0x29d   : > { %1972 = vmatmul.bf16.gmra.mxu0 %v5618_v43  ;;  %2061 = vmatmul.bf16.gmra.mxu1 %v5620_v57  ;;  %v2045_v29 = vadd.f32 %v2044_v3, %v1955_v45  ;;  %v3959_v6 = vpop.eup %3958 }
 0x29e   : > { %v3020_v11 = vpack.c.bf16 %v2221_v16, %v2043_v32  ;;  %2150 = vmatmul.bf16.gmra.mxu2 %v5618_v43  ;;  %2239 = vmatmul.bf16.gmra.mxu3 %v5620_v57  ;;  %v1053_v13 = vmul.f32 %v3959_v6, %v768_v55  ;;  %vm1059_vm6 = vweird.f32 %v3959_v6 }
 0x29f   : > { %2266 = vmatpush.bf16.msrb.mxu0 %v3349_v4  ;;  %2355 = vmatpush.bf16.msrb.mxu1 %v3541_v50  ;;  %vm1060_vm7 = vmor %vm1058_vm5, %vm1059_vm6 }
 0x2a0   : > { %3116 = vst [vmem:[%s5063_s2 + $0x180] sm:$0xff] %v3020_v11  ;;  %v1054_v58 = vmul.f32 %v3959_v6, %v1053_v13 }
 0x2a2   : > { %v2133_v18 = vpop.f32.mrf.mxu2  ;;  %v1055_v44 = vmul.f32 0.5, %v1054_v58 }
 0x2a3   : > { %v2222_v49 = vpop.f32.mrf.mxu3 }
 0x2a4   : > { %v2223_v36 = vadd.f32 %v2222_v49, %v2133_v18  ;;  %v1056_v51 = vsub.f32 1.5, %v1055_v44 }
 0x2a6   : > { %v3023_v63 = vpack.c.bf16 %v2223_v36, %v2045_v29  ;;  %v1057_v1 = vmul.f32 %v3959_v6, %v1056_v51 }
 0x2a8   : > { %3119 = vst [vmem:[%s5063_s2 + $0x198] sm:$0xff] %v3023_v63  ;;  %v1061_v20 = vsel %vm1060_vm7, %v3959_v6, %v1057_v1  ;;  %v3326_v1 = vld [vmem:[#allocation8 + $0x20] sm:$0xf0] }
 0x2a9   : > { %v1148_v60 = vmul.f32 %v1061_v20, %v5332_v59  ;;  %v1149_v49 = vmul.f32 %v1061_v20, %v5335_v5  ;;  %v3518_v20 = vld [vmem:[#allocation8 + $0x1a0] sm:$0xf0] }
 0x2ab   : > { %v1218_v26 = vmul.f32 %v4619_v10, %v1148_v60  ;;  %v1219_v34 = vmul.f32 %v4621_v17, %v1149_v49 }
 0x2ad   : > { %1977 = vmatmul.bf16.gmra.mxu0 %v5642_v31  ;;  %2066 = vmatmul.bf16.gmra.mxu1 %v5645_v54  ;;  %v1288_v6 = vadd.f32 %v4632_v21, %v1218_v26  ;;  %v1289_v47 = vadd.f32 %v4636_v9, %v1219_v34 }
 0x2ae   : > { %2155 = vmatmul.bf16.gmra.mxu2 %v5642_v31  ;;  %2244 = vmatmul.bf16.gmra.mxu3 %v5645_v54 }
 0x2c4   : > { %v701_v32 = vpop.xlane.xlu1 %700 }
 0x2c5   : > { %v737_v16 = vmul.f32 %v701_v32, %v4396_v33 }
 0x2c7   : > { %v769_v11 = vadd.f32 1e-05, %v737_v16 }
 0x2c9   : > { %3960 = vrsqrt.f32 %v769_v11  ;;  %vm1068_vm9 = vweird.f32 %v769_v11 }
 0x2cc   : > { %v704_v18 = vpop.xlane.xlu2 %703 }
 0x2cd   : > { %v738_v38 = vmul.f32 %v704_v18, %v4396_v33  ;;  %v3706_v18 = vld [vmem:[#allocation8 + $0x1c] sm:$0xf0] }
 0x2cf   : > { %v3961_v48 = vpop.eup %3960  ;;  %v770_v22 = vadd.f32 1e-05, %v738_v38  ;;  %v3516_v38 = vld [vmem:[#allocation8 + $0x188] sm:$0xf] }
 0x2d0   : > { %v1063_v45 = vmul.f32 %v3961_v48, %v769_v11  ;;  %vm1069_vm8 = vweird.f32 %v3961_v48 }
 0x2d1   : > { %vm1070_vm10 = vmor %vm1068_vm9, %vm1069_vm8  ;;  %3962 = vrsqrt.f32 %v770_v22  ;;  %vm1078_vm11 = vweird.f32 %v770_v22 }
 0x2d2   : > { %v1064_v3 = vmul.f32 %v3961_v48, %v1063_v45  ;;  %v3751_v45 = vld [vmem:[#allocation8 + $0x18c] sm:$0xf] }
 0x2d3   : > { %v1958_v29 = vpop.f32.mrf.mxu0  ;;  %v2047_v36 = vpop.f32.mrf.mxu1 }
 0x2d4   : > { %v1065_v14 = vmul.f32 0.5, %v1064_v3  ;;  %v2048_v25 = vadd.f32 %v2047_v36, %v1958_v29  ;;  %v3754_v29 = vld [vmem:[#allocation8 + $0x19c] sm:$0xf0] }
 0x2d6   : > { %v1066_v37 = vsub.f32 1.5, %v1065_v14  ;;  %v3324_v14 = vld [vmem:[#allocation8 + $0x8] sm:$0xf] }
 0x2d7   : > { %v3963_v44 = vpop.eup %3962  ;;  %v3325_v49 = vor.u32 %v3706_v18, %v3324_v14 }
 0x2d8   : > { %v1067_v28 = vmul.f32 %v3961_v48, %v1066_v37  ;;  %v1073_v51 = vmul.f32 %v3963_v44, %v770_v22  ;;  %v3521_v37 = vor.u32 %v3751_v45, %v3518_v20  ;;  %vm1079_vm12 = vweird.f32 %v3963_v44  ;;  %v3794_v22 = vld [vmem:[#allocation8 + $0x2e4] sm:$0xf]  ;;  %v3692_v45 = vld [vmem:[#allocation8 + $0x2e0] sm:$0xf] }
 0x2d9   : > { %2267 = vmatpush.bf16.msrb.mxu0 %v3325_v49  ;;  %vm1080_vm13 = vmor %vm1078_vm11, %vm1079_vm12 }
 0x2da   : > { %v1071_v63 = vsel %vm1070_vm10, %v3961_v48, %v1067_v28  ;;  %v2136_v52 = vpop.f32.mrf.mxu2  ;;  %v2225_v5 = vpop.f32.mrf.mxu3  ;;  %v3703_v48 = vld [vmem:[#allocation8 + $0xc] sm:$0xf]  ;;  %v1074_v60 = vmul.f32 %v3963_v44, %v1073_v51  ;;  %v3517_v28 = vor.u32 %v3754_v29, %v3516_v38  ;;  %2534 = vmatpush.bf16.msrb.mxu3 %v3521_v37 }
 0x2db   : > { %v1150_v15 = vmul.f32 %v1071_v63, %v5389_v62  ;;  %v1151_v59 = vmul.f32 %v1071_v63, %v5392_v42  ;;  %v2226_v46 = vadd.f32 %v2225_v5, %v2136_v52  ;;  %v1960_v4 = vpop.f32.mrf.mxu0  ;;  %v2049_v61 = vpop.f32.mrf.mxu1  ;;  %v3329_v3 = vor.u32 %v3703_v48, %v3326_v1 }
 0x2dc   : > { %v2050_v32 = vadd.f32 %v2049_v61, %v1960_v4  ;;  %2356 = vmatpush.bf16.msrb.mxu1 %v3517_v28  ;;  %v1075_v63 = vmul.f32 0.5, %v1074_v60  ;;  %v3502_v4 = vld [vmem:[#allocation8 + $0x178] sm:$0xf0] }
 0x2dd   : > { %v1220_v8 = vmul.f32 %v4619_v10, %v1150_v15  ;;  %v1221_v55 = vmul.f32 %v4621_v17, %v1151_v59  ;;  %v3026_v13 = vpack.c.bf16 %v2226_v46, %v2048_v25  ;;  %2445 = vmatpush.bf16.msrb.mxu2 %v3329_v3  ;;  %v3797_v3 = vld [vmem:[#allocation8 + $0x2f4] sm:$0xf0] }
 0x2de   : > { %v1076_v15 = vsub.f32 1.5, %v1075_v63  ;;  %v3693_v60 = vor.u32 %v3797_v3, %v3692_v45  ;;  %v3668_v45 = vld [vmem:[#allocation8 + $0x2b0] sm:$0xf]  ;;  %v3791_v3 = vld [vmem:[#allocation8 + $0x2c4] sm:$0xf0] }
 0x2df   : > { %v1290_v7 = vadd.f32 %v4632_v21, %v1220_v8  ;;  %v1291_v62 = vadd.f32 %v4636_v9, %v1221_v55  ;;  %3122 = vst [vmem:[%s5063_s2 + $0x1b0] sm:$0xff] %v3026_v13 }
 0x2e0   : > { %v1077_v52 = vmul.f32 %v3963_v44, %v1076_v15  ;;  %2705 = vmatpush.bf16.msra.mxu1 %v3693_v60 }
 0x2e1   : > { %v5666_v42 = vpack.c.bf16 %v1290_v7, %v1288_v6  ;;  %v5668_v19 = vpack.c.bf16 %v1291_v62, %v1289_v47  ;;  %v3746_v62 = vld [vmem:[#allocation8 + $0x164] sm:$0xf] }
 0x2e2   : > { %v2138_v58 = vpop.f32.mrf.mxu2  ;;  %v2227_v50 = vpop.f32.mrf.mxu3  ;;  %v1081_v46 = vsel %vm1080_vm13, %v3963_v44, %v1077_v52  ;;  %v3500_v44 = vld [vmem:[#allocation8 + $0x160] sm:$0xf] }
 0x2e3   : > { %1982 = vmatmul.bf16.gmra.mxu0 %v5666_v42  ;;  %2071 = vmatmul.bf16.gmra.mxu1 %v5668_v19  ;;  %v2228_v16 = vadd.f32 %v2227_v50, %v2138_v58  ;;  %v1153_v13 = vmul.f32 %v1081_v46, %v5417_v0 }
 0x2e4   : > { %2160 = vmatmul.bf16.gmra.mxu2 %v5666_v42  ;;  %2249 = vmatmul.bf16.gmra.mxu3 %v5668_v19 }
 0x2e5   : > { %v3029_v11 = vpack.c.bf16 %v2228_v16, %v2050_v32  ;;  %v1223_v58 = vmul.f32 %v4621_v17, %v1153_v13  ;;  %v3505_v32 = vor.u32 %v3746_v62, %v3502_v4  ;;  %v3694_v16 = vld [vmem:[#allocation8 + $0x2f8] sm:$0xf0] }
 0x2e6   : > { %v3697_v48 = vor.u32 %v3794_v22, %v3694_v16  ;;  %v3478_v16 = vld [vmem:[#allocation8 + $0x148] sm:$0xf0] }
 0x2e7   : > { %3125 = vst [vmem:[%s5063_s2 + $0x1c8] sm:$0xff] %v3029_v11  ;;  %v3749_v11 = vld [vmem:[#allocation8 + $0x174] sm:$0xf0]  ;;  %2794 = vmatpush.bf16.msra.mxu2 %v3505_v32  ;;  %v3740_v32 = vld [vmem:[#allocation8 + $0x134] sm:$0xf] }
 0x2e8   : > { %v3501_v1 = vor.u32 %v3749_v11, %v3500_v44  ;;  %2883 = vmatpush.bf16.msra.mxu3 %v3697_v48  ;;  %v3481_v44 = vor.u32 %v3740_v32, %v3478_v16  ;;  %v3788_v11 = vld [vmem:[#allocation8 + $0x2b4] sm:$0xf]  ;;  %v3646_v32 = vld [vmem:[#allocation8 + $0x298] sm:$0xf0]  ;;  %v3452_v16 = vld [vmem:[#allocation8 + $0x100] sm:$0xf] }
 0x2ea   : > { %v707_v36 = vpop.xlane.xlu0 %706  ;;  %2616 = vmatpush.bf16.msra.mxu0 %v3501_v1  ;;  %v3743_v1 = vld [vmem:[#allocation8 + $0x144] sm:$0xf0] }
 0x2eb   : > { %v739_v26 = vmul.f32 %v707_v36, %v4396_v33  ;;  %v1152_v33 = vmul.f32 %v1081_v46, %v5414_v30  ;;  %2795 = vmatpush.bf16.msra.mxu2 %v3481_v44  ;;  %v3737_v44 = vld [vmem:[#allocation8 + $0x114] sm:$0xf0] }
 0x2ed   : > { %v771_v34 = vadd.f32 1e-05, %v739_v26  ;;  %v1222_v61 = vmul.f32 %v4619_v10, %v1152_v33 }
 0x2ef   : > { %3964 = vrsqrt.f32 %v771_v34  ;;  %vm1088_vm15 = vweird.f32 %v771_v34 }
 0x2f5   : > { %v3965_v59 = vpop.eup %3964 }
 0x2f6   : > { %v1083_v5 = vmul.f32 %v3965_v59, %v771_v34  ;;  %vm1089_vm14 = vweird.f32 %v3965_v59 }
 0x2f7   : > { %vm1090_vm0 = vmor %vm1088_vm15, %vm1089_vm14 }
 0x2f8   : > { %v1084_v25 = vmul.f32 %v3965_v59, %v1083_v5 }
 0x2fa   : > { %v1085_v8 = vmul.f32 0.5, %v1084_v25  ;;  %v1963_v55 = vpop.f32.mrf.mxu0  ;;  %v2052_v6 = vpop.f32.mrf.mxu1 }
 0x2fb   : > { %v2053_v20 = vadd.f32 %v2052_v6, %v1963_v55 }
 0x2fc   : > { %v1086_v47 = vsub.f32 1.5, %v1085_v8 }
 0x2fe   : > { %v1087_v7 = vmul.f32 %v3965_v59, %v1086_v47  ;;  %v6089_v47 = vld [vmem:[#allocation24_spill] sm:$0xff] }
 0x300   : > { %v1091_v50 = vsel %vm1090_vm0, %v3965_v59, %v1087_v7  ;;  %v6090_v7 = vld [vmem:[#allocation25_spill] sm:$0xff] }
 0x301   : > { %v1154_v30 = vmul.f32 %v1091_v50, %v5468_v40  ;;  %v1155_v0 = vmul.f32 %v1091_v50, %v5471_v2  ;;  %v2141_v51 = vpop.f32.mrf.mxu2  ;;  %v2230_v14 = vpop.f32.mrf.mxu3  ;;  %v1292_v40 = vadd.f32 %v4632_v21, %v1222_v61  ;;  %v1293_v2 = vadd.f32 %v4636_v9, %v1223_v58 }
 0x302   : > { %v1965_v18 = vpop.f32.mrf.mxu0  ;;  %v2231_v38 = vadd.f32 %v2230_v14, %v2141_v51  ;;  %v2054_v29 = vpop.f32.mrf.mxu1 }
 0x303   : > { %v1224_v37 = vmul.f32 %v4619_v10, %v1154_v30  ;;  %v1225_v49 = vmul.f32 %v4621_v17, %v1155_v0  ;;  %v3670_v30 = vld [vmem:[#allocation8 + $0x2c8] sm:$0xf0]  ;;  %v3476_v0 = vld [vmem:[#allocation8 + $0x130] sm:$0xf] }
 0x304   : > { %v3032_v26 = vpack.c.bf16 %v2231_v38, %v2053_v20  ;;  %v3673_v48 = vor.u32 %v3788_v11, %v3670_v30  ;;  %v3477_v14 = vor.u32 %v3743_v1, %v3476_v0  ;;  %v3453_v30 = vor.u32 %v3737_v44, %v3452_v16  ;;  %v3644_v0 = vld [vmem:[#allocation8 + $0x280] sm:$0xf]  ;;  %v3722_v44 = vld [vmem:[#allocation8 + $0xa4] sm:$0xf] }
 0x305   : > { %v1294_v36 = vadd.f32 %v4632_v21, %v1224_v37  ;;  %v1295_v28 = vadd.f32 %v4636_v9, %v1225_v49  ;;  %v2055_v9 = vadd.f32 %v2054_v29, %v1965_v18  ;;  %v3669_v18 = vor.u32 %v3791_v3, %v3668_v45  ;;  %v6095_v45 = vld [vmem:[#allocation36_spill] sm:$0xff]  ;;  %v6096_v3 = vld [vmem:[#allocation37_spill] sm:$0xff]  ;;  %v6102_v16 = vld [vmem:[#allocation43_spill] sm:$0xff] }
 0x306   : > { %3128 = vst [vmem:[%s5063_s2 + $0x1e0] sm:$0xff] %v3032_v26  ;;  %2884 = vmatpush.bf16.msra.mxu3 %v3673_v48  ;;  %2617 = vmatpush.bf16.msra.mxu0 %v3477_v14  ;;  %v6098_v14 = vld [vmem:[#allocation22_spill] sm:$0xff] }
 0x307   : > { %v5688_v63 = vpack.c.bf16 %v1294_v36, %v1292_v40  ;;  %v5690_v10 = vpack.c.bf16 %v1295_v28, %v1293_v2  ;;  %2706 = vmatpush.bf16.msra.mxu1 %v3669_v18  ;;  %v6091_v2 = vld [vmem:[#allocation26_spill] sm:$0xff]  ;;  %v6092_v36 = vld [vmem:[#allocation27_spill] sm:$0xff]  ;;  %v3728_v18 = vld [vmem:[#allocation8 + $0xd4] sm:$0xf] }
 0x309   : > { %v2143_v17 = vpop.f32.mrf.mxu2  ;;  %1987 = vmatmul.bf16.gmra.mxu0 %v5688_v63  ;;  %2076 = vmatmul.bf16.gmra.mxu1 %v5690_v10  ;;  %v2232_v34 = vpop.f32.mrf.mxu3 }
 0x30a   : > { %2165 = vmatmul.bf16.gmra.mxu2 %v5688_v63  ;;  %2254 = vmatmul.bf16.gmra.mxu3 %v5690_v10  ;;  %v1968_v21 = vpop.f32.mrf.mxu0  ;;  %v2233_v15 = vadd.f32 %v2232_v34, %v2143_v17  ;;  %v2057_v59 = vpop.f32.mrf.mxu1 }
 0x30b   : > { %v2058_v8 = vadd.f32 %v2057_v59, %v1968_v21  ;;  %2618 = vmatpush.bf16.msra.mxu0 %v3453_v30  ;;  %v3770_v30 = vld [vmem:[#allocation8 + $0x224] sm:$0xf] }
 0x30c   : > { %v3035_v52 = vpack.c.bf16 %v2233_v15, %v2055_v9 }
 0x30e   : > { %3131 = vst [vmem:[%s5063_s2 + $0x1f8] sm:$0xff] %v3035_v52 }
 0x311   : > { %v2146_v5 = vpop.f32.mrf.mxu2  ;;  %v2235_v25 = vpop.f32.mrf.mxu3 }
 0x312   : > { %v1970_v46 = vpop.f32.mrf.mxu0  ;;  %v2236_v55 = vadd.f32 %v2235_v25, %v2146_v5  ;;  %v2059_v6 = vpop.f32.mrf.mxu1 }
 0x313   : > { %v2060_v22 = vadd.f32 %v2059_v6, %v1970_v46  ;;  %v6093_v6 = vld [vmem:[#allocation32_spill] sm:$0xff] }
 0x314   : > { %v3038_v33 = vpack.c.bf16 %v2236_v55, %v2058_v8 }
 0x316   : > { %3134 = vst [vmem:[%s5063_s2 + $0x210] sm:$0xff] %v3038_v33  ;;  %v6094_v33 = vld [vmem:[#allocation33_spill] sm:$0xff] }
 0x319   : > { %v2148_v13 = vpop.f32.mrf.mxu2  ;;  %2268 = vmatmul.bf16.vlgmr.msrb.gmra.mxu0 %v6089_v47  ;;  %2357 = vmatmul.bf16.vlgmr.msrb.gmra.mxu1 %v6090_v7  ;;  %v2237_v62 = vpop.f32.mrf.mxu3 }
 0x31a   : > { %2446 = vmatmul.bf16.vlgmr.msrb.gmra.mxu2 %v6089_v47  ;;  %2535 = vmatmul.bf16.vlgmr.msrb.gmra.mxu3 %v6090_v7  ;;  %v1973_v4 = vpop.f32.mrf.mxu0  ;;  %v2238_v61 = vadd.f32 %v2237_v62, %v2148_v13  ;;  %v2062_v58 = vpop.f32.mrf.mxu1  ;;  %v3734_v62 = vld [vmem:[#allocation8 + $0x104] sm:$0xf] }
 0x31b   : > { %v2063_v60 = vadd.f32 %v2062_v58, %v1973_v4  ;;  %v3454_v4 = vld [vmem:[#allocation8 + $0x118] sm:$0xf0] }
 0x31c   : > { %v3041_v50 = vpack.c.bf16 %v2238_v61, %v2060_v22  ;;  %v3782_v22 = vld [vmem:[#allocation8 + $0x284] sm:$0xf] }
 0x31d   : > { %v3649_v11 = vor.u32 %v3782_v22, %v3646_v32  ;;  %v6101_v32 = vld [vmem:[#allocation42_spill] sm:$0xff] }
 0x31e   : > { %3137 = vst [vmem:[%s5063_s2 + $0x228] sm:$0xff] %v3041_v50  ;;  %v3457_v50 = vor.u32 %v3734_v62, %v3454_v4 }
 0x31f   : > { %2885 = vmatpush.bf16.msra.mxu3 %v3649_v11  ;;  %v3406_v11 = vld [vmem:[#allocation8 + $0xb8] sm:$0xf0] }
 0x320   : > { %2796 = vmatpush.bf16.msra.mxu2 %v3457_v50 }
 0x321   : > { %v2151_v51 = vpop.f32.mrf.mxu2  ;;  %v2240_v20 = vpop.f32.mrf.mxu3 }
 0x322   : > { %v2241_v37 = vadd.f32 %v2240_v20, %v2151_v51  ;;  %v1975_v49 = vpop.f32.mrf.mxu0  ;;  %v2064_v38 = vpop.f32.mrf.mxu1  ;;  %v3785_v51 = vld [vmem:[#allocation8 + $0x294] sm:$0xf0]  ;;  %v6097_v20 = vld [vmem:[#allocation17_spill] sm:$0xff] }
 0x323   : > { %v2065_v26 = vadd.f32 %v2064_v38, %v1975_v49  ;;  %v3645_v1 = vor.u32 %v3785_v51, %v3644_v0  ;;  %v3622_v38 = vld [vmem:[#allocation8 + $0x268] sm:$0xf0]  ;;  %v3409_v0 = vor.u32 %v3722_v44, %v3406_v11  ;;  %v3598_v51 = vld [vmem:[#allocation8 + $0x238] sm:$0xf0] }
 0x324   : > { %v3044_v29 = vpack.c.bf16 %v2241_v37, %v2063_v60  ;;  %v3430_v60 = vld [vmem:[#allocation8 + $0xe8] sm:$0xf0]  ;;  %v3776_v37 = vld [vmem:[#allocation8 + $0x254] sm:$0xf] }
 0x325   : > { %2707 = vmatpush.bf16.msra.mxu1 %v3645_v1  ;;  %v3433_v49 = vor.u32 %v3728_v18, %v3430_v60  ;;  %v3404_v1 = vld [vmem:[#allocation8 + $0xa0] sm:$0xf]  ;;  %v3725_v18 = vld [vmem:[#allocation8 + $0xb4] sm:$0xf0] }
 0x326   : > { %3140 = vst [vmem:[%s5063_s2 + $0x240] sm:$0xff] %v3044_v29  ;;  %v3428_v29 = vld [vmem:[#allocation8 + $0xd0] sm:$0xf]  ;;  %v3596_v60 = vld [vmem:[#allocation8 + $0x220] sm:$0xf] }
 0x327   : > { %2797 = vmatpush.bf16.msra.mxu2 %v3433_v49  ;;  %v3773_v49 = vld [vmem:[#allocation8 + $0x234] sm:$0xf0] }
 0x329   : > { %v2153_v40 = vpop.f32.mrf.mxu2  ;;  %2273 = vmatmul.bf16.gmra.mxu0 %v6091_v2  ;;  %2362 = vmatmul.bf16.gmra.mxu1 %v6092_v36  ;;  %v2242_v28 = vpop.f32.mrf.mxu3 }
 0x32a   : > { %2451 = vmatmul.bf16.gmra.mxu2 %v6091_v2  ;;  %2540 = vmatmul.bf16.gmra.mxu3 %v6092_v36  ;;  %v2243_v17 = vadd.f32 %v2242_v28, %v2153_v40  ;;  %v1978_v21 = vpop.f32.mrf.mxu0  ;;  %v2067_v9 = vpop.f32.mrf.mxu1  ;;  %v3731_v40 = vld [vmem:[#allocation8 + $0xe4] sm:$0xf0]  ;;  %v3625_v28 = vor.u32 %v3776_v37, %v3622_v38  ;;  %v3405_v37 = vor.u32 %v3725_v18, %v3404_v1 }
 0x32b   : > { %v2068_v52 = vadd.f32 %v2067_v9, %v1978_v21  ;;  %2798 = vmatpush.bf16.msra.mxu2 %v3409_v0  ;;  %v3597_v38 = vor.u32 %v3773_v49, %v3596_v60  ;;  %v3380_v60 = vld [vmem:[#allocation8 + $0x70] sm:$0xf] }
 0x32c   : > { %v3047_v34 = vpack.c.bf16 %v2243_v17, %v2065_v26  ;;  %v3429_v26 = vor.u32 %v3731_v40, %v3428_v29  ;;  %v3620_v17 = vld [vmem:[#allocation8 + $0x250] sm:$0xf]  ;;  %2886 = vmatpush.bf16.msra.mxu3 %v3625_v28 }
 0x32e   : > { %3143 = vst [vmem:[%s5063_s2 + $0x258] sm:$0xff] %v3047_v34  ;;  %v3779_v34 = vld [vmem:[#allocation8 + $0x264] sm:$0xf0]  ;;  %2619 = vmatpush.bf16.msra.mxu0 %v3429_v26 }
 0x32f   : > { %v3621_v21 = vor.u32 %v3779_v34, %v3620_v17 }
 0x331   : > { %v2156_v15 = vpop.f32.mrf.mxu2  ;;  %v2245_v59 = vpop.f32.mrf.mxu3  ;;  %2708 = vmatpush.bf16.msra.mxu1 %v3621_v21 }
 0x332   : > { %v2246_v5 = vadd.f32 %v2245_v59, %v2156_v15  ;;  %v1980_v46 = vpop.f32.mrf.mxu0  ;;  %v2069_v8 = vpop.f32.mrf.mxu1  ;;  %2620 = vmatpush.bf16.msra.mxu0 %v3405_v37  ;;  %v3719_v37 = vld [vmem:[#allocation8 + $0x84] sm:$0xf0] }
 0x333   : > { %v2070_v61 = vadd.f32 %v2069_v8, %v1980_v46  ;;  %v6099_v8 = vld [vmem:[#allocation40_spill] sm:$0xff]  ;;  %v3381_v49 = vor.u32 %v3719_v37, %v3380_v60 }
 0x334   : > { %v3050_v25 = vpack.c.bf16 %v2246_v5, %v2068_v52 }
 0x335   : > { %2709 = vmatpush.bf16.msra.mxu1 %v3597_v38  ;;  %v3572_v38 = vld [vmem:[#allocation8 + $0x1f0] sm:$0xf] }
 0x336   : > { %3146 = vst [vmem:[%s5063_s2 + $0x270] sm:$0xff] %v3050_v25  ;;  %2621 = vmatpush.bf16.msra.mxu0 %v3381_v49 }
 0x339   : > { %v2158_v55 = vpop.f32.mrf.mxu2  ;;  %2278 = vmatmul.bf16.gmra.mxu0 %v6093_v6  ;;  %2367 = vmatmul.bf16.gmra.mxu1 %v6094_v33  ;;  %v2247_v13 = vpop.f32.mrf.mxu3 }
 0x33a   : > { %2456 = vmatmul.bf16.gmra.mxu2 %v6093_v6  ;;  %2545 = vmatmul.bf16.gmra.mxu3 %v6094_v33  ;;  %v2248_v58 = vadd.f32 %v2247_v13, %v2158_v55  ;;  %v6100_v55 = vld [vmem:[#allocation41_spill] sm:$0xff] }
 0x33c   : > { %v3053_v48 = vpack.c.bf16 %v2248_v58, %v2070_v61 }
 0x33e   : > { %3149 = vst [vmem:[%s5063_s2 + $0x288] sm:$0xff] %v3053_v48  ;;  %v3601_v48 = vor.u32 %v3770_v30, %v3598_v51 }
 0x340   : > { %2887 = vmatpush.bf16.msra.mxu3 %v3601_v48 }
 0x349   : > { %2283 = vmatmul.bf16.gmra.mxu0 %v6095_v45  ;;  %2372 = vmatmul.bf16.gmra.mxu1 %v6096_v3 }
 0x34a   : > { %2461 = vmatmul.bf16.gmra.mxu2 %v6095_v45  ;;  %2550 = vmatmul.bf16.gmra.mxu3 %v6096_v3 }
 0x359   : > { %2288 = vmatmul.bf16.gmra.mxu0 %v6097_v20  ;;  %2377 = vmatmul.bf16.gmra.mxu1 %v6098_v14 }
 0x35a   : > { %2466 = vmatmul.bf16.gmra.mxu2 %v6097_v20  ;;  %2555 = vmatmul.bf16.gmra.mxu3 %v6098_v14 }
 0x360   : > { %v1983_v9 = vpop.f32.mrf.mxu0  ;;  %v2072_v15 = vpop.f32.mrf.mxu1 }
 0x361   : > { %v2073_v5 = vadd.f32 %v2072_v15, %v1983_v9 }
 0x367   : > { %v2161_v59 = vpop.f32.mrf.mxu2  ;;  %v2250_v52 = vpop.f32.mrf.mxu3 }
 0x368   : > { %v2251_v25 = vadd.f32 %v2250_v52, %v2161_v59  ;;  %v1985_v13 = vpop.f32.mrf.mxu0  ;;  %v2074_v62 = vpop.f32.mrf.mxu1 }
 0x369   : > { %2293 = vmatmul.bf16.gmra.mxu0 %v6099_v8  ;;  %2382 = vmatmul.bf16.gmra.mxu1 %v6100_v55  ;;  %v2075_v61 = vadd.f32 %v2074_v62, %v1985_v13 }
 0x36a   : > { %v3056_v46 = vpack.c.bf16 %v2251_v25, %v2073_v5  ;;  %2471 = vmatmul.bf16.gmra.mxu2 %v6099_v8  ;;  %2560 = vmatmul.bf16.gmra.mxu3 %v6100_v55 }
 0x36c   : > { %3152 = vst [vmem:[%s5063_s2 + $0x2a0] sm:$0xff] %v3056_v46 }
 0x36f   : > { %v2163_v4 = vpop.f32.mrf.mxu2  ;;  %v2252_v22 = vpop.f32.mrf.mxu3 }
 0x370   : > { %v2253_v58 = vadd.f32 %v2252_v22, %v2163_v4  ;;  %v3716_v4 = vld [vmem:[#allocation8 + $0x74] sm:$0xf]  ;;  %v3382_v22 = vld [vmem:[#allocation8 + $0x88] sm:$0xf0] }
 0x372   : > { %v3059_v50 = vpack.c.bf16 %v2253_v58, %v2075_v61  ;;  %v3385_v61 = vor.u32 %v3716_v4, %v3382_v22  ;;  %v3764_v58 = vld [vmem:[#allocation8 + $0x1f4] sm:$0xf] }
 0x374   : > { %3155 = vst [vmem:[%s5063_s2 + $0x2b8] sm:$0xff] %v3059_v50  ;;  %v3574_v50 = vld [vmem:[#allocation8 + $0x208] sm:$0xf0]  ;;  %2799 = vmatpush.bf16.msra.mxu2 %v3385_v61 }
 0x375   : > { %v3577_v44 = vor.u32 %v3764_v58, %v3574_v50 }
 0x377   : > { %2888 = vmatpush.bf16.msra.mxu3 %v3577_v44 }
 0x379   : > { %2298 = vmatmul.bf16.gmra.mxu0 %v6101_v32  ;;  %2387 = vmatmul.bf16.gmra.mxu1 %v6102_v16 }
 0x37a   : > { %2476 = vmatmul.bf16.gmra.mxu2 %v6101_v32  ;;  %2565 = vmatmul.bf16.gmra.mxu3 %v6102_v16 }
 0x386   : > { %v1988_v29 = vpop.f32.mrf.mxu0  ;;  %v2077_v40 = vpop.f32.mrf.mxu1 }
 0x387   : > { %v2078_v17 = vadd.f32 %v2077_v40, %v1988_v29  ;;  %v3767_v29 = vld [vmem:[#allocation8 + $0x204] sm:$0xf0] }
 0x388   : > { %v3573_v40 = vor.u32 %v3767_v29, %v3572_v38 }
 0x389   : > { %2303 = vmatmul.bf16.gmra.mxu0 %v5339_v35  ;;  %2392 = vmatmul.bf16.gmra.mxu1 %v5343_v53 }
 0x38a   : > { %2481 = vmatmul.bf16.gmra.mxu2 %v5339_v35  ;;  %2570 = vmatmul.bf16.gmra.mxu3 %v5343_v53 }
 0x38b   : > { %2710 = vmatpush.bf16.msra.mxu1 %v3573_v40 }
 0x38d   : > { %v2166_v28 = vpop.f32.mrf.mxu2  ;;  %v2255_v26 = vpop.f32.mrf.mxu3 }
 0x38e   : > { %v2256_v34 = vadd.f32 %v2255_v26, %v2166_v28  ;;  %v1990_v21 = vpop.f32.mrf.mxu0  ;;  %v2079_v9 = vpop.f32.mrf.mxu1 }
 0x38f   : > { %v2080_v5 = vadd.f32 %v2079_v9, %v1990_v21 }
 0x390   : > { %v3062_v15 = vpack.c.bf16 %v2256_v34, %v2078_v17 }
 0x392   : > { %3158 = vst [vmem:[%s5063_s2 + $0x2d0] sm:$0xff] %v3062_v15 }
 0x395   : > { %v2168_v59 = vpop.f32.mrf.mxu2  ;;  %v2257_v52 = vpop.f32.mrf.mxu3 }
 0x396   : > { %v2258_v25 = vadd.f32 %v2257_v52, %v2168_v59  ;;  %v2269_v46 = vpop.f32.mrf.mxu0  ;;  %v2358_v13 = vpop.f32.mrf.mxu1  ;;  %v6103_v59 = vld [vmem:[#allocation38_spill] sm:$0xff] }
 0x397   : > { %v2359_v0 = vadd.f32 %v2358_v13, %v2269_v46 }
 0x398   : > { %v3065_v62 = vpack.c.bf16 %v2258_v25, %v2080_v5 }
 0x399   : > { %2308 = vmatmul.bf16.gmra.mxu0 %v5373_v56  ;;  %2397 = vmatmul.bf16.gmra.mxu1 %v5375_v39 }
 0x39a   : > { %3161 = vst [vmem:[%s5063_s2 + $0x2e8] sm:$0xff] %v3065_v62  ;;  %2486 = vmatmul.bf16.gmra.mxu2 %v5373_v56  ;;  %2575 = vmatmul.bf16.gmra.mxu3 %v5375_v39 }
 0x39d   : > { %v2447_v11 = vpop.f32.mrf.mxu2  ;;  %v2536_v30 = vpop.f32.mrf.mxu3 }
 0x39e   : > { %v2537_v51 = vadd.f32 %v2536_v30, %v2447_v11  ;;  %v2271_v48 = vpop.f32.mrf.mxu0  ;;  %v2360_v1 = vpop.f32.mrf.mxu1 }
 0x39f   : > { %v2361_v17 = vadd.f32 %v2360_v1, %v2271_v48  ;;  %v3758_v1 = vld [vmem:[#allocation8 + $0x1c4] sm:$0xf] }
 0x3a0   : > { %v2973_v18 = vpack.c.bf16 %v2537_v51, %v2359_v0  ;;  %v3710_v0 = vld [vmem:[#allocation8 + $0x44] sm:$0xf]  ;;  %v3358_v51 = vld [vmem:[#allocation8 + $0x58] sm:$0xf0] }
 0x3a1   : > { %v3361_v48 = vor.u32 %v3710_v0, %v3358_v51 }
 0x3a2   : > { %3069 = vst [vmem:[%s5063_s2 + $0x8] sm:$0xff] %v2973_v18  ;;  %v3550_v18 = vld [vmem:[#allocation8 + $0x1d8] sm:$0xf0] }
 0x3a3   : > { %v3553_v60 = vor.u32 %v3758_v1, %v3550_v18  ;;  %2800 = vmatpush.bf16.msra.mxu2 %v3361_v48 }
 0x3a5   : > { %v2449_v28 = vpop.f32.mrf.mxu2  ;;  %v2538_v26 = vpop.f32.mrf.mxu3  ;;  %2889 = vmatpush.bf16.msra.mxu3 %v3553_v60 }
 0x3a6   : > { %v2539_v34 = vadd.f32 %v2538_v26, %v2449_v28  ;;  %v2274_v21 = vpop.f32.mrf.mxu0  ;;  %v2363_v9 = vpop.f32.mrf.mxu1 }
 0x3a7   : > { %v2364_v25 = vadd.f32 %v2363_v9, %v2274_v21  ;;  %v3548_v9 = vld [vmem:[#allocation8 + $0x1c0] sm:$0xf] }
 0x3a8   : > { %v2976_v15 = vpack.c.bf16 %v2539_v34, %v2361_v17  ;;  %v3356_v17 = vld [vmem:[#allocation8 + $0x40] sm:$0xf]  ;;  %v3713_v34 = vld [vmem:[#allocation8 + $0x54] sm:$0xf0] }
 0x3a9   : > { %2313 = vmatmul.bf16.gmra.mxu0 %v5419_v27  ;;  %2402 = vmatmul.bf16.gmra.mxu1 %v6103_v59  ;;  %v3357_v21 = vor.u32 %v3713_v34, %v3356_v17 }
 0x3aa   : > { %3072 = vst [vmem:[%s5063_s2 + $0x20] sm:$0xff] %v2976_v15  ;;  %2491 = vmatmul.bf16.gmra.mxu2 %v5419_v27  ;;  %2580 = vmatmul.bf16.gmra.mxu3 %v6103_v59  ;;  %v3761_v15 = vld [vmem:[#allocation8 + $0x1d4] sm:$0xf0] }
 0x3ab   : > { %2622 = vmatpush.bf16.msra.mxu0 %v3357_v21 }
 0x3ad   : > { %v2452_v52 = vpop.f32.mrf.mxu2  ;;  %v2541_v5 = vpop.f32.mrf.mxu3 }
 0x3ae   : > { %v2542_v46 = vadd.f32 %v2541_v5, %v2452_v52  ;;  %v2276_v13 = vpop.f32.mrf.mxu0  ;;  %v2365_v62 = vpop.f32.mrf.mxu1  ;;  %v3549_v52 = vor.u32 %v3761_v15, %v3548_v9 }
 0x3af   : > { %v2366_v58 = vadd.f32 %v2365_v62, %v2276_v13 }
 0x3b0   : > { %v2979_v4 = vpack.c.bf16 %v2542_v46, %v2364_v25  ;;  %2711 = vmatpush.bf16.msra.mxu1 %v3549_v52 }
 0x3b2   : > { %3075 = vst [vmem:[%s5063_s2 + $0x38] sm:$0xff] %v2979_v4 }
 0x3b5   : > { %v2454_v22 = vpop.f32.mrf.mxu2  ;;  %v2543_v61 = vpop.f32.mrf.mxu3 }
 0x3b6   : > { %v2544_v50 = vadd.f32 %v2543_v61, %v2454_v22  ;;  %v2279_v44 = vpop.f32.mrf.mxu0  ;;  %v2368_v11 = vpop.f32.mrf.mxu1 }
 0x3b7   : > { %v2369_v38 = vadd.f32 %v2368_v11, %v2279_v44 }
 0x3b8   : > { %v2982_v30 = vpack.c.bf16 %v2544_v50, %v2366_v58 }
 0x3b9   : > { %2318 = vmatmul.bf16.gmra.mxu0 %v5517_v12  ;;  %2407 = vmatmul.bf16.gmra.mxu1 %v5519_v23 }
 0x3ba   : > { %3078 = vst [vmem:[%s5063_s2 + $0x50] sm:$0xff] %v2982_v30  ;;  %2496 = vmatmul.bf16.gmra.mxu2 %v5517_v12  ;;  %2585 = vmatmul.bf16.gmra.mxu3 %v5519_v23 }
 0x3bd   : > { %v2457_v37 = vpop.f32.mrf.mxu2  ;;  %v2546_v49 = vpop.f32.mrf.mxu3 }
 0x3be   : > { %v2547_v29 = vadd.f32 %v2546_v49, %v2457_v37  ;;  %v2281_v40 = vpop.f32.mrf.mxu0  ;;  %v2370_v28 = vpop.f32.mrf.mxu1 }
 0x3bf   : > { %v2371_v46 = vadd.f32 %v2370_v28, %v2281_v40  ;;  %v3752_v28 = vld [vmem:[#allocation8 + $0x194] sm:$0xf] }
 0x3c0   : > { %v2985_v26 = vpack.c.bf16 %v2547_v29, %v2369_v38  ;;  %v3704_v38 = vld [vmem:[#allocation8 + $0x14] sm:$0xf]  ;;  %v3334_v29 = vld [vmem:[#allocation8 + $0x28] sm:$0xf0] }
 0x3c1   : > { %v3337_v40 = vor.u32 %v3704_v38, %v3334_v29 }
 0x3c2   : > { %3081 = vst [vmem:[%s5063_s2 + $0x68] sm:$0xff] %v2985_v26  ;;  %v3526_v26 = vld [vmem:[#allocation8 + $0x1a8] sm:$0xf0] }
 0x3c3   : > { %v3529_v17 = vor.u32 %v3752_v28, %v3526_v26  ;;  %2801 = vmatpush.bf16.msra.mxu2 %v3337_v40 }
 0x3c5   : > { %v2459_v5 = vpop.f32.mrf.mxu2  ;;  %v2548_v25 = vpop.f32.mrf.mxu3  ;;  %2890 = vmatpush.bf16.msra.mxu3 %v3529_v17 }
 0x3c6   : > { %v2549_v13 = vadd.f32 %v2548_v25, %v2459_v5  ;;  %v2284_v62 = vpop.f32.mrf.mxu0  ;;  %v2373_v4 = vpop.f32.mrf.mxu1 }
 0x3c7   : > { %v2374_v50 = vadd.f32 %v2373_v4, %v2284_v62  ;;  %v3524_v4 = vld [vmem:[#allocation8 + $0x190] sm:$0xf] }
 0x3c8   : > { %v2988_v22 = vpack.c.bf16 %v2549_v13, %v2371_v46  ;;  %v3332_v46 = vld [vmem:[#allocation8 + $0x10] sm:$0xf]  ;;  %v3707_v13 = vld [vmem:[#allocation8 + $0x24] sm:$0xf0] }
 0x3c9   : > { %2323 = vmatmul.bf16.gmra.mxu0 %v5576_v41  ;;  %2412 = vmatmul.bf16.gmra.mxu1 %v5586_v24  ;;  %v3333_v62 = vor.u32 %v3707_v13, %v3332_v46 }
 0x3ca   : > { %3084 = vst [vmem:[%s5063_s2 + $0x80] sm:$0xff] %v2988_v22  ;;  %2501 = vmatmul.bf16.gmra.mxu2 %v5576_v41  ;;  %2590 = vmatmul.bf16.gmra.mxu3 %v5586_v24  ;;  %v3755_v22 = vld [vmem:[#allocation8 + $0x1a4] sm:$0xf0] }
 0x3cb   : > { %2623 = vmatpush.bf16.msra.mxu0 %v3333_v62 }
 0x3cd   : > { %v2462_v61 = vpop.f32.mrf.mxu2  ;;  %v2551_v58 = vpop.f32.mrf.mxu3 }
 0x3ce   : > { %v2552_v44 = vadd.f32 %v2551_v58, %v2462_v61  ;;  %v2286_v11 = vpop.f32.mrf.mxu0  ;;  %v2375_v30 = vpop.f32.mrf.mxu1  ;;  %v3525_v61 = vor.u32 %v3755_v22, %v3524_v4 }
 0x3cf   : > { %v2376_v1 = vadd.f32 %v2375_v30, %v2286_v11 }
 0x3d0   : > { %v2991_v0 = vpack.c.bf16 %v2552_v44, %v2374_v50  ;;  %2712 = vmatpush.bf16.msra.mxu1 %v3525_v61 }
 0x3d2   : > { %3087 = vst [vmem:[%s5063_s2 + $0x98] sm:$0xff] %v2991_v0 }
 0x3d5   : > { %v2464_v51 = vpop.f32.mrf.mxu2  ;;  %v2553_v48 = vpop.f32.mrf.mxu3 }
 0x3d6   : > { %v2554_v18 = vadd.f32 %v2553_v48, %v2464_v51  ;;  %v2289_v60 = vpop.f32.mrf.mxu0  ;;  %v2378_v37 = vpop.f32.mrf.mxu1 }
 0x3d7   : > { %v2379_v9 = vadd.f32 %v2378_v37, %v2289_v60 }
 0x3d8   : > { %v2994_v49 = vpack.c.bf16 %v2554_v18, %v2376_v1 }
 0x3d9   : > { %2328 = vmatmul.bf16.gmra.mxu0 %v5618_v43  ;;  %2417 = vmatmul.bf16.gmra.mxu1 %v5620_v57 }
 0x3da   : > { %3090 = vst [vmem:[%s5063_s2 + $0xb0] sm:$0xff] %v2994_v49  ;;  %2506 = vmatmul.bf16.gmra.mxu2 %v5618_v43  ;;  %2595 = vmatmul.bf16.gmra.mxu3 %v5620_v57 }
 0x3dd   : > { %v2467_v34 = vpop.f32.mrf.mxu2  ;;  %v2556_v21 = vpop.f32.mrf.mxu3 }
 0x3de   : > { %v2557_v15 = vadd.f32 %v2556_v21, %v2467_v34  ;;  %v2291_v52 = vpop.f32.mrf.mxu0  ;;  %v2380_v5 = vpop.f32.mrf.mxu1 }
 0x3df   : > { %v2381_v44 = vadd.f32 %v2380_v5, %v2291_v52 }
 0x3e0   : > { %v2997_v25 = vpack.c.bf16 %v2557_v15, %v2379_v9 }
 0x3e2   : > { %3093 = vst [vmem:[%s5063_s2 + $0xc8] sm:$0xff] %v2997_v25 }
 0x3e5   : > { %v2469_v58 = vpop.f32.mrf.mxu2  ;;  %v2558_v50 = vpop.f32.mrf.mxu3 }
 0x3e6   : > { %v2559_v11 = vadd.f32 %v2558_v50, %v2469_v58  ;;  %v2294_v30 = vpop.f32.mrf.mxu0  ;;  %v2383_v0 = vpop.f32.mrf.mxu1 }
 0x3e7   : > { %v2384_v18 = vadd.f32 %v2383_v0, %v2294_v30 }
 0x3e8   : > { %v3000_v51 = vpack.c.bf16 %v2559_v11, %v2381_v44 }
 0x3e9   : > { %2333 = vmatmul.bf16.gmra.mxu0 %v5642_v31  ;;  %2422 = vmatmul.bf16.gmra.mxu1 %v5645_v54 }
 0x3ea   : > { %3096 = vst [vmem:[%s5063_s2 + $0xe0] sm:$0xff] %v3000_v51  ;;  %2511 = vmatmul.bf16.gmra.mxu2 %v5642_v31  ;;  %2600 = vmatmul.bf16.gmra.mxu3 %v5645_v54 }
 0x3ed   : > { %v2472_v48 = vpop.f32.mrf.mxu2  ;;  %v2561_v1 = vpop.f32.mrf.mxu3 }
 0x3ee   : > { %v2562_v60 = vadd.f32 %v2561_v1, %v2472_v48  ;;  %v2296_v37 = vpop.f32.mrf.mxu0  ;;  %v2385_v49 = vpop.f32.mrf.mxu1 }
 0x3ef   : > { %v2386_v28 = vadd.f32 %v2385_v49, %v2296_v37 }
 0x3f0   : > { %v3003_v38 = vpack.c.bf16 %v2562_v60, %v2384_v18 }
 0x3f2   : > { %3099 = vst [vmem:[%s5063_s2 + $0xf8] sm:$0xff] %v3003_v38 }
 0x3f5   : > { %v2474_v29 = vpop.f32.mrf.mxu2  ;;  %v2563_v40 = vpop.f32.mrf.mxu3 }
 0x3f6   : > { %v2564_v26 = vadd.f32 %v2563_v40, %v2474_v29  ;;  %v2299_v17 = vpop.f32.mrf.mxu0  ;;  %v2388_v34 = vpop.f32.mrf.mxu1 }
 0x3f7   : > { %v2389_v52 = vadd.f32 %v2388_v34, %v2299_v17 }
 0x3f8   : > { %v3006_v21 = vpack.c.bf16 %v2564_v26, %v2386_v28 }
 0x3f9   : > { %2338 = vmatmul.bf16.gmra.mxu0 %v5666_v42  ;;  %2427 = vmatmul.bf16.gmra.mxu1 %v5668_v19 }
 0x3fa   : > { %3102 = vst [vmem:[%s5063_s2 + $0x110] sm:$0xff] %v3006_v21  ;;  %2516 = vmatmul.bf16.gmra.mxu2 %v5666_v42  ;;  %2605 = vmatmul.bf16.gmra.mxu3 %v5668_v19 }
 0x3fd   : > { %v2477_v9 = vpop.f32.mrf.mxu2  ;;  %v2566_v15 = vpop.f32.mrf.mxu3 }
 0x3fe   : > { %v2567_v5 = vadd.f32 %v2566_v15, %v2477_v9  ;;  %v2301_v25 = vpop.f32.mrf.mxu0  ;;  %v2390_v46 = vpop.f32.mrf.mxu1 }
 0x3ff   : > { %v2391_v22 = vadd.f32 %v2390_v46, %v2301_v25 }
 0x400   : > { %v3009_v13 = vpack.c.bf16 %v2567_v5, %v2389_v52 }
 0x402   : > { %3105 = vst [vmem:[%s5063_s2 + $0x128] sm:$0xff] %v3009_v13 }
 0x405   : > { %v2479_v62 = vpop.f32.mrf.mxu2  ;;  %v2568_v4 = vpop.f32.mrf.mxu3 }
 0x406   : > { %v2569_v61 = vadd.f32 %v2568_v4, %v2479_v62  ;;  %v2304_v58 = vpop.f32.mrf.mxu0  ;;  %v2393_v50 = vpop.f32.mrf.mxu1 }
 0x407   : > { %v2394_v0 = vadd.f32 %v2393_v50, %v2304_v58 }
 0x408   : > { %v3012_v44 = vpack.c.bf16 %v2569_v61, %v2391_v22 }
 0x409   : > { %2343 = vmatmul.bf16.gmra.mxu0 %v5688_v63  ;;  %2432 = vmatmul.bf16.gmra.mxu1 %v5690_v10 }
 0x40a   : > { %3108 = vst [vmem:[%s5063_s2 + $0x140] sm:$0xff] %v3012_v44  ;;  %2521 = vmatmul.bf16.gmra.mxu2 %v5688_v63  ;;  %2610 = vmatmul.bf16.gmra.mxu3 %v5690_v10 }
 0x40d   : > { %v2482_v11 = vpop.f32.mrf.mxu2  ;;  %v2571_v30 = vpop.f32.mrf.mxu3 }
 0x40e   : > { %v2572_v51 = vadd.f32 %v2571_v30, %v2482_v11  ;;  %v2306_v48 = vpop.f32.mrf.mxu0  ;;  %v2395_v1 = vpop.f32.mrf.mxu1 }
 0x40f   : > { %v2396_v49 = vadd.f32 %v2395_v1, %v2306_v48 }
 0x410   : > { %v3015_v18 = vpack.c.bf16 %v2572_v51, %v2394_v0 }
 0x412   : > { %3111 = vst [vmem:[%s5063_s2 + $0x158] sm:$0xff] %v3015_v18 }
 0x415   : > { %v2484_v60 = vpop.f32.mrf.mxu2  ;;  %v2573_v37 = vpop.f32.mrf.mxu3 }
 0x416   : > { %v2574_v38 = vadd.f32 %v2573_v37, %v2484_v60  ;;  %v2309_v29 = vpop.f32.mrf.mxu0  ;;  %v2398_v40 = vpop.f32.mrf.mxu1 }
 0x417   : > { %v2399_v34 = vadd.f32 %v2398_v40, %v2309_v29 }
 0x418   : > { %v3018_v28 = vpack.c.bf16 %v2574_v38, %v2396_v49 }
 0x419   : > { %2624 = vmatmul.bf16.vlgmr.msra.gmra.mxu0 %v6089_v47  ;;  %2713 = vmatmul.bf16.vlgmr.msra.gmra.mxu1 %v6090_v7 }
 0x41a   : > { %3114 = vst [vmem:[%s5063_s2 + $0x170] sm:$0xff] %v3018_v28  ;;  %2802 = vmatmul.bf16.vlgmr.msra.gmra.mxu2 %v6089_v47  ;;  %2891 = vmatmul.bf16.vlgmr.msra.gmra.mxu3 %v6090_v7 }
 0x41d   : > { %v2487_v26 = vpop.f32.mrf.mxu2  ;;  %v2576_v17 = vpop.f32.mrf.mxu3 }
 0x41e   : > { %v2577_v21 = vadd.f32 %v2576_v17, %v2487_v26  ;;  %v2311_v9 = vpop.f32.mrf.mxu0  ;;  %v2400_v15 = vpop.f32.mrf.mxu1 }
 0x41f   : > { %v2401_v46 = vadd.f32 %v2400_v15, %v2311_v9 }
 0x420   : > { %v3021_v52 = vpack.c.bf16 %v2577_v21, %v2399_v34 }
 0x422   : > { %3117 = vst [vmem:[%s5063_s2 + $0x188] sm:$0xff] %v3021_v52 }
 0x425   : > { %v2489_v5 = vpop.f32.mrf.mxu2  ;;  %v2578_v25 = vpop.f32.mrf.mxu3 }
 0x426   : > { %v2579_v13 = vadd.f32 %v2578_v25, %v2489_v5  ;;  %v2314_v62 = vpop.f32.mrf.mxu0  ;;  %v2403_v4 = vpop.f32.mrf.mxu1 }
 0x427   : > { %v2404_v61 = vadd.f32 %v2403_v4, %v2314_v62 }
 0x428   : > { %v3024_v22 = vpack.c.bf16 %v2579_v13, %v2401_v46 }
 0x429   : > { %2629 = vmatmul.bf16.gmra.mxu0 %v6091_v2  ;;  %2718 = vmatmul.bf16.gmra.mxu1 %v6092_v36 }
 0x42a   : > { %3120 = vst [vmem:[%s5063_s2 + $0x1a0] sm:$0xff] %v3024_v22  ;;  %2807 = vmatmul.bf16.gmra.mxu2 %v6091_v2  ;;  %2896 = vmatmul.bf16.gmra.mxu3 %v6092_v36 }
 0x42d   : > { %v2492_v47 = vpop.f32.mrf.mxu2  ;;  %v2581_v7 = vpop.f32.mrf.mxu3 }
 0x42e   : > { %v2582_v58 = vadd.f32 %v2581_v7, %v2492_v47  ;;  %v2316_v50 = vpop.f32.mrf.mxu0  ;;  %v2405_v44 = vpop.f32.mrf.mxu1 }
 0x42f   : > { %v2406_v51 = vadd.f32 %v2405_v44, %v2316_v50 }
 0x430   : > { %v3027_v11 = vpack.c.bf16 %v2582_v58, %v2404_v61 }
 0x432   : > { %3123 = vst [vmem:[%s5063_s2 + $0x1b8] sm:$0xff] %v3027_v11 }
 0x435   : > { %v2494_v30 = vpop.f32.mrf.mxu2  ;;  %v2583_v0 = vpop.f32.mrf.mxu3 }
 0x436   : > { %v2584_v48 = vadd.f32 %v2583_v0, %v2494_v30  ;;  %v2319_v1 = vpop.f32.mrf.mxu0  ;;  %v2408_v18 = vpop.f32.mrf.mxu1 }
 0x437   : > { %v2409_v37 = vadd.f32 %v2408_v18, %v2319_v1 }
 0x438   : > { %v3030_v60 = vpack.c.bf16 %v2584_v48, %v2406_v51 }
 0x439   : > { %2634 = vmatmul.bf16.gmra.mxu0 %v6093_v6  ;;  %2723 = vmatmul.bf16.gmra.mxu1 %v6094_v33 }
 0x43a   : > { %3126 = vst [vmem:[%s5063_s2 + $0x1d0] sm:$0xff] %v3030_v60  ;;  %2812 = vmatmul.bf16.gmra.mxu2 %v6093_v6  ;;  %2901 = vmatmul.bf16.gmra.mxu3 %v6094_v33 }
 0x43d   : > { %v2497_v2 = vpop.f32.mrf.mxu2  ;;  %v2586_v36 = vpop.f32.mrf.mxu3 }
 0x43e   : > { %v2587_v49 = vadd.f32 %v2586_v36, %v2497_v2  ;;  %v2321_v38 = vpop.f32.mrf.mxu0  ;;  %v2410_v29 = vpop.f32.mrf.mxu1 }
 0x43f   : > { %v2411_v17 = vadd.f32 %v2410_v29, %v2321_v38 }
 0x440   : > { %v3033_v40 = vpack.c.bf16 %v2587_v49, %v2409_v37 }
 0x442   : > { %3129 = vst [vmem:[%s5063_s2 + $0x1e8] sm:$0xff] %v3033_v40 }
 0x445   : > { %v2499_v28 = vpop.f32.mrf.mxu2  ;;  %v2588_v26 = vpop.f32.mrf.mxu3 }
 0x446   : > { %v2589_v34 = vadd.f32 %v2588_v26, %v2499_v28  ;;  %v2324_v21 = vpop.f32.mrf.mxu0  ;;  %v2413_v9 = vpop.f32.mrf.mxu1 }
 0x447   : > { %v2414_v52 = vadd.f32 %v2413_v9, %v2324_v21 }
 0x448   : > { %v3036_v15 = vpack.c.bf16 %v2589_v34, %v2411_v17 }
 0x449   : > { %2639 = vmatmul.bf16.gmra.mxu0 %v6095_v45  ;;  %2728 = vmatmul.bf16.gmra.mxu1 %v6096_v3 }
 0x44a   : > { %3132 = vst [vmem:[%s5063_s2 + $0x200] sm:$0xff] %v3036_v15  ;;  %2817 = vmatmul.bf16.gmra.mxu2 %v6095_v45  ;;  %2906 = vmatmul.bf16.gmra.mxu3 %v6096_v3 }
 0x44d   : > { %v2502_v6 = vpop.f32.mrf.mxu2  ;;  %v2591_v33 = vpop.f32.mrf.mxu3 }
 0x44e   : > { %v2592_v5 = vadd.f32 %v2591_v33, %v2502_v6  ;;  %v2326_v25 = vpop.f32.mrf.mxu0  ;;  %v2415_v46 = vpop.f32.mrf.mxu1 }
 0x44f   : > { %v2416_v22 = vadd.f32 %v2415_v46, %v2326_v25 }
 0x450   : > { %v3039_v13 = vpack.c.bf16 %v2592_v5, %v2414_v52 }
 0x452   : > { %3135 = vst [vmem:[%s5063_s2 + $0x218] sm:$0xff] %v3039_v13 }
 0x455   : > { %v2504_v62 = vpop.f32.mrf.mxu2  ;;  %v2593_v4 = vpop.f32.mrf.mxu3 }
 0x456   : > { %v2594_v47 = vadd.f32 %v2593_v4, %v2504_v62  ;;  %v2329_v7 = vpop.f32.mrf.mxu0  ;;  %v2418_v61 = vpop.f32.mrf.mxu1 }
 0x457   : > { %v2419_v50 = vadd.f32 %v2418_v61, %v2329_v7 }
 0x458   : > { %v3042_v58 = vpack.c.bf16 %v2594_v47, %v2416_v22 }
 0x459   : > { %2644 = vmatmul.bf16.gmra.mxu0 %v6097_v20  ;;  %2733 = vmatmul.bf16.gmra.mxu1 %v6098_v14 }
 0x45a   : > { %3138 = vst [vmem:[%s5063_s2 + $0x230] sm:$0xff] %v3042_v58  ;;  %2822 = vmatmul.bf16.gmra.mxu2 %v6097_v20  ;;  %2911 = vmatmul.bf16.gmra.mxu3 %v6098_v14 }
 0x45d   : > { %v2507_v45 = vpop.f32.mrf.mxu2  ;;  %v2596_v3 = vpop.f32.mrf.mxu3 }
 0x45e   : > { %v2597_v44 = vadd.f32 %v2596_v3, %v2507_v45  ;;  %v2331_v11 = vpop.f32.mrf.mxu0  ;;  %v2420_v30 = vpop.f32.mrf.mxu1 }
 0x45f   : > { %v2421_v1 = vadd.f32 %v2420_v30, %v2331_v11 }
 0x460   : > { %v3045_v0 = vpack.c.bf16 %v2597_v44, %v2419_v50 }
 0x462   : > { %3141 = vst [vmem:[%s5063_s2 + $0x248] sm:$0xff] %v3045_v0 }
 0x465   : > { %v2509_v51 = vpop.f32.mrf.mxu2  ;;  %v2598_v48 = vpop.f32.mrf.mxu3 }
 0x466   : > { %v2599_v18 = vadd.f32 %v2598_v48, %v2509_v51  ;;  %v2334_v60 = vpop.f32.mrf.mxu0  ;;  %v2423_v2 = vpop.f32.mrf.mxu1 }
 0x467   : > { %v2424_v37 = vadd.f32 %v2423_v2, %v2334_v60 }
 0x468   : > { %v3048_v36 = vpack.c.bf16 %v2599_v18, %v2421_v1 }
 0x469   : > { %2649 = vmatmul.bf16.gmra.mxu0 %v6099_v8  ;;  %2738 = vmatmul.bf16.gmra.mxu1 %v6100_v55 }
 0x46a   : > { %3144 = vst [vmem:[%s5063_s2 + $0x260] sm:$0xff] %v3048_v36  ;;  %2827 = vmatmul.bf16.gmra.mxu2 %v6099_v8  ;;  %2916 = vmatmul.bf16.gmra.mxu3 %v6100_v55 }
 0x46d   : > { %v2512_v20 = vpop.f32.mrf.mxu2  ;;  %v2601_v14 = vpop.f32.mrf.mxu3 }
 0x46e   : > { %v2602_v49 = vadd.f32 %v2601_v14, %v2512_v20  ;;  %v2336_v38 = vpop.f32.mrf.mxu0  ;;  %v2425_v29 = vpop.f32.mrf.mxu1 }
 0x46f   : > { %v2426_v17 = vadd.f32 %v2425_v29, %v2336_v38 }
 0x470   : > { %v3051_v40 = vpack.c.bf16 %v2602_v49, %v2424_v37 }
 0x472   : > { %3147 = vst [vmem:[%s5063_s2 + $0x278] sm:$0xff] %v3051_v40 }
 0x475   : > { %v2514_v28 = vpop.f32.mrf.mxu2  ;;  %v2603_v26 = vpop.f32.mrf.mxu3 }
 0x476   : > { %v2604_v34 = vadd.f32 %v2603_v26, %v2514_v28  ;;  %v2339_v21 = vpop.f32.mrf.mxu0  ;;  %v2428_v9 = vpop.f32.mrf.mxu1 }
 0x477   : > { %v2429_v6 = vadd.f32 %v2428_v9, %v2339_v21 }
 0x478   : > { %v3054_v15 = vpack.c.bf16 %v2604_v34, %v2426_v17 }
 0x479   : > { %2654 = vmatmul.bf16.gmra.mxu0 %v6101_v32  ;;  %2743 = vmatmul.bf16.gmra.mxu1 %v6102_v16 }
 0x47a   : > { %3150 = vst [vmem:[%s5063_s2 + $0x290] sm:$0xff] %v3054_v15  ;;  %2832 = vmatmul.bf16.gmra.mxu2 %v6101_v32  ;;  %2921 = vmatmul.bf16.gmra.mxu3 %v6102_v16 }
 0x47d   : > { %v2517_v8 = vpop.f32.mrf.mxu2  ;;  %v2606_v55 = vpop.f32.mrf.mxu3 }
 0x47e   : > { %v2607_v33 = vadd.f32 %v2606_v55, %v2517_v8  ;;  %v2341_v52 = vpop.f32.mrf.mxu0  ;;  %v2430_v5 = vpop.f32.mrf.mxu1 }
 0x47f   : > { %v2431_v62 = vadd.f32 %v2430_v5, %v2341_v52 }
 0x480   : > { %v3057_v25 = vpack.c.bf16 %v2607_v33, %v2429_v6 }
 0x482   : > { %3153 = vst [vmem:[%s5063_s2 + $0x2a8] sm:$0xff] %v3057_v25 }
 0x485   : > { %v2519_v46 = vpop.f32.mrf.mxu2  ;;  %v2608_v13 = vpop.f32.mrf.mxu3 }
 0x486   : > { %v2609_v4 = vadd.f32 %v2608_v13, %v2519_v46  ;;  %v2344_v22 = vpop.f32.mrf.mxu0  ;;  %v2433_v47 = vpop.f32.mrf.mxu1 }
 0x487   : > { %v2434_v61 = vadd.f32 %v2433_v47, %v2344_v22 }
 0x488   : > { %v3060_v7 = vpack.c.bf16 %v2609_v4, %v2431_v62 }
 0x489   : > { %2659 = vmatmul.bf16.gmra.mxu0 %v5339_v35  ;;  %2748 = vmatmul.bf16.gmra.mxu1 %v5343_v53 }
 0x48a   : > { %3156 = vst [vmem:[%s5063_s2 + $0x2c0] sm:$0xff] %v3060_v7  ;;  %2837 = vmatmul.bf16.gmra.mxu2 %v5339_v35  ;;  %2926 = vmatmul.bf16.gmra.mxu3 %v5343_v53 }
 0x48d   : > { %v2522_v32 = vpop.f32.mrf.mxu2  ;;  %v2611_v16 = vpop.f32.mrf.mxu3 }
 0x48e   : > { %v2612_v58 = vadd.f32 %v2611_v16, %v2522_v32  ;;  %v2346_v45 = vpop.f32.mrf.mxu0  ;;  %v2435_v3 = vpop.f32.mrf.mxu1 }
 0x48f   : > { %v2436_v30 = vadd.f32 %v2435_v3, %v2346_v45 }
 0x490   : > { %v3063_v50 = vpack.c.bf16 %v2612_v58, %v2434_v61 }
 0x492   : > { %3159 = vst [vmem:[%s5063_s2 + $0x2d8] sm:$0xff] %v3063_v50 }
 0x495   : > { %v2524_v44 = vpop.f32.mrf.mxu2  ;;  %v2613_v11 = vpop.f32.mrf.mxu3 }
 0x496   : > { %v2614_v0 = vadd.f32 %v2613_v11, %v2524_v44  ;;  %v2625_v51 = vpop.f32.mrf.mxu0  ;;  %v2714_v48 = vpop.f32.mrf.mxu1 }
 0x497   : > { %v2715_v18 = vadd.f32 %v2714_v48, %v2625_v51 }
 0x498   : > { %v3066_v1 = vpack.c.bf16 %v2614_v0, %v2436_v30 }
 0x499   : > { %2664 = vmatmul.bf16.gmra.mxu0 %v5373_v56  ;;  %2753 = vmatmul.bf16.gmra.mxu1 %v5375_v39 }
 0x49a   : > { %3162 = vst [vmem:[%s5063_s2 + $0x2f0] sm:$0xff] %v3066_v1  ;;  %2842 = vmatmul.bf16.gmra.mxu2 %v5373_v56  ;;  %2931 = vmatmul.bf16.gmra.mxu3 %v5375_v39 }
 0x49d   : > { %v2803_v35 = vpop.f32.mrf.mxu2  ;;  %v2892_v53 = vpop.f32.mrf.mxu3 }
 0x49e   : > { %v2893_v60 = vadd.f32 %v2892_v53, %v2803_v35  ;;  %v2627_v2 = vpop.f32.mrf.mxu0  ;;  %v2716_v36 = vpop.f32.mrf.mxu1 }
 0x49f   : > { %v2717_v49 = vadd.f32 %v2716_v36, %v2627_v2 }
 0x4a0   : > { %v2974_v20 = vpack.c.bf16 %v2893_v60, %v2715_v18 }
 0x4a2   : > { %3070 = vst [vmem:[%s5063_s2 + $0x10] sm:$0xff] %v2974_v20 }
 0x4a5   : > { %v2805_v14 = vpop.f32.mrf.mxu2  ;;  %v2894_v37 = vpop.f32.mrf.mxu3 }
 0x4a6   : > { %v2895_v38 = vadd.f32 %v2894_v37, %v2805_v14  ;;  %v2630_v29 = vpop.f32.mrf.mxu0  ;;  %v2719_v40 = vpop.f32.mrf.mxu1 }
 0x4a7   : > { %v2720_v26 = vadd.f32 %v2719_v40, %v2630_v29 }
 0x4a8   : > { %v2977_v28 = vpack.c.bf16 %v2895_v38, %v2717_v49 }
 0x4a9   : > { %2669 = vmatmul.bf16.gmra.mxu0 %v5419_v27  ;;  %2758 = vmatmul.bf16.gmra.mxu1 %v6103_v59 }
 0x4aa   : > { %3073 = vst [vmem:[%s5063_s2 + $0x28] sm:$0xff] %v2977_v28  ;;  %2847 = vmatmul.bf16.gmra.mxu2 %v5419_v27  ;;  %2936 = vmatmul.bf16.gmra.mxu3 %v6103_v59 }
 0x4ad   : > { %v2808_v56 = vpop.f32.mrf.mxu2  ;;  %v2897_v39 = vpop.f32.mrf.mxu3 }
 0x4ae   : > { %v2898_v17 = vadd.f32 %v2897_v39, %v2808_v56  ;;  %v2632_v34 = vpop.f32.mrf.mxu0  ;;  %v2721_v21 = vpop.f32.mrf.mxu1 }
 0x4af   : > { %v2722_v55 = vadd.f32 %v2721_v21, %v2632_v34 }
 0x4b0   : > { %v2980_v9 = vpack.c.bf16 %v2898_v17, %v2720_v26 }
 0x4b2   : > { %3076 = vst [vmem:[%s5063_s2 + $0x40] sm:$0xff] %v2980_v9 }
 0x4b5   : > { %v2810_v15 = vpop.f32.mrf.mxu2  ;;  %v2899_v8 = vpop.f32.mrf.mxu3 }
 0x4b6   : > { %v2900_v6 = vadd.f32 %v2899_v8, %v2810_v15  ;;  %v2635_v33 = vpop.f32.mrf.mxu0  ;;  %v2724_v52 = vpop.f32.mrf.mxu1 }
 0x4b7   : > { %v2725_v25 = vadd.f32 %v2724_v52, %v2635_v33 }
 0x4b8   : > { %v2983_v5 = vpack.c.bf16 %v2900_v6, %v2722_v55 }
 0x4b9   : > { %2674 = vmatmul.bf16.gmra.mxu0 %v5517_v12  ;;  %2763 = vmatmul.bf16.gmra.mxu1 %v5519_v23 }
 0x4ba   : > { %3079 = vst [vmem:[%s5063_s2 + $0x58] sm:$0xff] %v2983_v5  ;;  %2852 = vmatmul.bf16.gmra.mxu2 %v5517_v12  ;;  %2941 = vmatmul.bf16.gmra.mxu3 %v5519_v23 }
 0x4bd   : > { %v2813_v27 = vpop.f32.mrf.mxu2  ;;  %v2902_v59 = vpop.f32.mrf.mxu3 }
 0x4be   : > { %v2903_v46 = vadd.f32 %v2902_v59, %v2813_v27  ;;  %v2637_v13 = vpop.f32.mrf.mxu0  ;;  %v2726_v62 = vpop.f32.mrf.mxu1 }
 0x4bf   : > { %v2727_v7 = vadd.f32 %v2726_v62, %v2637_v13 }
 0x4c0   : > { %v2986_v4 = vpack.c.bf16 %v2903_v46, %v2725_v25 }
 0x4c2   : > { %3082 = vst [vmem:[%s5063_s2 + $0x70] sm:$0xff] %v2986_v4 }
 0x4c5   : > { %v2815_v22 = vpop.f32.mrf.mxu2  ;;  %v2904_v47 = vpop.f32.mrf.mxu3 }
 0x4c6   : > { %v2905_v32 = vadd.f32 %v2904_v47, %v2815_v22  ;;  %v2640_v16 = vpop.f32.mrf.mxu0  ;;  %v2729_v61 = vpop.f32.mrf.mxu1 }
 0x4c7   : > { %v2730_v45 = vadd.f32 %v2729_v61, %v2640_v16 }
 0x4c8   : > { %v2989_v58 = vpack.c.bf16 %v2905_v32, %v2727_v7 }
 0x4c9   : > { %2679 = vmatmul.bf16.gmra.mxu0 %v5576_v41  ;;  %2768 = vmatmul.bf16.gmra.mxu1 %v5586_v24 }
 0x4ca   : > { %3085 = vst [vmem:[%s5063_s2 + $0x88] sm:$0xff] %v2989_v58  ;;  %2857 = vmatmul.bf16.gmra.mxu2 %v5576_v41  ;;  %2946 = vmatmul.bf16.gmra.mxu3 %v5586_v24 }
 0x4cd   : > { %v2818_v12 = vpop.f32.mrf.mxu2  ;;  %v2907_v23 = vpop.f32.mrf.mxu3 }
 0x4ce   : > { %v2908_v3 = vadd.f32 %v2907_v23, %v2818_v12  ;;  %v2642_v50 = vpop.f32.mrf.mxu0  ;;  %v2731_v44 = vpop.f32.mrf.mxu1 }
 0x4cf   : > { %v2732_v51 = vadd.f32 %v2731_v44, %v2642_v50 }
 0x4d0   : > { %v2992_v11 = vpack.c.bf16 %v2908_v3, %v2730_v45 }
 0x4d2   : > { %3088 = vst [vmem:[%s5063_s2 + $0xa0] sm:$0xff] %v2992_v11 }
 0x4d5   : > { %v2820_v30 = vpop.f32.mrf.mxu2  ;;  %v2909_v0 = vpop.f32.mrf.mxu3 }
 0x4d6   : > { %v2910_v48 = vadd.f32 %v2909_v0, %v2820_v30  ;;  %v2645_v1 = vpop.f32.mrf.mxu0  ;;  %v2734_v35 = vpop.f32.mrf.mxu1 }
 0x4d7   : > { %v2735_v18 = vadd.f32 %v2734_v35, %v2645_v1 }
 0x4d8   : > { %v2995_v53 = vpack.c.bf16 %v2910_v48, %v2732_v51 }
 0x4d9   : > { %2684 = vmatmul.bf16.gmra.mxu0 %v5618_v43  ;;  %2773 = vmatmul.bf16.gmra.mxu1 %v5620_v57 }
 0x4da   : > { %3091 = vst [vmem:[%s5063_s2 + $0xb8] sm:$0xff] %v2995_v53  ;;  %2862 = vmatmul.bf16.gmra.mxu2 %v5618_v43  ;;  %2951 = vmatmul.bf16.gmra.mxu3 %v5620_v57 }
 0x4dd   : > { %v2823_v41 = vpop.f32.mrf.mxu2  ;;  %v2912_v24 = vpop.f32.mrf.mxu3 }
 0x4de   : > { %v2913_v60 = vadd.f32 %v2912_v24, %v2823_v41  ;;  %v2647_v2 = vpop.f32.mrf.mxu0  ;;  %v2736_v36 = vpop.f32.mrf.mxu1 }
 0x4df   : > { %v2737_v49 = vadd.f32 %v2736_v36, %v2647_v2 }
 0x4e0   : > { %v2998_v20 = vpack.c.bf16 %v2913_v60, %v2735_v18 }
 0x4e2   : > { %3094 = vst [vmem:[%s5063_s2 + $0xd0] sm:$0xff] %v2998_v20 }
 0x4e5   : > { %v2825_v14 = vpop.f32.mrf.mxu2  ;;  %v2914_v37 = vpop.f32.mrf.mxu3 }
 0x4e6   : > { %v2915_v38 = vadd.f32 %v2914_v37, %v2825_v14  ;;  %v2650_v29 = vpop.f32.mrf.mxu0  ;;  %v2739_v40 = vpop.f32.mrf.mxu1 }
 0x4e7   : > { %v2740_v56 = vadd.f32 %v2739_v40, %v2650_v29 }
 0x4e8   : > { %v3001_v28 = vpack.c.bf16 %v2915_v38, %v2737_v49 }
 0x4e9   : > { %2689 = vmatmul.bf16.gmra.mxu0 %v5642_v31  ;;  %2778 = vmatmul.bf16.gmra.mxu1 %v5645_v54 }
 0x4ea   : > { %3097 = vst [vmem:[%s5063_s2 + $0xe8] sm:$0xff] %v3001_v28  ;;  %2867 = vmatmul.bf16.gmra.mxu2 %v5642_v31  ;;  %2956 = vmatmul.bf16.gmra.mxu3 %v5645_v54 }
 0x4ed   : > { %v2828_v43 = vpop.f32.mrf.mxu2  ;;  %v2917_v57 = vpop.f32.mrf.mxu3 }
 0x4ee   : > { %v2918_v39 = vadd.f32 %v2917_v57, %v2828_v43  ;;  %v2652_v26 = vpop.f32.mrf.mxu0  ;;  %v2741_v17 = vpop.f32.mrf.mxu1 }
 0x4ef   : > { %v2742_v15 = vadd.f32 %v2741_v17, %v2652_v26 }
 0x4f0   : > { %v3004_v34 = vpack.c.bf16 %v2918_v39, %v2740_v56 }
 0x4f2   : > { %3100 = vst [vmem:[%s5063_s2 + $0x100] sm:$0xff] %v3004_v34 }
 0x4f5   : > { %v2830_v21 = vpop.f32.mrf.mxu2  ;;  %v2919_v9 = vpop.f32.mrf.mxu3 }
 0x4f6   : > { %v2920_v8 = vadd.f32 %v2919_v9, %v2830_v21  ;;  %v2655_v55 = vpop.f32.mrf.mxu0  ;;  %v2744_v6 = vpop.f32.mrf.mxu1 }
 0x4f7   : > { %v2745_v52 = vadd.f32 %v2744_v6, %v2655_v55 }
 0x4f8   : > { %v3007_v33 = vpack.c.bf16 %v2920_v8, %v2742_v15 }
 0x4f9   : > { %2694 = vmatmul.bf16.gmra.mxu0 %v5666_v42  ;;  %2783 = vmatmul.bf16.gmra.mxu1 %v5668_v19 }
 0x4fa   : > { %3103 = vst [vmem:[%s5063_s2 + $0x118] sm:$0xff] %v3007_v33  ;;  %2872 = vmatmul.bf16.gmra.mxu2 %v5666_v42  ;;  %2961 = vmatmul.bf16.gmra.mxu3 %v5668_v19 }
 0x4fd   : > { %v2833_v31 = vpop.f32.mrf.mxu2  ;;  %v2922_v54 = vpop.f32.mrf.mxu3 }
 0x4fe   : > { %v2923_v5 = vadd.f32 %v2922_v54, %v2833_v31  ;;  %v2657_v27 = vpop.f32.mrf.mxu0  ;;  %v2746_v59 = vpop.f32.mrf.mxu1 }
 0x4ff   : > { %v2747_v62 = vadd.f32 %v2746_v59, %v2657_v27 }
 0x500   : > { %v3010_v25 = vpack.c.bf16 %v2923_v5, %v2745_v52 }
 0x502   : > { %3106 = vst [vmem:[%s5063_s2 + $0x130] sm:$0xff] %v3010_v25 }
 0x505   : > { %v2835_v46 = vpop.f32.mrf.mxu2  ;;  %v2924_v13 = vpop.f32.mrf.mxu3 }
 0x506   : > { %v2925_v4 = vadd.f32 %v2924_v13, %v2835_v46  ;;  %v2660_v22 = vpop.f32.mrf.mxu0  ;;  %v2749_v47 = vpop.f32.mrf.mxu1 }
 0x507   : > { %v2750_v32 = vadd.f32 %v2749_v47, %v2660_v22 }
 0x508   : > { %v3013_v7 = vpack.c.bf16 %v2925_v4, %v2747_v62 }
 0x509   : > { %2699 = vmatmul.bf16.gmra.mxu0 %v5688_v63  ;;  %2788 = vmatmul.bf16.gmra.mxu1 %v5690_v10 }
 0x50a   : > { %3109 = vst [vmem:[%s5063_s2 + $0x148] sm:$0xff] %v3013_v7  ;;  %2877 = vmatmul.bf16.gmra.mxu2 %v5688_v63  ;;  %2966 = vmatmul.bf16.gmra.mxu3 %v5690_v10 }
 0x50d   : > { %v2838_v42 = vpop.f32.mrf.mxu2  ;;  %v2927_v19 = vpop.f32.mrf.mxu3 }
 0x50e   : > { %v2928_v16 = vadd.f32 %v2927_v19, %v2838_v42  ;;  %v2662_v61 = vpop.f32.mrf.mxu0  ;;  %v2751_v58 = vpop.f32.mrf.mxu1 }
 0x50f   : > { %v2752_v3 = vadd.f32 %v2751_v58, %v2662_v61 }
 0x510   : > { %v3016_v12 = vpack.c.bf16 %v2928_v16, %v2750_v32 }
 0x512   : > { %3112 = vst [vmem:[%s5063_s2 + $0x160] sm:$0xff] %v3016_v12 }
 0x515   : > { %v2840_v23 = vpop.f32.mrf.mxu2  ;;  %v2929_v45 = vpop.f32.mrf.mxu3 }
 0x516   : > { %v2930_v50 = vadd.f32 %v2929_v45, %v2840_v23  ;;  %v2665_v44 = vpop.f32.mrf.mxu0  ;;  %v2754_v11 = vpop.f32.mrf.mxu1 }
 0x517   : > { %v2755_v0 = vadd.f32 %v2754_v11, %v2665_v44 }
 0x518   : > { %v3019_v30 = vpack.c.bf16 %v2930_v50, %v2752_v3 }
 0x51a   : > { %3115 = vst [vmem:[%s5063_s2 + $0x178] sm:$0xff] %v3019_v30 }
 0x51d   : > { %v2843_v63 = vpop.f32.mrf.mxu2  ;;  %v2932_v10 = vpop.f32.mrf.mxu3 }
 0x51e   : > { %v2933_v51 = vadd.f32 %v2932_v10, %v2843_v63  ;;  %v2667_v48 = vpop.f32.mrf.mxu0  ;;  %v2756_v1 = vpop.f32.mrf.mxu1 }
 0x51f   : > { %v2757_v24 = vadd.f32 %v2756_v1, %v2667_v48 }
 0x520   : > { %v3022_v35 = vpack.c.bf16 %v2933_v51, %v2755_v0 }
 0x522   : > { %3118 = vst [vmem:[%s5063_s2 + $0x190] sm:$0xff] %v3022_v35 }
 0x525   : > { %v2845_v53 = vpop.f32.mrf.mxu2  ;;  %v2934_v41 = vpop.f32.mrf.mxu3 }
 0x526   : > { %v2935_v18 = vadd.f32 %v2934_v41, %v2845_v53  ;;  %v2670_v60 = vpop.f32.mrf.mxu0  ;;  %v2759_v2 = vpop.f32.mrf.mxu1 }
 0x527   : > { %v2760_v37 = vadd.f32 %v2759_v2, %v2670_v60 }
 0x528   : > { %v3025_v36 = vpack.c.bf16 %v2935_v18, %v2757_v24 }
 0x52a   : > { %3121 = vst [vmem:[%s5063_s2 + $0x1a8] sm:$0xff] %v3025_v36 }
 0x52d   : > { %v2848_v20 = vpop.f32.mrf.mxu2  ;;  %v2937_v14 = vpop.f32.mrf.mxu3 }
 0x52e   : > { %v2938_v49 = vadd.f32 %v2937_v14, %v2848_v20  ;;  %v2672_v38 = vpop.f32.mrf.mxu0  ;;  %v2761_v29 = vpop.f32.mrf.mxu1 }
 0x52f   : > { %v2762_v57 = vadd.f32 %v2761_v29, %v2672_v38 }
 0x530   : > { %v3028_v40 = vpack.c.bf16 %v2938_v49, %v2760_v37 }
 0x532   : > { %3124 = vst [vmem:[%s5063_s2 + $0x1c0] sm:$0xff] %v3028_v40 }
 0x535   : > { %v2850_v28 = vpop.f32.mrf.mxu2  ;;  %v2939_v43 = vpop.f32.mrf.mxu3 }
 0x536   : > { %v2940_v56 = vadd.f32 %v2939_v43, %v2850_v28  ;;  %v2675_v39 = vpop.f32.mrf.mxu0  ;;  %v2764_v26 = vpop.f32.mrf.mxu1 }
 0x537   : > { %v2765_v9 = vadd.f32 %v2764_v26, %v2675_v39 }
 0x538   : > { %v3031_v17 = vpack.c.bf16 %v2940_v56, %v2762_v57 }
 0x53a   : > { %3127 = vst [vmem:[%s5063_s2 + $0x1d8] sm:$0xff] %v3031_v17 }
 0x53d   : > { %v2853_v34 = vpop.f32.mrf.mxu2  ;;  %v2942_v21 = vpop.f32.mrf.mxu3 }
 0x53e   : > { %v2943_v15 = vadd.f32 %v2942_v21, %v2853_v34  ;;  %v2677_v8 = vpop.f32.mrf.mxu0  ;;  %v2766_v55 = vpop.f32.mrf.mxu1 }
 0x53f   : > { %v2767_v54 = vadd.f32 %v2766_v55, %v2677_v8 }
 0x540   : > { %v3034_v6 = vpack.c.bf16 %v2943_v15, %v2765_v9 }
 0x542   : > { %3130 = vst [vmem:[%s5063_s2 + $0x1f0] sm:$0xff] %v3034_v6 }
 0x545   : > { %v2855_v33 = vpop.f32.mrf.mxu2  ;;  %v2944_v31 = vpop.f32.mrf.mxu3 }
 0x546   : > { %v2945_v52 = vadd.f32 %v2944_v31, %v2855_v33  ;;  %v2680_v5 = vpop.f32.mrf.mxu0  ;;  %v2769_v27 = vpop.f32.mrf.mxu1 }
 0x547   : > { %v2770_v13 = vadd.f32 %v2769_v27, %v2680_v5 }
 0x548   : > { %v3037_v59 = vpack.c.bf16 %v2945_v52, %v2767_v54 }
 0x54a   : > { %3133 = vst [vmem:[%s5063_s2 + $0x208] sm:$0xff] %v3037_v59 }
 0x54d   : > { %v2858_v25 = vpop.f32.mrf.mxu2  ;;  %v2947_v46 = vpop.f32.mrf.mxu3 }
 0x54e   : > { %v2948_v62 = vadd.f32 %v2947_v46, %v2858_v25  ;;  %v2682_v4 = vpop.f32.mrf.mxu0  ;;  %v2771_v22 = vpop.f32.mrf.mxu1 }
 0x54f   : > { %v2772_v19 = vadd.f32 %v2771_v22, %v2682_v4 }
 0x550   : > { %v3040_v47 = vpack.c.bf16 %v2948_v62, %v2770_v13 }
 0x552   : > { %3136 = vst [vmem:[%s5063_s2 + $0x220] sm:$0xff] %v3040_v47 }
 0x555   : > { %v2860_v7 = vpop.f32.mrf.mxu2  ;;  %v2949_v42 = vpop.f32.mrf.mxu3 }
 0x556   : > { %v2950_v32 = vadd.f32 %v2949_v42, %v2860_v7  ;;  %v2685_v16 = vpop.f32.mrf.mxu0  ;;  %v2774_v61 = vpop.f32.mrf.mxu1 }
 0x557   : > { %v2775_v45 = vadd.f32 %v2774_v61, %v2685_v16 }
 0x558   : > { %v3043_v58 = vpack.c.bf16 %v2950_v32, %v2772_v19 }
 0x55a   : > { %3139 = vst [vmem:[%s5063_s2 + $0x238] sm:$0xff] %v3043_v58 }
 0x55d   : > { %v2863_v12 = vpop.f32.mrf.mxu2  ;;  %v2952_v23 = vpop.f32.mrf.mxu3 }
 0x55e   : > { %v2953_v3 = vadd.f32 %v2952_v23, %v2863_v12  ;;  %v2687_v50 = vpop.f32.mrf.mxu0  ;;  %v2776_v44 = vpop.f32.mrf.mxu1 }
 0x55f   : > { %v2777_v10 = vadd.f32 %v2776_v44, %v2687_v50 }
 0x560   : > { %v3046_v11 = vpack.c.bf16 %v2953_v3, %v2775_v45 }
 0x562   : > { %3142 = vst [vmem:[%s5063_s2 + $0x250] sm:$0xff] %v3046_v11 }
 0x565   : > { %v2865_v30 = vpop.f32.mrf.mxu2  ;;  %v2954_v63 = vpop.f32.mrf.mxu3 }
 0x566   : > { %v2955_v0 = vadd.f32 %v2954_v63, %v2865_v30  ;;  %v2690_v51 = vpop.f32.mrf.mxu0  ;;  %v2779_v48 = vpop.f32.mrf.mxu1 }
 0x567   : > { %v2780_v41 = vadd.f32 %v2779_v48, %v2690_v51 }
 0x568   : > { %v3049_v1 = vpack.c.bf16 %v2955_v0, %v2777_v10 }
 0x56a   : > { %3145 = vst [vmem:[%s5063_s2 + $0x268] sm:$0xff] %v3049_v1 }
 0x56d   : > { %v2868_v35 = vpop.f32.mrf.mxu2  ;;  %v2957_v53 = vpop.f32.mrf.mxu3 }
 0x56e   : > { %v2958_v24 = vadd.f32 %v2957_v53, %v2868_v35  ;;  %v2692_v18 = vpop.f32.mrf.mxu0  ;;  %v2781_v60 = vpop.f32.mrf.mxu1 }
 0x56f   : > { %v2782_v14 = vadd.f32 %v2781_v60, %v2692_v18 }
 0x570   : > { %v3052_v2 = vpack.c.bf16 %v2958_v24, %v2780_v41 }
 0x572   : > { %3148 = vst [vmem:[%s5063_s2 + $0x280] sm:$0xff] %v3052_v2 }
 0x575   : > { %v2870_v36 = vpop.f32.mrf.mxu2  ;;  %v2959_v20 = vpop.f32.mrf.mxu3 }
 0x576   : > { %v2960_v37 = vadd.f32 %v2959_v20, %v2870_v36  ;;  %v2695_v49 = vpop.f32.mrf.mxu0  ;;  %v2784_v38 = vpop.f32.mrf.mxu1 }
 0x577   : > { %v2785_v43 = vadd.f32 %v2784_v38, %v2695_v49 }
 0x578   : > { %v3055_v29 = vpack.c.bf16 %v2960_v37, %v2782_v14 }
 0x57a   : > { %3151 = vst [vmem:[%s5063_s2 + $0x298] sm:$0xff] %v3055_v29 }
 0x57d   : > { %v2873_v40 = vpop.f32.mrf.mxu2  ;;  %v2962_v28 = vpop.f32.mrf.mxu3 }
 0x57e   : > { %v2963_v57 = vadd.f32 %v2962_v28, %v2873_v40  ;;  %v2697_v56 = vpop.f32.mrf.mxu0  ;;  %v2786_v39 = vpop.f32.mrf.mxu1 }
 0x57f   : > { %v2787_v21 = vadd.f32 %v2786_v39, %v2697_v56 }
 0x580   : > { %v3058_v26 = vpack.c.bf16 %v2963_v57, %v2785_v43 }
 0x582   : > { %3154 = vst [vmem:[%s5063_s2 + $0x2b0] sm:$0xff] %v3058_v26 }
 0x585   : > { %v2875_v17 = vpop.f32.mrf.mxu2  ;;  %v2964_v34 = vpop.f32.mrf.mxu3 }
 0x586   : > { %v2965_v9 = vadd.f32 %v2964_v34, %v2875_v17  ;;  %v2700_v8 = vpop.f32.mrf.mxu0  ;;  %v2789_v55 = vpop.f32.mrf.mxu1 }
 0x587   : > { %v2790_v31 = vadd.f32 %v2789_v55, %v2700_v8 }
 0x588   : > { %v3061_v15 = vpack.c.bf16 %v2965_v9, %v2787_v21 }
 0x58a   : > { %3157 = vst [vmem:[%s5063_s2 + $0x2c8] sm:$0xff] %v3061_v15 }
 0x58d   : > { %v2878_v6 = vpop.f32.mrf.mxu2  ;;  %v2967_v33 = vpop.f32.mrf.mxu3 }
 0x58e   : > { %v2968_v54 = vadd.f32 %v2967_v33, %v2878_v6  ;;  %v2702_v5 = vpop.f32.mrf.mxu0  ;;  %v2791_v27 = vpop.f32.mrf.mxu1 }
 0x58f   : > { %v2792_v46 = vadd.f32 %v2791_v27, %v2702_v5 }
 0x590   : > { %v3064_v52 = vpack.c.bf16 %v2968_v54, %v2790_v31 }
 0x592   : > { %3160 = vst [vmem:[%s5063_s2 + $0x2e0] sm:$0xff] %v3064_v52 }
 0x595   : > { %v2880_v59 = vpop.f32.mrf.mxu2  ;;  %v2969_v25 = vpop.f32.mrf.mxu3 }
 0x596   : > { %v2970_v13 = vadd.f32 %v2969_v25, %v2880_v59 }
 0x598   : > { %v3067_v62 = vpack.c.bf16 %v2970_v13, %v2792_v46 }
 0x59a   : > { %3163 = vst [vmem:[%s5063_s2 + $0x2f8] sm:$0xff] %v3067_v62 }
 0x59b   : > { %4113 = shalt.err (!%p4110_p0)
}
 0x59c   : > { %s4186_s7 = smov 384   ;;  %s4187_s11 = smov 24  }
 0x59d   : > { %3814 = dma.vmem_to_hbm [thread:$0]  (%p4302_p3), %s3181_s9, 12288, %s3183_s13, %s3165_s18, %s4186_s7, %s4186_s7, %s4187_s11  }
 0x59e PF: > { %s3197_s12 = sand.u32 1, %s4156_s15   ;;  %p3831_p5 = pnand %p3305_p9, %p4262_p6 }
 0x59f   : > { %s3198_s1 = scalar_lea.sflag [#allocation4], %s3197_s12 }
 0x5a0   : > { %p3832_p7 = pneg %p3831_p5 }
 0x5a2   : > { %4151 = dma.done.wait (%p3832_p7), %s3198_s1, 12288  }
 0x5a3   : > { %4153 = vsyncadd (%p3832_p7), %s3198_s1, 4294955008  ;;  %s22_s20 = sadd.s32 1, %s4176_s20   ;;  %s6104_s15 = smov %s4160_s16 }
 0x5a4   : > { %p19_p10 = scmp.ge.s32.totalorder %s22_s20, 4   ;;  %s6105_s16 = smov %s4164_s17 }
 0x5a5   : > { %s6106_s17 = smov %s4318_s24  ;;  %s6107_s18 = smov %s4172_s19 }
 0x5a6   : > { %s6108_s19 = smov %s6110_s8  ;;  %21 = sbr.rel (!%p19_p10) target bundleno = 11 (0xb), region = 93 }
 0x5ab   :  { %3204 = vsyncpa [#allocation3], 1 }
 0x5ac   :  { %3206 = vsyncpa [#allocation3 + $0x1], 1 }
 0x5ad   :  { %3207 = vsyncpa [#allocation6], 1 }
 0x5ae   :  { %3208 = vsyncpa [#allocation9], 1 }
 0x5af   :  { %3209 = vsyncpa [#allocation4], 1 }
 0x5b0   :  { %3211 = vsyncpa [#allocation4 + $0x1], 1 }

</bundles_post_ra>
